<compile_context>
chip_gen: v6e
topology: v6e:2x2x1
jax: 0.10.0
libtpu: 0.0.40
codegen_flags: <defaults>
</compile_context>

<pallas_src>
import jax
import jax.numpy as jnp
from jax.experimental import pallas as pl
from jax.experimental.pallas import tpu as pltpu

NEG_SLOPE = 0.01   # nn.LeakyReLU default
IN_EPS = 1e-5      # nn.InstanceNorm3d default (affine=False, biased variance)


def _round_up(x, m):
    return (x + m - 1) // m * m


def _geometry(d, h, w):
    """Canvas geometry for a (d, h, w) output volume with 3x3x3 / pad=1 conv."""
    dp, hp, wp = d + 2, h + 2, w + 2
    spf = dp * hp * wp                       # flattened padded grid length
    r = hp * wp + wp + 1                     # max |flat tap offset|
    gpad = _round_up(r, 128)                 # zero guard band (lane-aligned)
    s_up = _round_up(spf, 128)               # lane-dense compute window
    ltot = gpad + s_up + gpad                # total canvas length (mult. of 128)
    offsets = [(kd - 1) * hp * wp + (kh - 1) * wp + (kw - 1)
               for kd in range(3) for kh in range(3) for kw in range(3)]
    # 1.0 exactly at true (interior) output positions of the padded grid.
    m3 = jnp.zeros((dp, hp, wp), jnp.float32).at[1:-1, 1:-1, 1:-1].set(1.0)
    mask = jnp.zeros((1, s_up), jnp.float32).at[0, :spf].set(m3.reshape(-1))
    return dict(dp=dp, hp=hp, wp=wp, spf=spf, gpad=gpad, s_up=s_up, ltot=ltot,
                s_true=d * h * w, offsets=tuple(offsets), mask=mask)


def _to_canvas(a, geom):
    """(N, C, D, H, W) -> (N, C, Ltot) bf16 flat canvas (zero pad + guards)."""
    n, c = a.shape[0], a.shape[1]
    ap = jnp.pad(a, ((0, 0), (0, 0), (1, 1), (1, 1), (1, 1)))
    flat = ap.reshape(n, c, geom["spf"])
    canvas = jnp.pad(
        flat, ((0, 0), (0, 0),
               (geom["gpad"], geom["ltot"] - geom["gpad"] - geom["spf"])))
    return canvas.astype(jnp.bfloat16)


def _pack_weights(w, cins):
    """(3,3,3, sum(cins), Cout) -> (Cout, 27*sum(cins)) bf16, kernel row order."""
    cout = w.shape[-1]
    chunks, start = [], 0
    for c in cins:
        wi = w[:, :, :, start:start + c, :]            # (3,3,3,c,cout)
        wi = wi.reshape(27, c, cout)                   # tap-major (kd,kh,kw)
        wi = jnp.transpose(wi, (2, 0, 1)).reshape(cout, 27 * c)
        chunks.append(wi)
        start += c
    return jnp.concatenate(chunks, axis=1).astype(jnp.bfloat16)


def _make_conv_in_lrelu_kernel(cins, cout, offsets, gpad, s_up, ltot, s_true,
                               out_dtype):
    """Fused 3x3x3 conv (one K=27*Cin matmul) + InstanceNorm3d + LeakyReLU."""
    n_in = len(cins)
    inv_s = 1.0 / float(s_true)

    def kernel(*refs):
        x_refs = refs[:n_in]                 # each (cin_i, ltot) bf16 canvas
        w_ref, mask_ref, o_ref, p_ref = refs[n_in:n_in + 4]

        # In-kernel halo gather: 27 constant-offset slices per input canvas.
        row = 0
        for x_ref, cin in zip(x_refs, cins):
            for off in offsets:
                start = gpad + off
                p_ref[row:row + cin, :] = x_ref[:, start:start + s_up]
                row += cin

        # One MXU contraction: (cout, 27*sum(cin)) @ (27*sum(cin), s_up).
        acc = jnp.dot(w_ref[...], p_ref[...],
                      preferred_element_type=jnp.float32)      # (cout, s_up) f32

        # InstanceNorm3d (no affine, biased variance) over true positions only.
        m = mask_ref[...]                                       # (1, s_up) f32
        mean = jnp.sum(acc * m, axis=-1, keepdims=True) * inv_s
        diff = (acc - mean) * m
        var = jnp.sum(diff * diff, axis=-1, keepdims=True) * inv_s
        y = (acc - mean) * jax.lax.rsqrt(var + IN_EPS)
        y = jnp.where(y >= 0, y, NEG_SLOPE * y)                 # LeakyReLU(0.01)
        y = y * m           # zero the conv-padding ring / alignment tail so the
                            # output canvas is directly reusable as next input.

        o_ref[:, 0:gpad] = jnp.zeros((cout, gpad), out_dtype)
        o_ref[:, gpad:gpad + s_up] = y.astype(out_dtype)
        o_ref[:, gpad + s_up:ltot] = jnp.zeros((cout, ltot - gpad - s_up),
                                               out_dtype)

    return kernel


def conv3d_in_lrelu(canvases, w, geom, out_dtype):
    """One Conv3dReLU block on flat-canvas inputs -> flat-canvas output."""
    n = canvases[0].shape[0]
    cins = [c.shape[1] for c in canvases]
    cout = w.shape[-1]
    ktot = 27 * sum(cins)
    gpad, s_up, ltot = geom["gpad"], geom["s_up"], geom["ltot"]

    w_mat = _pack_weights(w, cins)
    kernel = _make_conv_in_lrelu_kernel(tuple(cins), cout, geom["offsets"],
                                        gpad, s_up, ltot, geom["s_true"],
                                        out_dtype)

    in_specs = ([pl.BlockSpec((None, c, ltot), lambda b: (b, 0, 0))
                 for c in cins]
                + [pl.BlockSpec((cout, ktot), lambda b: (0, 0)),
                   pl.BlockSpec((1, s_up), lambda b: (0, 0))])

    return pl.pallas_call(
        kernel,
        out_shape=jax.ShapeDtypeStruct((n, cout, ltot), out_dtype),
        grid=(n,),
        in_specs=in_specs,
        out_specs=pl.BlockSpec((None, cout, ltot), lambda b: (b, 0, 0)),
        scratch_shapes=[pltpu.VMEM((ktot, s_up), jnp.bfloat16)],
        compiler_params=pltpu.CompilerParams(
            dimension_semantics=("parallel",)),
    )(*canvases, w_mat, geom["mask"])


def decoder_block(x, skip, w1, w2):
    """Matches DecoderBlock.forward.

    x:    (N, Cin, D, H, W)        NCDHW
    skip: (N, Cskip, 2D, 2H, 2W)   or None
    w1:   (3,3,3, Cin+Cskip, Cout) (input-channel order: [x, skip])
    w2:   (3,3,3, Cout, Cout)
    returns (N, Cout, 2D, 2H, 2W)  NCDHW, float32
    """
    n, c, d, h, w = x.shape
    d2, h2, w2s = 2 * d, 2 * h, 2 * w
    # nn.Upsample(scale_factor=2, mode='trilinear', align_corners=False)
    x_up = jax.image.resize(x, (n, c, d2, h2, w2s), method="trilinear")

    geom = _geometry(d2, h2, w2s)
    canvases = [_to_canvas(x_up, geom)]
    if skip is not None:
        # torch.cat([x, skip], dim=1) is folded into the kernel's K dimension.
        canvases.append(_to_canvas(skip, geom))

    y1 = conv3d_in_lrelu(canvases, w1, geom, out_dtype=jnp.bfloat16)  # canvas
    y2 = conv3d_in_lrelu([y1], w2, geom, out_dtype=jnp.float32)       # canvas

    cout = w2.shape[-1]
    out = y2[:, :, geom["gpad"]:geom["gpad"] + geom["spf"]]
    out = out.reshape(n, cout, geom["dp"], geom["hp"], geom["wp"])
    return out[:, :, 1:-1, 1:-1, 1:-1]


if __name__ == "__main__":
    # Small shapes consistent with the module:
    # in_channels=4, skip_channels=4, out_channels=8, input spatial 4^3.
    N, Cin, Cskip, Cout = 2, 4, 4, 8
    D = H = W = 4

    key = jax.random.PRNGKey(0)
    kx, ks, kw1, kw2 = jax.random.split(key, 4)

    x = jax.random.normal(kx, (N, Cin, D, H, W), dtype=jnp.float32)
    skip = jax.random.normal(ks, (N, Cskip, 2 * D, 2 * H, 2 * W),
                             dtype=jnp.float32)

    # Deterministic synthetic weights (Conv3d has bias=False since
    # use_batchnorm=True). Kaiming-like fan-in scaling.
    fan1 = 27 * (Cin + Cskip)
    fan2 = 27 * Cout
    w1 = jax.random.normal(kw1, (3, 3, 3, Cin + Cskip, Cout),
                           dtype=jnp.float32) / jnp.sqrt(fan1)
    w2 = jax.random.normal(kw2, (3, 3, 3, Cout, Cout),
                           dtype=jnp.float32) / jnp.sqrt(fan2)

    fwd = jax.jit(decoder_block)
    out = fwd(x, skip, w1, w2)
    out = jax.block_until_ready(out)
    assert out.shape == (N, Cout, 2 * D, 2 * H, 2 * W)
    assert bool(jnp.all(jnp.isfinite(out)))
    print("KERNEL_OK")
</pallas_src>

<mosaic_0001>
module attributes {stable_mosaic.version = 11 : i64} {
  func.func @kernel(%arg0: i32, %arg1: memref<1x4x1280xbf16, #tpu.memory_space<vmem>>, %arg2: memref<1x4x1280xbf16, #tpu.memory_space<vmem>>, %arg3: memref<8x216xbf16, #tpu.memory_space<vmem>>, %arg4: memref<1x1024xf32, #tpu.memory_space<vmem>>, %arg5: memref<1x8x1280xbf16, #tpu.memory_space<vmem>>, %arg6: memref<216x1024xbf16, #tpu.memory_space<vmem>>) attributes {dimension_semantics = [#tpu.dimension_semantics<parallel>], iteration_bounds = array<i64: 2>, scalar_prefetch = 0 : i64, scratch_operands = 1 : i64, tpu.core_type = #tpu.core_type<tc>, window_params = [{transform_indices = @transform_0, window_bounds = array<i64: 1, 4, 1280>}, {transform_indices = @transform_1, window_bounds = array<i64: 1, 4, 1280>}, {pipeline_mode = #tpu.pipeline_mode<synchronous>, transform_indices = @transform_2, window_bounds = array<i64: 8, 216>}, {pipeline_mode = #tpu.pipeline_mode<synchronous>, transform_indices = @transform_3, window_bounds = array<i64: 1, 1024>}, {transform_indices = @transform_4, window_bounds = array<i64: 1, 8, 1280>}]} {
    %c0 = arith.constant 0 : index
    %c0_0 = arith.constant 0 : index
    %c17 = arith.constant 17 : index
    %0 = vector.load %arg1[%c0, %c0_0, %c17] : memref<1x4x1280xbf16, #tpu.memory_space<vmem>>, vector<1x4x1024xbf16>
    %1 = vector.shape_cast %0 : vector<1x4x1024xbf16> to vector<4x1024xbf16>
    %c0_1 = arith.constant 0 : index
    %c0_2 = arith.constant 0 : index
    %2 = vector.load %arg6[%c0_1, %c0_2] : memref<216x1024xbf16, #tpu.memory_space<vmem>>, vector<4x1024xbf16>
    tpu.vector_store %arg6[%c0_1, %c0_2], %1 {strides = array<i32>} : memref<216x1024xbf16, #tpu.memory_space<vmem>>, vector<4x1024xbf16>,
    %c0_3 = arith.constant 0 : index
    %c0_4 = arith.constant 0 : index
    %c18 = arith.constant 18 : index
    %3 = vector.load %arg1[%c0_3, %c0_4, %c18] : memref<1x4x1280xbf16, #tpu.memory_space<vmem>>, vector<1x4x1024xbf16>
    %4 = vector.shape_cast %3 : vector<1x4x1024xbf16> to vector<4x1024xbf16>
    %c4 = arith.constant 4 : index
    %c0_5 = arith.constant 0 : index
    %5 = vector.load %arg6[%c4, %c0_5] : memref<216x1024xbf16, #tpu.memory_space<vmem>>, vector<4x1024xbf16>
    tpu.vector_store %arg6[%c4, %c0_5], %4 {strides = array<i32>} : memref<216x1024xbf16, #tpu.memory_space<vmem>>, vector<4x1024xbf16>,
    %c0_6 = arith.constant 0 : index
    %c0_7 = arith.constant 0 : index
    %c19 = arith.constant 19 : index
    %6 = vector.load %arg1[%c0_6, %c0_7, %c19] : memref<1x4x1280xbf16, #tpu.memory_space<vmem>>, vector<1x4x1024xbf16>
    %7 = vector.shape_cast %6 : vector<1x4x1024xbf16> to vector<4x1024xbf16>
    %c8 = arith.constant 8 : index
    %c0_8 = arith.constant 0 : index
    %8 = vector.load %arg6[%c8, %c0_8] : memref<216x1024xbf16, #tpu.memory_space<vmem>>, vector<4x1024xbf16>
    tpu.vector_store %arg6[%c8, %c0_8], %7 {strides = array<i32>} : memref<216x1024xbf16, #tpu.memory_space<vmem>>, vector<4x1024xbf16>,
    %c0_9 = arith.constant 0 : index
    %c0_10 = arith.constant 0 : index
    %c27 = arith.constant 27 : index
    %9 = vector.load %arg1[%c0_9, %c0_10, %c27] : memref<1x4x1280xbf16, #tpu.memory_space<vmem>>, vector<1x4x1024xbf16>
    %10 = vector.shape_cast %9 : vector<1x4x1024xbf16> to vector<4x1024xbf16>
    %c12 = arith.constant 12 : index
    %c0_11 = arith.constant 0 : index
    %11 = vector.load %arg6[%c12, %c0_11] : memref<216x1024xbf16, #tpu.memory_space<vmem>>, vector<4x1024xbf16>
    tpu.vector_store %arg6[%c12, %c0_11], %10 {strides = array<i32>} : memref<216x1024xbf16, #tpu.memory_space<vmem>>, vector<4x1024xbf16>,
    %c0_12 = arith.constant 0 : index
    %c0_13 = arith.constant 0 : index
    %c28 = arith.constant 28 : index
    %12 = vector.load %arg1[%c0_12, %c0_13, %c28] : memref<1x4x1280xbf16, #tpu.memory_space<vmem>>, vector<1x4x1024xbf16>
    %13 = vector.shape_cast %12 : vector<1x4x1024xbf16> to vector<4x1024xbf16>
    %c16 = arith.constant 16 : index
    %c0_14 = arith.constant 0 : index
    %14 = vector.load %arg6[%c16, %c0_14] : memref<216x1024xbf16, #tpu.memory_space<vmem>>, vector<4x1024xbf16>
    tpu.vector_store %arg6[%c16, %c0_14], %13 {strides = array<i32>} : memref<216x1024xbf16, #tpu.memory_space<vmem>>, vector<4x1024xbf16>,
    %c0_15 = arith.constant 0 : index
    %c0_16 = arith.constant 0 : index
    %c29 = arith.constant 29 : index
    %15 = vector.load %arg1[%c0_15, %c0_16, %c29] : memref<1x4x1280xbf16, #tpu.memory_space<vmem>>, vector<1x4x1024xbf16>
    %16 = vector.shape_cast %15 : vector<1x4x1024xbf16> to vector<4x1024xbf16>
    %c20 = arith.constant 20 : index
    %c0_17 = arith.constant 0 : index
    %17 = vector.load %arg6[%c20, %c0_17] : memref<216x1024xbf16, #tpu.memory_space<vmem>>, vector<4x1024xbf16>
    tpu.vector_store %arg6[%c20, %c0_17], %16 {strides = array<i32>} : memref<216x1024xbf16, #tpu.memory_space<vmem>>, vector<4x1024xbf16>,
    %c0_18 = arith.constant 0 : index
    %c0_19 = arith.constant 0 : index
    %c37 = arith.constant 37 : index
    %18 = vector.load %arg1[%c0_18, %c0_19, %c37] : memref<1x4x1280xbf16, #tpu.memory_space<vmem>>, vector<1x4x1024xbf16>
    %19 = vector.shape_cast %18 : vector<1x4x1024xbf16> to vector<4x1024xbf16>
    %c24 = arith.constant 24 : index
    %c0_20 = arith.constant 0 : index
    %20 = vector.load %arg6[%c24, %c0_20] : memref<216x1024xbf16, #tpu.memory_space<vmem>>, vector<4x1024xbf16>
    tpu.vector_store %arg6[%c24, %c0_20], %19 {strides = array<i32>} : memref<216x1024xbf16, #tpu.memory_space<vmem>>, vector<4x1024xbf16>,
    %c0_21 = arith.constant 0 : index
    %c0_22 = arith.constant 0 : index
    %c38 = arith.constant 38 : index
    %21 = vector.load %arg1[%c0_21, %c0_22, %c38] : memref<1x4x1280xbf16, #tpu.memory_space<vmem>>, vector<1x4x1024xbf16>
    %22 = vector.shape_cast %21 : vector<1x4x1024xbf16> to vector<4x1024xbf16>
    %c28_23 = arith.constant 28 : index
    %c0_24 = arith.constant 0 : index
    %23 = vector.load %arg6[%c28_23, %c0_24] : memref<216x1024xbf16, #tpu.memory_space<vmem>>, vector<4x1024xbf16>
    tpu.vector_store %arg6[%c28_23, %c0_24], %22 {strides = array<i32>} : memref<216x1024xbf16, #tpu.memory_space<vmem>>, vector<4x1024xbf16>,
    %c0_25 = arith.constant 0 : index
    %c0_26 = arith.constant 0 : index
    %c39 = arith.constant 39 : index
    %24 = vector.load %arg1[%c0_25, %c0_26, %c39] : memref<1x4x1280xbf16, #tpu.memory_space<vmem>>, vector<1x4x1024xbf16>
    %25 = vector.shape_cast %24 : vector<1x4x1024xbf16> to vector<4x1024xbf16>
    %c32 = arith.constant 32 : index
    %c0_27 = arith.constant 0 : index
    %26 = vector.load %arg6[%c32, %c0_27] : memref<216x1024xbf16, #tpu.memory_space<vmem>>, vector<4x1024xbf16>
    tpu.vector_store %arg6[%c32, %c0_27], %25 {strides = array<i32>} : memref<216x1024xbf16, #tpu.memory_space<vmem>>, vector<4x1024xbf16>,
    %c0_28 = arith.constant 0 : index
    %c0_29 = arith.constant 0 : index
    %c117 = arith.constant 117 : index
    %27 = vector.load %arg1[%c0_28, %c0_29, %c117] : memref<1x4x1280xbf16, #tpu.memory_space<vmem>>, vector<1x4x1024xbf16>
    %28 = vector.shape_cast %27 : vector<1x4x1024xbf16> to vector<4x1024xbf16>
    %c36 = arith.constant 36 : index
    %c0_30 = arith.constant 0 : index
    %29 = vector.load %arg6[%c36, %c0_30] : memref<216x1024xbf16, #tpu.memory_space<vmem>>, vector<4x1024xbf16>
    tpu.vector_store %arg6[%c36, %c0_30], %28 {strides = array<i32>} : memref<216x1024xbf16, #tpu.memory_space<vmem>>, vector<4x1024xbf16>,
    %c0_31 = arith.constant 0 : index
    %c0_32 = arith.constant 0 : index
    %c118 = arith.constant 118 : index
    %30 = vector.load %arg1[%c0_31, %c0_32, %c118] : memref<1x4x1280xbf16, #tpu.memory_space<vmem>>, vector<1x4x1024xbf16>
    %31 = vector.shape_cast %30 : vector<1x4x1024xbf16> to vector<4x1024xbf16>
    %c40 = arith.constant 40 : index
    %c0_33 = arith.constant 0 : index
    %32 = vector.load %arg6[%c40, %c0_33] : memref<216x1024xbf16, #tpu.memory_space<vmem>>, vector<4x1024xbf16>
    tpu.vector_store %arg6[%c40, %c0_33], %31 {strides = array<i32>} : memref<216x1024xbf16, #tpu.memory_space<vmem>>, vector<4x1024xbf16>,
    %c0_34 = arith.constant 0 : index
    %c0_35 = arith.constant 0 : index
    %c119 = arith.constant 119 : index
    %33 = vector.load %arg1[%c0_34, %c0_35, %c119] : memref<1x4x1280xbf16, #tpu.memory_space<vmem>>, vector<1x4x1024xbf16>
    %34 = vector.shape_cast %33 : vector<1x4x1024xbf16> to vector<4x1024xbf16>
    %c44 = arith.constant 44 : index
    %c0_36 = arith.constant 0 : index
    %35 = vector.load %arg6[%c44, %c0_36] : memref<216x1024xbf16, #tpu.memory_space<vmem>>, vector<4x1024xbf16>
    tpu.vector_store %arg6[%c44, %c0_36], %34 {strides = array<i32>} : memref<216x1024xbf16, #tpu.memory_space<vmem>>, vector<4x1024xbf16>,
    %c0_37 = arith.constant 0 : index
    %c0_38 = arith.constant 0 : index
    %c127 = arith.constant 127 : index
    %36 = vector.load %arg1[%c0_37, %c0_38, %c127] : memref<1x4x1280xbf16, #tpu.memory_space<vmem>>, vector<1x4x1024xbf16>
    %37 = vector.shape_cast %36 : vector<1x4x1024xbf16> to vector<4x1024xbf16>
    %c48 = arith.constant 48 : index
    %c0_39 = arith.constant 0 : index
    %38 = vector.load %arg6[%c48, %c0_39] : memref<216x1024xbf16, #tpu.memory_space<vmem>>, vector<4x1024xbf16>
    tpu.vector_store %arg6[%c48, %c0_39], %37 {strides = array<i32>} : memref<216x1024xbf16, #tpu.memory_space<vmem>>, vector<4x1024xbf16>,
    %c0_40 = arith.constant 0 : index
    %c0_41 = arith.constant 0 : index
    %c128 = arith.constant 128 : index
    %39 = vector.load %arg1[%c0_40, %c0_41, %c128] : memref<1x4x1280xbf16, #tpu.memory_space<vmem>>, vector<1x4x1024xbf16>
    %40 = vector.shape_cast %39 : vector<1x4x1024xbf16> to vector<4x1024xbf16>
    %c52 = arith.constant 52 : index
    %c0_42 = arith.constant 0 : index
    %41 = vector.load %arg6[%c52, %c0_42] : memref<216x1024xbf16, #tpu.memory_space<vmem>>, vector<4x1024xbf16>
    tpu.vector_store %arg6[%c52, %c0_42], %40 {strides = array<i32>} : memref<216x1024xbf16, #tpu.memory_space<vmem>>, vector<4x1024xbf16>,
    %c0_43 = arith.constant 0 : index
    %c0_44 = arith.constant 0 : index
    %c129 = arith.constant 129 : index
    %42 = vector.load %arg1[%c0_43, %c0_44, %c129] : memref<1x4x1280xbf16, #tpu.memory_space<vmem>>, vector<1x4x1024xbf16>
    %43 = vector.shape_cast %42 : vector<1x4x1024xbf16> to vector<4x1024xbf16>
    %c56 = arith.constant 56 : index
    %c0_45 = arith.constant 0 : index
    %44 = vector.load %arg6[%c56, %c0_45] : memref<216x1024xbf16, #tpu.memory_space<vmem>>, vector<4x1024xbf16>
    tpu.vector_store %arg6[%c56, %c0_45], %43 {strides = array<i32>} : memref<216x1024xbf16, #tpu.memory_space<vmem>>, vector<4x1024xbf16>,
    %c0_46 = arith.constant 0 : index
    %c0_47 = arith.constant 0 : index
    %c137 = arith.constant 137 : index
    %45 = vector.load %arg1[%c0_46, %c0_47, %c137] : memref<1x4x1280xbf16, #tpu.memory_space<vmem>>, vector<1x4x1024xbf16>
    %46 = vector.shape_cast %45 : vector<1x4x1024xbf16> to vector<4x1024xbf16>
    %c60 = arith.constant 60 : index
    %c0_48 = arith.constant 0 : index
    %47 = vector.load %arg6[%c60, %c0_48] : memref<216x1024xbf16, #tpu.memory_space<vmem>>, vector<4x1024xbf16>
    tpu.vector_store %arg6[%c60, %c0_48], %46 {strides = array<i32>} : memref<216x1024xbf16, #tpu.memory_space<vmem>>, vector<4x1024xbf16>,
    %c0_49 = arith.constant 0 : index
    %c0_50 = arith.constant 0 : index
    %c138 = arith.constant 138 : index
    %48 = vector.load %arg1[%c0_49, %c0_50, %c138] : memref<1x4x1280xbf16, #tpu.memory_space<vmem>>, vector<1x4x1024xbf16>
    %49 = vector.shape_cast %48 : vector<1x4x1024xbf16> to vector<4x1024xbf16>
    %c64 = arith.constant 64 : index
    %c0_51 = arith.constant 0 : index
    %50 = vector.load %arg6[%c64, %c0_51] : memref<216x1024xbf16, #tpu.memory_space<vmem>>, vector<4x1024xbf16>
    tpu.vector_store %arg6[%c64, %c0_51], %49 {strides = array<i32>} : memref<216x1024xbf16, #tpu.memory_space<vmem>>, vector<4x1024xbf16>,
    %c0_52 = arith.constant 0 : index
    %c0_53 = arith.constant 0 : index
    %c139 = arith.constant 139 : index
    %51 = vector.load %arg1[%c0_52, %c0_53, %c139] : memref<1x4x1280xbf16, #tpu.memory_space<vmem>>, vector<1x4x1024xbf16>
    %52 = vector.shape_cast %51 : vector<1x4x1024xbf16> to vector<4x1024xbf16>
    %c68 = arith.constant 68 : index
    %c0_54 = arith.constant 0 : index
    %53 = vector.load %arg6[%c68, %c0_54] : memref<216x1024xbf16, #tpu.memory_space<vmem>>, vector<4x1024xbf16>
    tpu.vector_store %arg6[%c68, %c0_54], %52 {strides = array<i32>} : memref<216x1024xbf16, #tpu.memory_space<vmem>>, vector<4x1024xbf16>,
    %c0_55 = arith.constant 0 : index
    %c0_56 = arith.constant 0 : index
    %c217 = arith.constant 217 : index
    %54 = vector.load %arg1[%c0_55, %c0_56, %c217] : memref<1x4x1280xbf16, #tpu.memory_space<vmem>>, vector<1x4x1024xbf16>
    %55 = vector.shape_cast %54 : vector<1x4x1024xbf16> to vector<4x1024xbf16>
    %c72 = arith.constant 72 : index
    %c0_57 = arith.constant 0 : index
    %56 = vector.load %arg6[%c72, %c0_57] : memref<216x1024xbf16, #tpu.memory_space<vmem>>, vector<4x1024xbf16>
    tpu.vector_store %arg6[%c72, %c0_57], %55 {strides = array<i32>} : memref<216x1024xbf16, #tpu.memory_space<vmem>>, vector<4x1024xbf16>,
    %c0_58 = arith.constant 0 : index
    %c0_59 = arith.constant 0 : index
    %c218 = arith.constant 218 : index
    %57 = vector.load %arg1[%c0_58, %c0_59, %c218] : memref<1x4x1280xbf16, #tpu.memory_space<vmem>>, vector<1x4x1024xbf16>
    %58 = vector.shape_cast %57 : vector<1x4x1024xbf16> to vector<4x1024xbf16>
    %c76 = arith.constant 76 : index
    %c0_60 = arith.constant 0 : index
    %59 = vector.load %arg6[%c76, %c0_60] : memref<216x1024xbf16, #tpu.memory_space<vmem>>, vector<4x1024xbf16>
    tpu.vector_store %arg6[%c76, %c0_60], %58 {strides = array<i32>} : memref<216x1024xbf16, #tpu.memory_space<vmem>>, vector<4x1024xbf16>,
    %c0_61 = arith.constant 0 : index
    %c0_62 = arith.constant 0 : index
    %c219 = arith.constant 219 : index
    %60 = vector.load %arg1[%c0_61, %c0_62, %c219] : memref<1x4x1280xbf16, #tpu.memory_space<vmem>>, vector<1x4x1024xbf16>
    %61 = vector.shape_cast %60 : vector<1x4x1024xbf16> to vector<4x1024xbf16>
    %c80 = arith.constant 80 : index
    %c0_63 = arith.constant 0 : index
    %62 = vector.load %arg6[%c80, %c0_63] : memref<216x1024xbf16, #tpu.memory_space<vmem>>, vector<4x1024xbf16>
    tpu.vector_store %arg6[%c80, %c0_63], %61 {strides = array<i32>} : memref<216x1024xbf16, #tpu.memory_space<vmem>>, vector<4x1024xbf16>,
    %c0_64 = arith.constant 0 : index
    %c0_65 = arith.constant 0 : index
    %c227 = arith.constant 227 : index
    %63 = vector.load %arg1[%c0_64, %c0_65, %c227] : memref<1x4x1280xbf16, #tpu.memory_space<vmem>>, vector<1x4x1024xbf16>
    %64 = vector.shape_cast %63 : vector<1x4x1024xbf16> to vector<4x1024xbf16>
    %c84 = arith.constant 84 : index
    %c0_66 = arith.constant 0 : index
    %65 = vector.load %arg6[%c84, %c0_66] : memref<216x1024xbf16, #tpu.memory_space<vmem>>, vector<4x1024xbf16>
    tpu.vector_store %arg6[%c84, %c0_66], %64 {strides = array<i32>} : memref<216x1024xbf16, #tpu.memory_space<vmem>>, vector<4x1024xbf16>,
    %c0_67 = arith.constant 0 : index
    %c0_68 = arith.constant 0 : index
    %c228 = arith.constant 228 : index
    %66 = vector.load %arg1[%c0_67, %c0_68, %c228] : memref<1x4x1280xbf16, #tpu.memory_space<vmem>>, vector<1x4x1024xbf16>
    %67 = vector.shape_cast %66 : vector<1x4x1024xbf16> to vector<4x1024xbf16>
    %c88 = arith.constant 88 : index
    %c0_69 = arith.constant 0 : index
    %68 = vector.load %arg6[%c88, %c0_69] : memref<216x1024xbf16, #tpu.memory_space<vmem>>, vector<4x1024xbf16>
    tpu.vector_store %arg6[%c88, %c0_69], %67 {strides = array<i32>} : memref<216x1024xbf16, #tpu.memory_space<vmem>>, vector<4x1024xbf16>,
    %c0_70 = arith.constant 0 : index
    %c0_71 = arith.constant 0 : index
    %c229 = arith.constant 229 : index
    %69 = vector.load %arg1[%c0_70, %c0_71, %c229] : memref<1x4x1280xbf16, #tpu.memory_space<vmem>>, vector<1x4x1024xbf16>
    %70 = vector.shape_cast %69 : vector<1x4x1024xbf16> to vector<4x1024xbf16>
    %c92 = arith.constant 92 : index
    %c0_72 = arith.constant 0 : index
    %71 = vector.load %arg6[%c92, %c0_72] : memref<216x1024xbf16, #tpu.memory_space<vmem>>, vector<4x1024xbf16>
    tpu.vector_store %arg6[%c92, %c0_72], %70 {strides = array<i32>} : memref<216x1024xbf16, #tpu.memory_space<vmem>>, vector<4x1024xbf16>,
    %c0_73 = arith.constant 0 : index
    %c0_74 = arith.constant 0 : index
    %c237 = arith.constant 237 : index
    %72 = vector.load %arg1[%c0_73, %c0_74, %c237] : memref<1x4x1280xbf16, #tpu.memory_space<vmem>>, vector<1x4x1024xbf16>
    %73 = vector.shape_cast %72 : vector<1x4x1024xbf16> to vector<4x1024xbf16>
    %c96 = arith.constant 96 : index
    %c0_75 = arith.constant 0 : index
    %74 = vector.load %arg6[%c96, %c0_75] : memref<216x1024xbf16, #tpu.memory_space<vmem>>, vector<4x1024xbf16>
    tpu.vector_store %arg6[%c96, %c0_75], %73 {strides = array<i32>} : memref<216x1024xbf16, #tpu.memory_space<vmem>>, vector<4x1024xbf16>,
    %c0_76 = arith.constant 0 : index
    %c0_77 = arith.constant 0 : index
    %c238 = arith.constant 238 : index
    %75 = vector.load %arg1[%c0_76, %c0_77, %c238] : memref<1x4x1280xbf16, #tpu.memory_space<vmem>>, vector<1x4x1024xbf16>
    %76 = vector.shape_cast %75 : vector<1x4x1024xbf16> to vector<4x1024xbf16>
    %c100 = arith.constant 100 : index
    %c0_78 = arith.constant 0 : index
    %77 = vector.load %arg6[%c100, %c0_78] : memref<216x1024xbf16, #tpu.memory_space<vmem>>, vector<4x1024xbf16>
    tpu.vector_store %arg6[%c100, %c0_78], %76 {strides = array<i32>} : memref<216x1024xbf16, #tpu.memory_space<vmem>>, vector<4x1024xbf16>,
    %c0_79 = arith.constant 0 : index
    %c0_80 = arith.constant 0 : index
    %c239 = arith.constant 239 : index
    %78 = vector.load %arg1[%c0_79, %c0_80, %c239] : memref<1x4x1280xbf16, #tpu.memory_space<vmem>>, vector<1x4x1024xbf16>
    %79 = vector.shape_cast %78 : vector<1x4x1024xbf16> to vector<4x1024xbf16>
    %c104 = arith.constant 104 : index
    %c0_81 = arith.constant 0 : index
    %80 = vector.load %arg6[%c104, %c0_81] : memref<216x1024xbf16, #tpu.memory_space<vmem>>, vector<4x1024xbf16>
    tpu.vector_store %arg6[%c104, %c0_81], %79 {strides = array<i32>} : memref<216x1024xbf16, #tpu.memory_space<vmem>>, vector<4x1024xbf16>,
    %c0_82 = arith.constant 0 : index
    %c0_83 = arith.constant 0 : index
    %c17_84 = arith.constant 17 : index
    %81 = vector.load %arg2[%c0_82, %c0_83, %c17_84] : memref<1x4x1280xbf16, #tpu.memory_space<vmem>>, vector<1x4x1024xbf16>
    %82 = vector.shape_cast %81 : vector<1x4x1024xbf16> to vector<4x1024xbf16>
    %c108 = arith.constant 108 : index
    %c0_85 = arith.constant 0 : index
    %83 = vector.load %arg6[%c108, %c0_85] : memref<216x1024xbf16, #tpu.memory_space<vmem>>, vector<4x1024xbf16>
    tpu.vector_store %arg6[%c108, %c0_85], %82 {strides = array<i32>} : memref<216x1024xbf16, #tpu.memory_space<vmem>>, vector<4x1024xbf16>,
    %c0_86 = arith.constant 0 : index
    %c0_87 = arith.constant 0 : index
    %c18_88 = arith.constant 18 : index
    %84 = vector.load %arg2[%c0_86, %c0_87, %c18_88] : memref<1x4x1280xbf16, #tpu.memory_space<vmem>>, vector<1x4x1024xbf16>
    %85 = vector.shape_cast %84 : vector<1x4x1024xbf16> to vector<4x1024xbf16>
    %c112 = arith.constant 112 : index
    %c0_89 = arith.constant 0 : index
    %86 = vector.load %arg6[%c112, %c0_89] : memref<216x1024xbf16, #tpu.memory_space<vmem>>, vector<4x1024xbf16>
    tpu.vector_store %arg6[%c112, %c0_89], %85 {strides = array<i32>} : memref<216x1024xbf16, #tpu.memory_space<vmem>>, vector<4x1024xbf16>,
    %c0_90 = arith.constant 0 : index
    %c0_91 = arith.constant 0 : index
    %c19_92 = arith.constant 19 : index
    %87 = vector.load %arg2[%c0_90, %c0_91, %c19_92] : memref<1x4x1280xbf16, #tpu.memory_space<vmem>>, vector<1x4x1024xbf16>
    %88 = vector.shape_cast %87 : vector<1x4x1024xbf16> to vector<4x1024xbf16>
    %c116 = arith.constant 116 : index
    %c0_93 = arith.constant 0 : index
    %89 = vector.load %arg6[%c116, %c0_93] : memref<216x1024xbf16, #tpu.memory_space<vmem>>, vector<4x1024xbf16>
    tpu.vector_store %arg6[%c116, %c0_93], %88 {strides = array<i32>} : memref<216x1024xbf16, #tpu.memory_space<vmem>>, vector<4x1024xbf16>,
    %c0_94 = arith.constant 0 : index
    %c0_95 = arith.constant 0 : index
    %c27_96 = arith.constant 27 : index
    %90 = vector.load %arg2[%c0_94, %c0_95, %c27_96] : memref<1x4x1280xbf16, #tpu.memory_space<vmem>>, vector<1x4x1024xbf16>
    %91 = vector.shape_cast %90 : vector<1x4x1024xbf16> to vector<4x1024xbf16>
    %c120 = arith.constant 120 : index
    %c0_97 = arith.constant 0 : index
    %92 = vector.load %arg6[%c120, %c0_97] : memref<216x1024xbf16, #tpu.memory_space<vmem>>, vector<4x1024xbf16>
    tpu.vector_store %arg6[%c120, %c0_97], %91 {strides = array<i32>} : memref<216x1024xbf16, #tpu.memory_space<vmem>>, vector<4x1024xbf16>,
    %c0_98 = arith.constant 0 : index
    %c0_99 = arith.constant 0 : index
    %c28_100 = arith.constant 28 : index
    %93 = vector.load %arg2[%c0_98, %c0_99, %c28_100] : memref<1x4x1280xbf16, #tpu.memory_space<vmem>>, vector<1x4x1024xbf16>
    %94 = vector.shape_cast %93 : vector<1x4x1024xbf16> to vector<4x1024xbf16>
    %c124 = arith.constant 124 : index
    %c0_101 = arith.constant 0 : index
    %95 = vector.load %arg6[%c124, %c0_101] : memref<216x1024xbf16, #tpu.memory_space<vmem>>, vector<4x1024xbf16>
    tpu.vector_store %arg6[%c124, %c0_101], %94 {strides = array<i32>} : memref<216x1024xbf16, #tpu.memory_space<vmem>>, vector<4x1024xbf16>,
    %c0_102 = arith.constant 0 : index
    %c0_103 = arith.constant 0 : index
    %c29_104 = arith.constant 29 : index
    %96 = vector.load %arg2[%c0_102, %c0_103, %c29_104] : memref<1x4x1280xbf16, #tpu.memory_space<vmem>>, vector<1x4x1024xbf16>
    %97 = vector.shape_cast %96 : vector<1x4x1024xbf16> to vector<4x1024xbf16>
    %c128_105 = arith.constant 128 : index
    %c0_106 = arith.constant 0 : index
    %98 = vector.load %arg6[%c128_105, %c0_106] : memref<216x1024xbf16, #tpu.memory_space<vmem>>, vector<4x1024xbf16>
    tpu.vector_store %arg6[%c128_105, %c0_106], %97 {strides = array<i32>} : memref<216x1024xbf16, #tpu.memory_space<vmem>>, vector<4x1024xbf16>,
    %c0_107 = arith.constant 0 : index
    %c0_108 = arith.constant 0 : index
    %c37_109 = arith.constant 37 : index
    %99 = vector.load %arg2[%c0_107, %c0_108, %c37_109] : memref<1x4x1280xbf16, #tpu.memory_space<vmem>>, vector<1x4x1024xbf16>
    %100 = vector.shape_cast %99 : vector<1x4x1024xbf16> to vector<4x1024xbf16>
    %c132 = arith.constant 132 : index
    %c0_110 = arith.constant 0 : index
    %101 = vector.load %arg6[%c132, %c0_110] : memref<216x1024xbf16, #tpu.memory_space<vmem>>, vector<4x1024xbf16>
    tpu.vector_store %arg6[%c132, %c0_110], %100 {strides = array<i32>} : memref<216x1024xbf16, #tpu.memory_space<vmem>>, vector<4x1024xbf16>,
    %c0_111 = arith.constant 0 : index
    %c0_112 = arith.constant 0 : index
    %c38_113 = arith.constant 38 : index
    %102 = vector.load %arg2[%c0_111, %c0_112, %c38_113] : memref<1x4x1280xbf16, #tpu.memory_space<vmem>>, vector<1x4x1024xbf16>
    %103 = vector.shape_cast %102 : vector<1x4x1024xbf16> to vector<4x1024xbf16>
    %c136 = arith.constant 136 : index
    %c0_114 = arith.constant 0 : index
    %104 = vector.load %arg6[%c136, %c0_114] : memref<216x1024xbf16, #tpu.memory_space<vmem>>, vector<4x1024xbf16>
    tpu.vector_store %arg6[%c136, %c0_114], %103 {strides = array<i32>} : memref<216x1024xbf16, #tpu.memory_space<vmem>>, vector<4x1024xbf16>,
    %c0_115 = arith.constant 0 : index
    %c0_116 = arith.constant 0 : index
    %c39_117 = arith.constant 39 : index
    %105 = vector.load %arg2[%c0_115, %c0_116, %c39_117] : memref<1x4x1280xbf16, #tpu.memory_space<vmem>>, vector<1x4x1024xbf16>
    %106 = vector.shape_cast %105 : vector<1x4x1024xbf16> to vector<4x1024xbf16>
    %c140 = arith.constant 140 : index
    %c0_118 = arith.constant 0 : index
    %107 = vector.load %arg6[%c140, %c0_118] : memref<216x1024xbf16, #tpu.memory_space<vmem>>, vector<4x1024xbf16>
    tpu.vector_store %arg6[%c140, %c0_118], %106 {strides = array<i32>} : memref<216x1024xbf16, #tpu.memory_space<vmem>>, vector<4x1024xbf16>,
    %c0_119 = arith.constant 0 : index
    %c0_120 = arith.constant 0 : index
    %c117_121 = arith.constant 117 : index
    %108 = vector.load %arg2[%c0_119, %c0_120, %c117_121] : memref<1x4x1280xbf16, #tpu.memory_space<vmem>>, vector<1x4x1024xbf16>
    %109 = vector.shape_cast %108 : vector<1x4x1024xbf16> to vector<4x1024xbf16>
    %c144 = arith.constant 144 : index
    %c0_122 = arith.constant 0 : index
    %110 = vector.load %arg6[%c144, %c0_122] : memref<216x1024xbf16, #tpu.memory_space<vmem>>, vector<4x1024xbf16>
    tpu.vector_store %arg6[%c144, %c0_122], %109 {strides = array<i32>} : memref<216x1024xbf16, #tpu.memory_space<vmem>>, vector<4x1024xbf16>,
    %c0_123 = arith.constant 0 : index
    %c0_124 = arith.constant 0 : index
    %c118_125 = arith.constant 118 : index
    %111 = vector.load %arg2[%c0_123, %c0_124, %c118_125] : memref<1x4x1280xbf16, #tpu.memory_space<vmem>>, vector<1x4x1024xbf16>
    %112 = vector.shape_cast %111 : vector<1x4x1024xbf16> to vector<4x1024xbf16>
    %c148 = arith.constant 148 : index
    %c0_126 = arith.constant 0 : index
    %113 = vector.load %arg6[%c148, %c0_126] : memref<216x1024xbf16, #tpu.memory_space<vmem>>, vector<4x1024xbf16>
    tpu.vector_store %arg6[%c148, %c0_126], %112 {strides = array<i32>} : memref<216x1024xbf16, #tpu.memory_space<vmem>>, vector<4x1024xbf16>,
    %c0_127 = arith.constant 0 : index
    %c0_128 = arith.constant 0 : index
    %c119_129 = arith.constant 119 : index
    %114 = vector.load %arg2[%c0_127, %c0_128, %c119_129] : memref<1x4x1280xbf16, #tpu.memory_space<vmem>>, vector<1x4x1024xbf16>
    %115 = vector.shape_cast %114 : vector<1x4x1024xbf16> to vector<4x1024xbf16>
    %c152 = arith.constant 152 : index
    %c0_130 = arith.constant 0 : index
    %116 = vector.load %arg6[%c152, %c0_130] : memref<216x1024xbf16, #tpu.memory_space<vmem>>, vector<4x1024xbf16>
    tpu.vector_store %arg6[%c152, %c0_130], %115 {strides = array<i32>} : memref<216x1024xbf16, #tpu.memory_space<vmem>>, vector<4x1024xbf16>,
    %c0_131 = arith.constant 0 : index
    %c0_132 = arith.constant 0 : index
    %c127_133 = arith.constant 127 : index
    %117 = vector.load %arg2[%c0_131, %c0_132, %c127_133] : memref<1x4x1280xbf16, #tpu.memory_space<vmem>>, vector<1x4x1024xbf16>
    %118 = vector.shape_cast %117 : vector<1x4x1024xbf16> to vector<4x1024xbf16>
    %c156 = arith.constant 156 : index
    %c0_134 = arith.constant 0 : index
    %119 = vector.load %arg6[%c156, %c0_134] : memref<216x1024xbf16, #tpu.memory_space<vmem>>, vector<4x1024xbf16>
    tpu.vector_store %arg6[%c156, %c0_134], %118 {strides = array<i32>} : memref<216x1024xbf16, #tpu.memory_space<vmem>>, vector<4x1024xbf16>,
    %c0_135 = arith.constant 0 : index
    %c0_136 = arith.constant 0 : index
    %c128_137 = arith.constant 128 : index
    %120 = vector.load %arg2[%c0_135, %c0_136, %c128_137] : memref<1x4x1280xbf16, #tpu.memory_space<vmem>>, vector<1x4x1024xbf16>
    %121 = vector.shape_cast %120 : vector<1x4x1024xbf16> to vector<4x1024xbf16>
    %c160 = arith.constant 160 : index
    %c0_138 = arith.constant 0 : index
    %122 = vector.load %arg6[%c160, %c0_138] : memref<216x1024xbf16, #tpu.memory_space<vmem>>, vector<4x1024xbf16>
    tpu.vector_store %arg6[%c160, %c0_138], %121 {strides = array<i32>} : memref<216x1024xbf16, #tpu.memory_space<vmem>>, vector<4x1024xbf16>,
    %c0_139 = arith.constant 0 : index
    %c0_140 = arith.constant 0 : index
    %c129_141 = arith.constant 129 : index
    %123 = vector.load %arg2[%c0_139, %c0_140, %c129_141] : memref<1x4x1280xbf16, #tpu.memory_space<vmem>>, vector<1x4x1024xbf16>
    %124 = vector.shape_cast %123 : vector<1x4x1024xbf16> to vector<4x1024xbf16>
    %c164 = arith.constant 164 : index
    %c0_142 = arith.constant 0 : index
    %125 = vector.load %arg6[%c164, %c0_142] : memref<216x1024xbf16, #tpu.memory_space<vmem>>, vector<4x1024xbf16>
    tpu.vector_store %arg6[%c164, %c0_142], %124 {strides = array<i32>} : memref<216x1024xbf16, #tpu.memory_space<vmem>>, vector<4x1024xbf16>,
    %c0_143 = arith.constant 0 : index
    %c0_144 = arith.constant 0 : index
    %c137_145 = arith.constant 137 : index
    %126 = vector.load %arg2[%c0_143, %c0_144, %c137_145] : memref<1x4x1280xbf16, #tpu.memory_space<vmem>>, vector<1x4x1024xbf16>
    %127 = vector.shape_cast %126 : vector<1x4x1024xbf16> to vector<4x1024xbf16>
    %c168 = arith.constant 168 : index
    %c0_146 = arith.constant 0 : index
    %128 = vector.load %arg6[%c168, %c0_146] : memref<216x1024xbf16, #tpu.memory_space<vmem>>, vector<4x1024xbf16>
    tpu.vector_store %arg6[%c168, %c0_146], %127 {strides = array<i32>} : memref<216x1024xbf16, #tpu.memory_space<vmem>>, vector<4x1024xbf16>,
    %c0_147 = arith.constant 0 : index
    %c0_148 = arith.constant 0 : index
    %c138_149 = arith.constant 138 : index
    %129 = vector.load %arg2[%c0_147, %c0_148, %c138_149] : memref<1x4x1280xbf16, #tpu.memory_space<vmem>>, vector<1x4x1024xbf16>
    %130 = vector.shape_cast %129 : vector<1x4x1024xbf16> to vector<4x1024xbf16>
    %c172 = arith.constant 172 : index
    %c0_150 = arith.constant 0 : index
    %131 = vector.load %arg6[%c172, %c0_150] : memref<216x1024xbf16, #tpu.memory_space<vmem>>, vector<4x1024xbf16>
    tpu.vector_store %arg6[%c172, %c0_150], %130 {strides = array<i32>} : memref<216x1024xbf16, #tpu.memory_space<vmem>>, vector<4x1024xbf16>,
    %c0_151 = arith.constant 0 : index
    %c0_152 = arith.constant 0 : index
    %c139_153 = arith.constant 139 : index
    %132 = vector.load %arg2[%c0_151, %c0_152, %c139_153] : memref<1x4x1280xbf16, #tpu.memory_space<vmem>>, vector<1x4x1024xbf16>
    %133 = vector.shape_cast %132 : vector<1x4x1024xbf16> to vector<4x1024xbf16>
    %c176 = arith.constant 176 : index
    %c0_154 = arith.constant 0 : index
    %134 = vector.load %arg6[%c176, %c0_154] : memref<216x1024xbf16, #tpu.memory_space<vmem>>, vector<4x1024xbf16>
    tpu.vector_store %arg6[%c176, %c0_154], %133 {strides = array<i32>} : memref<216x1024xbf16, #tpu.memory_space<vmem>>, vector<4x1024xbf16>,
    %c0_155 = arith.constant 0 : index
    %c0_156 = arith.constant 0 : index
    %c217_157 = arith.constant 217 : index
    %135 = vector.load %arg2[%c0_155, %c0_156, %c217_157] : memref<1x4x1280xbf16, #tpu.memory_space<vmem>>, vector<1x4x1024xbf16>
    %136 = vector.shape_cast %135 : vector<1x4x1024xbf16> to vector<4x1024xbf16>
    %c180 = arith.constant 180 : index
    %c0_158 = arith.constant 0 : index
    %137 = vector.load %arg6[%c180, %c0_158] : memref<216x1024xbf16, #tpu.memory_space<vmem>>, vector<4x1024xbf16>
    tpu.vector_store %arg6[%c180, %c0_158], %136 {strides = array<i32>} : memref<216x1024xbf16, #tpu.memory_space<vmem>>, vector<4x1024xbf16>,
    %c0_159 = arith.constant 0 : index
    %c0_160 = arith.constant 0 : index
    %c218_161 = arith.constant 218 : index
    %138 = vector.load %arg2[%c0_159, %c0_160, %c218_161] : memref<1x4x1280xbf16, #tpu.memory_space<vmem>>, vector<1x4x1024xbf16>
    %139 = vector.shape_cast %138 : vector<1x4x1024xbf16> to vector<4x1024xbf16>
    %c184 = arith.constant 184 : index
    %c0_162 = arith.constant 0 : index
    %140 = vector.load %arg6[%c184, %c0_162] : memref<216x1024xbf16, #tpu.memory_space<vmem>>, vector<4x1024xbf16>
    tpu.vector_store %arg6[%c184, %c0_162], %139 {strides = array<i32>} : memref<216x1024xbf16, #tpu.memory_space<vmem>>, vector<4x1024xbf16>,
    %c0_163 = arith.constant 0 : index
    %c0_164 = arith.constant 0 : index
    %c219_165 = arith.constant 219 : index
    %141 = vector.load %arg2[%c0_163, %c0_164, %c219_165] : memref<1x4x1280xbf16, #tpu.memory_space<vmem>>, vector<1x4x1024xbf16>
    %142 = vector.shape_cast %141 : vector<1x4x1024xbf16> to vector<4x1024xbf16>
    %c188 = arith.constant 188 : index
    %c0_166 = arith.constant 0 : index
    %143 = vector.load %arg6[%c188, %c0_166] : memref<216x1024xbf16, #tpu.memory_space<vmem>>, vector<4x1024xbf16>
    tpu.vector_store %arg6[%c188, %c0_166], %142 {strides = array<i32>} : memref<216x1024xbf16, #tpu.memory_space<vmem>>, vector<4x1024xbf16>,
    %c0_167 = arith.constant 0 : index
    %c0_168 = arith.constant 0 : index
    %c227_169 = arith.constant 227 : index
    %144 = vector.load %arg2[%c0_167, %c0_168, %c227_169] : memref<1x4x1280xbf16, #tpu.memory_space<vmem>>, vector<1x4x1024xbf16>
    %145 = vector.shape_cast %144 : vector<1x4x1024xbf16> to vector<4x1024xbf16>
    %c192 = arith.constant 192 : index
    %c0_170 = arith.constant 0 : index
    %146 = vector.load %arg6[%c192, %c0_170] : memref<216x1024xbf16, #tpu.memory_space<vmem>>, vector<4x1024xbf16>
    tpu.vector_store %arg6[%c192, %c0_170], %145 {strides = array<i32>} : memref<216x1024xbf16, #tpu.memory_space<vmem>>, vector<4x1024xbf16>,
    %c0_171 = arith.constant 0 : index
    %c0_172 = arith.constant 0 : index
    %c228_173 = arith.constant 228 : index
    %147 = vector.load %arg2[%c0_171, %c0_172, %c228_173] : memref<1x4x1280xbf16, #tpu.memory_space<vmem>>, vector<1x4x1024xbf16>
    %148 = vector.shape_cast %147 : vector<1x4x1024xbf16> to vector<4x1024xbf16>
    %c196 = arith.constant 196 : index
    %c0_174 = arith.constant 0 : index
    %149 = vector.load %arg6[%c196, %c0_174] : memref<216x1024xbf16, #tpu.memory_space<vmem>>, vector<4x1024xbf16>
    tpu.vector_store %arg6[%c196, %c0_174], %148 {strides = array<i32>} : memref<216x1024xbf16, #tpu.memory_space<vmem>>, vector<4x1024xbf16>,
    %c0_175 = arith.constant 0 : index
    %c0_176 = arith.constant 0 : index
    %c229_177 = arith.constant 229 : index
    %150 = vector.load %arg2[%c0_175, %c0_176, %c229_177] : memref<1x4x1280xbf16, #tpu.memory_space<vmem>>, vector<1x4x1024xbf16>
    %151 = vector.shape_cast %150 : vector<1x4x1024xbf16> to vector<4x1024xbf16>
    %c200 = arith.constant 200 : index
    %c0_178 = arith.constant 0 : index
    %152 = vector.load %arg6[%c200, %c0_178] : memref<216x1024xbf16, #tpu.memory_space<vmem>>, vector<4x1024xbf16>
    tpu.vector_store %arg6[%c200, %c0_178], %151 {strides = array<i32>} : memref<216x1024xbf16, #tpu.memory_space<vmem>>, vector<4x1024xbf16>,
    %c0_179 = arith.constant 0 : index
    %c0_180 = arith.constant 0 : index
    %c237_181 = arith.constant 237 : index
    %153 = vector.load %arg2[%c0_179, %c0_180, %c237_181] : memref<1x4x1280xbf16, #tpu.memory_space<vmem>>, vector<1x4x1024xbf16>
    %154 = vector.shape_cast %153 : vector<1x4x1024xbf16> to vector<4x1024xbf16>
    %c204 = arith.constant 204 : index
    %c0_182 = arith.constant 0 : index
    %155 = vector.load %arg6[%c204, %c0_182] : memref<216x1024xbf16, #tpu.memory_space<vmem>>, vector<4x1024xbf16>
    tpu.vector_store %arg6[%c204, %c0_182], %154 {strides = array<i32>} : memref<216x1024xbf16, #tpu.memory_space<vmem>>, vector<4x1024xbf16>,
    %c0_183 = arith.constant 0 : index
    %c0_184 = arith.constant 0 : index
    %c238_185 = arith.constant 238 : index
    %156 = vector.load %arg2[%c0_183, %c0_184, %c238_185] : memref<1x4x1280xbf16, #tpu.memory_space<vmem>>, vector<1x4x1024xbf16>
    %157 = vector.shape_cast %156 : vector<1x4x1024xbf16> to vector<4x1024xbf16>
    %c208 = arith.constant 208 : index
    %c0_186 = arith.constant 0 : index
    %158 = vector.load %arg6[%c208, %c0_186] : memref<216x1024xbf16, #tpu.memory_space<vmem>>, vector<4x1024xbf16>
    tpu.vector_store %arg6[%c208, %c0_186], %157 {strides = array<i32>} : memref<216x1024xbf16, #tpu.memory_space<vmem>>, vector<4x1024xbf16>,
    %c0_187 = arith.constant 0 : index
    %c0_188 = arith.constant 0 : index
    %c239_189 = arith.constant 239 : index
    %159 = vector.load %arg2[%c0_187, %c0_188, %c239_189] : memref<1x4x1280xbf16, #tpu.memory_space<vmem>>, vector<1x4x1024xbf16>
    %160 = vector.shape_cast %159 : vector<1x4x1024xbf16> to vector<4x1024xbf16>
    %c212 = arith.constant 212 : index
    %c0_190 = arith.constant 0 : index
    %161 = vector.load %arg6[%c212, %c0_190] : memref<216x1024xbf16, #tpu.memory_space<vmem>>, vector<4x1024xbf16>
    tpu.vector_store %arg6[%c212, %c0_190], %160 {strides = array<i32>} : memref<216x1024xbf16, #tpu.memory_space<vmem>>, vector<4x1024xbf16>,
    %c0_191 = arith.constant 0 : index
    %c0_192 = arith.constant 0 : index
    %162 = vector.load %arg3[%c0_191, %c0_192] : memref<8x216xbf16, #tpu.memory_space<vmem>>, vector<8x216xbf16>
    %c0_193 = arith.constant 0 : index
    %c0_194 = arith.constant 0 : index
    %163 = vector.load %arg6[%c0_193, %c0_194] : memref<216x1024xbf16, #tpu.memory_space<vmem>>, vector<216x1024xbf16>
    %cst = arith.constant dense<0.000000e+00> : vector<8x1024xf32>
    %164 = tpu.matmul %162, %163, %cst {dimension_numbers = #tpu.dot_dimension_numbers<[1], [0], [0], [1], [0, 0, 1, 1], [], []>} : vector<8x216xbf16>, vector<216x1024xbf16>, vector<8x1024xf32> -> vector<8x1024xf32>
    %c0_195 = arith.constant 0 : index
    %c0_196 = arith.constant 0 : index
    %165 = vector.load %arg4[%c0_195, %c0_196] : memref<1x1024xf32, #tpu.memory_space<vmem>>, vector<1x1024xf32>
    %166 = vector.broadcast %165 : vector<1x1024xf32> to vector<8x1024xf32>
    %167 = arith.mulf %164, %166 : vector<8x1024xf32>
    %cst_197 = arith.constant dense<0.000000e+00> : vector<8xf32>
    %168 = vector.multi_reduction <add>, %167, %cst_197 [1] : vector<8x1024xf32> to vector<8xf32>
    %169 = vector.shape_cast %168 : vector<8xf32> to vector<8x1xf32>
    %cst_198 = arith.constant 0.001953125 : f32
    %170 = vector.broadcast %cst_198 : f32 to vector<8x1xf32>
    %171 = arith.mulf %169, %170 : vector<8x1xf32>
    %172 = vector.broadcast %171 : vector<8x1xf32> to vector<8x1024xf32>
    %173 = arith.subf %164, %172 : vector<8x1024xf32>
    %174 = vector.broadcast %165 : vector<1x1024xf32> to vector<8x1024xf32>
    %175 = arith.mulf %173, %174 : vector<8x1024xf32>
    %176 = arith.mulf %175, %175 : vector<8x1024xf32>
    %cst_199 = arith.constant dense<0.000000e+00> : vector<8xf32>
    %177 = vector.multi_reduction <add>, %176, %cst_199 [1] : vector<8x1024xf32> to vector<8xf32>
    %178 = vector.shape_cast %177 : vector<8xf32> to vector<8x1xf32>
    %cst_200 = arith.constant 0.001953125 : f32
    %179 = vector.broadcast %cst_200 : f32 to vector<8x1xf32>
    %180 = arith.mulf %178, %179 : vector<8x1xf32>
    %181 = vector.broadcast %171 : vector<8x1xf32> to vector<8x1024xf32>
    %182 = arith.subf %164, %181 : vector<8x1024xf32>
    %cst_201 = arith.constant 9.99999974E-6 : f32
    %183 = vector.broadcast %cst_201 : f32 to vector<8x1xf32>
    %184 = arith.addf %180, %183 : vector<8x1xf32>
    %185 = math.rsqrt %184 : vector<8x1xf32>
    %186 = vector.broadcast %185 : vector<8x1xf32> to vector<8x1024xf32>
    %187 = arith.mulf %182, %186 : vector<8x1024xf32>
    %cst_202 = arith.constant 0.000000e+00 : f32
    %188 = vector.broadcast %cst_202 : f32 to vector<8x1024xf32>
    %189 = arith.cmpf oge, %187, %188 : vector<8x1024xf32>
    %cst_203 = arith.constant 0.00999999977 : f32
    %190 = vector.broadcast %cst_203 : f32 to vector<8x1024xf32>
    %191 = arith.mulf %190, %187 : vector<8x1024xf32>
    %192 = arith.select %189, %187, %191 : vector<8x1024xi1>, vector<8x1024xf32>
    %193 = vector.broadcast %165 : vector<1x1024xf32> to vector<8x1024xf32>
    %194 = arith.mulf %192, %193 : vector<8x1024xf32>
    %cst_204 = arith.constant 0.000000e+00 : bf16
    %195 = vector.broadcast %cst_204 : bf16 to vector<8x128xbf16>
    %c0_205 = arith.constant 0 : index
    %c0_206 = arith.constant 0 : index
    %c0_207 = arith.constant 0 : index
    %196 = vector.load %arg5[%c0_205, %c0_206, %c0_207] : memref<1x8x1280xbf16, #tpu.memory_space<vmem>>, vector<1x8x128xbf16>
    %197 = vector.shape_cast %196 : vector<1x8x128xbf16> to vector<8x128xbf16>
    %198 = vector.shape_cast %195 : vector<8x128xbf16> to vector<1x8x128xbf16>
    tpu.vector_store %arg5[%c0_205, %c0_206, %c0_207], %198 {strides = array<i32>} : memref<1x8x1280xbf16, #tpu.memory_space<vmem>>, vector<1x8x128xbf16>,
    %199 = arith.truncf %194 : vector<8x1024xf32> to vector<8x1024xbf16>
    %c0_208 = arith.constant 0 : index
    %c0_209 = arith.constant 0 : index
    %c128_210 = arith.constant 128 : index
    %200 = vector.load %arg5[%c0_208, %c0_209, %c128_210] : memref<1x8x1280xbf16, #tpu.memory_space<vmem>>, vector<1x8x1024xbf16>
    %201 = vector.shape_cast %200 : vector<1x8x1024xbf16> to vector<8x1024xbf16>
    %202 = vector.shape_cast %199 : vector<8x1024xbf16> to vector<1x8x1024xbf16>
    tpu.vector_store %arg5[%c0_208, %c0_209, %c128_210], %202 {strides = array<i32>} : memref<1x8x1280xbf16, #tpu.memory_space<vmem>>, vector<1x8x1024xbf16>,
    %cst_211 = arith.constant 0.000000e+00 : bf16
    %203 = vector.broadcast %cst_211 : bf16 to vector<8x128xbf16>
    %c0_212 = arith.constant 0 : index
    %c0_213 = arith.constant 0 : index
    %c1152 = arith.constant 1152 : index
    %204 = vector.load %arg5[%c0_212, %c0_213, %c1152] : memref<1x8x1280xbf16, #tpu.memory_space<vmem>>, vector<1x8x128xbf16>
    %205 = vector.shape_cast %204 : vector<1x8x128xbf16> to vector<8x128xbf16>
    %206 = vector.shape_cast %203 : vector<8x128xbf16> to vector<1x8x128xbf16>
    tpu.vector_store %arg5[%c0_212, %c0_213, %c1152], %206 {strides = array<i32>} : memref<1x8x1280xbf16, #tpu.memory_space<vmem>>, vector<1x8x128xbf16>,
    return
  }
  func.func @transform_0(%arg0: i32) -> (i32, i32, i32) {
    %c0_i32 = arith.constant 0 : i32
    %c0_i32_0 = arith.constant 0 : i32
    %c0_i32_1 = arith.constant 0 : i32
    return %arg0, %c0_i32, %c0_i32_0 : i32, i32, i32
  }
  func.func @transform_1(%arg0: i32) -> (i32, i32, i32) {
    %c0_i32 = arith.constant 0 : i32
    %c0_i32_0 = arith.constant 0 : i32
    %c0_i32_1 = arith.constant 0 : i32
    return %arg0, %c0_i32, %c0_i32_0 : i32, i32, i32
  }
  func.func @transform_2(%arg0: i32) -> (i32, i32) {
    %c0_i32 = arith.constant 0 : i32
    %c0_i32_0 = arith.constant 0 : i32
    %c0_i32_1 = arith.constant 0 : i32
    return %c0_i32, %c0_i32_0 : i32, i32
  }
  func.func @transform_3(%arg0: i32) -> (i32, i32) {
    %c0_i32 = arith.constant 0 : i32
    %c0_i32_0 = arith.constant 0 : i32
    %c0_i32_1 = arith.constant 0 : i32
    return %c0_i32, %c0_i32_0 : i32, i32
  }
  func.func @transform_4(%arg0: i32) -> (i32, i32, i32) {
    %c0_i32 = arith.constant 0 : i32
    %c0_i32_0 = arith.constant 0 : i32
    %c0_i32_1 = arith.constant 0 : i32
    return %arg0, %c0_i32, %c0_i32_0 : i32, i32, i32
  }
}

module attributes {stable_mosaic.version = 11 : i64} {
  func.func @kernel(%arg0: i32, %arg1: memref<1x8x1280xbf16, #tpu.memory_space<vmem>>, %arg2: memref<8x216xbf16, #tpu.memory_space<vmem>>, %arg3: memref<1x1024xf32, #tpu.memory_space<vmem>>, %arg4: memref<1x8x1280xf32, #tpu.memory_space<vmem>>, %arg5: memref<216x1024xbf16, #tpu.memory_space<vmem>>) attributes {dimension_semantics = [#tpu.dimension_semantics<parallel>], iteration_bounds = array<i64: 2>, scalar_prefetch = 0 : i64, scratch_operands = 1 : i64, tpu.core_type = #tpu.core_type<tc>, window_params = [{transform_indices = @transform_0, window_bounds = array<i64: 1, 8, 1280>}, {pipeline_mode = #tpu.pipeline_mode<synchronous>, transform_indices = @transform_1, window_bounds = array<i64: 8, 216>}, {pipeline_mode = #tpu.pipeline_mode<synchronous>, transform_indices = @transform_2, window_bounds = array<i64: 1, 1024>}, {transform_indices = @transform_3, window_bounds = array<i64: 1, 8, 1280>}]} {
    %c0 = arith.constant 0 : index
    %c0_0 = arith.constant 0 : index
    %c17 = arith.constant 17 : index
    %0 = vector.load %arg1[%c0, %c0_0, %c17] : memref<1x8x1280xbf16, #tpu.memory_space<vmem>>, vector<1x8x1024xbf16>
    %1 = vector.shape_cast %0 : vector<1x8x1024xbf16> to vector<8x1024xbf16>
    %c0_1 = arith.constant 0 : index
    %c0_2 = arith.constant 0 : index
    %2 = vector.load %arg5[%c0_1, %c0_2] : memref<216x1024xbf16, #tpu.memory_space<vmem>>, vector<8x1024xbf16>
    tpu.vector_store %arg5[%c0_1, %c0_2], %1 {strides = array<i32>} : memref<216x1024xbf16, #tpu.memory_space<vmem>>, vector<8x1024xbf16>,
    %c0_3 = arith.constant 0 : index
    %c0_4 = arith.constant 0 : index
    %c18 = arith.constant 18 : index
    %3 = vector.load %arg1[%c0_3, %c0_4, %c18] : memref<1x8x1280xbf16, #tpu.memory_space<vmem>>, vector<1x8x1024xbf16>
    %4 = vector.shape_cast %3 : vector<1x8x1024xbf16> to vector<8x1024xbf16>
    %c8 = arith.constant 8 : index
    %c0_5 = arith.constant 0 : index
    %5 = vector.load %arg5[%c8, %c0_5] : memref<216x1024xbf16, #tpu.memory_space<vmem>>, vector<8x1024xbf16>
    tpu.vector_store %arg5[%c8, %c0_5], %4 {strides = array<i32>} : memref<216x1024xbf16, #tpu.memory_space<vmem>>, vector<8x1024xbf16>,
    %c0_6 = arith.constant 0 : index
    %c0_7 = arith.constant 0 : index
    %c19 = arith.constant 19 : index
    %6 = vector.load %arg1[%c0_6, %c0_7, %c19] : memref<1x8x1280xbf16, #tpu.memory_space<vmem>>, vector<1x8x1024xbf16>
    %7 = vector.shape_cast %6 : vector<1x8x1024xbf16> to vector<8x1024xbf16>
    %c16 = arith.constant 16 : index
    %c0_8 = arith.constant 0 : index
    %8 = vector.load %arg5[%c16, %c0_8] : memref<216x1024xbf16, #tpu.memory_space<vmem>>, vector<8x1024xbf16>
    tpu.vector_store %arg5[%c16, %c0_8], %7 {strides = array<i32>} : memref<216x1024xbf16, #tpu.memory_space<vmem>>, vector<8x1024xbf16>,
    %c0_9 = arith.constant 0 : index
    %c0_10 = arith.constant 0 : index
    %c27 = arith.constant 27 : index
    %9 = vector.load %arg1[%c0_9, %c0_10, %c27] : memref<1x8x1280xbf16, #tpu.memory_space<vmem>>, vector<1x8x1024xbf16>
    %10 = vector.shape_cast %9 : vector<1x8x1024xbf16> to vector<8x1024xbf16>
    %c24 = arith.constant 24 : index
    %c0_11 = arith.constant 0 : index
    %11 = vector.load %arg5[%c24, %c0_11] : memref<216x1024xbf16, #tpu.memory_space<vmem>>, vector<8x1024xbf16>
    tpu.vector_store %arg5[%c24, %c0_11], %10 {strides = array<i32>} : memref<216x1024xbf16, #tpu.memory_space<vmem>>, vector<8x1024xbf16>,
    %c0_12 = arith.constant 0 : index
    %c0_13 = arith.constant 0 : index
    %c28 = arith.constant 28 : index
    %12 = vector.load %arg1[%c0_12, %c0_13, %c28] : memref<1x8x1280xbf16, #tpu.memory_space<vmem>>, vector<1x8x1024xbf16>
    %13 = vector.shape_cast %12 : vector<1x8x1024xbf16> to vector<8x1024xbf16>
    %c32 = arith.constant 32 : index
    %c0_14 = arith.constant 0 : index
    %14 = vector.load %arg5[%c32, %c0_14] : memref<216x1024xbf16, #tpu.memory_space<vmem>>, vector<8x1024xbf16>
    tpu.vector_store %arg5[%c32, %c0_14], %13 {strides = array<i32>} : memref<216x1024xbf16, #tpu.memory_space<vmem>>, vector<8x1024xbf16>,
    %c0_15 = arith.constant 0 : index
    %c0_16 = arith.constant 0 : index
    %c29 = arith.constant 29 : index
    %15 = vector.load %arg1[%c0_15, %c0_16, %c29] : memref<1x8x1280xbf16, #tpu.memory_space<vmem>>, vector<1x8x1024xbf16>
    %16 = vector.shape_cast %15 : vector<1x8x1024xbf16> to vector<8x1024xbf16>
    %c40 = arith.constant 40 : index
    %c0_17 = arith.constant 0 : index
    %17 = vector.load %arg5[%c40, %c0_17] : memref<216x1024xbf16, #tpu.memory_space<vmem>>, vector<8x1024xbf16>
    tpu.vector_store %arg5[%c40, %c0_17], %16 {strides = array<i32>} : memref<216x1024xbf16, #tpu.memory_space<vmem>>, vector<8x1024xbf16>,
    %c0_18 = arith.constant 0 : index
    %c0_19 = arith.constant 0 : index
    %c37 = arith.constant 37 : index
    %18 = vector.load %arg1[%c0_18, %c0_19, %c37] : memref<1x8x1280xbf16, #tpu.memory_space<vmem>>, vector<1x8x1024xbf16>
    %19 = vector.shape_cast %18 : vector<1x8x1024xbf16> to vector<8x1024xbf16>
    %c48 = arith.constant 48 : index
    %c0_20 = arith.constant 0 : index
    %20 = vector.load %arg5[%c48, %c0_20] : memref<216x1024xbf16, #tpu.memory_space<vmem>>, vector<8x1024xbf16>
    tpu.vector_store %arg5[%c48, %c0_20], %19 {strides = array<i32>} : memref<216x1024xbf16, #tpu.memory_space<vmem>>, vector<8x1024xbf16>,
    %c0_21 = arith.constant 0 : index
    %c0_22 = arith.constant 0 : index
    %c38 = arith.constant 38 : index
    %21 = vector.load %arg1[%c0_21, %c0_22, %c38] : memref<1x8x1280xbf16, #tpu.memory_space<vmem>>, vector<1x8x1024xbf16>
    %22 = vector.shape_cast %21 : vector<1x8x1024xbf16> to vector<8x1024xbf16>
    %c56 = arith.constant 56 : index
    %c0_23 = arith.constant 0 : index
    %23 = vector.load %arg5[%c56, %c0_23] : memref<216x1024xbf16, #tpu.memory_space<vmem>>, vector<8x1024xbf16>
    tpu.vector_store %arg5[%c56, %c0_23], %22 {strides = array<i32>} : memref<216x1024xbf16, #tpu.memory_space<vmem>>, vector<8x1024xbf16>,
    %c0_24 = arith.constant 0 : index
    %c0_25 = arith.constant 0 : index
    %c39 = arith.constant 39 : index
    %24 = vector.load %arg1[%c0_24, %c0_25, %c39] : memref<1x8x1280xbf16, #tpu.memory_space<vmem>>, vector<1x8x1024xbf16>
    %25 = vector.shape_cast %24 : vector<1x8x1024xbf16> to vector<8x1024xbf16>
    %c64 = arith.constant 64 : index
    %c0_26 = arith.constant 0 : index
    %26 = vector.load %arg5[%c64, %c0_26] : memref<216x1024xbf16, #tpu.memory_space<vmem>>, vector<8x1024xbf16>
    tpu.vector_store %arg5[%c64, %c0_26], %25 {strides = array<i32>} : memref<216x1024xbf16, #tpu.memory_space<vmem>>, vector<8x1024xbf16>,
    %c0_27 = arith.constant 0 : index
    %c0_28 = arith.constant 0 : index
    %c117 = arith.constant 117 : index
    %27 = vector.load %arg1[%c0_27, %c0_28, %c117] : memref<1x8x1280xbf16, #tpu.memory_space<vmem>>, vector<1x8x1024xbf16>
    %28 = vector.shape_cast %27 : vector<1x8x1024xbf16> to vector<8x1024xbf16>
    %c72 = arith.constant 72 : index
    %c0_29 = arith.constant 0 : index
    %29 = vector.load %arg5[%c72, %c0_29] : memref<216x1024xbf16, #tpu.memory_space<vmem>>, vector<8x1024xbf16>
    tpu.vector_store %arg5[%c72, %c0_29], %28 {strides = array<i32>} : memref<216x1024xbf16, #tpu.memory_space<vmem>>, vector<8x1024xbf16>,
    %c0_30 = arith.constant 0 : index
    %c0_31 = arith.constant 0 : index
    %c118 = arith.constant 118 : index
    %30 = vector.load %arg1[%c0_30, %c0_31, %c118] : memref<1x8x1280xbf16, #tpu.memory_space<vmem>>, vector<1x8x1024xbf16>
    %31 = vector.shape_cast %30 : vector<1x8x1024xbf16> to vector<8x1024xbf16>
    %c80 = arith.constant 80 : index
    %c0_32 = arith.constant 0 : index
    %32 = vector.load %arg5[%c80, %c0_32] : memref<216x1024xbf16, #tpu.memory_space<vmem>>, vector<8x1024xbf16>
    tpu.vector_store %arg5[%c80, %c0_32], %31 {strides = array<i32>} : memref<216x1024xbf16, #tpu.memory_space<vmem>>, vector<8x1024xbf16>,
    %c0_33 = arith.constant 0 : index
    %c0_34 = arith.constant 0 : index
    %c119 = arith.constant 119 : index
    %33 = vector.load %arg1[%c0_33, %c0_34, %c119] : memref<1x8x1280xbf16, #tpu.memory_space<vmem>>, vector<1x8x1024xbf16>
    %34 = vector.shape_cast %33 : vector<1x8x1024xbf16> to vector<8x1024xbf16>
    %c88 = arith.constant 88 : index
    %c0_35 = arith.constant 0 : index
    %35 = vector.load %arg5[%c88, %c0_35] : memref<216x1024xbf16, #tpu.memory_space<vmem>>, vector<8x1024xbf16>
    tpu.vector_store %arg5[%c88, %c0_35], %34 {strides = array<i32>} : memref<216x1024xbf16, #tpu.memory_space<vmem>>, vector<8x1024xbf16>,
    %c0_36 = arith.constant 0 : index
    %c0_37 = arith.constant 0 : index
    %c127 = arith.constant 127 : index
    %36 = vector.load %arg1[%c0_36, %c0_37, %c127] : memref<1x8x1280xbf16, #tpu.memory_space<vmem>>, vector<1x8x1024xbf16>
    %37 = vector.shape_cast %36 : vector<1x8x1024xbf16> to vector<8x1024xbf16>
    %c96 = arith.constant 96 : index
    %c0_38 = arith.constant 0 : index
    %38 = vector.load %arg5[%c96, %c0_38] : memref<216x1024xbf16, #tpu.memory_space<vmem>>, vector<8x1024xbf16>
    tpu.vector_store %arg5[%c96, %c0_38], %37 {strides = array<i32>} : memref<216x1024xbf16, #tpu.memory_space<vmem>>, vector<8x1024xbf16>,
    %c0_39 = arith.constant 0 : index
    %c0_40 = arith.constant 0 : index
    %c128 = arith.constant 128 : index
    %39 = vector.load %arg1[%c0_39, %c0_40, %c128] : memref<1x8x1280xbf16, #tpu.memory_space<vmem>>, vector<1x8x1024xbf16>
    %40 = vector.shape_cast %39 : vector<1x8x1024xbf16> to vector<8x1024xbf16>
    %c104 = arith.constant 104 : index
    %c0_41 = arith.constant 0 : index
    %41 = vector.load %arg5[%c104, %c0_41] : memref<216x1024xbf16, #tpu.memory_space<vmem>>, vector<8x1024xbf16>
    tpu.vector_store %arg5[%c104, %c0_41], %40 {strides = array<i32>} : memref<216x1024xbf16, #tpu.memory_space<vmem>>, vector<8x1024xbf16>,
    %c0_42 = arith.constant 0 : index
    %c0_43 = arith.constant 0 : index
    %c129 = arith.constant 129 : index
    %42 = vector.load %arg1[%c0_42, %c0_43, %c129] : memref<1x8x1280xbf16, #tpu.memory_space<vmem>>, vector<1x8x1024xbf16>
    %43 = vector.shape_cast %42 : vector<1x8x1024xbf16> to vector<8x1024xbf16>
    %c112 = arith.constant 112 : index
    %c0_44 = arith.constant 0 : index
    %44 = vector.load %arg5[%c112, %c0_44] : memref<216x1024xbf16, #tpu.memory_space<vmem>>, vector<8x1024xbf16>
    tpu.vector_store %arg5[%c112, %c0_44], %43 {strides = array<i32>} : memref<216x1024xbf16, #tpu.memory_space<vmem>>, vector<8x1024xbf16>,
    %c0_45 = arith.constant 0 : index
    %c0_46 = arith.constant 0 : index
    %c137 = arith.constant 137 : index
    %45 = vector.load %arg1[%c0_45, %c0_46, %c137] : memref<1x8x1280xbf16, #tpu.memory_space<vmem>>, vector<1x8x1024xbf16>
    %46 = vector.shape_cast %45 : vector<1x8x1024xbf16> to vector<8x1024xbf16>
    %c120 = arith.constant 120 : index
    %c0_47 = arith.constant 0 : index
    %47 = vector.load %arg5[%c120, %c0_47] : memref<216x1024xbf16, #tpu.memory_space<vmem>>, vector<8x1024xbf16>
    tpu.vector_store %arg5[%c120, %c0_47], %46 {strides = array<i32>} : memref<216x1024xbf16, #tpu.memory_space<vmem>>, vector<8x1024xbf16>,
    %c0_48 = arith.constant 0 : index
    %c0_49 = arith.constant 0 : index
    %c138 = arith.constant 138 : index
    %48 = vector.load %arg1[%c0_48, %c0_49, %c138] : memref<1x8x1280xbf16, #tpu.memory_space<vmem>>, vector<1x8x1024xbf16>
    %49 = vector.shape_cast %48 : vector<1x8x1024xbf16> to vector<8x1024xbf16>
    %c128_50 = arith.constant 128 : index
    %c0_51 = arith.constant 0 : index
    %50 = vector.load %arg5[%c128_50, %c0_51] : memref<216x1024xbf16, #tpu.memory_space<vmem>>, vector<8x1024xbf16>
    tpu.vector_store %arg5[%c128_50, %c0_51], %49 {strides = array<i32>} : memref<216x1024xbf16, #tpu.memory_space<vmem>>, vector<8x1024xbf16>,
    %c0_52 = arith.constant 0 : index
    %c0_53 = arith.constant 0 : index
    %c139 = arith.constant 139 : index
    %51 = vector.load %arg1[%c0_52, %c0_53, %c139] : memref<1x8x1280xbf16, #tpu.memory_space<vmem>>, vector<1x8x1024xbf16>
    %52 = vector.shape_cast %51 : vector<1x8x1024xbf16> to vector<8x1024xbf16>
    %c136 = arith.constant 136 : index
    %c0_54 = arith.constant 0 : index
    %53 = vector.load %arg5[%c136, %c0_54] : memref<216x1024xbf16, #tpu.memory_space<vmem>>, vector<8x1024xbf16>
    tpu.vector_store %arg5[%c136, %c0_54], %52 {strides = array<i32>} : memref<216x1024xbf16, #tpu.memory_space<vmem>>, vector<8x1024xbf16>,
    %c0_55 = arith.constant 0 : index
    %c0_56 = arith.constant 0 : index
    %c217 = arith.constant 217 : index
    %54 = vector.load %arg1[%c0_55, %c0_56, %c217] : memref<1x8x1280xbf16, #tpu.memory_space<vmem>>, vector<1x8x1024xbf16>
    %55 = vector.shape_cast %54 : vector<1x8x1024xbf16> to vector<8x1024xbf16>
    %c144 = arith.constant 144 : index
    %c0_57 = arith.constant 0 : index
    %56 = vector.load %arg5[%c144, %c0_57] : memref<216x1024xbf16, #tpu.memory_space<vmem>>, vector<8x1024xbf16>
    tpu.vector_store %arg5[%c144, %c0_57], %55 {strides = array<i32>} : memref<216x1024xbf16, #tpu.memory_space<vmem>>, vector<8x1024xbf16>,
    %c0_58 = arith.constant 0 : index
    %c0_59 = arith.constant 0 : index
    %c218 = arith.constant 218 : index
    %57 = vector.load %arg1[%c0_58, %c0_59, %c218] : memref<1x8x1280xbf16, #tpu.memory_space<vmem>>, vector<1x8x1024xbf16>
    %58 = vector.shape_cast %57 : vector<1x8x1024xbf16> to vector<8x1024xbf16>
    %c152 = arith.constant 152 : index
    %c0_60 = arith.constant 0 : index
    %59 = vector.load %arg5[%c152, %c0_60] : memref<216x1024xbf16, #tpu.memory_space<vmem>>, vector<8x1024xbf16>
    tpu.vector_store %arg5[%c152, %c0_60], %58 {strides = array<i32>} : memref<216x1024xbf16, #tpu.memory_space<vmem>>, vector<8x1024xbf16>,
    %c0_61 = arith.constant 0 : index
    %c0_62 = arith.constant 0 : index
    %c219 = arith.constant 219 : index
    %60 = vector.load %arg1[%c0_61, %c0_62, %c219] : memref<1x8x1280xbf16, #tpu.memory_space<vmem>>, vector<1x8x1024xbf16>
    %61 = vector.shape_cast %60 : vector<1x8x1024xbf16> to vector<8x1024xbf16>
    %c160 = arith.constant 160 : index
    %c0_63 = arith.constant 0 : index
    %62 = vector.load %arg5[%c160, %c0_63] : memref<216x1024xbf16, #tpu.memory_space<vmem>>, vector<8x1024xbf16>
    tpu.vector_store %arg5[%c160, %c0_63], %61 {strides = array<i32>} : memref<216x1024xbf16, #tpu.memory_space<vmem>>, vector<8x1024xbf16>,
    %c0_64 = arith.constant 0 : index
    %c0_65 = arith.constant 0 : index
    %c227 = arith.constant 227 : index
    %63 = vector.load %arg1[%c0_64, %c0_65, %c227] : memref<1x8x1280xbf16, #tpu.memory_space<vmem>>, vector<1x8x1024xbf16>
    %64 = vector.shape_cast %63 : vector<1x8x1024xbf16> to vector<8x1024xbf16>
    %c168 = arith.constant 168 : index
    %c0_66 = arith.constant 0 : index
    %65 = vector.load %arg5[%c168, %c0_66] : memref<216x1024xbf16, #tpu.memory_space<vmem>>, vector<8x1024xbf16>
    tpu.vector_store %arg5[%c168, %c0_66], %64 {strides = array<i32>} : memref<216x1024xbf16, #tpu.memory_space<vmem>>, vector<8x1024xbf16>,
    %c0_67 = arith.constant 0 : index
    %c0_68 = arith.constant 0 : index
    %c228 = arith.constant 228 : index
    %66 = vector.load %arg1[%c0_67, %c0_68, %c228] : memref<1x8x1280xbf16, #tpu.memory_space<vmem>>, vector<1x8x1024xbf16>
    %67 = vector.shape_cast %66 : vector<1x8x1024xbf16> to vector<8x1024xbf16>
    %c176 = arith.constant 176 : index
    %c0_69 = arith.constant 0 : index
    %68 = vector.load %arg5[%c176, %c0_69] : memref<216x1024xbf16, #tpu.memory_space<vmem>>, vector<8x1024xbf16>
    tpu.vector_store %arg5[%c176, %c0_69], %67 {strides = array<i32>} : memref<216x1024xbf16, #tpu.memory_space<vmem>>, vector<8x1024xbf16>,
    %c0_70 = arith.constant 0 : index
    %c0_71 = arith.constant 0 : index
    %c229 = arith.constant 229 : index
    %69 = vector.load %arg1[%c0_70, %c0_71, %c229] : memref<1x8x1280xbf16, #tpu.memory_space<vmem>>, vector<1x8x1024xbf16>
    %70 = vector.shape_cast %69 : vector<1x8x1024xbf16> to vector<8x1024xbf16>
    %c184 = arith.constant 184 : index
    %c0_72 = arith.constant 0 : index
    %71 = vector.load %arg5[%c184, %c0_72] : memref<216x1024xbf16, #tpu.memory_space<vmem>>, vector<8x1024xbf16>
    tpu.vector_store %arg5[%c184, %c0_72], %70 {strides = array<i32>} : memref<216x1024xbf16, #tpu.memory_space<vmem>>, vector<8x1024xbf16>,
    %c0_73 = arith.constant 0 : index
    %c0_74 = arith.constant 0 : index
    %c237 = arith.constant 237 : index
    %72 = vector.load %arg1[%c0_73, %c0_74, %c237] : memref<1x8x1280xbf16, #tpu.memory_space<vmem>>, vector<1x8x1024xbf16>
    %73 = vector.shape_cast %72 : vector<1x8x1024xbf16> to vector<8x1024xbf16>
    %c192 = arith.constant 192 : index
    %c0_75 = arith.constant 0 : index
    %74 = vector.load %arg5[%c192, %c0_75] : memref<216x1024xbf16, #tpu.memory_space<vmem>>, vector<8x1024xbf16>
    tpu.vector_store %arg5[%c192, %c0_75], %73 {strides = array<i32>} : memref<216x1024xbf16, #tpu.memory_space<vmem>>, vector<8x1024xbf16>,
    %c0_76 = arith.constant 0 : index
    %c0_77 = arith.constant 0 : index
    %c238 = arith.constant 238 : index
    %75 = vector.load %arg1[%c0_76, %c0_77, %c238] : memref<1x8x1280xbf16, #tpu.memory_space<vmem>>, vector<1x8x1024xbf16>
    %76 = vector.shape_cast %75 : vector<1x8x1024xbf16> to vector<8x1024xbf16>
    %c200 = arith.constant 200 : index
    %c0_78 = arith.constant 0 : index
    %77 = vector.load %arg5[%c200, %c0_78] : memref<216x1024xbf16, #tpu.memory_space<vmem>>, vector<8x1024xbf16>
    tpu.vector_store %arg5[%c200, %c0_78], %76 {strides = array<i32>} : memref<216x1024xbf16, #tpu.memory_space<vmem>>, vector<8x1024xbf16>,
    %c0_79 = arith.constant 0 : index
    %c0_80 = arith.constant 0 : index
    %c239 = arith.constant 239 : index
    %78 = vector.load %arg1[%c0_79, %c0_80, %c239] : memref<1x8x1280xbf16, #tpu.memory_space<vmem>>, vector<1x8x1024xbf16>
    %79 = vector.shape_cast %78 : vector<1x8x1024xbf16> to vector<8x1024xbf16>
    %c208 = arith.constant 208 : index
    %c0_81 = arith.constant 0 : index
    %80 = vector.load %arg5[%c208, %c0_81] : memref<216x1024xbf16, #tpu.memory_space<vmem>>, vector<8x1024xbf16>
    tpu.vector_store %arg5[%c208, %c0_81], %79 {strides = array<i32>} : memref<216x1024xbf16, #tpu.memory_space<vmem>>, vector<8x1024xbf16>,
    %c0_82 = arith.constant 0 : index
    %c0_83 = arith.constant 0 : index
    %81 = vector.load %arg2[%c0_82, %c0_83] : memref<8x216xbf16, #tpu.memory_space<vmem>>, vector<8x216xbf16>
    %c0_84 = arith.constant 0 : index
    %c0_85 = arith.constant 0 : index
    %82 = vector.load %arg5[%c0_84, %c0_85] : memref<216x1024xbf16, #tpu.memory_space<vmem>>, vector<216x1024xbf16>
    %cst = arith.constant dense<0.000000e+00> : vector<8x1024xf32>
    %83 = tpu.matmul %81, %82, %cst {dimension_numbers = #tpu.dot_dimension_numbers<[1], [0], [0], [1], [0, 0, 1, 1], [], []>} : vector<8x216xbf16>, vector<216x1024xbf16>, vector<8x1024xf32> -> vector<8x1024xf32>
    %c0_86 = arith.constant 0 : index
    %c0_87 = arith.constant 0 : index
    %84 = vector.load %arg3[%c0_86, %c0_87] : memref<1x1024xf32, #tpu.memory_space<vmem>>, vector<1x1024xf32>
    %85 = vector.broadcast %84 : vector<1x1024xf32> to vector<8x1024xf32>
    %86 = arith.mulf %83, %85 : vector<8x1024xf32>
    %cst_88 = arith.constant dense<0.000000e+00> : vector<8xf32>
    %87 = vector.multi_reduction <add>, %86, %cst_88 [1] : vector<8x1024xf32> to vector<8xf32>
    %88 = vector.shape_cast %87 : vector<8xf32> to vector<8x1xf32>
    %cst_89 = arith.constant 0.001953125 : f32
    %89 = vector.broadcast %cst_89 : f32 to vector<8x1xf32>
    %90 = arith.mulf %88, %89 : vector<8x1xf32>
    %91 = vector.broadcast %90 : vector<8x1xf32> to vector<8x1024xf32>
    %92 = arith.subf %83, %91 : vector<8x1024xf32>
    %93 = vector.broadcast %84 : vector<1x1024xf32> to vector<8x1024xf32>
    %94 = arith.mulf %92, %93 : vector<8x1024xf32>
    %95 = arith.mulf %94, %94 : vector<8x1024xf32>
    %cst_90 = arith.constant dense<0.000000e+00> : vector<8xf32>
    %96 = vector.multi_reduction <add>, %95, %cst_90 [1] : vector<8x1024xf32> to vector<8xf32>
    %97 = vector.shape_cast %96 : vector<8xf32> to vector<8x1xf32>
    %cst_91 = arith.constant 0.001953125 : f32
    %98 = vector.broadcast %cst_91 : f32 to vector<8x1xf32>
    %99 = arith.mulf %97, %98 : vector<8x1xf32>
    %100 = vector.broadcast %90 : vector<8x1xf32> to vector<8x1024xf32>
    %101 = arith.subf %83, %100 : vector<8x1024xf32>
    %cst_92 = arith.constant 9.99999974E-6 : f32
    %102 = vector.broadcast %cst_92 : f32 to vector<8x1xf32>
    %103 = arith.addf %99, %102 : vector<8x1xf32>
    %104 = math.rsqrt %103 : vector<8x1xf32>
    %105 = vector.broadcast %104 : vector<8x1xf32> to vector<8x1024xf32>
    %106 = arith.mulf %101, %105 : vector<8x1024xf32>
    %cst_93 = arith.constant 0.000000e+00 : f32
    %107 = vector.broadcast %cst_93 : f32 to vector<8x1024xf32>
    %108 = arith.cmpf oge, %106, %107 : vector<8x1024xf32>
    %cst_94 = arith.constant 0.00999999977 : f32
    %109 = vector.broadcast %cst_94 : f32 to vector<8x1024xf32>
    %110 = arith.mulf %109, %106 : vector<8x1024xf32>
    %111 = arith.select %108, %106, %110 : vector<8x1024xi1>, vector<8x1024xf32>
    %112 = vector.broadcast %84 : vector<1x1024xf32> to vector<8x1024xf32>
    %113 = arith.mulf %111, %112 : vector<8x1024xf32>
    %cst_95 = arith.constant 0.000000e+00 : f32
    %114 = vector.broadcast %cst_95 : f32 to vector<8x128xf32>
    %c0_96 = arith.constant 0 : index
    %c0_97 = arith.constant 0 : index
    %c0_98 = arith.constant 0 : index
    %115 = vector.load %arg4[%c0_96, %c0_97, %c0_98] : memref<1x8x1280xf32, #tpu.memory_space<vmem>>, vector<1x8x128xf32>
    %116 = vector.shape_cast %115 : vector<1x8x128xf32> to vector<8x128xf32>
    %117 = vector.shape_cast %114 : vector<8x128xf32> to vector<1x8x128xf32>
    tpu.vector_store %arg4[%c0_96, %c0_97, %c0_98], %117 {strides = array<i32>} : memref<1x8x1280xf32, #tpu.memory_space<vmem>>, vector<1x8x128xf32>,
    %c0_99 = arith.constant 0 : index
    %c0_100 = arith.constant 0 : index
    %c128_101 = arith.constant 128 : index
    %118 = vector.load %arg4[%c0_99, %c0_100, %c128_101] : memref<1x8x1280xf32, #tpu.memory_space<vmem>>, vector<1x8x1024xf32>
    %119 = vector.shape_cast %118 : vector<1x8x1024xf32> to vector<8x1024xf32>
    %120 = vector.shape_cast %113 : vector<8x1024xf32> to vector<1x8x1024xf32>
    tpu.vector_store %arg4[%c0_99, %c0_100, %c128_101], %120 {strides = array<i32>} : memref<1x8x1280xf32, #tpu.memory_space<vmem>>, vector<1x8x1024xf32>,
    %cst_102 = arith.constant 0.000000e+00 : f32
    %121 = vector.broadcast %cst_102 : f32 to vector<8x128xf32>
    %c0_103 = arith.constant 0 : index
    %c0_104 = arith.constant 0 : index
    %c1152 = arith.constant 1152 : index
    %122 = vector.load %arg4[%c0_103, %c0_104, %c1152] : memref<1x8x1280xf32, #tpu.memory_space<vmem>>, vector<1x8x128xf32>
    %123 = vector.shape_cast %122 : vector<1x8x128xf32> to vector<8x128xf32>
    %124 = vector.shape_cast %121 : vector<8x128xf32> to vector<1x8x128xf32>
    tpu.vector_store %arg4[%c0_103, %c0_104, %c1152], %124 {strides = array<i32>} : memref<1x8x1280xf32, #tpu.memory_space<vmem>>, vector<1x8x128xf32>,
    return
  }
  func.func @transform_0(%arg0: i32) -> (i32, i32, i32) {
    %c0_i32 = arith.constant 0 : i32
    %c0_i32_0 = arith.constant 0 : i32
    %c0_i32_1 = arith.constant 0 : i32
    return %arg0, %c0_i32, %c0_i32_0 : i32, i32, i32
  }
  func.func @transform_1(%arg0: i32) -> (i32, i32) {
    %c0_i32 = arith.constant 0 : i32
    %c0_i32_0 = arith.constant 0 : i32
    %c0_i32_1 = arith.constant 0 : i32
    return %c0_i32, %c0_i32_0 : i32, i32
  }
  func.func @transform_2(%arg0: i32) -> (i32, i32) {
    %c0_i32 = arith.constant 0 : i32
    %c0_i32_0 = arith.constant 0 : i32
    %c0_i32_1 = arith.constant 0 : i32
    return %c0_i32, %c0_i32_0 : i32, i32
  }
  func.func @transform_3(%arg0: i32) -> (i32, i32, i32) {
    %c0_i32 = arith.constant 0 : i32
    %c0_i32_0 = arith.constant 0 : i32
    %c0_i32_1 = arith.constant 0 : i32
    return %arg0, %c0_i32, %c0_i32_0 : i32, i32, i32
  }
}

</mosaic_0001>

<bundles_post_ra>
// kernel: decoder_block.3
= control target key start
LH: loop header
LB: loop body
LE: loop exit
PB: predicated region body
PF: predicated region fallthrough
CT: control target
= control target key end

     0   :  { %s2549_s12 = smov 0   ;;  %s3434_s0 = inlined_call_operand.vmem [shape: bf16[2,8,1280], index: 0, kind: input, shape index: {}]   ;;  %s3435_s1 = inlined_call_operand.vmem [shape: bf16[8,216], index: 1, kind: input, shape index: {}]   ;;  %s3436_s2 = inlined_call_operand.vmem [shape: f32[1,1024], index: 2, kind: input, shape index: {}]   ;;  %s3437_s3 = inlined_call_operand.vmem [shape: f32[2,8,1280], index: 3, kind: output, shape index: {}]  }
   0x1 LB: > { %s2322_s13 = sadd.s32 4294967295, %s2500_s12   ;;  %p2326_p0 = scmp.ge.s32.totalorder %s2500_s12, 1  ;;  %s2500_s12 = sphi %s2549_s12, %s13_s12  }
   0x2   : > { %p137_p1 = scmp.lt.s32.totalorder %s2500_s12, 3 }
   0x4   : > { %p138_p2 = pnand %p2326_p0, %p137_p1 }
   0x5   : > { %p161_p3 = scmp.lt.s32.totalorder (!%p138_p2), %s2322_s13, 1  ;;  %s2502_s18 = smov (!%p138_p2), 119  }
   0x6   : > { %141 = sbr.rel (%p138_p2) target bundleno = 926 (0x39e), region = 32  ;;  %s2503_s19 = smov (!%p138_p2), 127  }
   0x7   : > { %s2504_s20 = smov (!%p138_p2), 1   ;;  %s2505_s21 = smov (!%p138_p2), 10  }
   0x8   : > { %s2506_s22 = smov (!%p138_p2), 9   ;;  %s2507_s23 = smov (!%p138_p2), 89  }
   0x9   : > { %s2508_s24 = smov (!%p138_p2), 11   ;;  %s2509_s25 = smov (!%p138_p2), 91  }
   0xa   : > { %s2510_s26 = smov (!%p138_p2), 90   ;;  %s2511_s27 = smov (!%p138_p2), 100  }
   0xb   : > { %s3503_s13 = smov (!%p161_p3, %s2322_s13), 1  ;;  %s2512_s28 = smov 99   ;;  %vm197_vm0 = vcmask 1043456   ;;  %vm753_vm1 = vcmask 1039360   ;;  %vm795_vm2 = vcmask 973824   ;;  %vm703_vm3 = vcmask 7168  }
   0xc   : > { %s2453_s14 = smul.u32 40, %s3503_s13  ;;  %s2513_s29 = smov 109   ;;  %vm619_vm4 = vcmask 80896   ;;  %vm661_vm5 = vcmask 72704   ;;  %v2735_v62 = vld [vmem:[%s3435_s1] sm:$0xff]  ;;  %vm1928_vm6 = vcmask 719872  }
   0xd   : > { %s2514_s30 = smov 101   ;;  %s2515_s4 = smov 111   ;;  %v2743_v63 = vcombine.high %v2735_v62, %v2735_v62  ;;  %vm535_vm7 = vcmask 728064   ;;  %vm577_vm8 = vcmask 89088   ;;  %vm451_vm9 = vcmask 744448  }
   0xe   : > { %s2563_s17 = scalar_lea.vmem %s3434_s0, %s2453_s14  ;;  %s2516_s5 = smov 110   ;;  %vm493_vm10 = vcmask 736256   ;;  %vm3446_vm11 = vcmask 818176   ;;  %vm3460_vm12 = vcmask 809984   ;;  %vm3451_vm13 = vcmask 891904  }
   0xf   : > { %v2566_v0 = vld [vmem:[%s2563_s17 + $0x4] sm:$0xff]  ;;  %v2573_v1 = vld [vmem:[%s2563_s17 + $0xc] sm:$0xff]  ;;  %v2584_v4 = vld [vmem:[%s2563_s17 + $0x14] sm:$0xff]  ;;  %s2517_s6 = smov 17   ;;  %s2518_s7 = smov 19   ;;  %2444 = vmatprep.mubr.msk.bf16.mxu0 %vm1928_vm6, %v2743_v63  ;;  %2446 = vmatprep.mubr.msk.bf16.mxu1 %vm1928_vm6, %v2743_v63  ;;  %vm3447_vm14 = vcmask 826368  }
  0x10   : > { %779 = vrot.lane.b32.xlu1 %v2566_v0, %s2502_s18  ;;  %737 = vrot.lane.b32.xlu0 %v2566_v0, %s2503_s19  ;;  %v678_v2 = vld [vmem:[%s2563_s17 + $0x8] sm:$0xff]  ;;  %v677_v3 = vld [vmem:[%s2563_s17] sm:$0xff]  ;;  %s2519_s8 = smov 18   ;;  %s3444_s9 = smov 28   ;;  %vm3449_vm15 = vcmask 908288  }
  0x11   : > { %v679_v5 = vld [vmem:[%s2563_s17 + $0x10] sm:$0xff]  ;;  %s3438_s10 = smov 27   ;;  %s3442_s11 = smov 37  }
  0x12   : > { %s3440_s14 = smov 29   ;;  %s2524_s15 = smov 39  }
  0x13   : > { %s2525_s16 = smov 38  }
  0x14   : > { %781 = vrot.lane.b32.xlu1 %v2573_v1, %s2502_s18  ;;  %739 = vrot.lane.b32.xlu0 %v2573_v1, %s2503_s19 }
  0x18   : > { %689 = vrot.lane.b32.xlu1 %v678_v2, %s2504_s20  ;;  %687 = vrot.lane.b32.xlu0 %v677_v3, %s2504_s20 }
  0x1c   : > { %783 = vrot.lane.b32.xlu1 %v2584_v4, %s2502_s18  ;;  %741 = vrot.lane.b32.xlu0 %v2584_v4, %s2503_s19 }
  0x20   : > { %605 = vrot.lane.b32.xlu1 %v678_v2, %s2505_s21  ;;  %603 = vrot.lane.b32.xlu0 %v677_v3, %s2505_s21 }
  0x24   : > { %647 = vrot.lane.b32.xlu1 %v678_v2, %s2506_s22  ;;  %645 = vrot.lane.b32.xlu0 %v677_v3, %s2506_s22 }
  0x28   : > { %691 = vrot.lane.b32.xlu0 %v679_v5, %s2504_s20  ;;  %519 = vrot.lane.b32.xlu1 %v677_v3, %s2507_s23 }
  0x2c   : > { %521 = vrot.lane.b32.xlu0 %v678_v2, %s2507_s23  ;;  %561 = vrot.lane.b32.xlu1 %v677_v3, %s2508_s24 }
  0x30   : > { %563 = vrot.lane.b32.xlu0 %v678_v2, %s2508_s24  ;;  %607 = vrot.lane.b32.xlu1 %v679_v5, %s2505_s21 }
  0x34   : > { %649 = vrot.lane.b32.xlu0 %v679_v5, %s2506_s22  ;;  %435 = vrot.lane.b32.xlu1 %v677_v3, %s2509_s25 }
  0x38   : > { %437 = vrot.lane.b32.xlu0 %v678_v2, %s2509_s25  ;;  %477 = vrot.lane.b32.xlu1 %v677_v3, %s2510_s26 }
  0x3c   : > { %479 = vrot.lane.b32.xlu0 %v678_v2, %s2510_s26  ;;  %523 = vrot.lane.b32.xlu1 %v679_v5, %s2507_s23 }
  0x40   : > { %565 = vrot.lane.b32.xlu0 %v679_v5, %s2508_s24  ;;  %351 = vrot.lane.b32.xlu1 %v677_v3, %s2511_s27 }
  0x44   : > { %353 = vrot.lane.b32.xlu0 %v678_v2, %s2511_s27  ;;  %393 = vrot.lane.b32.xlu1 %v677_v3, %s2512_s28 }
  0x48   : > { %395 = vrot.lane.b32.xlu0 %v678_v2, %s2512_s28  ;;  %439 = vrot.lane.b32.xlu1 %v679_v5, %s2509_s25 }
  0x4c   : > { %481 = vrot.lane.b32.xlu0 %v679_v5, %s2510_s26  ;;  %267 = vrot.lane.b32.xlu1 %v677_v3, %s2513_s29 }
  0x50   : > { %269 = vrot.lane.b32.xlu0 %v678_v2, %s2513_s29  ;;  %309 = vrot.lane.b32.xlu1 %v677_v3, %s2514_s30 }
  0x54   : > { %311 = vrot.lane.b32.xlu0 %v678_v2, %s2514_s30  ;;  %355 = vrot.lane.b32.xlu1 %v679_v5, %s2511_s27 }
  0x58   : > { %397 = vrot.lane.b32.xlu0 %v679_v5, %s2512_s28  ;;  %182 = vrot.lane.b32.xlu1 %v677_v3, %s2515_s4 }
  0x5c   : > { %184 = vrot.lane.b32.xlu0 %v678_v2, %s2515_s4  ;;  %225 = vrot.lane.b32.xlu1 %v677_v3, %s2516_s5 }
  0x60   : > { %227 = vrot.lane.b32.xlu0 %v678_v2, %s2516_s5  ;;  %271 = vrot.lane.b32.xlu1 %v679_v5, %s2513_s29 }
  0x64   : > { %313 = vrot.lane.b32.xlu0 %v679_v5, %s2514_s30  ;;  %186 = vrot.lane.b32.xlu1 %v679_v5, %s2515_s4 }
  0x68   : > { %229 = vrot.lane.b32.xlu0 %v679_v5, %s2516_s5  ;;  %1241 = vrot.lane.b32.xlu1 %v2566_v0, %s2517_s6 }
  0x6c   : > { %1243 = vrot.lane.b32.xlu0 %v2573_v1, %s2517_s6  ;;  %1157 = vrot.lane.b32.xlu1 %v2566_v0, %s2518_s7 }
  0x70   : > { %1159 = vrot.lane.b32.xlu0 %v2573_v1, %s2518_s7  ;;  %1199 = vrot.lane.b32.xlu1 %v2566_v0, %s2519_s8 }
  0x74   : > { %1201 = vrot.lane.b32.xlu0 %v2573_v1, %s2519_s8  ;;  %1245 = vrot.lane.b32.xlu1 %v2584_v4, %s2517_s6 }
  0x78   : > { %1073 = vrot.lane.b32.xlu0 %v2566_v0, %s3444_s9  ;;  %1075 = vrot.lane.b32.xlu1 %v2573_v1, %s3444_s9 }
  0x7c   : > { %1115 = vrot.lane.b32.xlu0 %v2566_v0, %s3438_s10  ;;  %1117 = vrot.lane.b32.xlu1 %v2573_v1, %s3438_s10 }
  0x80   : > { %1161 = vrot.lane.b32.xlu0 %v2584_v4, %s2518_s7  ;;  %1203 = vrot.lane.b32.xlu1 %v2584_v4, %s2519_s8 }
  0x82   : > { %v780_v6 = vpop.permute.xlu1 %779  ;;  %v738_v7 = vpop.permute.xlu0 %737 }
  0x83   : > { %v789_v10 = vrot.slane %v780_v6, 4  ;;  %v747_v11 = vrot.slane %v738_v7, 4 }
  0x84   : > { %989 = vrot.lane.b32.xlu0 %v2566_v0, %s3442_s11  ;;  %991 = vrot.lane.b32.xlu1 %v2573_v1, %s3442_s11 }
  0x86   : > { %v782_v8 = vpop.permute.xlu1 %781  ;;  %v740_v9 = vpop.permute.xlu0 %739 }
  0x87   : > { %v790_v12 = vrot.slane %v782_v8, 4  ;;  %v748_v13 = vrot.slane %v740_v9, 4 }
  0x88   : > { %1031 = vrot.lane.b32.xlu0 %v2566_v0, %s3440_s14  ;;  %1033 = vrot.lane.b32.xlu1 %v2573_v1, %s3440_s14 }
  0x89   : > { %v752_v14 = vsel %vm197_vm0, %v747_v11, %v748_v13  ;;  %v794_v15 = vsel %vm197_vm0, %v789_v10, %v790_v12 }
  0x8a   : > { %v2664_v16 = vpop.permute.xlu1 %689  ;;  %v688_v17 = vpop.permute.xlu0 %687  ;;  %v754_v18 = vsel %vm753_vm1, %v738_v7, %v752_v14  ;;  %v796_v19 = vsel %vm795_vm2, %v780_v6, %v794_v15 }
  0x8b   : > { %v698_v20 = vrot.slane %v2664_v16, 4  ;;  %v697_v21 = vrot.slane %v688_v17, 4  ;;  %v2388_v22 = vcombine.high %v754_v18, %v796_v19  ;;  %v2387_v23 = vcombine.low %v754_v18, %v796_v19 }
  0x8c   : > { %1077 = vrot.lane.b32.xlu0 %v2584_v4, %s3444_s9  ;;  %1119 = vrot.lane.b32.xlu1 %v2584_v4, %s3438_s10  ;;  %s2526_s10 = smov 118   ;;  %s2527_s9 = smov 117  }
  0x8d   : > { %v702_v24 = vsel %vm197_vm0, %v697_v21, %v698_v20  ;;  %1957 = vmatprep.subr.bf16.mxu0 %v2388_v22 }
  0x8e   : > { %v704_v25 = vsel %vm703_vm3, %v688_v17, %v702_v24  ;;  %1958 = vmatpush1.bf16.msra.mxu0 %v2387_v23  ;;  %v2675_v26 = vpop.permute.xlu1 %783  ;;  %v2677_v27 = vpop.permute.xlu0 %741 }
  0x8f   : > { %v791_v28 = vrot.slane %v2675_v26, 4  ;;  %v749_v29 = vrot.slane %v2677_v27, 4  ;;  %v2380_v30 = vcombine.high %v704_v25, %v2566_v0  ;;  %v2379_v31 = vcombine.low %v704_v25, %v2566_v0 }
  0x90   : > { %905 = vrot.lane.b32.xlu0 %v2566_v0, %s2524_s15  ;;  %907 = vrot.lane.b32.xlu1 %v2573_v1, %s2524_s15 }
  0x91   : > { %1959 = vmatprep.subr.bf16.mxu0 %v2380_v30  ;;  %v755_v32 = vsel %vm197_vm0, %v748_v13, %v749_v29  ;;  %v797_v33 = vsel %vm197_vm0, %v790_v12, %v791_v28 }
  0x92   : > { %1960 = vmatpush1.bf16.msra.mxu0 %v2379_v31  ;;  %v2693_v34 = vpop.permute.xlu1 %605  ;;  %v604_v35 = vpop.permute.xlu0 %603  ;;  %v756_v36 = vsel %vm753_vm1, %v740_v9, %v755_v32  ;;  %v798_v37 = vsel %vm795_vm2, %v782_v8, %v797_v33  ;;  %v2763_v8 = vld [vmem:[%s2563_s17 + $0x1c] sm:$0xff]  ;;  %v731_v32 = vld [vmem:[%s2563_s17 + $0x24] sm:$0xf] }
  0x93   : > { %v614_v38 = vrot.slane %v2693_v34, 4  ;;  %v613_v39 = vrot.slane %v604_v35, 4  ;;  %v2390_v40 = vcombine.high %v756_v36, %v798_v37  ;;  %v2389_v41 = vcombine.low %v756_v36, %v798_v37  ;;  %v2795_v31 = vld [vmem:[%s2563_s17 + $0x18] sm:$0xff] }
  0x94   : > { %947 = vrot.lane.b32.xlu0 %v2566_v0, %s2525_s16  ;;  %949 = vrot.lane.b32.xlu1 %v2573_v1, %s2525_s16 }
  0x95   : > { %1998 = vmatprep.subr.bf16.mxu1 %v2390_v40  ;;  %v618_v44 = vsel %vm197_vm0, %v613_v39, %v614_v38 }
  0x96   : > { %1999 = vmatpush1.bf16.msra.mxu1 %v2389_v41  ;;  %v2702_v42 = vpop.permute.xlu1 %647  ;;  %v646_v43 = vpop.permute.xlu0 %645  ;;  %v620_v48 = vsel %vm619_vm4, %v604_v35, %v618_v44 }
  0x97   : > { %v656_v45 = vrot.slane %v2702_v42, 4  ;;  %v655_v46 = vrot.slane %v646_v43, 4 }
  0x98   : > { %993 = vrot.lane.b32.xlu0 %v2584_v4, %s3442_s11  ;;  %1035 = vrot.lane.b32.xlu1 %v2584_v4, %s3440_s14 }
  0x99   : > { %v660_v47 = vsel %vm197_vm0, %v655_v46, %v656_v45 }
  0x9a   : > { %v662_v49 = vsel %vm661_vm5, %v646_v43, %v660_v47  ;;  %v2715_v50 = vpop.permute.xlu0 %691  ;;  %v520_v51 = vpop.permute.xlu1 %519 }
  0x9b   : > { %v699_v52 = vrot.slane %v2715_v50, 4  ;;  %v2372_v53 = vcombine.high %v620_v48, %v662_v49  ;;  %v2371_v54 = vcombine.low %v620_v48, %v662_v49  ;;  %v529_v2 = vrot.slane %v520_v51, 4  ;;  %v681_v48 = vld [vmem:[%s2563_s17 + $0x20] sm:$0xf] }
  0x9c   : > { %821 = vrot.lane.b32.xlu0 %v2566_v0, %s2526_s10  ;;  %823 = vrot.lane.b32.xlu1 %v2573_v1, %s2526_s10 }
  0x9d   : > { %1961 = vmatprep.subr.bf16.mxu0 %v2372_v53  ;;  %v705_v55 = vsel %vm197_vm0, %v698_v20, %v699_v52 }
  0x9e   : > { %1962 = vmatpush1.bf16.msra.mxu0 %v2371_v54  ;;  %v2725_v56 = vpop.permute.xlu0 %521  ;;  %v562_v57 = vpop.permute.xlu1 %561  ;;  %v706_v58 = vsel %vm703_vm3, %v2664_v16, %v705_v55 }
  0x9f   : > { %v530_v59 = vrot.slane %v2725_v56, 4  ;;  %v2382_v60 = vcombine.high %v706_v58, %v2573_v1  ;;  %v2381_v61 = vcombine.low %v706_v58, %v2573_v1 }
  0xa0   : > { %863 = vrot.lane.b32.xlu0 %v2566_v0, %s2527_s9  ;;  %865 = vrot.lane.b32.xlu1 %v2573_v1, %s2527_s9  ;;  %v571_v0 = vrot.slane %v562_v57, 4 }
  0xa1   : > { %2000 = vmatprep.subr.bf16.mxu1 %v2382_v60  ;;  %v534_v7 = vsel %vm197_vm0, %v529_v2, %v530_v59 }
  0xa2   : > { %2001 = vmatpush1.bf16.msra.mxu1 %v2381_v61  ;;  %v2745_v3 = vpop.permute.xlu0 %563  ;;  %v2747_v5 = vpop.permute.xlu1 %607  ;;  %v536_v12 = vsel %vm535_vm7, %v520_v51, %v534_v7  ;;  %v597_v7 = vld [vmem:[%s2563_s17 + $0x20] sm:$0xf] }
  0xa3   : > { %v572_v1 = vrot.slane %v2745_v3, 4  ;;  %v615_v6 = vrot.slane %v2747_v5, 4 }
  0xa4   : > { %909 = vrot.lane.b32.xlu0 %v2584_v4, %s2524_s15  ;;  %951 = vrot.lane.b32.xlu1 %v2584_v4, %s2525_s16 }
  0xa5   : > { %v576_v9 = vsel %vm197_vm0, %v571_v0, %v572_v1  ;;  %v621_v17 = vsel %vm197_vm0, %v614_v38, %v615_v6  ;;  %v773_v38 = vld [vmem:[%s2563_s17 + $0x24] sm:$0xf] }
  0xa6   : > { %v2766_v10 = vpop.permute.xlu0 %649  ;;  %v436_v11 = vpop.permute.xlu1 %435  ;;  %v578_v13 = vsel %vm577_vm8, %v562_v57, %v576_v9  ;;  %v622_v21 = vsel %vm619_vm4, %v2693_v34, %v621_v17  ;;  %v639_v9 = vld [vmem:[%s2563_s17 + $0x20] sm:$0xf] }
  0xa7   : > { %v657_v14 = vrot.slane %v2766_v10, 4  ;;  %v2364_v15 = vcombine.high %v536_v12, %v578_v13  ;;  %v2363_v16 = vcombine.low %v536_v12, %v578_v13  ;;  %v445_v30 = vrot.slane %v436_v11, 4 }
  0xa8   : > { %743 = vrot.lane.b32.xlu0 %v2763_v8, %s2503_s19  ;;  %785 = vrot.lane.b32.xlu1 %v2763_v8, %s2502_s18 }
  0xa9   : > { %1963 = vmatprep.subr.bf16.mxu0 %v2364_v15  ;;  %v663_v18 = vsel %vm197_vm0, %v656_v45, %v657_v14 }
  0xaa   : > { %1964 = vmatpush1.bf16.msra.mxu0 %v2363_v16  ;;  %v2783_v19 = vpop.permute.xlu0 %437  ;;  %v478_v20 = vpop.permute.xlu1 %477  ;;  %v664_v22 = vsel %vm661_vm5, %v2702_v42, %v663_v18 }
  0xab   : > { %v446_v23 = vrot.slane %v2783_v19, 4  ;;  %v2374_v24 = vcombine.high %v622_v21, %v664_v22  ;;  %v2373_v25 = vcombine.low %v622_v21, %v664_v22  ;;  %v487_v35 = vrot.slane %v478_v20, 4 }
  0xac   : > { %825 = vrot.lane.b32.xlu0 %v2584_v4, %s2526_s10  ;;  %867 = vrot.lane.b32.xlu1 %v2584_v4, %s2527_s9 }
  0xad   : > { %2002 = vmatprep.subr.bf16.mxu1 %v2374_v24  ;;  %v450_v4 = vsel %vm197_vm0, %v445_v30, %v446_v23 }
  0xae   : > { %2003 = vmatpush1.bf16.msra.mxu1 %v2373_v25  ;;  %v2798_v33 = vpop.permute.xlu0 %479  ;;  %v2800_v34 = vpop.permute.xlu1 %523  ;;  %v452_v42 = vsel %vm451_vm9, %v436_v11, %v450_v4 }
  0xaf   : > { %v488_v36 = vrot.slane %v2798_v33, 4  ;;  %v531_v37 = vrot.slane %v2800_v34, 4 }
  0xb0   : > { %693 = vrot.lane.b32.xlu0 %v2795_v31, %s2504_s20  ;;  %745 = vrot.lane.b32.xlu1 %v731_v32, %s2503_s19  ;;  %s3467_s19 = smov 27  }
  0xb1   : > { %v492_v39 = vsel %vm197_vm0, %v487_v35, %v488_v36  ;;  %v537_v47 = vsel %vm197_vm0, %v530_v59, %v531_v37 }
  0xb2   : > { %v2812_v40 = vpop.permute.xlu0 %565  ;;  %v352_v41 = vpop.permute.xlu1 %351  ;;  %v494_v43 = vsel %vm493_vm10, %v478_v20, %v492_v39  ;;  %v538_v54 = vsel %vm535_vm7, %v2725_v56, %v537_v47  ;;  %v555_v39 = vld [vmem:[%s2563_s17 + $0x20] sm:$0xf] }
  0xb3   : > { %v573_v44 = vrot.slane %v2812_v40, 4  ;;  %v2356_v45 = vcombine.high %v452_v42, %v494_v43  ;;  %v2355_v46 = vcombine.low %v452_v42, %v494_v43  ;;  %v361_v60 = vrot.slane %v352_v41, 4 }
  0xb4   : > { %787 = vrot.lane.b32.xlu0 %v773_v38, %s2502_s18  ;;  %609 = vrot.lane.b32.xlu1 %v2795_v31, %s2505_s21  ;;  %v513_v38 = vld [vmem:[%s2563_s17 + $0x20] sm:$0xf]  ;;  %s3466_s18 = smov 28  }
  0xb5   : > { %1965 = vmatprep.subr.bf16.mxu0 %v2356_v45  ;;  %v579_v49 = vsel %vm197_vm0, %v572_v1, %v573_v44 }
  0xb6   : > { %1966 = vmatpush1.bf16.msra.mxu0 %v2355_v46  ;;  %v2829_v51 = vpop.permute.xlu0 %353  ;;  %v394_v53 = vpop.permute.xlu1 %393  ;;  %v580_v55 = vsel %vm577_vm8, %v2745_v3, %v579_v49 }
  0xb7   : > { %v362_v57 = vrot.slane %v2829_v51, 4  ;;  %v2366_v58 = vcombine.high %v538_v54, %v580_v55  ;;  %v2365_v59 = vcombine.low %v538_v54, %v580_v55  ;;  %v403_v2 = vrot.slane %v394_v53, 4 }
  0xb8   : > { %651 = vrot.lane.b32.xlu0 %v2795_v31, %s2506_s22  ;;  %695 = vrot.lane.b32.xlu1 %v681_v48, %s2504_s20  ;;  %s3468_s20 = smov 37  }
  0xb9   : > { %2004 = vmatprep.subr.bf16.mxu1 %v2366_v58  ;;  %v366_v1 = vsel %vm197_vm0, %v361_v60, %v362_v57 }
  0xba   : > { %2005 = vmatpush1.bf16.msra.mxu1 %v2365_v59  ;;  %v2839_v61 = vpop.permute.xlu0 %395  ;;  %v2841_v56 = vpop.permute.xlu1 %439  ;;  %v368_v15 = vsel %vm3446_vm11, %v352_v41, %v366_v1  ;;  %v471_v1 = vld [vmem:[%s2563_s17 + $0x20] sm:$0xf] }
  0xbb   : > { %v404_v3 = vrot.slane %v2839_v61, 4  ;;  %v447_v0 = vrot.slane %v2841_v56, 4 }
  0xbc   : > { %525 = vrot.lane.b32.xlu0 %v2795_v31, %s2507_s23  ;;  %567 = vrot.lane.b32.xlu1 %v2795_v31, %s2508_s24 }
  0xbd   : > { %v408_v11 = vsel %vm197_vm0, %v403_v2, %v404_v3  ;;  %v453_v21 = vsel %vm197_vm0, %v446_v23, %v447_v0  ;;  %v429_v2 = vld [vmem:[%s2563_s17 + $0x20] sm:$0xf] }
  0xbe   : > { %v2855_v12 = vpop.permute.xlu0 %481  ;;  %v268_v13 = vpop.permute.xlu1 %267  ;;  %v410_v16 = vsel %vm3460_vm12, %v394_v53, %v408_v11  ;;  %v454_v30 = vsel %vm451_vm9, %v2783_v19, %v453_v21 }
  0xbf   : > { %v489_v17 = vrot.slane %v2855_v12, 4  ;;  %v2348_v18 = vcombine.high %v368_v15, %v410_v16  ;;  %v2347_v20 = vcombine.low %v368_v15, %v410_v16 }
  0xc0   : > { %611 = vrot.lane.b32.xlu0 %v597_v7, %s2505_s21  ;;  %653 = vrot.lane.b32.xlu1 %v639_v9, %s2506_s22  ;;  %s3469_s21 = smov 29  }
  0xc1   : > { %1967 = vmatprep.subr.bf16.mxu0 %v2348_v18  ;;  %v495_v22 = vsel %vm197_vm0, %v488_v36, %v489_v17  ;;  %v277_v36 = vrot.slane %v268_v13, 4 }
  0xc2   : > { %1968 = vmatpush1.bf16.msra.mxu0 %v2347_v20  ;;  %v2870_v24 = vpop.permute.xlu0 %269  ;;  %v310_v25 = vpop.permute.xlu1 %309  ;;  %v496_v23 = vsel %vm493_vm10, %v2798_v33, %v495_v22 }
  0xc3   : > { %v278_v32 = vrot.slane %v2870_v24, 4  ;;  %v2358_v35 = vcombine.high %v454_v30, %v496_v23  ;;  %v2357_v4 = vcombine.low %v454_v30, %v496_v23  ;;  %v319_v33 = vrot.slane %v310_v25, 4  ;;  %v345_v30 = vld [vmem:[%s2563_s17 + $0x20] sm:$0xf] }
  0xc4   : > { %441 = vrot.lane.b32.xlu0 %v2795_v31, %s2509_s25  ;;  %483 = vrot.lane.b32.xlu1 %v2795_v31, %s2510_s26  ;;  %v387_v23 = vld [vmem:[%s2563_s17 + $0x20] sm:$0xf] }
  0xc5   : > { %2006 = vmatprep.subr.bf16.mxu1 %v2358_v35  ;;  %v282_v45 = vsel %vm197_vm0, %v277_v36, %v278_v32 }
  0xc6   : > { %2007 = vmatpush1.bf16.msra.mxu1 %v2357_v4  ;;  %v2883_v41 = vpop.permute.xlu0 %311  ;;  %v2885_v19 = vpop.permute.xlu1 %355  ;;  %v284_v49 = vsel %vm3451_vm13, %v268_v13, %v282_v45 }
  0xc7   : > { %v320_v42 = vrot.slane %v2883_v41, 4  ;;  %v363_v43 = vrot.slane %v2885_v19, 4 }
  0xc8   : > { %527 = vrot.lane.b32.xlu0 %v513_v38, %s2507_s23  ;;  %569 = vrot.lane.b32.xlu1 %v555_v39, %s2508_s24  ;;  %s2454_s23 = smul.u32 80, %s3503_s13 }
  0xc9   : > { %v324_v46 = vsel %vm197_vm0, %v319_v33, %v320_v42  ;;  %v369_v54 = vsel %vm197_vm0, %v362_v57, %v363_v43 }
  0xca   : > { %v2893_v47 = vpop.permute.xlu0 %397  ;;  %v183_v48 = vpop.permute.xlu1 %182  ;;  %v326_v53 = vsel %vm3447_vm14, %v310_v25, %v324_v46  ;;  %v370_v9 = vsel %vm3446_vm11, %v2829_v51, %v369_v54  ;;  %vm3448_vm11 = vcmask 900096  }
  0xcb   : > { %v405_v55 = vrot.slane %v2893_v47, 4  ;;  %v2340_v58 = vcombine.high %v284_v49, %v326_v53  ;;  %v2339_v59 = vcombine.low %v284_v49, %v326_v53 }
  0xcc   : > { %357 = vrot.lane.b32.xlu0 %v2795_v31, %s2511_s27  ;;  %399 = vrot.lane.b32.xlu1 %v2795_v31, %s2512_s28 }
  0xcd   : > { %v411_v60 = vsel %vm197_vm0, %v404_v3, %v405_v55  ;;  %1969 = vmatprep.subr.bf16.mxu0 %v2340_v58  ;;  %v192_v3 = vrot.slane %v183_v48, 4 }
  0xce   : > { %1970 = vmatpush1.bf16.msra.mxu0 %v2339_v59  ;;  %v185_v7 = vpop.permute.xlu0 %184  ;;  %v226_v57 = vpop.permute.xlu1 %225  ;;  %v412_v11 = vsel %vm3460_vm12, %v2839_v61, %v411_v60  ;;  %vm837_vm12 = vcmask 965632  }
  0xcf   : > { %v193_v13 = vrot.slane %v185_v7, 4  ;;  %v2350_v15 = vcombine.high %v370_v9, %v412_v11  ;;  %v2349_v16 = vcombine.low %v370_v9, %v412_v11  ;;  %v235_v61 = vrot.slane %v226_v57, 4 }
  0xd0   : > { %443 = vrot.lane.b32.xlu0 %v429_v2, %s2509_s25  ;;  %485 = vrot.lane.b32.xlu1 %v471_v1, %s2510_s26  ;;  %v303_v1 = vld [vmem:[%s2563_s17 + $0x20] sm:$0xf]  ;;  %s3395_s26 = scalar_lea.vmem %s3437_s3, %s2454_s23 }
  0xd1   : > { %2008 = vmatprep.subr.bf16.mxu1 %v2350_v15  ;;  %v198_v51 = vsel %vm197_vm0, %v192_v3, %v193_v13 }
  0xd2   : > { %2009 = vmatpush1.bf16.msra.mxu1 %v2349_v16  ;;  %v228_v18 = vpop.permute.xlu0 %227  ;;  %v2918_v20 = vpop.permute.xlu1 %271  ;;  %v200_v38 = vsel %vm3449_vm15, %v183_v48, %v198_v51 }
  0xd3   : > { %v236_v21 = vrot.slane %v228_v18, 4  ;;  %v279_v22 = vrot.slane %v2918_v20, 4 }
  0xd4   : > { %273 = vrot.lane.b32.xlu0 %v2795_v31, %s2513_s29  ;;  %315 = vrot.lane.b32.xlu1 %v2795_v31, %s2514_s30 }
  0xd5   : > { %v240_v25 = vsel %vm197_vm0, %v235_v61, %v236_v21  ;;  %v285_v35 = vsel %vm197_vm0, %v278_v32, %v279_v22  ;;  %v176_v61 = vld [vmem:[%s2563_s17 + $0x20] sm:$0xf] }
  0xd6   : > { %v2932_v4 = vpop.permute.xlu0 %313  ;;  %v2934_v36 = vpop.permute.xlu1 %186  ;;  %v242_v39 = vsel %vm3448_vm11, %v226_v57, %v240_v25  ;;  %v286_v54 = vsel %vm3451_vm13, %v2870_v24, %v285_v35  ;;  %vm3455_vm13 = vcmask 220160  }
  0xd7   : > { %v321_v33 = vrot.slane %v2932_v4, 4  ;;  %v194_v45 = vrot.slane %v2934_v36, 4  ;;  %v2332_v46 = vcombine.high %v200_v38, %v242_v39  ;;  %v2331_v49 = vcombine.low %v200_v38, %v242_v39 }
  0xd8   : > { %359 = vrot.lane.b32.xlu0 %v345_v30, %s2511_s27  ;;  %401 = vrot.lane.b32.xlu1 %v387_v23, %s2512_s28 }
  0xd9   : > { %v327_v32 = vsel %vm197_vm0, %v320_v42, %v321_v33  ;;  %1971 = vmatprep.subr.bf16.mxu0 %v2332_v46  ;;  %v201_v59 = vsel %vm197_vm0, %v193_v13, %v194_v45 }
  0xda   : > { %v2945_v48 = vpop.permute.xlu0 %229  ;;  %1972 = vmatpush1.bf16.msra.mxu0 %v2331_v49  ;;  %v1242_v53 = vpop.permute.xlu1 %1241  ;;  %v328_v58 = vsel %vm3447_vm14, %v2883_v41, %v327_v32  ;;  %v261_v41 = vld [vmem:[%s2563_s17 + $0x20] sm:$0xf]  ;;  %v202_v11 = vsel %vm3449_vm15, %v185_v7, %v201_v59  ;;  %vm3450_vm14 = vcmask 138240   ;;  %vm3453_vm15 = vcmask 146432  }
  0xdb   : > { %v237_v60 = vrot.slane %v2945_v48, 4  ;;  %v2342_v2 = vcombine.high %v286_v54, %v328_v58  ;;  %v2341_v42 = vcombine.low %v286_v54, %v328_v58  ;;  %v1251_v15 = vrot.slane %v1242_v53, 4 }
  0xdc   : > { %188 = vrot.lane.b32.xlu0 %v2795_v31, %s2515_s4  ;;  %231 = vrot.lane.b32.xlu1 %v2795_v31, %s2516_s5 }
  0xdd   : > { %v243_v24 = vsel %vm197_vm0, %v236_v21, %v237_v60  ;;  %2010 = vmatprep.subr.bf16.mxu1 %v2342_v2  ;;  %v219_v21 = vld [vmem:[%s2563_s17 + $0x20] sm:$0xf] }
  0xde   : > { %v1244_v57 = vpop.permute.xlu0 %1243  ;;  %2011 = vmatpush1.bf16.msra.mxu1 %v2341_v42  ;;  %v1158_v9 = vpop.permute.xlu1 %1157  ;;  %v244_v13 = vsel %vm3448_vm11, %v228_v18, %v243_v24  ;;  %vm3452_vm11 = vcmask 154624   ;;  %v1235_v42 = vld [vmem:[%s2563_s17 + $0x24] sm:$0xf] }
  0xdf   : > { %v1252_v16 = vrot.slane %v1244_v57, 4  ;;  %v2334_v31 = vcombine.high %v202_v11, %v244_v13  ;;  %v2333_v3 = vcombine.low %v202_v11, %v244_v13  ;;  %v1167_v38 = vrot.slane %v1158_v9, 4 }
  0xe0   : > { %275 = vrot.lane.b32.xlu0 %v261_v41, %s2513_s29  ;;  %317 = vrot.lane.b32.xlu1 %v303_v1, %s2514_s30 }
  0xe1   : > { %v1256_v51 = vsel %vm197_vm0, %v1251_v15, %v1252_v16  ;;  %2012 = vmatprep.subr.bf16.mxu1 %v2334_v31 }
  0xe2   : > { %v2971_v25 = vpop.permute.xlu0 %1159  ;;  %2013 = vmatpush1.bf16.msra.mxu1 %v2333_v3  ;;  %v1200_v7 = vpop.permute.xlu1 %1199  ;;  %v1258_v18 = vsel %vm3450_vm14, %v1242_v53, %v1256_v51 }
  0xe3   : > { %v1168_v30 = vrot.slane %v2971_v25, 4  ;;  %v2436_v23 = vcombine.high %v1258_v18, %v1258_v18  ;;  %v2435_v35 = vcombine.low %v1258_v18, %v1258_v18  ;;  %v1209_v53 = vrot.slane %v1200_v7, 4 }
  0xe4   : > { %190 = vrot.lane.b32.xlu0 %v176_v61, %s2515_s4  ;;  %233 = vrot.lane.b32.xlu1 %v219_v21, %s2516_s5 }
  0xe5   : > { %2443 = vmatprep.subr.msk.bf16.mxu0 %vm197_vm0, %v2436_v23  ;;  %v1934_v39 = vsel %vm197_vm0, %v2435_v35, 0  ;;  %v1172_v32 = vsel %vm197_vm0, %v1167_v38, %v1168_v30  ;;  %v1151_v38 = vld [vmem:[%s2563_s17 + $0x24] sm:$0xf] }
  0xe6   : > { %v1202_v46 = vpop.permute.xlu0 %1201  ;;  %1978 = vmatpush2.bf16.msra.mxu0 %v1934_v39  ;;  %v2979_v49 = vpop.permute.xlu1 %1245  ;;  %v1174_v1 = vsel %vm3452_vm11, %v1158_v9, %v1172_v32  ;;  %v1193_v39 = vld [vmem:[%s2563_s17 + $0x24] sm:$0xf] }
  0xe7   : > { %v1210_v54 = vrot.slane %v1202_v46, 4  ;;  %v1253_v58 = vrot.slane %v2979_v49, 4 }
  0xe8   : > { %1247 = vrot.lane.b32.xlu0 %v2763_v8, %s2517_s6  ;;  %1163 = vrot.lane.b32.xlu1 %v2763_v8, %s2518_s7 }
  0xe9   : > { %v1214_v59 = vsel %vm197_vm0, %v1209_v53, %v1210_v54  ;;  %v1259_v2 = vsel %vm197_vm0, %v1252_v16, %v1253_v58 }
  0xea   : > { %v1074_v24 = vpop.permute.xlu0 %1073  ;;  %v2994_v41 = vpop.permute.xlu1 %1075  ;;  %v1216_v11 = vsel %vm3453_vm15, %v1200_v7, %v1214_v59  ;;  %v1260_v13 = vsel %vm3450_vm14, %v1244_v57, %v1259_v2  ;;  %vm3454_vm14 = vcmask 228352  }
  0xeb   : > { %v1083_v15 = vrot.slane %v1074_v24, 4  ;;  %v1084_v31 = vrot.slane %v2994_v41, 4  ;;  %v2428_v3 = vcombine.high %v1174_v1, %v1216_v11  ;;  %v2438_v51 = vcombine.high %v1260_v13, %v1260_v13 }
  0xec   : > { %1205 = vrot.lane.b32.xlu0 %v2763_v8, %s2519_s8  ;;  %1249 = vrot.lane.b32.xlu1 %v1235_v42, %s2517_s6  ;;  %v2427_v16 = vcombine.low %v1174_v1, %v1216_v11  ;;  %v2437_v61 = vcombine.low %v1260_v13, %v1260_v13 }
  0xed   : > { %1979 = vmatprep.subr.bf16.mxu0 %v2428_v3  ;;  %2445 = vmatprep.subr.msk.bf16.mxu1 %vm197_vm0, %v2438_v51  ;;  %v1088_v7 = vsel %vm197_vm0, %v1083_v15, %v1084_v31 }
  0xee   : > { %v1116_v9 = vpop.permute.xlu0 %1115  ;;  %1980 = vmatpush2.bf16.msra.mxu0 %v2427_v16  ;;  %v1940_v57 = vsel %vm197_vm0, %v2437_v61, 0  ;;  %v3005_v21 = vpop.permute.xlu1 %1117  ;;  %v1090_v59 = vsel %vm3454_vm14, %v1074_v24, %v1088_v7 }
  0xef   : > { %v1125_v18 = vrot.slane %v1116_v9, 4  ;;  %2019 = vmatpush2.bf16.msra.mxu1 %v1940_v57  ;;  %v1126_v23 = vrot.slane %v3005_v21, 4 }
  0xf0   : > { %1079 = vrot.lane.b32.xlu0 %v2763_v8, %s3466_s18  ;;  %1121 = vrot.lane.b32.xlu1 %v2763_v8, %s3467_s19 }
  0xf1   : > { %v1130_v35 = vsel %vm197_vm0, %v1125_v18, %v1126_v23  ;;  %v1109_v18 = vld [vmem:[%s2563_s17 + $0x24] sm:$0xf] }
  0xf2   : > { %v3018_v32 = vpop.permute.xlu0 %1161  ;;  %v3020_v53 = vpop.permute.xlu1 %1203  ;;  %v1132_v2 = vsel %vm3455_vm13, %v1116_v9, %v1130_v35 }
  0xf3   : > { %v3459_v42 = vrot.slane %v3018_v32, 4  ;;  %v3458_v1 = vrot.slane %v3020_v53, 4  ;;  %v2420_v11 = vcombine.high %v1090_v59, %v1132_v2  ;;  %v2419_v13 = vcombine.low %v1090_v59, %v1132_v2 }
  0xf4   : > { %1165 = vrot.lane.b32.xlu0 %v1151_v38, %s2518_s7  ;;  %1207 = vrot.lane.b32.xlu1 %v1193_v39, %s2519_s8 }
  0xf5   : > { %v1175_v15 = vsel %vm197_vm0, %v1168_v30, %v3459_v42  ;;  %v1217_v24 = vsel %vm197_vm0, %v1210_v54, %v3458_v1  ;;  %1981 = vmatprep.subr.bf16.mxu0 %v2420_v11  ;;  %v1067_v54 = vld [vmem:[%s2563_s17 + $0x24] sm:$0xf] }
  0xf6   : > { %v990_v3 = vpop.permute.xlu0 %989  ;;  %1982 = vmatpush2.bf16.msra.mxu0 %v2419_v13  ;;  %v3036_v51 = vpop.permute.xlu1 %991  ;;  %v1176_v16 = vsel %vm3452_vm11, %v2971_v25, %v1175_v15  ;;  %v1218_v61 = vsel %vm3453_vm15, %v1202_v46, %v1217_v24  ;;  %vm3462_vm11 = vcmask 302080   ;;  %vm1047_vm15 = vcmask 236544  }
  0xf7   : > { %v999_v9 = vrot.slane %v990_v3, 4  ;;  %v1000_v57 = vrot.slane %v3036_v51, 4  ;;  %v2430_v7 = vcombine.high %v1176_v16, %v1218_v61  ;;  %v2429_v30 = vcombine.low %v1176_v16, %v1218_v61 }
  0xf8   : > { %995 = vrot.lane.b32.xlu0 %v2763_v8, %s3468_s20  ;;  %1037 = vrot.lane.b32.xlu1 %v2763_v8, %s3469_s21 }
  0xf9   : > { %2020 = vmatprep.subr.bf16.mxu1 %v2430_v7  ;;  %v1004_v25 = vsel %vm197_vm0, %v999_v9, %v1000_v57 }
  0xfa   : > { %v1032_v35 = vpop.permute.xlu0 %1031  ;;  %2021 = vmatpush2.bf16.msra.mxu1 %v2429_v30  ;;  %v3048_v38 = vpop.permute.xlu1 %1033  ;;  %v1006_v13 = vsel %vm3462_vm11, %v990_v3, %v1004_v25  ;;  %v983_v30 = vld [vmem:[%s2563_s17 + $0x24] sm:$0xf] }
  0xfb   : > { %v1041_v46 = vrot.slane %v1032_v35, 4  ;;  %v1042_v39 = vrot.slane %v3048_v38, 4 }
  0xfc   : > { %1081 = vrot.lane.b32.xlu0 %v1067_v54, %s3466_s18  ;;  %1123 = vrot.lane.b32.xlu1 %v1109_v18, %s3467_s19  ;;  %v1025_v54 = vld [vmem:[%s2563_s17 + $0x24] sm:$0xf] }
  0xfd   : > { %v1046_v59 = vsel %vm197_vm0, %v1041_v46, %v1042_v39 }
  0xfe   : > { %v3057_v2 = vpop.permute.xlu0 %1077  ;;  %v3059_v11 = vpop.permute.xlu1 %1119  ;;  %v1048_v15 = vsel %vm1047_vm15, %v1032_v35, %v1046_v59 }
  0xff   : > { %v3457_v24 = vrot.slane %v3057_v2, 4  ;;  %v3456_v16 = vrot.slane %v3059_v11, 4  ;;  %v2412_v61 = vcombine.high %v1006_v13, %v1048_v15  ;;  %v2411_v9 = vcombine.low %v1006_v13, %v1048_v15 }
 0x100   : > { %911 = vrot.lane.b32.xlu0 %v2763_v8, %s2524_s15  ;;  %953 = vrot.lane.b32.xlu1 %v2763_v8, %s2525_s16 }
 0x101   : > { %v1091_v3 = vsel %vm197_vm0, %v1084_v31, %v3457_v24  ;;  %v1133_v7 = vsel %vm197_vm0, %v1126_v23, %v3456_v16  ;;  %1983 = vmatprep.subr.bf16.mxu0 %v2412_v61 }
 0x102   : > { %v906_v18 = vpop.permute.xlu0 %905  ;;  %1984 = vmatpush2.bf16.msra.mxu0 %v2411_v9  ;;  %v3079_v35 = vpop.permute.xlu1 %907  ;;  %v1092_v25 = vsel %vm3454_vm14, %v2994_v41, %v1091_v3  ;;  %v1134_v46 = vsel %vm3455_vm13, %v3005_v21, %v1133_v7  ;;  %vm921_vm14 = vcmask 318464   ;;  %vm963_vm13 = vcmask 310272   ;;  %v899_v7 = vld [vmem:[%s2563_s17 + $0x24] sm:$0xf] }
 0x103   : > { %v915_v59 = vrot.slane %v906_v18, 4  ;;  %v916_v31 = vrot.slane %v3079_v35, 4  ;;  %v2422_v13 = vcombine.high %v1092_v25, %v1134_v46  ;;  %v2421_v15 = vcombine.low %v1092_v25, %v1134_v46 }
 0x104   : > { %997 = vrot.lane.b32.xlu0 %v983_v30, %s3468_s20  ;;  %1039 = vrot.lane.b32.xlu1 %v1025_v54, %s3469_s21  ;;  %v941_v30 = vld [vmem:[%s2563_s17 + $0x24] sm:$0xf] }
 0x105   : > { %2022 = vmatprep.subr.bf16.mxu1 %v2422_v13  ;;  %v920_v41 = vsel %vm197_vm0, %v915_v59, %v916_v31 }
 0x106   : > { %v948_v23 = vpop.permute.xlu0 %947  ;;  %2023 = vmatpush2.bf16.msra.mxu1 %v2421_v15  ;;  %v3088_v61 = vpop.permute.xlu1 %949  ;;  %v922_v46 = vsel %vm921_vm14, %v906_v18, %v920_v41  ;;  %v857_v41 = vld [vmem:[%s2563_s17 + $0x24] sm:$0xf] }
 0x107   : > { %v957_v21 = vrot.slane %v948_v23, 4  ;;  %v958_v9 = vrot.slane %v3088_v61, 4 }
 0x108   : > { %827 = vrot.lane.b32.xlu0 %v2763_v8, %s2526_s10  ;;  %869 = vrot.lane.b32.xlu1 %v2763_v8, %s2527_s9 }
 0x109   : > { %v962_v3 = vsel %vm197_vm0, %v957_v21, %v958_v9 }
 0x10a   : > { %v3101_v54 = vpop.permute.xlu0 %993  ;;  %v3103_v25 = vpop.permute.xlu1 %1035  ;;  %v964_v59 = vsel %vm963_vm13, %v948_v23, %v962_v3  ;;  %v815_v23 = vld [vmem:[%s2563_s17 + $0x24] sm:$0xf] }
 0x10b   : > { %v3464_v13 = vrot.slane %v3101_v54, 4  ;;  %v3461_v15 = vrot.slane %v3103_v25, 4  ;;  %v2404_v16 = vcombine.high %v922_v46, %v964_v59  ;;  %v2403_v24 = vcombine.low %v922_v46, %v964_v59 }
 0x10c   : > { %913 = vrot.lane.b32.xlu0 %v899_v7, %s2524_s15  ;;  %955 = vrot.lane.b32.xlu1 %v941_v30, %s2525_s16 }
 0x10d   : > { %v1007_v21 = vsel %vm197_vm0, %v1000_v57, %v3464_v13  ;;  %v1049_v18 = vsel %vm197_vm0, %v1042_v39, %v3461_v15  ;;  %1985 = vmatprep.subr.bf16.mxu0 %v2404_v16 }
 0x10e   : > { %v822_v3 = vpop.permute.xlu0 %821  ;;  %1986 = vmatpush2.bf16.msra.mxu0 %v2403_v24  ;;  %v824_v46 = vpop.permute.xlu1 %823  ;;  %v1008_v7 = vsel %vm3462_vm11, %v3036_v51, %v1007_v21  ;;  %v1050_v30 = vsel %vm1047_vm15, %v3048_v38, %v1049_v18  ;;  %vm879_vm11 = vcmask 957440  }
 0x10f   : > { %v831_v59 = vrot.slane %v822_v3, 4  ;;  %v832_v1 = vrot.slane %v824_v46, 4  ;;  %v2414_v42 = vcombine.high %v1008_v7, %v1050_v30  ;;  %v2413_v57 = vcombine.low %v1008_v7, %v1050_v30 }
 0x110   : > { %829 = vrot.lane.b32.xlu0 %v815_v23, %s2526_s10  ;;  %871 = vrot.lane.b32.xlu1 %v857_v41, %s2527_s9 }
 0x111   : > { %2024 = vmatprep.subr.bf16.mxu1 %v2414_v42  ;;  %v836_v24 = vsel %vm197_vm0, %v831_v59, %v832_v1 }
 0x112   : > { %v864_v39 = vpop.permute.xlu0 %863  ;;  %2025 = vmatpush2.bf16.msra.mxu1 %v2413_v57  ;;  %v866_v16 = vpop.permute.xlu1 %865  ;;  %v838_v23 = vsel %vm837_vm12, %v822_v3, %v836_v24  ;;  %v3147_v3 = vcombine.low %v2735_v62, %v2735_v62 }
 0x113   : > { %v873_v15 = vrot.slane %v864_v39, 4  ;;  %v874_v51 = vrot.slane %v866_v16, 4 }
 0x115   : > { %v878_v38 = vsel %vm197_vm0, %v873_v15, %v874_v51 }
 0x116   : > { %v3129_v21 = vpop.permute.xlu0 %909  ;;  %v3131_v18 = vpop.permute.xlu1 %951  ;;  %v880_v41 = vsel %vm879_vm11, %v864_v39, %v878_v38 }
 0x117   : > { %v3463_v42 = vrot.slane %v3129_v21, 4  ;;  %v3465_v7 = vrot.slane %v3131_v18, 4  ;;  %v2396_v30 = vcombine.high %v838_v23, %v880_v41  ;;  %v2395_v57 = vcombine.low %v838_v23, %v880_v41 }
 0x119   : > { %v923_v15 = vsel %vm197_vm0, %v916_v31, %v3463_v42  ;;  %v965_v59 = vsel %vm197_vm0, %v958_v9, %v3465_v7  ;;  %1987 = vmatprep.subr.bf16.mxu0 %v2396_v30 }
 0x11a   : > { %v744_v39 = vpop.permute.xlu0 %743  ;;  %1988 = vmatpush2.bf16.msra.mxu0 %v2395_v57  ;;  %v786_v24 = vpop.permute.xlu1 %785  ;;  %v924_v38 = vsel %vm921_vm14, %v3079_v35, %v923_v15  ;;  %v966_v23 = vsel %vm963_vm13, %v3088_v61, %v965_v59 }
 0x11b   : > { %v750_v41 = vrot.slane %v744_v39, 4  ;;  %v792_v31 = vrot.slane %v786_v24, 4  ;;  %v2406_v42 = vcombine.high %v924_v38, %v966_v23  ;;  %v2405_v13 = vcombine.low %v924_v38, %v966_v23 }
 0x11d   : > { %v757_v9 = vsel %vm197_vm0, %v749_v29, %v750_v41  ;;  %v799_v62 = vsel %vm197_vm0, %v791_v28, %v792_v31  ;;  %2026 = vmatprep.subr.bf16.mxu1 %v2406_v42  ;;  %1990 = vmatmul.mubr.bf16.vlgmr.msra.gmra.mxu0 %v3147_v3 }
 0x11e   : > { %v3160_v30 = vpop.permute.xlu0 %825  ;;  %2027 = vmatpush2.bf16.msra.mxu1 %v2405_v13  ;;  %v3162_v35 = vpop.permute.xlu1 %867  ;;  %v758_v61 = vsel %vm753_vm1, %v2677_v27, %v757_v9  ;;  %v800_v57 = vsel %vm795_vm2, %v2675_v26, %v799_v62  ;;  %2448 = vmatprep.mubr.msk.bf16.mxu0 %vm1928_vm6, %v2743_v63 }
 0x11f   : > { %v833_v29 = vrot.slane %v3160_v30, 4  ;;  %v875_v28 = vrot.slane %v3162_v35, 4  ;;  %v2391_v42 = vcombine.low %v758_v61, %v800_v57  ;;  %v2392_v15 = vcombine.high %v758_v61, %v800_v57  ;;  %v721_v57 = vld [vmem:[%s2563_s17 + $0x14] sm:$0xff] }
 0x121   : > { %v839_v13 = vsel %vm197_vm0, %v832_v1, %v833_v29  ;;  %v881_v27 = vsel %vm197_vm0, %v874_v51, %v875_v28  ;;  %2039 = vmatprep.subr.bf16.mxu0 %v2392_v15 }
 0x122   : > { %v694_v26 = vpop.permute.xlu0 %693  ;;  %2040 = vmatpush1.bf16.msra.mxu0 %v2391_v42  ;;  %v746_v59 = vpop.permute.xlu1 %745  ;;  %v840_v38 = vsel %vm837_vm12, %v824_v46, %v839_v13  ;;  %v882_v23 = vsel %vm879_vm11, %v866_v16, %v881_v27 }
 0x123   : > { %v700_v9 = vrot.slane %v694_v26, 4  ;;  %v751_v62 = vrot.slane %v746_v59, 4  ;;  %v2398_v7 = vcombine.high %v840_v38, %v882_v23  ;;  %v2397_v61 = vcombine.low %v840_v38, %v882_v23 }
 0x125   : > { %v707_v1 = vsel %vm197_vm0, %v699_v52, %v700_v9  ;;  %2028 = vmatprep.subr.bf16.mxu1 %v2398_v7  ;;  %v759_v51 = vsel %vm197_vm0, %v750_v41, %v751_v62 }
 0x126   : > { %v788_v15 = vpop.permute.xlu0 %787  ;;  %2029 = vmatpush2.bf16.msra.mxu1 %v2397_v61  ;;  %v610_v42 = vpop.permute.xlu1 %609  ;;  %v708_v46 = vsel %vm703_vm3, %v2715_v50, %v707_v1  ;;  %v760_v23 = vsel %vm753_vm1, %v744_v39, %v759_v51  ;;  %vm3470_vm1 = vcmask 818176  }
 0x127   : > { %v793_v13 = vrot.slane %v788_v15, 4  ;;  %v616_v16 = vrot.slane %v610_v42, 4  ;;  %v2383_v27 = vcombine.low %v708_v46, %v721_v57  ;;  %v2384_v59 = vcombine.high %v708_v46, %v721_v57 }
 0x129   : > { %v801_v38 = vsel %vm197_vm0, %v792_v31, %v793_v13  ;;  %2041 = vmatprep.subr.bf16.mxu0 %v2384_v59  ;;  %2031 = vmatmul.mubr.bf16.vlgmr.msra.gmra.mxu1 %v3147_v3  ;;  %v623_v52 = vsel %vm197_vm0, %v615_v6, %v616_v16 }
 0x12a   : > { %v652_v7 = vpop.permute.xlu0 %651  ;;  %2042 = vmatpush1.bf16.msra.mxu0 %v2383_v27  ;;  %v696_v41 = vpop.permute.xlu1 %695  ;;  %v802_v50 = vsel %vm795_vm2, %v786_v24, %v801_v38  ;;  %2450 = vmatprep.mubr.msk.bf16.mxu1 %vm1928_vm6, %v2743_v63  ;;  %v624_v39 = vsel %vm619_vm4, %v2747_v5, %v623_v52  ;;  %vm3471_vm2 = vcmask 809984  }
 0x12b   : > { %v658_v62 = vrot.slane %v652_v7, 4  ;;  %v701_v61 = vrot.slane %v696_v41, 4  ;;  %v2393_v31 = vcombine.low %v760_v23, %v802_v50  ;;  %v2394_v57 = vcombine.high %v760_v23, %v802_v50  ;;  %vm3475_vm6 = vmmov %vm3471_vm2 }
 0x12d   : > { %v665_v1 = vsel %vm197_vm0, %v657_v14, %v658_v62  ;;  %v709_v6 = vsel %vm197_vm0, %v700_v9, %v701_v61  ;;  %2080 = vmatprep.subr.bf16.mxu1 %v2394_v57 }
 0x12e   : > { %v526_v15 = vpop.permute.xlu0 %525  ;;  %2081 = vmatpush1.bf16.msra.mxu1 %v2393_v31  ;;  %v568_v46 = vpop.permute.xlu1 %567  ;;  %v666_v63 = vsel %vm661_vm5, %v2766_v10, %v665_v1  ;;  %v710_v24 = vsel %vm703_vm3, %v694_v26, %v709_v6  ;;  %vm3472_vm3 = vcmask 891904  }
 0x12f   : > { %v532_v51 = vrot.slane %v526_v15, 4  ;;  %v574_v13 = vrot.slane %v568_v46, 4  ;;  %v2375_v27 = vcombine.low %v624_v39, %v666_v63  ;;  %v2376_v59 = vcombine.high %v624_v39, %v666_v63 }
 0x130   : > { %v2385_v14 = vcombine.low %v710_v24, %v2763_v8  ;;  %v2386_v9 = vcombine.high %v710_v24, %v2763_v8 }
 0x131   : > { %v539_v38 = vsel %vm197_vm0, %v531_v37, %v532_v51  ;;  %v581_v5 = vsel %vm197_vm0, %v573_v44, %v574_v13  ;;  %2043 = vmatprep.subr.bf16.mxu0 %v2376_v59 }
 0x132   : > { %2082 = vmatprep.subr.bf16.mxu1 %v2386_v9  ;;  %v612_v10 = vpop.permute.xlu0 %611  ;;  %2044 = vmatpush1.bf16.msra.mxu0 %v2375_v27  ;;  %v654_v26 = vpop.permute.xlu1 %653  ;;  %v540_v52 = vsel %vm535_vm7, %v2800_v34, %v539_v38  ;;  %v582_v41 = vsel %vm577_vm8, %v2812_v40, %v581_v5 }
 0x133   : > { %v617_v8 = vrot.slane %v612_v10, 4  ;;  %2083 = vmatpush1.bf16.msra.mxu1 %v2385_v14  ;;  %v659_v23 = vrot.slane %v654_v26, 4  ;;  %v2367_v50 = vcombine.low %v540_v52, %v582_v41  ;;  %v2368_v37 = vcombine.high %v540_v52, %v582_v41 }
 0x135   : > { %v625_v61 = vsel %vm197_vm0, %v616_v16, %v617_v8  ;;  %v667_v44 = vsel %vm197_vm0, %v658_v62, %v659_v23  ;;  %2045 = vmatprep.subr.bf16.mxu0 %v2368_v37 }
 0x136   : > { %v442_v31 = vpop.permute.xlu0 %441  ;;  %2046 = vmatpush1.bf16.msra.mxu0 %v2367_v50  ;;  %v484_v57 = vpop.permute.xlu1 %483  ;;  %v626_v1 = vsel %vm619_vm4, %v610_v42, %v625_v61  ;;  %v668_v34 = vsel %vm661_vm5, %v652_v7, %v667_v44  ;;  %vm3473_vm4 = vcmask 826368   ;;  %vm3474_vm5 = vmmov %vm3470_vm1 }
 0x137   : > { %v448_v6 = vrot.slane %v442_v31, 4  ;;  %v490_v39 = vrot.slane %v484_v57, 4  ;;  %v2377_v40 = vcombine.low %v626_v1, %v668_v34  ;;  %v2378_v63 = vcombine.high %v626_v1, %v668_v34 }
 0x139   : > { %v455_v24 = vsel %vm197_vm0, %v447_v0, %v448_v6  ;;  %v497_v16 = vsel %vm197_vm0, %v489_v17, %v490_v39  ;;  %2084 = vmatprep.subr.bf16.mxu1 %v2378_v63 }
 0x13a   : > { %v528_v62 = vpop.permute.xlu0 %527  ;;  %2085 = vmatpush1.bf16.msra.mxu1 %v2377_v40  ;;  %v570_v27 = vpop.permute.xlu1 %569  ;;  %v456_v42 = vsel %vm451_vm9, %v2841_v56, %v455_v24  ;;  %v498_v7 = vsel %vm493_vm10, %v2855_v12, %v497_v16 }
 0x13b   : > { %v533_v59 = vrot.slane %v528_v62, 4  ;;  %v575_v14 = vrot.slane %v570_v27, 4  ;;  %v2359_v9 = vcombine.low %v456_v42, %v498_v7  ;;  %v2360_v38 = vcombine.high %v456_v42, %v498_v7 }
 0x13d   : > { %v541_v0 = vsel %vm197_vm0, %v532_v51, %v533_v59  ;;  %v583_v5 = vsel %vm197_vm0, %v574_v13, %v575_v14  ;;  %2047 = vmatprep.subr.bf16.mxu0 %v2360_v38 }
 0x13e   : > { %v358_v17 = vpop.permute.xlu0 %357  ;;  %2048 = vmatpush1.bf16.msra.mxu0 %v2359_v9  ;;  %v400_v10 = vpop.permute.xlu1 %399  ;;  %v542_v26 = vsel %vm535_vm7, %v526_v15, %v541_v0  ;;  %v584_v52 = vsel %vm577_vm8, %v568_v46, %v583_v5  ;;  %vm3476_vm7 = vcmask 908288   ;;  %vm3477_vm8 = vcmask 900096  }
 0x13f   : > { %v364_v56 = vrot.slane %v358_v17, 4  ;;  %v406_v41 = vrot.slane %v400_v10, 4  ;;  %v2369_v8 = vcombine.low %v542_v26, %v584_v52  ;;  %v2370_v12 = vcombine.high %v542_v26, %v584_v52 }
 0x141   : > { %v371_v23 = vsel %vm197_vm0, %v363_v43, %v364_v56  ;;  %v413_v51 = vsel %vm197_vm0, %v405_v55, %v406_v41  ;;  %2086 = vmatprep.subr.bf16.mxu1 %v2370_v12 }
 0x142   : > { %v444_v13 = vpop.permute.xlu0 %443  ;;  %2087 = vmatpush1.bf16.msra.mxu1 %v2369_v8  ;;  %v486_v50 = vpop.permute.xlu1 %485  ;;  %v372_v15 = vsel %vm3470_vm1, %v2885_v19, %v371_v23  ;;  %v414_v46 = vsel %vm3471_vm2, %v2893_v47, %v413_v51  ;;  %vm3480_vm1 = vmmov %vm3476_vm7 }
 0x143   : > { %v449_v37 = vrot.slane %v444_v13, 4  ;;  %v491_v61 = vrot.slane %v486_v50, 4  ;;  %v2351_v44 = vcombine.low %v372_v15, %v414_v46  ;;  %v2352_v1 = vcombine.high %v372_v15, %v414_v46  ;;  %vm3481_vm2 = vmmov %vm3477_vm8 }
 0x145   : > { %v457_v43 = vsel %vm197_vm0, %v448_v6, %v449_v37  ;;  %v499_v34 = vsel %vm197_vm0, %v490_v39, %v491_v61  ;;  %2049 = vmatprep.subr.bf16.mxu0 %v2352_v1 }
 0x146   : > { %v274_v55 = vpop.permute.xlu0 %273  ;;  %2050 = vmatpush1.bf16.msra.mxu0 %v2351_v44  ;;  %v316_v40 = vpop.permute.xlu1 %315  ;;  %v458_v63 = vsel %vm451_vm9, %v442_v31, %v457_v43  ;;  %v500_v24 = vsel %vm493_vm10, %v484_v57, %v499_v34  ;;  %vm3478_vm9 = vmmov %vm3472_vm3 }
 0x147   : > { %v280_v19 = vrot.slane %v274_v55, 4  ;;  %v322_v16 = vrot.slane %v316_v40, 4  ;;  %v2361_v62 = vcombine.low %v458_v63, %v500_v24  ;;  %v2362_v47 = vcombine.high %v458_v63, %v500_v24  ;;  %vm3479_vm10 = vmmov %vm3473_vm4 }
 0x149   : > { %v287_v27 = vsel %vm197_vm0, %v279_v22, %v280_v19  ;;  %v329_v6 = vsel %vm197_vm0, %v321_v33, %v322_v16  ;;  %2088 = vmatprep.subr.bf16.mxu1 %v2362_v47 }
 0x14a   : > { %v360_v39 = vpop.permute.xlu0 %359  ;;  %2089 = vmatpush1.bf16.msra.mxu1 %v2361_v62  ;;  %v402_v42 = vpop.permute.xlu1 %401  ;;  %v288_v31 = vsel %vm3472_vm3, %v2918_v20, %v287_v27  ;;  %v330_v57 = vsel %vm3473_vm4, %v2932_v4, %v329_v6  ;;  %vm3483_vm3 = vcmask 138240  }
 0x14b   : > { %v365_v7 = vrot.slane %v360_v39, 4  ;;  %v407_v59 = vrot.slane %v402_v42, 4  ;;  %v2343_v14 = vcombine.low %v288_v31, %v330_v57  ;;  %v2344_v9 = vcombine.high %v288_v31, %v330_v57  ;;  %vm3485_vm4 = vmmov %vm3483_vm3 }
 0x14c   : > { %v3482_v39 = vrot.slane %v3018_v32, 4 }
 0x14d   : > { %v373_v22 = vsel %vm197_vm0, %v364_v56, %v365_v7  ;;  %v415_v38 = vsel %vm197_vm0, %v406_v41, %v407_v59  ;;  %2051 = vmatprep.subr.bf16.mxu0 %v2344_v9 }
 0x14e   : > { %v189_v33 = vpop.permute.xlu0 %188  ;;  %2052 = vmatpush1.bf16.msra.mxu0 %v2343_v14  ;;  %v232_v0 = vpop.permute.xlu1 %231  ;;  %v374_v5 = vsel %vm3474_vm5, %v358_v17, %v373_v22  ;;  %v416_v26 = vsel %vm3475_vm6, %v400_v10, %v415_v38  ;;  %v3484_v38 = vrot.slane %v3020_v53, 4  ;;  %vm3486_vm5 = vcmask 154624  }
 0x14f   : > { %v195_v20 = vrot.slane %v189_v33, 4  ;;  %v238_v52 = vrot.slane %v232_v0, 4  ;;  %v2353_v8 = vcombine.low %v374_v5, %v416_v26  ;;  %v2354_v4 = vcombine.high %v374_v5, %v416_v26 }
 0x150   : > { %vm3487_vm6 = vcmask 146432  }
 0x151   : > { %v203_v12 = vsel %vm197_vm0, %v194_v45, %v195_v20  ;;  %v245_v56 = vsel %vm197_vm0, %v237_v60, %v238_v52  ;;  %2090 = vmatprep.subr.bf16.mxu1 %v2354_v4 }
 0x152   : > { %v276_v41 = vpop.permute.xlu0 %275  ;;  %2091 = vmatpush1.bf16.msra.mxu1 %v2353_v8  ;;  %v318_v23 = vpop.permute.xlu1 %317  ;;  %v204_v17 = vsel %vm3476_vm7, %v2934_v36, %v203_v12  ;;  %v246_v10 = vsel %vm3477_vm8, %v2945_v48, %v245_v56  ;;  %vm3490_vm7 = vcmask 228352   ;;  %vm3491_vm8 = vcmask 220160  }
 0x153   : > { %v281_v51 = vrot.slane %v276_v41, 4  ;;  %v323_v13 = vrot.slane %v318_v23, 4  ;;  %v2335_v50 = vcombine.low %v204_v17, %v246_v10  ;;  %v2336_v15 = vcombine.high %v204_v17, %v246_v10 }
 0x154   : > { %v3488_v17 = vrot.slane %v3057_v2, 4 }
 0x155   : > { %v289_v45 = vsel %vm197_vm0, %v280_v19, %v281_v51  ;;  %v331_v46 = vsel %vm197_vm0, %v322_v16, %v323_v13  ;;  %2053 = vmatprep.subr.bf16.mxu0 %v2336_v15  ;;  %v3489_v51 = vrot.slane %v3059_v11, 4 }
 0x156   : > { %v191_v60 = vpop.permute.xlu0 %190  ;;  %2054 = vmatpush1.bf16.msra.mxu0 %v2335_v50  ;;  %v234_v37 = vpop.permute.xlu1 %233  ;;  %v290_v61 = vsel %vm3478_vm9, %v274_v55, %v289_v45  ;;  %v332_v44 = vsel %vm3479_vm10, %v316_v40, %v331_v46  ;;  %vm3492_vm9 = vmmov %vm3486_vm5 }
 0x157   : > { %v196_v36 = vrot.slane %v191_v60, 4  ;;  %v239_v1 = vrot.slane %v234_v37, 4  ;;  %v2345_v43 = vcombine.low %v290_v61, %v332_v44  ;;  %v2346_v48 = vcombine.high %v290_v61, %v332_v44  ;;  %vm3493_vm10 = vmmov %vm3487_vm6 }
 0x159   : > { %v205_v34 = vsel %vm197_vm0, %v195_v20, %v196_v36  ;;  %v247_v63 = vsel %vm197_vm0, %v238_v52, %v239_v1  ;;  %2092 = vmatprep.subr.bf16.mxu1 %v2346_v48 }
 0x15a   : > { %v1248_v24 = vpop.permute.xlu0 %1247  ;;  %2093 = vmatpush1.bf16.msra.mxu1 %v2345_v43  ;;  %v1164_v19 = vpop.permute.xlu1 %1163  ;;  %v206_v16 = vsel %vm3480_vm1, %v189_v33, %v205_v34  ;;  %v248_v62 = vsel %vm3481_vm2, %v232_v0, %v247_v63  ;;  %vm3496_vm1 = vcmask 302080   ;;  %vm3497_vm2 = vmmov %vm3490_vm7 }
 0x15b   : > { %v1254_v47 = vrot.slane %v1248_v24, 4  ;;  %v1170_v55 = vrot.slane %v1164_v19, 4  ;;  %v2337_v27 = vcombine.low %v206_v16, %v248_v62  ;;  %v2338_v40 = vcombine.high %v206_v16, %v248_v62 }
 0x15c   : > { %v3494_v16 = vrot.slane %v3101_v54, 4 }
 0x15d   : > { %v1261_v6 = vsel %vm197_vm0, %v1253_v58, %v1254_v47  ;;  %2094 = vmatprep.subr.bf16.mxu1 %v2338_v40  ;;  %v1177_v42 = vsel %vm197_vm0, %v3482_v39, %v1170_v55 }
 0x15e   : > { %v1206_v31 = vpop.permute.xlu0 %1205  ;;  %2095 = vmatpush1.bf16.msra.mxu1 %v2337_v27  ;;  %v1250_v57 = vpop.permute.xlu1 %1249  ;;  %v1262_v7 = vsel %vm3483_vm3, %v2979_v49, %v1261_v6  ;;  %v1178_v49 = vsel %vm3486_vm5, %v3018_v32, %v1177_v42  ;;  %vm3498_vm3 = vmmov %vm3491_vm8 }
 0x15f   : > { %v1212_v59 = vrot.slane %v1206_v31, 4  ;;  %v1255_v14 = vrot.slane %v1250_v57, 4  ;;  %v2440_v9 = vcombine.high %v1262_v7, %v1262_v7  ;;  %v2439_v22 = vcombine.low %v1262_v7, %v1262_v7 }
 0x161   : > { %v1219_v33 = vsel %vm197_vm0, %v3484_v38, %v1212_v59  ;;  %v1263_v58 = vsel %vm197_vm0, %v1254_v47, %v1255_v14  ;;  %2447 = vmatprep.subr.msk.bf16.mxu0 %vm197_vm0, %v2440_v9  ;;  %v1946_v0 = vsel %vm197_vm0, %v2439_v22, 0  ;;  %v3495_v47 = vrot.slane %v3103_v25, 4 }
 0x162   : > { %v1264_v5 = vsel %vm3485_vm4, %v1248_v24, %v1263_v58  ;;  %v1080_v26 = vpop.permute.xlu0 %1079  ;;  %2060 = vmatpush2.bf16.msra.mxu0 %v1946_v0  ;;  %v1122_v20 = vpop.permute.xlu1 %1121  ;;  %v1220_v52 = vsel %vm3487_vm6, %v3020_v53, %v1219_v33  ;;  %v3499_v0 = vrot.slane %v3129_v21, 4  ;;  %vm3501_vm4 = vmmov %vm3496_vm1 }
 0x163   : > { %v1086_v8 = vrot.slane %v1080_v26, 4  ;;  %v1128_v4 = vrot.slane %v1122_v20, 4  ;;  %v2431_v12 = vcombine.low %v1178_v49, %v1220_v52  ;;  %v2432_v56 = vcombine.high %v1178_v49, %v1220_v52 }
 0x164   : > { %v2442_v41 = vcombine.high %v1264_v5, %v1264_v5  ;;  %v2441_v23 = vcombine.low %v1264_v5, %v1264_v5  ;;  %v3500_v49 = vrot.slane %v3131_v18, 4 }
 0x165   : > { %v1093_v10 = vsel %vm197_vm0, %v3488_v17, %v1086_v8  ;;  %v1135_v13 = vsel %vm197_vm0, %v3489_v51, %v1128_v4  ;;  %2061 = vmatprep.subr.bf16.mxu0 %v2432_v56 }
 0x166   : > { %2449 = vmatprep.subr.msk.bf16.mxu1 %vm197_vm0, %v2442_v41  ;;  %v1166_v32 = vpop.permute.xlu0 %1165  ;;  %2062 = vmatpush2.bf16.msra.mxu0 %v2431_v12  ;;  %v1952_v53 = vsel %vm197_vm0, %v2441_v23, 0  ;;  %v1208_v50 = vpop.permute.xlu1 %1207  ;;  %v1094_v15 = vsel %vm3490_vm7, %v3057_v2, %v1093_v10  ;;  %v1136_v45 = vsel %vm3491_vm8, %v3059_v11, %v1135_v13 }
 0x167   : > { %v1171_v46 = vrot.slane %v1166_v32, 4  ;;  %2101 = vmatpush2.bf16.msra.mxu1 %v1952_v53  ;;  %v1213_v60 = vrot.slane %v1208_v50, 4  ;;  %v2423_v37 = vcombine.low %v1094_v15, %v1136_v45  ;;  %v2424_v61 = vcombine.high %v1094_v15, %v1136_v45 }
 0x169   : > { %v1179_v44 = vsel %vm197_vm0, %v1170_v55, %v1171_v46  ;;  %v1221_v36 = vsel %vm197_vm0, %v1212_v59, %v1213_v60  ;;  %2063 = vmatprep.subr.bf16.mxu0 %v2424_v61 }
 0x16a   : > { %v996_v1 = vpop.permute.xlu0 %995  ;;  %2064 = vmatpush2.bf16.msra.mxu0 %v2423_v37  ;;  %v1038_v43 = vpop.permute.xlu1 %1037  ;;  %v1180_v48 = vsel %vm3492_vm9, %v1164_v19, %v1179_v44  ;;  %v1222_v2 = vsel %vm3493_vm10, %v1206_v31, %v1221_v36 }
 0x16b   : > { %v1002_v34 = vrot.slane %v996_v1, 4  ;;  %v1044_v63 = vrot.slane %v1038_v43, 4  ;;  %v2433_v11 = vcombine.low %v1180_v48, %v1222_v2  ;;  %v2434_v24 = vcombine.high %v1180_v48, %v1222_v2 }
 0x16d   : > { %v1009_v62 = vsel %vm197_vm0, %v3494_v16, %v1002_v34  ;;  %v1051_v55 = vsel %vm197_vm0, %v3495_v47, %v1044_v63  ;;  %2102 = vmatprep.subr.bf16.mxu1 %v2434_v24 }
 0x16e   : > { %v1082_v27 = vpop.permute.xlu0 %1081  ;;  %2103 = vmatpush2.bf16.msra.mxu1 %v2433_v11  ;;  %v1124_v40 = vpop.permute.xlu1 %1123  ;;  %v1010_v19 = vsel %vm3496_vm1, %v3101_v54, %v1009_v62  ;;  %v1052_v6 = vsel %vm1047_vm15, %v3103_v25, %v1051_v55 }
 0x16f   : > { %v1087_v39 = vrot.slane %v1082_v27, 4  ;;  %v1129_v42 = vrot.slane %v1124_v40, 4  ;;  %v2415_v31 = vcombine.low %v1010_v19, %v1052_v6  ;;  %v2416_v57 = vcombine.high %v1010_v19, %v1052_v6 }
 0x171   : > { %v1095_v7 = vsel %vm197_vm0, %v1086_v8, %v1087_v39  ;;  %v1137_v59 = vsel %vm197_vm0, %v1128_v4, %v1129_v42  ;;  %2065 = vmatprep.subr.bf16.mxu0 %v2416_v57 }
 0x172   : > { %v912_v14 = vpop.permute.xlu0 %911  ;;  %2066 = vmatpush2.bf16.msra.mxu0 %v2415_v31  ;;  %v954_v9 = vpop.permute.xlu1 %953  ;;  %v1096_v22 = vsel %vm3497_vm2, %v1080_v26, %v1095_v7  ;;  %v1138_v38 = vsel %vm3498_vm3, %v1122_v20, %v1137_v59 }
 0x173   : > { %v918_v54 = vrot.slane %v912_v14, 4  ;;  %v960_v33 = vrot.slane %v954_v9, 4  ;;  %v2425_v58 = vcombine.low %v1096_v22, %v1138_v38  ;;  %v2426_v25 = vcombine.high %v1096_v22, %v1138_v38 }
 0x175   : > { %v925_v5 = vsel %vm197_vm0, %v3499_v0, %v918_v54  ;;  %v967_v52 = vsel %vm197_vm0, %v3500_v49, %v960_v33  ;;  %2104 = vmatprep.subr.bf16.mxu1 %v2426_v25 }
 0x176   : > { %v998_v8 = vpop.permute.xlu0 %997  ;;  %2105 = vmatpush2.bf16.msra.mxu1 %v2425_v58  ;;  %v1040_v4 = vpop.permute.xlu1 %1039  ;;  %v926_v26 = vsel %vm921_vm14, %v3129_v21, %v925_v5  ;;  %v968_v20 = vsel %vm963_vm13, %v3131_v18, %v967_v52 }
 0x177   : > { %v1003_v12 = vrot.slane %v998_v8, 4  ;;  %v1045_v56 = vrot.slane %v1040_v4, 4  ;;  %v2407_v41 = vcombine.low %v926_v26, %v968_v20  ;;  %v2408_v23 = vcombine.high %v926_v26, %v968_v20 }
 0x179   : > { %v1011_v17 = vsel %vm197_vm0, %v1002_v34, %v1003_v12  ;;  %v1053_v10 = vsel %vm197_vm0, %v1044_v63, %v1045_v56  ;;  %2067 = vmatprep.subr.bf16.mxu0 %v2408_v23 }
 0x17a   : > { %v828_v51 = vpop.permute.xlu0 %827  ;;  %2068 = vmatpush2.bf16.msra.mxu0 %v2407_v41  ;;  %v870_v13 = vpop.permute.xlu1 %869  ;;  %v1012_v32 = vsel %vm3501_vm4, %v996_v1, %v1011_v17  ;;  %v1054_v53 = vsel %vm1047_vm15, %v1038_v43, %v1053_v10 }
 0x17b   : > { %v834_v21 = vrot.slane %v828_v51, 4  ;;  %v876_v50 = vrot.slane %v870_v13, 4  ;;  %v2417_v15 = vcombine.low %v1012_v32, %v1054_v53  ;;  %v2418_v18 = vcombine.high %v1012_v32, %v1054_v53 }
 0x17d   : > { %v841_v45 = vsel %vm197_vm0, %v833_v29, %v834_v21  ;;  %v883_v46 = vsel %vm197_vm0, %v875_v28, %v876_v50  ;;  %2106 = vmatprep.subr.bf16.mxu1 %v2418_v18 }
 0x17e   : > { %v914_v60 = vpop.permute.xlu0 %913  ;;  %2107 = vmatpush2.bf16.msra.mxu1 %v2417_v15  ;;  %v956_v37 = vpop.permute.xlu1 %955  ;;  %v842_v61 = vsel %vm837_vm12, %v3160_v30, %v841_v45  ;;  %v884_v44 = vsel %vm879_vm11, %v3162_v35, %v883_v46 }
 0x17f   : > { %v919_v36 = vrot.slane %v914_v60, 4  ;;  %v961_v1 = vrot.slane %v956_v37, 4  ;;  %v2399_v43 = vcombine.low %v842_v61, %v884_v44  ;;  %v2400_v48 = vcombine.high %v842_v61, %v884_v44 }
 0x181   : > { %v927_v29 = vsel %vm197_vm0, %v918_v54, %v919_v36  ;;  %v969_v2 = vsel %vm197_vm0, %v960_v33, %v961_v1  ;;  %2069 = vmatprep.subr.bf16.mxu0 %v2400_v48  ;;  %v2121_v33 = vld [vmem:[%s3436_s2] sm:$0xff] }
 0x182   : > { %v830_v28 = vpop.permute.xlu0 %829  ;;  %2070 = vmatpush2.bf16.msra.mxu0 %v2399_v43  ;;  %v872_v34 = vpop.permute.xlu1 %871  ;;  %v928_v63 = vsel %vm921_vm14, %v912_v14, %v927_v29  ;;  %v970_v11 = vsel %vm963_vm13, %v954_v9, %v969_v2  ;;  %v2123_v9 = vlaneseq }
 0x183   : > { %v835_v30 = vrot.slane %v830_v28, 4  ;;  %v877_v24 = vrot.slane %v872_v34, 4  ;;  %v2409_v16 = vcombine.low %v928_v63, %v970_v11  ;;  %v2410_v35 = vcombine.high %v928_v63, %v970_v11 }
 0x184   : > { %v2124_v22 = vshrl.u32 %v2123_v9, 7  ;;  %v2528_v28 = vmov 0.0  }
 0x185   : > { %v843_v62 = vsel %vm197_vm0, %v834_v21, %v835_v30  ;;  %v885_v47 = vsel %vm197_vm0, %v876_v50, %v877_v24  ;;  %2072 = vmatmul.mubr.bf16.vlgmr.msra.gmra.mxu0 %v3147_v3  ;;  %2108 = vmatprep.subr.bf16.mxu1 %v2410_v35  ;;  %2257 = vst [vmem:[%s3395_s26] sm:$0xff] %v2528_v28  ;;  %2266 = vst [vmem:[%s3395_s26 + $0x48] sm:$0xff] %v2528_v28 }
 0x186   : > { %2109 = vmatpush2.bf16.msra.mxu1 %v2409_v16  ;;  %v844_v55 = vsel %vm837_vm12, %v828_v51, %v843_v62  ;;  %v886_v27 = vsel %vm879_vm11, %v870_v13, %v885_v47  ;;  %v2125_v38 = vsub.s32 0, %v2124_v22  ;;  %v2129_v54 = vsub.s32 1, %v2124_v22 }
 0x187   : > { %v2401_v40 = vcombine.low %v844_v55, %v886_v27  ;;  %v2402_v19 = vcombine.high %v844_v55, %v886_v27  ;;  %v2137_v52 = vsub.s32 3, %v2124_v22  ;;  %v2141_v8 = vsub.s32 4, %v2124_v22 }
 0x188   : > { %v3367_v58 = vrot.slane %v2121_v33, %v2125_v38  ;;  %v3369_v25 = vrot.slane %v2121_v33, %v2129_v54  ;;  %v2145_v56 = vsub.s32 5, %v2124_v22  ;;  %v2149_v13 = vsub.s32 6, %v2124_v22 }
 0x189   : > { %2110 = vmatprep.subr.bf16.mxu1 %v2402_v19  ;;  %v3376_v20 = vrot.slane %v2121_v33, %v2137_v52  ;;  %v3378_v12 = vrot.slane %v2121_v33, %v2141_v8  ;;  %v2153_v21 = vsub.s32 7, %v2124_v22 }
 0x18a   : > { %2111 = vmatpush2.bf16.msra.mxu1 %v2401_v40  ;;  %v3382_v51 = vrot.slane %v2121_v33, %v2145_v56  ;;  %v3385_v45 = vrot.slane %v2121_v33, %v2149_v13 }
 0x18b   : > { %v3387_v60 = vrot.slane %v2121_v33, %v2153_v21 }
 0x18d   : > { %2113 = vmatmul.mubr.bf16.vlgmr.msra.gmra.mxu1 %v3147_v3  ;;  %v2133_v3 = vsub.s32 2, %v2124_v22 }
 0x18f   : > { %v3373_v49 = vrot.slane %v2121_v33, %v2133_v3 }
 0x1dd   : > { %v1991_v6 = vpop.f32.mrf.mxu0 }
 0x1de   : > { %v2163_v0 = vmul.f32 %v3367_v58, %v1991_v6 }
 0x1df   : > { %v1993_v39 = vpop.f32.mrf.mxu0 }
 0x1e0   : > { %v2164_v5 = vmul.f32 %v3369_v25, %v1993_v39 }
 0x1e1   : > { %v1995_v42 = vpop.f32.mrf.mxu0 }
 0x1e2   : > { %v2171_v4 = vadd.f32 %v2164_v5, %v2163_v0 }
 0x1e3   : > { %v1996_v31 = vpop.f32.mrf.mxu0 }
 0x1e9   : > { %v2032_v57 = vpop.f32.mrf.mxu1 }
 0x1ea   : > { %v2165_v26 = vmul.f32 %v3373_v49, %v2032_v57 }
 0x1eb   : > { %v2034_v7 = vpop.f32.mrf.mxu1 }
 0x1ec   : > { %v2172_v41 = vadd.f32 %v2171_v4, %v2165_v26  ;;  %v2166_v23 = vmul.f32 %v3376_v20, %v2034_v7 }
 0x1ed   : > { %v2036_v59 = vpop.f32.mrf.mxu1 }
 0x1ee   : > { %v2173_v53 = vadd.f32 %v2172_v41, %v2166_v23 }
 0x1ef   : > { %v2037_v14 = vpop.f32.mrf.mxu1 }
 0x245   : > { %v2073_v17 = vpop.f32.mrf.mxu0 }
 0x246   : > { %v2167_v10 = vmul.f32 %v3378_v12, %v2073_v17 }
 0x247   : > { %v2075_v32 = vpop.f32.mrf.mxu0 }
 0x248   : > { %v2174_v15 = vadd.f32 %v2173_v53, %v2167_v10  ;;  %v2168_v18 = vmul.f32 %v3382_v51, %v2075_v32 }
 0x249   : > { %v2077_v50 = vpop.f32.mrf.mxu0 }
 0x24a   : > { %v2175_v61 = vadd.f32 %v2174_v15, %v2168_v18 }
 0x24b   : > { %v2078_v46 = vpop.f32.mrf.mxu0 }
 0x24d   : > { %v2114_v37 = vpop.f32.mrf.mxu1 }
 0x24e   : > { %v2169_v44 = vmul.f32 %v3385_v45, %v2114_v37 }
 0x24f   : > { %v2116_v36 = vpop.f32.mrf.mxu1 }
 0x250   : > { %v2176_v1 = vadd.f32 %v2175_v61, %v2169_v44  ;;  %v2170_v43 = vmul.f32 %v3387_v60, %v2116_v36 }
 0x251   : > { %v2118_v48 = vpop.f32.mrf.mxu1 }
 0x252   : > { %v2177_v29 = vadd.f32 %v2176_v1, %v2170_v43 }
 0x253   : > { %v2119_v2 = vpop.f32.mrf.mxu1 }
 0x254   : > { %2178 = vadd.xlane.f32.xlu0 %v2177_v29 }
 0x2dd   : > { %v2179_v34 = vpop.xlane.xlu0 %2178 }
 0x2de   : > { %v2180_v63 = vmul.f32 0.001953125, %v2179_v34 }
 0x2e0   : > { %v2181_v11 = vsub.f32 %v1991_v6, %v2180_v63  ;;  %v2182_v30 = vsub.f32 %v1993_v39, %v2180_v63  ;;  %v2183_v24 = vsub.f32 %v2032_v57, %v2180_v63  ;;  %v2184_v16 = vsub.f32 %v2034_v7, %v2180_v63 }
 0x2e1   : > { %v2185_v35 = vsub.f32 %v2073_v17, %v2180_v63  ;;  %v2186_v27 = vsub.f32 %v2075_v32, %v2180_v63  ;;  %v2187_v31 = vsub.f32 %v2114_v37, %v2180_v63  ;;  %v2188_v39 = vsub.f32 %v2116_v36, %v2180_v63 }
 0x2e2   : > { %v2189_v62 = vmul.f32 %v2181_v11, %v3367_v58  ;;  %v2190_v47 = vmul.f32 %v2182_v30, %v3369_v25  ;;  %v2191_v55 = vmul.f32 %v2183_v24, %v3373_v49  ;;  %v2192_v40 = vmul.f32 %v2184_v16, %v3376_v20 }
 0x2e3   : > { %v2193_v59 = vmul.f32 %v2185_v35, %v3378_v12  ;;  %v2194_v57 = vmul.f32 %v2186_v27, %v3382_v51  ;;  %v2195_v22 = vmul.f32 %v2187_v31, %v3385_v45  ;;  %v2196_v33 = vmul.f32 %v2188_v39, %v3387_v60 }
 0x2e4   : > { %v2197_v19 = vmul.f32 %v2189_v62, %v2189_v62  ;;  %v2198_v42 = vmul.f32 %v2190_v47, %v2190_v47  ;;  %v2199_v14 = vmul.f32 %v2191_v55, %v2191_v55  ;;  %v2200_v7 = vmul.f32 %v2192_v40, %v2192_v40 }
 0x2e5   : > { %v2201_v38 = vmul.f32 %v2193_v59, %v2193_v59  ;;  %v2202_v3 = vmul.f32 %v2194_v57, %v2194_v57  ;;  %v2203_v5 = vmul.f32 %v2195_v22, %v2195_v22  ;;  %v2204_v8 = vmul.f32 %v2196_v33, %v2196_v33 }
 0x2e6   : > { %v2205_v6 = vadd.f32 %v2198_v42, %v2197_v19 }
 0x2e8   : > { %v2206_v9 = vadd.f32 %v2205_v6, %v2199_v14 }
 0x2ea   : > { %v2207_v54 = vadd.f32 %v2206_v9, %v2200_v7 }
 0x2ec   : > { %v2208_v0 = vadd.f32 %v2207_v54, %v2201_v38 }
 0x2ee   : > { %v2209_v52 = vadd.f32 %v2208_v0, %v2202_v3 }
 0x2f0   : > { %v2210_v4 = vadd.f32 %v2209_v52, %v2203_v5 }
 0x2f2   : > { %v2211_v26 = vadd.f32 %v2210_v4, %v2204_v8 }
 0x2f4   : > { %2212 = vadd.xlane.f32.xlu1 %v2211_v26 }
 0x37d   : > { %v2213_v56 = vpop.xlane.xlu1 %2212 }
 0x37e   : > { %v2214_v41 = vmul.f32 0.001953125, %v2213_v56 }
 0x380   : > { %v2215_v23 = vadd.f32 1e-05, %v2214_v41 }
 0x382   : > { %2492 = vrsqrt.f32 %v2215_v23 }
 0x38f   : > { %v2493_v17 = vpop.eup %2492 }
 0x390   : > { %v2217_v10 = vmul.f32 %v2493_v17, %v2181_v11  ;;  %v2218_v13 = vmul.f32 %v2493_v17, %v2182_v30  ;;  %v2219_v32 = vmul.f32 %v2493_v17, %v2183_v24  ;;  %v2220_v53 = vmul.f32 %v2493_v17, %v2184_v16 }
 0x391   : > { %v2221_v21 = vmul.f32 %v2493_v17, %v2185_v35  ;;  %v2222_v50 = vmul.f32 %v2493_v17, %v2186_v27  ;;  %v2223_v15 = vmul.f32 %v2493_v17, %v2187_v31  ;;  %v2224_v18 = vmul.f32 %v2493_v17, %v2188_v39 }
 0x392   : > { %vm2225_vm0 = vcmp.ge.f32.partialorder %v2217_v10, 0.0  ;;  %vm2226_vm11 = vcmp.ge.f32.partialorder %v2218_v13, 0.0  ;;  %vm2227_vm12 = vcmp.ge.f32.partialorder %v2219_v32, 0.0  ;;  %vm2228_vm13 = vcmp.ge.f32.partialorder %v2220_v53, 0.0 }
 0x393   : > { %vm2229_vm14 = vcmp.ge.f32.partialorder %v2221_v21, 0.0  ;;  %vm2230_vm15 = vcmp.ge.f32.partialorder %v2222_v50, 0.0  ;;  %vm2231_vm5 = vcmp.ge.f32.partialorder %v2223_v15, 0.0  ;;  %vm2232_vm6 = vcmp.ge.f32.partialorder %v2224_v18, 0.0 }
 0x394   : > { %v2233_v46 = vmul.f32 0.01, %v2217_v10  ;;  %v2234_v37 = vmul.f32 0.01, %v2218_v13  ;;  %v2235_v61 = vmul.f32 0.01, %v2219_v32 }
 0x395   : > { %v2236_v44 = vmul.f32 0.01, %v2220_v53  ;;  %v2237_v36 = vmul.f32 0.01, %v2221_v21  ;;  %v2238_v1 = vmul.f32 0.01, %v2222_v50 }
 0x396   : > { %v2239_v43 = vmul.f32 0.01, %v2223_v15  ;;  %v2240_v48 = vmul.f32 0.01, %v2224_v18  ;;  %v2241_v29 = vsel %vm2225_vm0, %v2217_v10, %v2233_v46  ;;  %v2242_v2 = vsel %vm2226_vm11, %v2218_v13, %v2234_v37 }
 0x397   : > { %v2243_v28 = vsel %vm2227_vm12, %v2219_v32, %v2235_v61  ;;  %v2244_v34 = vsel %vm2228_vm13, %v2220_v53, %v2236_v44  ;;  %v2245_v63 = vsel %vm2229_vm14, %v2221_v21, %v2237_v36  ;;  %v2246_v11 = vsel %vm2230_vm15, %v2222_v50, %v2238_v1 }
 0x398   : > { %v2247_v30 = vsel %vm2231_vm5, %v2223_v15, %v2239_v43  ;;  %v2248_v24 = vsel %vm2232_vm6, %v2224_v18, %v2240_v48  ;;  %v2249_v16 = vmul.f32 %v2241_v29, %v3367_v58  ;;  %v2250_v35 = vmul.f32 %v2242_v2, %v3369_v25 }
 0x399   : > { %v2251_v62 = vmul.f32 %v2243_v28, %v3373_v49  ;;  %v2252_v47 = vmul.f32 %v2244_v34, %v3376_v20  ;;  %v2253_v55 = vmul.f32 %v2245_v63, %v3378_v12  ;;  %v2254_v27 = vmul.f32 %v2246_v11, %v3382_v51 }
 0x39a   : > { %v2255_v40 = vmul.f32 %v2247_v30, %v3385_v45  ;;  %v2256_v19 = vmul.f32 %v2248_v24, %v3387_v60  ;;  %2258 = vst [vmem:[%s3395_s26 + $0x8] sm:$0xff] %v2249_v16  ;;  %2259 = vst [vmem:[%s3395_s26 + $0x10] sm:$0xff] %v2250_v35 }
 0x39b   : > { %2260 = vst [vmem:[%s3395_s26 + $0x18] sm:$0xff] %v2251_v62  ;;  %2261 = vst [vmem:[%s3395_s26 + $0x20] sm:$0xff] %v2252_v47 }
 0x39c   : > { %2262 = vst [vmem:[%s3395_s26 + $0x28] sm:$0xff] %v2253_v55  ;;  %2263 = vst [vmem:[%s3395_s26 + $0x30] sm:$0xff] %v2254_v27 }
 0x39d   : > { %2264 = vst [vmem:[%s3395_s26 + $0x38] sm:$0xff] %v2255_v40  ;;  %2265 = vst [vmem:[%s3395_s26 + $0x40] sm:$0xff] %v2256_v19 }
 0x39e PF: > { %s13_s12 = sadd.s32 1, %s2500_s12  }
 0x39f   : > { %p10_p4 = scmp.ge.s32.totalorder %s13_s12, 4  }
 0x3a1   :  { %12 = sbr.rel (!%p10_p4) target bundleno = 1 (0x1), region = 62 }

// kernel: decoder_block.2
= control target key start
LH: loop header
LB: loop body
LE: loop exit
PB: predicated region body
PF: predicated region fallthrough
CT: control target
= control target key end

     0   :  { %s5629_s15 = smov 0   ;;  %s8060_s0 = inlined_call_operand.vmem [shape: bf16[2,4,1280], index: 0, kind: input, shape index: {}]   ;;  %s8061_s1 = inlined_call_operand.vmem [shape: bf16[2,4,1280], index: 1, kind: input, shape index: {}]   ;;  %s8062_s2 = inlined_call_operand.vmem [shape: bf16[8,216], index: 2, kind: input, shape index: {}]   ;;  %s8063_s3 = inlined_call_operand.vmem [shape: f32[1,1024], index: 3, kind: input, shape index: {}]   ;;  %s8064_s4 = inlined_call_operand.vmem [shape: bf16[2,8,1280], index: 4, kind: output, shape index: {}]  }
   0x1 LB: > { %s5293_s16 = sadd.s32 4294967295, %s5574_s15   ;;  %p5297_p0 = scmp.ge.s32.totalorder %s5574_s15, 1  ;;  %s5574_s15 = sphi %s5629_s15, %s14_s15  }
   0x2   : > { %p172_p1 = scmp.lt.s32.totalorder %s5574_s15, 3 }
   0x4   : > { %p173_p2 = pnand %p5297_p0, %p172_p1 }
   0x6   : > { %176 = sbr.rel (%p173_p2) target bundleno = 1199 (0x4af), region = 36 }
   0xb   : > { %p203_p3 = scmp.lt.s32.totalorder %s5293_s16, 1  ;;  %v229_v0 = vlaneseq  ;;  %v5576_v1 = vmov 1983009808   ;;  %s8133_s24 = smov 109   ;;  %vm277_vm0 = vcmask 1043456   ;;  %vm430_vm1 = vcmask 891904  }
   0xc   : > { %v227_v2 = vunpack.c.l.s4 %v5576_v1  ;;  %s5578_s25 = smov 110   ;;  %s5579_s26 = smov 100   ;;  %vm355_vm2 = vcmask 900096   ;;  %vm506_vm3 = vcmask 826368   ;;  %vm581_vm4 = vcmask 818176  }
   0xd   : > { %s8397_s16 = smov (!%p203_p3, %s5293_s16), 1  ;;  %v5639_v3 = vshrl.u32 %v229_v0, 7  ;;  %s5580_s27 = smov 101   ;;  %vm8073_vm5 = vcmask 154624   ;;  %vm2133_vm6 = vcmask 146432   ;;  %vm2208_vm7 = vcmask 138240  }
   0xe   : > { %v228_v4 = vunpack.c.0.s8 %v227_v2  ;;  %s5467_s17 = smul.u32 20, %s8397_s16  ;;  %s8143_s28 = smov 19   ;;  %vm8115_vm8 = vcmask 908288   ;;  %vm8074_vm9 = vcmask 302080   ;;  %vm8138_vm10 = vcmask 236544  }
   0xf   : > { %8209 = vst [vmem:[#allocation3_spill] sm:$0xff] %v5639_v3  ;;  %s5582_s29 = smov 18   ;;  %s5583_s30 = smov 17   ;;  %vm8076_vm11 = vcmask 228352   ;;  %vm8075_vm12 = vcmask 220160   ;;  %vm8077_vm13 = vcmask 965632  }
  0x10   : > { %v5643_v5 = vsub.s32 %v228_v4, %v5639_v3  ;;  %s5648_s20 = scalar_lea.vmem %s8061_s1, %s5467_s17  ;;  %s5655_s23 = scalar_lea.vmem %s8060_s0, %s5467_s17  ;;  %vm8080_vm14 = vcmask 957440   ;;  %vm8079_vm15 = vcmask 318464  }
  0x11   : > { %v2373_v6 = vld [vmem:[%s5648_s20] sm:$0xff]  ;;  %v2300_v18 = vld [vmem:[%s5648_s20 + $0x8] sm:$0xff]  ;;  %s5584_s5 = smov 111   ;;  %s8168_s6 = smov 37  }
  0x12   : > { %v2393_v7 = vrot.slane %v2373_v6, %v5643_v5  ;;  %v2379_v8 = vcombine.low %v2373_v6, %v2373_v6  ;;  %v2305_v9 = vcombine.high %v2373_v6, %v2373_v6  ;;  %v1998_v12 = vld [vmem:[%s5655_s23 + $0x2] sm:$0xff]  ;;  %v2394_v19 = vcombine.low %v2300_v18, %v2300_v18  ;;  %s8086_s7 = smov 29   ;;  %v1999_v22 = vld [vmem:[%s5655_s23 + $0xa] sm:$0xff]  ;;  %s8083_s8 = smov 28  }
  0x13   : > { %v2004_v13 = vcombine.high %v1998_v12, %v1998_v12  ;;  %v5669_v14 = vrot.slane %v1998_v12, %v5643_v5  ;;  %v2079_v16 = vcombine.low %v1998_v12, %v1998_v12  ;;  %v2327_v20 = vrot.slane %v2300_v18, %v5643_v5  ;;  %s8081_s9 = smov 27   ;;  %s8065_s10 = smov 118   ;;  %v1201_v26 = vld [vmem:[%s5655_s23 + $0x2] sm:$0xff] }
  0x14   : > { %2419 = vrot.lane.b32.xlu1 %v2393_v7, %s8133_s24  ;;  %2342 = vrot.lane.b32.xlu0 %v2393_v7, %s5578_s25  ;;  %v2386_v10 = vrot.slane %v2379_v8, %v5643_v5  ;;  %v2319_v11 = vrot.slane %v2305_v9, %v5643_v5  ;;  %v2401_v21 = vrot.slane %v2394_v19, %v5643_v5  ;;  %s5590_s11 = smov 117   ;;  %s8100_s12 = smov 39   ;;  %v1126_v27 = vld [vmem:[%s5655_s23] sm:$0xff]  ;;  %v5798_v36 = vld [vmem:[%s5655_s23 + $0x8] sm:$0xff] }
  0x15   : > { %v5672_v15 = vrot.slane %v2004_v13, %v5643_v5  ;;  %v5679_v17 = vrot.slane %v2079_v16, %v5643_v5  ;;  %v2094_v23 = vcombine.low %v1999_v22, %v1999_v22  ;;  %v5716_v24 = vrot.slane %v1999_v22, %v5643_v5  ;;  %s8163_s13 = smov 38   ;;  %5309 = vst.sshfl [vmem:[#allocation2 + $0xc8] sm:$0xf0 pattern:$0x76325410] %v1201_v26  ;;  %s8067_s14 = smov 1  }
  0x16   : > { %v1205_v28 = vcombine.low %v1201_v26, %v1201_v26  ;;  %v1132_v29 = vcombine.high %v1126_v27, %v1126_v27  ;;  %v5755_v30 = vrot.slane %v1126_v27, %v5643_v5  ;;  %s8071_s17 = smov 127   ;;  %s8069_s18 = smov 119   ;;  %v905_v32 = vcombine.low %v1126_v27, %v1126_v27 }
  0x17   : > { %v5719_v25 = vrot.slane %v2094_v23, %v5643_v5  ;;  %s8188_s19 = smov 89   ;;  %s8112_s21 = smov 11   ;;  %v5808_v39 = vrot.slane %v5798_v36, %v5643_v5  ;;  %v920_v18 = vcombine.low %v5798_v36, %v5798_v36 }
  0x18   : > { %2568 = vrot.lane.b32.xlu1 %v2393_v7, %s5579_s26  ;;  %2491 = vrot.lane.b32.xlu0 %v2393_v7, %s5580_s27  ;;  %5308 = vst.sshfl [vmem:[#allocation2 + $0xc0] sm:$0xf0 pattern:$0x76325410] %v1205_v28  ;;  %v5758_v31 = vrot.slane %v1132_v29, %v5643_v5  ;;  %v5785_v33 = vrot.slane %v905_v32, %v5643_v5  ;;  %s5598_s22 = smov 10  }
  0x1c   : > { %2417 = vrot.lane.b32.xlu1 %v2386_v10, %s8133_s24  ;;  %2344 = vrot.lane.b32.xlu0 %v2319_v11, %s5578_s25 }
  0x20   : > { %2493 = vrot.lane.b32.xlu1 %v2319_v11, %s5580_s27  ;;  %2566 = vrot.lane.b32.xlu0 %v2386_v10, %s5579_s26 }
  0x24   : > { %2041 = vrot.lane.b32.xlu0 %v5669_v14, %s8143_s28  ;;  %2043 = vrot.lane.b32.xlu1 %v5672_v15, %s8143_s28 }
  0x28   : > { %2117 = vrot.lane.b32.xlu0 %v5679_v17, %s5582_s29  ;;  %2119 = vrot.lane.b32.xlu1 %v5669_v14, %s5582_s29 }
  0x2c   : > { %2192 = vrot.lane.b32.xlu0 %v5669_v14, %s5583_s30  ;;  %2194 = vrot.lane.b32.xlu1 %v5672_v15, %s5583_s30 }
  0x30   : > { %2268 = vrot.lane.b32.xlu0 %v2386_v10, %s5584_s5  ;;  %2270 = vrot.lane.b32.xlu1 %v2393_v7, %s5584_s5 }
  0x34   : > { %2346 = vrot.lane.b32.xlu0 %v2327_v20, %s5578_s25  ;;  %2421 = vrot.lane.b32.xlu1 %v2401_v21, %s8133_s24 }
  0x38   : > { %2495 = vrot.lane.b32.xlu0 %v2327_v20, %s5580_s27  ;;  %2570 = vrot.lane.b32.xlu1 %v2401_v21, %s5579_s26 }
  0x3c   : > { %1739 = vrot.lane.b32.xlu0 %v5669_v14, %s8168_s6  ;;  %1741 = vrot.lane.b32.xlu1 %v5672_v15, %s8168_s6 }
  0x40   : > { %1815 = vrot.lane.b32.xlu0 %v5679_v17, %s8086_s7  ;;  %1817 = vrot.lane.b32.xlu1 %v5669_v14, %s8086_s7 }
  0x44   : > { %1890 = vrot.lane.b32.xlu0 %v5669_v14, %s8083_s8  ;;  %1892 = vrot.lane.b32.xlu1 %v5672_v15, %s8083_s8 }
  0x48   : > { %1966 = vrot.lane.b32.xlu0 %v5679_v17, %s8081_s9  ;;  %1968 = vrot.lane.b32.xlu1 %v5669_v14, %s8081_s9 }
  0x4c   : > { %2045 = vrot.lane.b32.xlu0 %v5716_v24, %s8143_s28  ;;  %2121 = vrot.lane.b32.xlu1 %v5719_v25, %s5582_s29 }
  0x50   : > { %2196 = vrot.lane.b32.xlu0 %v5716_v24, %s5583_s30  ;;  %2272 = vrot.lane.b32.xlu1 %v2401_v21, %s5584_s5 }
  0x54   : > { %1437 = vrot.lane.b32.xlu0 %v5669_v14, %s8065_s10  ;;  %1439 = vrot.lane.b32.xlu1 %v5672_v15, %s8065_s10 }
  0x58   : > { %1513 = vrot.lane.b32.xlu0 %v5679_v17, %s5590_s11  ;;  %1515 = vrot.lane.b32.xlu1 %v5669_v14, %s5590_s11 }
  0x5c   : > { %1588 = vrot.lane.b32.xlu0 %v5669_v14, %s8100_s12  ;;  %1590 = vrot.lane.b32.xlu1 %v5672_v15, %s8100_s12 }
  0x60   : > { %1664 = vrot.lane.b32.xlu0 %v5679_v17, %s8163_s13  ;;  %1666 = vrot.lane.b32.xlu1 %v5669_v14, %s8163_s13 }
  0x64   : > { %1743 = vrot.lane.b32.xlu0 %v5716_v24, %s8168_s6  ;;  %1819 = vrot.lane.b32.xlu1 %v5719_v25, %s8086_s7 }
  0x68   : > { %1894 = vrot.lane.b32.xlu0 %v5716_v24, %s8083_s8  ;;  %1970 = vrot.lane.b32.xlu1 %v5719_v25, %s8081_s9 }
  0x6c   : > { %1169 = vrot.lane.b32.xlu0 %v5755_v30, %s8067_s14  ;;  %1171 = vrot.lane.b32.xlu1 %v5758_v31, %s8067_s14 }
  0x70   : > { %1286 = vrot.lane.b32.xlu0 %v5669_v14, %s8071_s17  ;;  %1288 = vrot.lane.b32.xlu1 %v5672_v15, %s8071_s17 }
  0x74   : > { %1362 = vrot.lane.b32.xlu0 %v5679_v17, %s8069_s18  ;;  %1364 = vrot.lane.b32.xlu1 %v5669_v14, %s8069_s18 }
  0x78   : > { %1441 = vrot.lane.b32.xlu0 %v5716_v24, %s8065_s10  ;;  %1517 = vrot.lane.b32.xlu1 %v5719_v25, %s5590_s11  ;;  %s8110_s10 = smov 9  }
  0x7c   : > { %1592 = vrot.lane.b32.xlu0 %v5716_v24, %s8100_s12  ;;  %1668 = vrot.lane.b32.xlu1 %v5719_v25, %s8163_s13 }
  0x80   : > { %867 = vrot.lane.b32.xlu0 %v5755_v30, %s8188_s19  ;;  %869 = vrot.lane.b32.xlu1 %v5758_v31, %s8188_s19 }
  0x84   : > { %943 = vrot.lane.b32.xlu0 %v5785_v33, %s8112_s21  ;;  %945 = vrot.lane.b32.xlu1 %v5755_v30, %s8112_s21 }
  0x86   : > { %v5791_v34 = vpop.permute.xlu1 %2419  ;;  %v2343_v35 = vpop.permute.xlu0 %2342 }
  0x87   : > { %v2428_v42 = vrot.slane %v5791_v34, 4  ;;  %v2352_v43 = vrot.slane %v2343_v35, 4 }
  0x88   : > { %1018 = vrot.lane.b32.xlu0 %v5755_v30, %s5598_s22  ;;  %1020 = vrot.lane.b32.xlu1 %v5758_v31, %s5598_s22 }
  0x8a   : > { %v5800_v37 = vpop.permute.xlu1 %2568  ;;  %v2492_v38 = vpop.permute.xlu0 %2491 }
  0x8b   : > { %v2577_v52 = vrot.slane %v5800_v37, 4  ;;  %v2501_v53 = vrot.slane %v2492_v38, 4 }
  0x8c   : > { %1094 = vrot.lane.b32.xlu0 %v5785_v33, %s8110_s10  ;;  %1096 = vrot.lane.b32.xlu1 %v5755_v30, %s8110_s10 }
  0x8e   : > { %v2418_v40 = vpop.permute.xlu1 %2417  ;;  %v5810_v41 = vpop.permute.xlu0 %2344 }
  0x8f   : > { %v2427_v44 = vrot.slane %v2418_v40, 4  ;;  %v2353_v45 = vrot.slane %v5810_v41, 4 }
  0x90   : > { %1173 = vrot.lane.b32.xlu0 %v5808_v39, %s8067_s14  ;;  %1290 = vrot.lane.b32.xlu1 %v5716_v24, %s8071_s17  ;;  %s5600_s14 = smov 99   ;;  %s5602_s17 = smov 90  }
  0x91   : > { %v2432_v46 = vsel %vm277_vm0, %v2427_v44, %v2428_v42  ;;  %v2357_v47 = vsel %vm277_vm0, %v2352_v43, %v2353_v45 }
  0x92   : > { %v2433_v48 = vsel %vm430_vm1, %v2418_v40, %v2432_v46  ;;  %v2358_v49 = vsel %vm355_vm2, %v2343_v35, %v2357_v47  ;;  %v5826_v50 = vpop.permute.xlu1 %2493  ;;  %v2567_v51 = vpop.permute.xlu0 %2566 }
  0x93   : > { %2444 = vst [vmem:[#allocation2 + $0x1c0] sm:$0xcc] %v2433_v48  ;;  %2369 = vst [vmem:[#allocation2 + $0x1c0] sm:$0x33] %v2358_v49  ;;  %v2502_v54 = vrot.slane %v5826_v50, 4  ;;  %v2576_v55 = vrot.slane %v2567_v51, 4 }
  0x94   : > { %1366 = vrot.lane.b32.xlu0 %v5719_v25, %s8069_s18  ;;  %565 = vrot.lane.b32.xlu1 %v5755_v30, %s5579_s26  ;;  %s5601_s18 = smov 91   ;;  %v5885_v25 = vrot.slane %v920_v18, %v5643_v5 }
  0x95   : > { %v2506_v56 = vsel %vm277_vm0, %v2501_v53, %v2502_v54  ;;  %v2581_v57 = vsel %vm277_vm0, %v2576_v55, %v2577_v52 }
  0x96   : > { %v2507_v58 = vsel %vm506_vm3, %v2492_v38, %v2506_v56  ;;  %v2582_v59 = vsel %vm581_vm4, %v2567_v51, %v2581_v57  ;;  %v2042_v60 = vpop.permute.xlu0 %2041  ;;  %v5842_v61 = vpop.permute.xlu1 %2043 }
  0x97   : > { %2518 = vst [vmem:[#allocation2 + $0x1e0] sm:$0x33] %v2507_v58  ;;  %2593 = vst [vmem:[#allocation2 + $0x1e0] sm:$0xcc] %v2582_v59  ;;  %v2051_v62 = vrot.slane %v2042_v60, 4  ;;  %v2052_v63 = vrot.slane %v5842_v61, 4 }
  0x98   : > { %641 = vrot.lane.b32.xlu1 %v5785_v33, %s5600_s14  ;;  %567 = vrot.lane.b32.xlu0 %v5758_v31, %s5579_s26 }
  0x99   : > { %v2056_v0 = vsel %vm277_vm0, %v2051_v62, %v2052_v63 }
  0x9a   : > { %v2058_v1 = vsel %vm8073_vm5, %v2042_v60, %v2056_v0  ;;  %v2118_v2 = vpop.permute.xlu0 %2117  ;;  %v5853_v4 = vpop.permute.xlu1 %2119  ;;  %v4261_v12 = vld [vmem:[#allocation2 + $0x1c0] sm:$0xff] }
  0x9b   : > { %2069 = vst [vmem:[#allocation2 + $0x180] sm:$0x33] %v2058_v1  ;;  %v2127_v6 = vrot.slane %v2118_v2, 4  ;;  %v2128_v7 = vrot.slane %v5853_v4, 4 }
  0x9c   : > { %716 = vrot.lane.b32.xlu1 %v5755_v30, %s5601_s18  ;;  %643 = vrot.lane.b32.xlu0 %v5755_v30, %s5600_s14 }
  0x9d   : > { %v2132_v8 = vsel %vm277_vm0, %v2127_v6, %v2128_v7 }
  0x9e   : > { %v2134_v9 = vsel %vm2133_vm6, %v2118_v2, %v2132_v8  ;;  %v2193_v10 = vpop.permute.xlu0 %2192  ;;  %v5864_v11 = vpop.permute.xlu1 %2194  ;;  %v4265_v13 = vld [vmem:[#allocation2 + $0x1e0] sm:$0xff] }
  0x9f   : > { %2145 = vst [vmem:[#allocation2 + $0x180] sm:$0xcc] %v2134_v9  ;;  %v2202_v14 = vrot.slane %v2193_v10, 4  ;;  %v2203_v15 = vrot.slane %v5864_v11, 4  ;;  %v5394_v16 = vcombine.high %v4261_v12, %v4265_v13  ;;  %v5393_v17 = vcombine.low %v4261_v12, %v4265_v13 }
  0xa0   : > { %792 = vrot.lane.b32.xlu1 %v5785_v33, %s5602_s17  ;;  %718 = vrot.lane.b32.xlu0 %v5758_v31, %s5601_s18 }
  0xa1   : > { %v2207_v19 = vsel %vm277_vm0, %v2202_v14, %v2203_v15  ;;  %4888 = vmatprep.subr.bf16.mxu0 %v5394_v16 }
  0xa2   : > { %v2209_v20 = vsel %vm2208_vm7, %v2193_v10, %v2207_v19  ;;  %4889 = vmatpush1.bf16.msra.mxu0 %v5393_v17  ;;  %v2269_v21 = vpop.permute.xlu0 %2268  ;;  %v5877_v22 = vpop.permute.xlu1 %2270 }
  0xa3   : > { %2220 = vst [vmem:[#allocation2 + $0x1a0] sm:$0x33] %v2209_v20  ;;  %v2278_v23 = vrot.slane %v2269_v21, 4  ;;  %v2279_v24 = vrot.slane %v5877_v22, 4 }
  0xa4   : > { %871 = vrot.lane.b32.xlu1 %v5808_v39, %s8188_s19  ;;  %794 = vrot.lane.b32.xlu0 %v5755_v30, %s5602_s17 }
  0xa5   : > { %v2283_v26 = vsel %vm277_vm0, %v2278_v23, %v2279_v24 }
  0xa6   : > { %v2284_v27 = vsel %vm8115_vm8, %v2269_v21, %v2283_v26  ;;  %v5891_v28 = vpop.permute.xlu0 %2346  ;;  %v5893_v29 = vpop.permute.xlu1 %2421  ;;  %v4253_v53 = vld [vmem:[#allocation2 + $0x180] sm:$0xff] }
  0xa7   : > { %2295 = vst [vmem:[#allocation2 + $0x1a0] sm:$0xcc] %v2284_v27  ;;  %v8127_v32 = vrot.slane %v5891_v28, 4  ;;  %v8130_v35 = vrot.slane %v5893_v29, 4 }
  0xa8   : > { %1022 = vrot.lane.b32.xlu1 %v5808_v39, %s5598_s22  ;;  %947 = vrot.lane.b32.xlu0 %v5885_v25, %s8112_s21 }
  0xa9   : > { %v2359_v36 = vsel %vm277_vm0, %v2353_v45, %v8127_v32  ;;  %v2434_v38 = vsel %vm277_vm0, %v2428_v42, %v8130_v35 }
  0xaa   : > { %v2360_v40 = vsel %vm355_vm2, %v5810_v41, %v2359_v36  ;;  %v2435_v43 = vsel %vm430_vm1, %v5791_v34, %v2434_v38  ;;  %v5915_v44 = vpop.permute.xlu0 %2495  ;;  %v5917_v46 = vpop.permute.xlu1 %2570 }
  0xab   : > { %2370 = vst [vmem:[#allocation2 + $0x1c8] sm:$0x33] %v2360_v40  ;;  %2445 = vst [vmem:[#allocation2 + $0x1c8] sm:$0xcc] %v2435_v43  ;;  %v8125_v45 = vrot.slane %v5915_v44, 4  ;;  %v8126_v47 = vrot.slane %v5917_v46, 4 }
  0xac   : > { %1098 = vrot.lane.b32.xlu0 %v5885_v25, %s8110_s10  ;;  %262 = vrot.lane.b32.xlu1 %v5755_v30, %s5584_s5 }
  0xad   : > { %v2508_v34 = vsel %vm277_vm0, %v2502_v54, %v8125_v45  ;;  %v2583_v41 = vsel %vm277_vm0, %v2577_v52, %v8126_v47 }
  0xae   : > { %v2509_v42 = vsel %vm506_vm3, %v5826_v50, %v2508_v34  ;;  %v2584_v48 = vsel %vm581_vm4, %v5800_v37, %v2583_v41  ;;  %v1740_v49 = vpop.permute.xlu0 %1739  ;;  %v5939_v51 = vpop.permute.xlu1 %1741  ;;  %v4257_v55 = vld [vmem:[#allocation2 + $0x1a0] sm:$0xff] }
  0xaf   : > { %2519 = vst [vmem:[#allocation2 + $0x1e8] sm:$0x33] %v2509_v42  ;;  %2594 = vst [vmem:[#allocation2 + $0x1e8] sm:$0xcc] %v2584_v48  ;;  %v1749_v54 = vrot.slane %v1740_v49, 4  ;;  %v1750_v56 = vrot.slane %v5939_v51, 4  ;;  %v5386_v57 = vcombine.high %v4253_v53, %v4257_v55  ;;  %v5385_v58 = vcombine.low %v4253_v53, %v4257_v55 }
  0xb0   : > { %339 = vrot.lane.b32.xlu1 %v5785_v33, %s5578_s25  ;;  %264 = vrot.lane.b32.xlu0 %v5758_v31, %s5584_s5 }
  0xb1   : > { %v1754_v37 = vsel %vm277_vm0, %v1749_v54, %v1750_v56  ;;  %4890 = vmatprep.subr.bf16.mxu0 %v5386_v57 }
  0xb2   : > { %v1756_v50 = vsel %vm8074_vm9, %v1740_v49, %v1754_v37  ;;  %4891 = vmatpush1.bf16.msra.mxu0 %v5385_v58  ;;  %v1816_v52 = vpop.permute.xlu0 %1815  ;;  %v5950_v59 = vpop.permute.xlu1 %1817  ;;  %v4262_v8 = vld [vmem:[#allocation2 + $0x1c8] sm:$0xff] }
  0xb3   : > { %1767 = vst [vmem:[#allocation2 + $0x140] sm:$0x33] %v1756_v50  ;;  %v1825_v60 = vrot.slane %v1816_v52, 4  ;;  %v1826_v62 = vrot.slane %v5950_v59, 4 }
  0xb4   : > { %414 = vrot.lane.b32.xlu1 %v5755_v30, %s8133_s24  ;;  %341 = vrot.lane.b32.xlu0 %v5755_v30, %s5578_s25 }
  0xb5   : > { %v1830_v0 = vsel %vm277_vm0, %v1825_v60, %v1826_v62 }
  0xb6   : > { %v1832_v1 = vsel %vm8138_vm10, %v1816_v52, %v1830_v0  ;;  %v1891_v2 = vpop.permute.xlu0 %1890  ;;  %v5961_v6 = vpop.permute.xlu1 %1892  ;;  %v4266_v9 = vld [vmem:[#allocation2 + $0x1e8] sm:$0xff] }
  0xb7   : > { %1843 = vst [vmem:[#allocation2 + $0x140] sm:$0xcc] %v1832_v1  ;;  %v1900_v10 = vrot.slane %v1891_v2, 4  ;;  %v1901_v12 = vrot.slane %v5961_v6, 4  ;;  %v5396_v13 = vcombine.high %v4262_v8, %v4266_v9  ;;  %v5395_v14 = vcombine.low %v4262_v8, %v4266_v9 }
  0xb8   : > { %490 = vrot.lane.b32.xlu1 %v5785_v33, %s5580_s27  ;;  %416 = vrot.lane.b32.xlu0 %v5758_v31, %s8133_s24 }
  0xb9   : > { %v1905_v16 = vsel %vm277_vm0, %v1900_v10, %v1901_v12  ;;  %4929 = vmatprep.subr.bf16.mxu1 %v5396_v13 }
  0xba   : > { %v1907_v17 = vsel %vm8076_vm11, %v1891_v2, %v1905_v16  ;;  %4930 = vmatpush1.bf16.msra.mxu1 %v5395_v14  ;;  %v1967_v18 = vpop.permute.xlu0 %1966  ;;  %v5972_v19 = vpop.permute.xlu1 %1968 }
  0xbb   : > { %1918 = vst [vmem:[#allocation2 + $0x160] sm:$0x33] %v1907_v17  ;;  %v1976_v20 = vrot.slane %v1967_v18, 4  ;;  %v1977_v21 = vrot.slane %v5972_v19, 4 }
  0xbc   : > { %569 = vrot.lane.b32.xlu1 %v5808_v39, %s5579_s26  ;;  %492 = vrot.lane.b32.xlu0 %v5755_v30, %s5580_s27 }
  0xbd   : > { %v1981_v31 = vsel %vm277_vm0, %v1976_v20, %v1977_v21 }
  0xbe   : > { %v1983_v33 = vsel %vm8075_vm12, %v1967_v18, %v1981_v31  ;;  %v5983_v23 = vpop.permute.xlu0 %2045  ;;  %v5985_v26 = vpop.permute.xlu1 %2121  ;;  %v4245_v54 = vld [vmem:[#allocation2 + $0x140] sm:$0xff] }
  0xbf   : > { %1994 = vst [vmem:[#allocation2 + $0x160] sm:$0xcc] %v1983_v33  ;;  %v8123_v27 = vrot.slane %v5983_v23, 4  ;;  %v8124_v36 = vrot.slane %v5985_v26, 4 }
  0xc0   : > { %720 = vrot.lane.b32.xlu1 %v5808_v39, %s5601_s18  ;;  %645 = vrot.lane.b32.xlu0 %v5885_v25, %s5600_s14 }
  0xc1   : > { %v2059_v30 = vsel %vm277_vm0, %v2052_v63, %v8123_v27  ;;  %v2135_v38 = vsel %vm277_vm0, %v2128_v7, %v8124_v36  ;;  %v4055_v7 = vld [vmem:[%s5648_s20 + $0x2] sm:$0xff] }
  0xc2   : > { %v2060_v40 = vsel %vm8073_vm5, %v5842_v61, %v2059_v30  ;;  %v2136_v43 = vsel %vm2133_vm6, %v5853_v4, %v2135_v38  ;;  %v6007_v34 = vpop.permute.xlu0 %2196  ;;  %v6009_v41 = vpop.permute.xlu1 %2272  ;;  %v4061_v50 = vcombine.high %v4055_v7, %v4055_v7  ;;  %vm8078_vm5 = vcmask 310272  }
  0xc3   : > { %2070 = vst [vmem:[#allocation2 + $0x188] sm:$0x33] %v2060_v40  ;;  %2146 = vst [vmem:[#allocation2 + $0x188] sm:$0xcc] %v2136_v43  ;;  %v8120_v63 = vrot.slane %v6007_v34, 4  ;;  %v8122_v42 = vrot.slane %v6009_v41, 4 }
  0xc4   : > { %266 = vrot.lane.b32.xlu1 %v5808_v39, %s5584_s5  ;;  %796 = vrot.lane.b32.xlu0 %v5885_v25, %s5602_s17  ;;  %v6057_v9 = vrot.slane %v4061_v50, %v5643_v5 }
  0xc5   : > { %v2210_v61 = vsel %vm277_vm0, %v2203_v15, %v8120_v63  ;;  %v2285_v4 = vsel %vm277_vm0, %v2279_v24, %v8122_v42 }
  0xc6   : > { %v2211_v48 = vsel %vm2208_vm7, %v5864_v11, %v2210_v61  ;;  %v2286_v49 = vsel %vm8115_vm8, %v5877_v22, %v2285_v4  ;;  %v1438_v53 = vpop.permute.xlu0 %1437  ;;  %v6032_v55 = vpop.permute.xlu1 %1439  ;;  %v4249_v57 = vld [vmem:[#allocation2 + $0x160] sm:$0xff]  ;;  %v6040_v11 = vrot.slane %v4055_v7, %v5643_v5  ;;  %v4135_v22 = vcombine.low %v4055_v7, %v4055_v7 }
  0xc7   : > { %2221 = vst [vmem:[#allocation2 + $0x1a8] sm:$0x33] %v2211_v48  ;;  %2296 = vst [vmem:[#allocation2 + $0x1a8] sm:$0xcc] %v2286_v49  ;;  %v1447_v15 = vrot.slane %v1438_v53, 4  ;;  %v1448_v58 = vrot.slane %v6032_v55, 4  ;;  %v5378_v37 = vcombine.high %v4245_v54, %v4249_v57  ;;  %v5377_v24 = vcombine.low %v4245_v54, %v4249_v57 }
  0xc8   : > { %418 = vrot.lane.b32.xlu1 %v5808_v39, %s8133_s24  ;;  %343 = vrot.lane.b32.xlu0 %v5885_v25, %s5578_s25  ;;  %v6054_v8 = vrot.slane %v4135_v22, %v5643_v5 }
  0xc9   : > { %v1452_v52 = vsel %vm277_vm0, %v1447_v15, %v1448_v58  ;;  %4892 = vmatprep.subr.bf16.mxu0 %v5378_v37 }
  0xca   : > { %v1454_v60 = vsel %vm8077_vm13, %v1438_v53, %v1452_v52  ;;  %4893 = vmatpush1.bf16.msra.mxu0 %v5377_v24  ;;  %v1514_v0 = vpop.permute.xlu0 %1513  ;;  %v6046_v1 = vpop.permute.xlu1 %1515  ;;  %v4254_v17 = vld [vmem:[#allocation2 + $0x188] sm:$0xff] }
  0xcb   : > { %1465 = vst [vmem:[#allocation2 + $0x100] sm:$0x33] %v1454_v60  ;;  %v1523_v39 = vrot.slane %v1514_v0, 4  ;;  %v1524_v2 = vrot.slane %v6046_v1, 4 }
  0xcc   : > { %4098 = vrot.lane.b32.xlu1 %v6040_v11, %s5582_s29  ;;  %494 = vrot.lane.b32.xlu0 %v5885_v25, %s5580_s27 }
  0xcd   : > { %v1528_v10 = vsel %vm277_vm0, %v1523_v39, %v1524_v2 }
  0xce   : > { %v1530_v13 = vsel %vm8080_vm14, %v1514_v0, %v1528_v10  ;;  %v1589_v14 = vpop.permute.xlu0 %1588  ;;  %v6063_v16 = vpop.permute.xlu1 %1590  ;;  %v4258_v18 = vld [vmem:[#allocation2 + $0x1a8] sm:$0xff] }
  0xcf   : > { %1541 = vst [vmem:[#allocation2 + $0x100] sm:$0xcc] %v1530_v13  ;;  %v1598_v25 = vrot.slane %v1589_v14, 4  ;;  %v1599_v20 = vrot.slane %v6063_v16, 4  ;;  %v5388_v31 = vcombine.high %v4254_v17, %v4258_v18  ;;  %v5387_v33 = vcombine.low %v4254_v17, %v4258_v18 }
  0xd0   : > { %4173 = vrot.lane.b32.xlu1 %v6054_v8, %s5583_s30  ;;  %4100 = vrot.lane.b32.xlu0 %v6057_v9, %s5582_s29 }
  0xd1   : > { %v1603_v30 = vsel %vm277_vm0, %v1598_v25, %v1599_v20  ;;  %4931 = vmatprep.subr.bf16.mxu1 %v5388_v31 }
  0xd2   : > { %v1605_v38 = vsel %vm8079_vm15, %v1589_v14, %v1603_v30  ;;  %4932 = vmatpush1.bf16.msra.mxu1 %v5387_v33  ;;  %v1665_v40 = vpop.permute.xlu0 %1664  ;;  %v6074_v43 = vpop.permute.xlu1 %1666 }
  0xd3   : > { %1616 = vst [vmem:[#allocation2 + $0x120] sm:$0x33] %v1605_v38  ;;  %v1674_v61 = vrot.slane %v1665_v40, 4  ;;  %v1675_v4 = vrot.slane %v6074_v43, 4 }
  0xd4   : > { %3800 = vrot.lane.b32.xlu1 %v6040_v11, %s8086_s7  ;;  %4175 = vrot.lane.b32.xlu0 %v6040_v11, %s5583_s30 }
  0xd5   : > { %v1679_v7 = vsel %vm277_vm0, %v1674_v61, %v1675_v4 }
  0xd6   : > { %v1681_v48 = vsel %vm8078_vm5, %v1665_v40, %v1679_v7  ;;  %v6085_v49 = vpop.permute.xlu0 %1743  ;;  %v6087_v53 = vpop.permute.xlu1 %1819  ;;  %v4237_v14 = vld [vmem:[#allocation2 + $0x100] sm:$0xff] }
  0xd7   : > { %1692 = vst [vmem:[#allocation2 + $0x120] sm:$0xcc] %v1681_v48  ;;  %v8105_v54 = vrot.slane %v6085_v49, 4  ;;  %v8106_v57 = vrot.slane %v6087_v53, 4 }
  0xd8   : > { %3875 = vrot.lane.b32.xlu1 %v6054_v8, %s8083_s8  ;;  %3802 = vrot.lane.b32.xlu0 %v6057_v9, %s8086_s7 }
  0xd9   : > { %v1757_v15 = vsel %vm277_vm0, %v1750_v56, %v8105_v54  ;;  %v1833_v37 = vsel %vm277_vm0, %v1826_v62, %v8106_v57  ;;  %v4056_v62 = vld [vmem:[%s5648_s20 + $0xa] sm:$0xff] }
  0xda   : > { %v1758_v24 = vsel %vm8074_vm9, %v5939_v51, %v1757_v15  ;;  %v1834_v22 = vsel %vm8138_vm10, %v5950_v59, %v1833_v37  ;;  %v6109_v50 = vpop.permute.xlu0 %1894  ;;  %v6111_v52 = vpop.permute.xlu1 %1970  ;;  %vm8090_vm9 = vcmask 7168  }
  0xdb   : > { %1768 = vst [vmem:[#allocation2 + $0x148] sm:$0x33] %v1758_v24  ;;  %1844 = vst [vmem:[#allocation2 + $0x148] sm:$0xcc] %v1834_v22  ;;  %v8096_v56 = vrot.slane %v6109_v50, 4  ;;  %v8098_v60 = vrot.slane %v6111_v52, 4 }
  0xdc   : > { %3949 = vrot.lane.b32.xlu1 %v6040_v11, %s8081_s9  ;;  %3877 = vrot.lane.b32.xlu0 %v6040_v11, %s8083_s8 }
  0xdd   : > { %v1908_v51 = vsel %vm277_vm0, %v1901_v12, %v8096_v56  ;;  %v1984_v59 = vsel %vm277_vm0, %v1977_v21, %v8098_v60 }
  0xde   : > { %v1909_v0 = vsel %vm8076_vm11, %v5961_v6, %v1908_v51  ;;  %v1985_v39 = vsel %vm8075_vm12, %v5972_v19, %v1984_v59  ;;  %v1170_v10 = vpop.permute.xlu0 %1169  ;;  %v6134_v13 = vpop.permute.xlu1 %1171  ;;  %v4241_v17 = vld [vmem:[#allocation2 + $0x120] sm:$0xff]  ;;  %v6142_v6 = vrot.slane %v4056_v62, %v5643_v5  ;;  %v4150_v19 = vcombine.low %v4056_v62, %v4056_v62 }
  0xdf   : > { %1919 = vst [vmem:[#allocation2 + $0x168] sm:$0x33] %v1909_v0  ;;  %1995 = vst [vmem:[#allocation2 + $0x168] sm:$0xcc] %v1985_v39  ;;  %v1179_v12 = vrot.slane %v1170_v10, 4  ;;  %v1180_v18 = vrot.slane %v6134_v13, 4  ;;  %v5370_v25 = vcombine.high %v4237_v14, %v4241_v17  ;;  %v5369_v21 = vcombine.low %v4237_v14, %v4241_v17 }
  0xe0   : > { %4024 = vrot.lane.b32.xlu1 %v6054_v8, %s8143_s28  ;;  %3951 = vrot.lane.b32.xlu0 %v6057_v9, %s8081_s9  ;;  %vm8097_vm12 = vcmask 1039360   ;;  %v6156_v7 = vrot.slane %v4150_v19, %v5643_v5  ;;  %vm8091_vm11 = vcmask 973824  }
  0xe1   : > { %v1184_v31 = vsel %vm277_vm0, %v1179_v12, %v1180_v18  ;;  %4894 = vmatprep.subr.bf16.mxu0 %v5370_v25 }
  0xe2   : > { %v1186_v33 = vsel %vm8090_vm9, %v1170_v10, %v1184_v31  ;;  %4895 = vmatpush1.bf16.msra.mxu0 %v5369_v21  ;;  %v1287_v30 = vpop.permute.xlu0 %1286  ;;  %v6148_v38 = vpop.permute.xlu1 %1288  ;;  %v4246_v22 = vld [vmem:[#allocation2 + $0x148] sm:$0xff] }
  0xe3   : > { %1197 = vst [vmem:[#allocation2 + $0xc0] sm:$0x33] %v1186_v33  ;;  %v1296_v40 = vrot.slane %v1287_v30, 4  ;;  %v1297_v61 = vrot.slane %v6148_v38, 4 }
  0xe4   : > { %4102 = vrot.lane.b32.xlu1 %v6142_v6, %s5582_s29  ;;  %4026 = vrot.lane.b32.xlu0 %v6040_v11, %s8143_s28 }
  0xe5   : > { %v1301_v48 = vsel %vm277_vm0, %v1296_v40, %v1297_v61 }
  0xe6   : > { %v1303_v15 = vsel %vm8097_vm12, %v1287_v30, %v1301_v48  ;;  %v1363_v37 = vpop.permute.xlu0 %1362  ;;  %v6162_v24 = vpop.permute.xlu1 %1364  ;;  %v4250_v51 = vld [vmem:[#allocation2 + $0x168] sm:$0xff] }
  0xe7   : > { %1314 = vst [vmem:[#allocation2 + $0xe0] sm:$0x33] %v1303_v15  ;;  %v1372_v59 = vrot.slane %v1363_v37, 4  ;;  %v1373_v62 = vrot.slane %v6162_v24, 4  ;;  %v5380_v0 = vcombine.high %v4246_v22, %v4250_v51  ;;  %v5379_v39 = vcombine.low %v4246_v22, %v4250_v51 }
  0xe8   : > { %3502 = vrot.lane.b32.xlu1 %v6040_v11, %s5590_s11  ;;  %4177 = vrot.lane.b32.xlu0 %v6156_v7, %s5583_s30 }
  0xe9   : > { %v1377_v10 = vsel %vm277_vm0, %v1372_v59, %v1373_v62  ;;  %4933 = vmatprep.subr.bf16.mxu1 %v5380_v0 }
  0xea   : > { %v1379_v14 = vsel %vm8091_vm11, %v1363_v37, %v1377_v10  ;;  %4934 = vmatpush1.bf16.msra.mxu1 %v5379_v39  ;;  %v6173_v17 = vpop.permute.xlu0 %1441  ;;  %v6175_v12 = vpop.permute.xlu1 %1517  ;;  %v4229_v59 = vld [vmem:[#allocation2 + $0xc0] sm:$0xff] }
  0xeb   : > { %1390 = vst [vmem:[#allocation2 + $0xe0] sm:$0xcc] %v1379_v14  ;;  %v8094_v25 = vrot.slane %v6173_v17, 4  ;;  %v8095_v21 = vrot.slane %v6175_v12, 4 }
  0xec   : > { %3577 = vrot.lane.b32.xlu1 %v6054_v8, %s8100_s12  ;;  %3504 = vrot.lane.b32.xlu0 %v6057_v9, %s5590_s11 }
  0xed   : > { %v1455_v19 = vsel %vm277_vm0, %v1448_v58, %v8094_v25  ;;  %v1531_v31 = vsel %vm277_vm0, %v1524_v2, %v8095_v21 }
  0xee   : > { %v1456_v33 = vsel %vm8077_vm13, %v6032_v55, %v1455_v19  ;;  %v1532_v30 = vsel %vm8080_vm14, %v6046_v1, %v1531_v31  ;;  %v6197_v40 = vpop.permute.xlu0 %1592  ;;  %v6199_v48 = vpop.permute.xlu1 %1668  ;;  %vm883_vm13 = vcmask 728064   ;;  %vm1110_vm14 = vcmask 72704  }
  0xef   : > { %1466 = vst [vmem:[#allocation2 + $0x108] sm:$0x33] %v1456_v33  ;;  %1542 = vst [vmem:[#allocation2 + $0x108] sm:$0xcc] %v1532_v30  ;;  %v8085_v58 = vrot.slane %v6197_v40, 4  ;;  %v8093_v15 = vrot.slane %v6199_v48, 4 }
  0xf0   : > { %3651 = vrot.lane.b32.xlu1 %v6040_v11, %s8163_s13  ;;  %3579 = vrot.lane.b32.xlu0 %v6040_v11, %s8100_s12 }
  0xf1   : > { %v1606_v55 = vsel %vm277_vm0, %v1599_v20, %v8085_v58  ;;  %v1682_v1 = vsel %vm277_vm0, %v1675_v4, %v8093_v15 }
  0xf2   : > { %v1607_v2 = vsel %vm8079_vm15, %v6063_v16, %v1606_v55  ;;  %v1683_v37 = vsel %vm8078_vm5, %v6074_v43, %v1682_v1  ;;  %v868_v22 = vpop.permute.xlu0 %867  ;;  %v6221_v51 = vpop.permute.xlu1 %869  ;;  %v4233_v0 = vld [vmem:[#allocation2 + $0xe0] sm:$0xff]  ;;  %vm959_vm5 = vcmask 89088   ;;  %vm1034_vm15 = vcmask 80896  }
  0xf3   : > { %1617 = vst [vmem:[#allocation2 + $0x128] sm:$0x33] %v1607_v2  ;;  %1693 = vst [vmem:[#allocation2 + $0x128] sm:$0xcc] %v1683_v37  ;;  %v877_v20 = vrot.slane %v868_v22, 4  ;;  %v878_v39 = vrot.slane %v6221_v51, 4  ;;  %v5362_v10 = vcombine.high %v4229_v59, %v4233_v0  ;;  %v5361_v14 = vcombine.low %v4229_v59, %v4233_v0 }
  0xf4   : > { %3726 = vrot.lane.b32.xlu1 %v6054_v8, %s8168_s6  ;;  %3653 = vrot.lane.b32.xlu0 %v6057_v9, %s8163_s13  ;;  %v6246_v59 = vld [vmem:[%s5648_s20 + $0x2] sm:$0xff] }
  0xf5   : > { %v882_v16 = vsel %vm277_vm0, %v877_v20, %v878_v39  ;;  %4896 = vmatprep.subr.bf16.mxu0 %v5362_v10  ;;  %5325 = vst.sshfl [vmem:[#allocation2 + $0x280] sm:$0xf pattern:$0x76325410] %v6246_v59 }
  0xf6   : > { %v884_v43 = vsel %vm883_vm13, %v868_v22, %v882_v16  ;;  %4897 = vmatpush1.bf16.msra.mxu0 %v5361_v14  ;;  %v944_v4 = vpop.permute.xlu0 %943  ;;  %v6232_v19 = vpop.permute.xlu1 %945  ;;  %v4238_v37 = vld [vmem:[#allocation2 + $0x108] sm:$0xff] }
  0xf7   : > { %895 = vst [vmem:[#allocation2 + $0x80] sm:$0x33] %v884_v43  ;;  %v953_v31 = vrot.slane %v944_v4, 4  ;;  %v954_v33 = vrot.slane %v6232_v19, 4 }
  0xf8   : > { %3804 = vrot.lane.b32.xlu1 %v6142_v6, %s8086_s7  ;;  %3728 = vrot.lane.b32.xlu0 %v6040_v11, %s8168_s6  ;;  %s8212_s7 = smov 118  }
  0xf9   : > { %v958_v30 = vsel %vm277_vm0, %v953_v31, %v954_v33 }
  0xfa   : > { %v960_v55 = vsel %vm959_vm5, %v944_v4, %v958_v30  ;;  %v1019_v1 = vpop.permute.xlu0 %1018  ;;  %v6243_v2 = vpop.permute.xlu1 %1020  ;;  %v4242_v22 = vld [vmem:[#allocation2 + $0x128] sm:$0xff] }
  0xfb   : > { %971 = vst [vmem:[#allocation2 + $0x80] sm:$0xcc] %v960_v55  ;;  %v1028_v0 = vrot.slane %v1019_v1, 4  ;;  %v1029_v20 = vrot.slane %v6243_v2, 4  ;;  %v5372_v10 = vcombine.high %v4238_v37, %v4242_v22  ;;  %v5371_v14 = vcombine.low %v4238_v37, %v4242_v22 }
  0xfc   : > { %3953 = vrot.lane.b32.xlu1 %v6142_v6, %s8081_s9  ;;  %3879 = vrot.lane.b32.xlu0 %v6156_v7, %s8083_s8  ;;  %s8210_s9 = smov 127   ;;  %s8211_s8 = smov 119  }
  0xfd   : > { %v1033_v16 = vsel %vm277_vm0, %v1028_v0, %v1029_v20  ;;  %4935 = vmatprep.subr.bf16.mxu1 %v5372_v10 }
  0xfe   : > { %v1035_v43 = vsel %vm1034_vm15, %v1019_v1, %v1033_v16  ;;  %4936 = vmatpush1.bf16.msra.mxu1 %v5371_v14  ;;  %v1095_v4 = vpop.permute.xlu0 %1094  ;;  %v6258_v31 = vpop.permute.xlu1 %1096 }
  0xff   : > { %1046 = vst [vmem:[#allocation2 + $0xa0] sm:$0x33] %v1035_v43  ;;  %v1104_v30 = vrot.slane %v1095_v4, 4  ;;  %v1105_v55 = vrot.slane %v6258_v31, 4 }
 0x100   : > { %3279 = vrot.lane.b32.xlu1 %v6054_v8, %s8210_s9  ;;  %4028 = vrot.lane.b32.xlu0 %v6156_v7, %s8143_s28 }
 0x101   : > { %v1109_v37 = vsel %vm277_vm0, %v1104_v30, %v1105_v55 }
 0x102   : > { %v1111_v1 = vsel %vm1110_vm14, %v1095_v4, %v1109_v37  ;;  %v6269_v22 = vpop.permute.xlu0 %1173  ;;  %v6271_v0 = vpop.permute.xlu1 %1290 }
 0x103   : > { %1122 = vst [vmem:[#allocation2 + $0xa0] sm:$0xcc] %v1111_v1  ;;  %v8089_v10 = vrot.slane %v6269_v22, 4  ;;  %v8092_v14 = vrot.slane %v6271_v0, 4 }
 0x104   : > { %3353 = vrot.lane.b32.xlu1 %v6040_v11, %s8211_s8  ;;  %3281 = vrot.lane.b32.xlu0 %v6040_v11, %s8210_s9 }
 0x105   : > { %v1187_v16 = vsel %vm277_vm0, %v1180_v18, %v8089_v10  ;;  %v1304_v43 = vsel %vm277_vm0, %v1297_v61, %v8092_v14 }
 0x106   : > { %v1188_v4 = vsel %vm8090_vm9, %v6134_v13, %v1187_v16  ;;  %v1305_v30 = vsel %vm8097_vm12, %v6148_v38, %v1304_v43  ;;  %v6293_v37 = vpop.permute.xlu0 %1366  ;;  %v566_v1 = vpop.permute.xlu1 %565  ;;  %v4221_v16 = vld [vmem:[#allocation2 + $0x80] sm:$0xff]  ;;  %vm657_vm9 = vcmask 809984   ;;  %vm808_vm12 = vcmask 736256  }
 0x107   : > { %1198 = vst [vmem:[#allocation2 + $0xc8] sm:$0x33] %v1188_v4  ;;  %1315 = vst [vmem:[#allocation2 + $0xe8] sm:$0x33] %v1305_v30  ;;  %v8088_v58 = vrot.slane %v6293_v37, 4 }
 0x108   : > { %3428 = vrot.lane.b32.xlu1 %v6054_v8, %s8212_s7  ;;  %3355 = vrot.lane.b32.xlu0 %v6057_v9, %s8211_s8  ;;  %v575_v8 = vrot.slane %v566_v1, 4 }
 0x109   : > { %v1380_v13 = vsel %vm277_vm0, %v1373_v62, %v8088_v58  ;;  %v2895_v62 = vld [vmem:[%s5648_s20] sm:$0xff] }
 0x10a   : > { %v1381_v18 = vsel %vm8091_vm11, %v6162_v24, %v1380_v13  ;;  %v642_v38 = vpop.permute.xlu1 %641  ;;  %v6307_v61 = vpop.permute.xlu0 %567  ;;  %v4225_v43 = vld [vmem:[#allocation2 + $0xa0] sm:$0xff]  ;;  %vm732_vm11 = vcmask 744448  }
 0x10b   : > { %1391 = vst [vmem:[#allocation2 + $0xe8] sm:$0xcc] %v1381_v18  ;;  %v576_v4 = vrot.slane %v6307_v61, 4  ;;  %v5354_v9 = vcombine.high %v4221_v16, %v4225_v43  ;;  %v5353_v30 = vcombine.low %v4221_v16, %v4225_v43  ;;  %v651_v10 = vrot.slane %v642_v38, 4 }
 0x10c   : > { %3506 = vrot.lane.b32.xlu1 %v6142_v6, %s5590_s11  ;;  %3430 = vrot.lane.b32.xlu0 %v6040_v11, %s8212_s7  ;;  %v6327_v11 = vrot.slane %v2895_v62, %v5643_v5  ;;  %v2975_v43 = vcombine.low %v2895_v62, %v2895_v62 }
 0x10d   : > { %v580_v24 = vsel %vm277_vm0, %v575_v8, %v576_v4  ;;  %4898 = vmatprep.subr.bf16.mxu0 %v5354_v9 }
 0x10e   : > { %v582_v13 = vsel %vm581_vm4, %v566_v1, %v580_v24  ;;  %4899 = vmatpush1.bf16.msra.mxu0 %v5353_v30  ;;  %v717_v18 = vpop.permute.xlu1 %716  ;;  %v6319_v58 = vpop.permute.xlu0 %643  ;;  %v2901_v1 = vcombine.high %v2895_v62, %v2895_v62 }
 0x10f   : > { %593 = vst [vmem:[#allocation2 + $0x40] sm:$0x33] %v582_v13  ;;  %v652_v16 = vrot.slane %v6319_v58, 4  ;;  %v4230_v13 = vld [vmem:[#allocation2 + $0xc8] sm:$0xff]  ;;  %v726_v15 = vrot.slane %v717_v18, 4 }
 0x110   : > { %3655 = vrot.lane.b32.xlu1 %v6142_v6, %s8163_s13  ;;  %3581 = vrot.lane.b32.xlu0 %v6156_v7, %s8100_s12  ;;  %s8213_s12 = smov 1  }
 0x111   : > { %v656_v8 = vsel %vm277_vm0, %v651_v10, %v652_v16  ;;  %v6341_v10 = vrot.slane %v2975_v43, %v5643_v5 }
 0x112   : > { %v658_v9 = vsel %vm657_vm9, %v642_v38, %v656_v8  ;;  %v793_v30 = vpop.permute.xlu1 %792  ;;  %v6333_v24 = vpop.permute.xlu0 %718  ;;  %v4234_v14 = vld [vmem:[#allocation2 + $0xe8] sm:$0xff]  ;;  %v6344_v38 = vrot.slane %v2901_v1, %v5643_v5 }
 0x113   : > { %669 = vst [vmem:[#allocation2 + $0x40] sm:$0xcc] %v658_v9  ;;  %v727_v25 = vrot.slane %v6333_v24, 4  ;;  %v5364_v21 = vcombine.high %v4230_v13, %v4234_v14  ;;  %v5363_v56 = vcombine.low %v4230_v13, %v4234_v14  ;;  %v802_v13 = vrot.slane %v793_v30, 4 }
 0x114   : > { %2938 = vrot.lane.b32.xlu1 %v6327_v11, %s8112_s21  ;;  %3730 = vrot.lane.b32.xlu0 %v6156_v7, %s8168_s6 }
 0x115   : > { %v731_v62 = vsel %vm277_vm0, %v726_v15, %v727_v25  ;;  %4937 = vmatprep.subr.bf16.mxu1 %v5364_v21  ;;  %v3197_v15 = vcombine.high %v6246_v59, %v6246_v59 }
 0x116   : > { %v733_v8 = vsel %vm732_vm11, %v717_v18, %v731_v62  ;;  %4938 = vmatpush1.bf16.msra.mxu1 %v5363_v56  ;;  %v6350_v14 = vpop.permute.xlu1 %871  ;;  %v6352_v9 = vpop.permute.xlu0 %794 }
 0x117   : > { %744 = vst [vmem:[#allocation2 + $0x60] sm:$0x33] %v733_v8  ;;  %v8099_v43 = vrot.slane %v6350_v14, 4  ;;  %v803_v1 = vrot.slane %v6352_v9, 4 }
 0x118   : > { %3013 = vrot.lane.b32.xlu1 %v6341_v10, %s5598_s22  ;;  %2940 = vrot.lane.b32.xlu0 %v6344_v38, %s8112_s21  ;;  %5326 = vst.sshfl [vmem:[#allocation2 + $0x288] sm:$0xf pattern:$0x76325410] %v3197_v15 }
 0x119   : > { %v885_v56 = vsel %vm277_vm0, %v878_v39, %v8099_v43  ;;  %v807_v21 = vsel %vm277_vm0, %v802_v13, %v803_v1 }
 0x11a   : > { %v886_v18 = vsel %vm883_vm13, %v6221_v51, %v885_v56  ;;  %v809_v62 = vsel %vm808_vm12, %v793_v30, %v807_v21  ;;  %v6373_v8 = vpop.permute.xlu1 %1022  ;;  %v6375_v60 = vpop.permute.xlu0 %947 }
 0x11b   : > { %896 = vst [vmem:[#allocation2 + $0x88] sm:$0x33] %v886_v18  ;;  %820 = vst [vmem:[#allocation2 + $0x60] sm:$0xcc] %v809_v62  ;;  %v8104_v39 = vrot.slane %v6373_v8, 4  ;;  %v8103_v43 = vrot.slane %v6375_v60, 4 }
 0x11c   : > { %3087 = vrot.lane.b32.xlu1 %v6327_v11, %s8110_s10  ;;  %3015 = vrot.lane.b32.xlu0 %v6327_v11, %s5598_s22  ;;  %v4213_v18 = vld [vmem:[#allocation2 + $0x40] sm:$0xff] }
 0x11d   : > { %v1036_v51 = vsel %vm277_vm0, %v1029_v20, %v8104_v39  ;;  %v961_v59 = vsel %vm277_vm0, %v954_v33, %v8103_v43 }
 0x11e   : > { %v1037_v30 = vsel %vm1034_vm15, %v6243_v2, %v1036_v51  ;;  %v962_v13 = vsel %vm959_vm5, %v6232_v19, %v961_v59  ;;  %v6397_v56 = vpop.permute.xlu0 %1098  ;;  %v263_v21 = vpop.permute.xlu1 %262 }
 0x11f   : > { %1047 = vst [vmem:[#allocation2 + $0xa8] sm:$0x33] %v1037_v30  ;;  %972 = vst [vmem:[#allocation2 + $0x88] sm:$0xcc] %v962_v13  ;;  %v8102_v15 = vrot.slane %v6397_v56, 4  ;;  %v272_v51 = vrot.slane %v263_v21, 4 }
 0x120   : > { %3162 = vrot.lane.b32.xlu1 %v6341_v10, %s8213_s12  ;;  %3089 = vrot.lane.b32.xlu0 %v6344_v38, %s8110_s10 }
 0x121   : > { %v1112_v33 = vsel %vm277_vm0, %v1105_v55, %v8102_v15 }
 0x122   : > { %v1113_v19 = vsel %vm1110_vm14, %v6258_v31, %v1112_v33  ;;  %v340_v2 = vpop.permute.xlu1 %339  ;;  %v6411_v20 = vpop.permute.xlu0 %264  ;;  %v4217_v62 = vld [vmem:[#allocation2 + $0x60] sm:$0xff] }
 0x123   : > { %1123 = vst [vmem:[#allocation2 + $0xa8] sm:$0xcc] %v1113_v19  ;;  %v273_v59 = vrot.slane %v6411_v20, 4  ;;  %v5346_v30 = vcombine.high %v4213_v18, %v4217_v62  ;;  %v5345_v13 = vcombine.low %v4213_v18, %v4217_v62  ;;  %v349_v15 = vrot.slane %v340_v2, 4 }
 0x124   : > { %3283 = vrot.lane.b32.xlu1 %v6156_v7, %s8210_s9  ;;  %3164 = vrot.lane.b32.xlu0 %v6327_v11, %s8213_s12 }
 0x125   : > { %v278_v31 = vsel %vm277_vm0, %v272_v51, %v273_v59  ;;  %4900 = vmatprep.subr.bf16.mxu0 %v5346_v30 }
 0x126   : > { %v280_v55 = vsel %vm8115_vm8, %v263_v21, %v278_v31  ;;  %4901 = vmatpush1.bf16.msra.mxu0 %v5345_v13  ;;  %v415_v33 = vpop.permute.xlu1 %414  ;;  %v6422_v19 = vpop.permute.xlu0 %341  ;;  %v4222_v13 = vld [vmem:[#allocation2 + $0x88] sm:$0xff] }
 0x127   : > { %291 = vst [vmem:[#allocation2] sm:$0x33] %v280_v55  ;;  %v350_v18 = vrot.slane %v6422_v19, 4  ;;  %v424_v55 = vrot.slane %v415_v33, 4 }
 0x128   : > { %3432 = vrot.lane.b32.xlu1 %v6156_v7, %s8212_s7  ;;  %3357 = vrot.lane.b32.xlu0 %v6142_v6, %s8211_s8 }
 0x129   : > { %v354_v62 = vsel %vm277_vm0, %v349_v15, %v350_v18 }
 0x12a   : > { %v356_v21 = vsel %vm355_vm2, %v340_v2, %v354_v62  ;;  %v491_v51 = vpop.permute.xlu1 %490  ;;  %v6433_v30 = vpop.permute.xlu0 %416  ;;  %v4226_v31 = vld [vmem:[#allocation2 + $0xa8] sm:$0xff] }
 0x12b   : > { %367 = vst [vmem:[#allocation2] sm:$0xcc] %v356_v21  ;;  %v425_v43 = vrot.slane %v6433_v30, 4  ;;  %v5356_v39 = vcombine.high %v4222_v13, %v4226_v31  ;;  %v5355_v7 = vcombine.low %v4222_v13, %v4226_v31  ;;  %v500_v21 = vrot.slane %v491_v51, 4 }
 0x12c   : > { %2642 = vrot.lane.b32.xlu1 %v6344_v38, %s5600_s14  ;;  %2640 = vrot.lane.b32.xlu0 %v6327_v11, %s5600_s14 }
 0x12d   : > { %v429_v6 = vsel %vm277_vm0, %v424_v55, %v425_v43  ;;  %4939 = vmatprep.subr.bf16.mxu1 %v5356_v39  ;;  %v2970_v55 = vld [vmem:[%s5648_s20 + $0x8] sm:$0xff] }
 0x12e   : > { %v431_v15 = vsel %vm430_vm1, %v415_v33, %v429_v6  ;;  %4940 = vmatpush1.bf16.msra.mxu1 %v5355_v7  ;;  %v6444_v2 = vpop.permute.xlu1 %569  ;;  %v6446_v62 = vpop.permute.xlu0 %492 }
 0x12f   : > { %442 = vst [vmem:[#allocation2 + $0x20] sm:$0x33] %v431_v15  ;;  %v8118_v13 = vrot.slane %v6444_v2, 4  ;;  %v501_v31 = vrot.slane %v6446_v62, 4 }
 0x130   : > { %2717 = vrot.lane.b32.xlu1 %v6327_v11, %s5601_s18  ;;  %2715 = vrot.lane.b32.xlu0 %v6341_v10, %s5601_s18 }
 0x131   : > { %v583_v39 = vsel %vm277_vm0, %v576_v4, %v8118_v13  ;;  %v505_v33 = vsel %vm277_vm0, %v500_v21, %v501_v31  ;;  %v2990_v21 = vcombine.low %v2970_v55, %v2970_v55 }
 0x132   : > { %v584_v7 = vsel %vm581_vm4, %v6307_v61, %v583_v39  ;;  %v507_v6 = vsel %vm506_vm3, %v491_v51, %v505_v33  ;;  %v6466_v15 = vpop.permute.xlu1 %720  ;;  %v6468_v54 = vpop.permute.xlu0 %645 }
 0x133   : > { %594 = vst [vmem:[#allocation2 + $0x48] sm:$0x33] %v584_v7  ;;  %518 = vst [vmem:[#allocation2 + $0x20] sm:$0xcc] %v507_v6  ;;  %v8108_v57 = vrot.slane %v6466_v15, 4  ;;  %v8119_v4 = vrot.slane %v6468_v54, 4 }
 0x134   : > { %2791 = vrot.lane.b32.xlu1 %v6344_v38, %s5602_s17  ;;  %2789 = vrot.lane.b32.xlu0 %v6327_v11, %s5602_s17 }
 0x135   : > { %v734_v61 = vsel %vm277_vm0, %v727_v25, %v8108_v57  ;;  %v659_v51 = vsel %vm277_vm0, %v652_v16, %v8119_v4  ;;  %v6501_v16 = vrot.slane %v2990_v21, %v5643_v5  ;;  %v5563_v57 = vld [vmem:[%s5648_s20 + $0x8] sm:$0xff] }
 0x136   : > { %v735_v39 = vsel %vm732_vm11, %v6333_v24, %v734_v61  ;;  %v660_v38 = vsel %vm657_vm9, %v6319_v58, %v659_v51  ;;  %v6490_v33 = vpop.permute.xlu1 %266  ;;  %v6492_v7 = vpop.permute.xlu0 %796  ;;  %v6504_v58 = vrot.slane %v2970_v55, %v5643_v5  ;;  %v4205_v51 = vld [vmem:[#allocation2] sm:$0xff] }
 0x137   : > { %745 = vst [vmem:[#allocation2 + $0x68] sm:$0x33] %v735_v39  ;;  %670 = vst [vmem:[#allocation2 + $0x48] sm:$0xcc] %v660_v38  ;;  %v8107_v25 = vrot.slane %v6490_v33, 4  ;;  %v8109_v6 = vrot.slane %v6492_v7, 4 }
 0x138   : > { %2866 = vrot.lane.b32.xlu1 %v6327_v11, %s8188_s19  ;;  %2864 = vrot.lane.b32.xlu0 %v6341_v10, %s8188_s19 }
 0x139   : > { %v281_v24 = vsel %vm277_vm0, %v273_v59, %v8107_v25  ;;  %v810_v11 = vsel %vm277_vm0, %v803_v1, %v8109_v6  ;;  %v2320_v6 = vcombine.high %v5563_v57, %v5563_v57 }
 0x13a   : > { %v282_v10 = vsel %vm8115_vm8, %v6411_v20, %v281_v24  ;;  %v811_v21 = vsel %vm808_vm12, %v6352_v9, %v810_v11  ;;  %v6520_v55 = vpop.permute.xlu1 %418  ;;  %v6522_v61 = vpop.permute.xlu0 %343  ;;  %v4209_v39 = vld [vmem:[#allocation2 + $0x20] sm:$0xff]  ;;  %vm8121_vm8 = vcmask 719872  }
 0x13b   : > { %292 = vst [vmem:[#allocation2 + $0x8] sm:$0x33] %v282_v10  ;;  %821 = vst [vmem:[#allocation2 + $0x68] sm:$0xcc] %v811_v21  ;;  %v8114_v59 = vrot.slane %v6520_v55, 4  ;;  %v8117_v38 = vrot.slane %v6522_v61, 4  ;;  %v5338_v25 = vcombine.high %v4205_v51, %v4209_v39  ;;  %v5337_v1 = vcombine.low %v4205_v51, %v4209_v39 }
 0x13c   : > { %3017 = vrot.lane.b32.xlu1 %v6501_v16, %s5598_s22  ;;  %2942 = vrot.lane.b32.xlu0 %v6504_v58, %s8112_s21  ;;  %s8220_s21 = smov 27  }
 0x13d   : > { %v432_v9 = vsel %vm277_vm0, %v425_v43, %v8114_v59  ;;  %v357_v20 = vsel %vm277_vm0, %v350_v18, %v8117_v38  ;;  %4902 = vmatprep.subr.bf16.mxu0 %v5338_v25  ;;  %v6553_v18 = vrot.slane %v5563_v57, %v5643_v5 }
 0x13e   : > { %v433_v24 = vsel %vm430_vm1, %v6433_v30, %v432_v9  ;;  %v358_v11 = vsel %vm355_vm2, %v6422_v19, %v357_v20  ;;  %v4099_v10 = vpop.permute.xlu1 %4098  ;;  %4903 = vmatpush1.bf16.msra.mxu0 %v5337_v1  ;;  %v6545_v21 = vpop.permute.xlu0 %494  ;;  %v2334_v30 = vrot.slane %v2320_v6, %v5643_v5  ;;  %v4214_v1 = vld [vmem:[#allocation2 + $0x48] sm:$0xff] }
 0x13f   : > { %443 = vst [vmem:[#allocation2 + $0x28] sm:$0x33] %v433_v24  ;;  %368 = vst [vmem:[#allocation2 + $0x8] sm:$0xcc] %v358_v11  ;;  %v8116_v43 = vrot.slane %v6545_v21, 4  ;;  %v4108_v20 = vrot.slane %v4099_v10, 4 }
 0x140   : > { %3166 = vrot.lane.b32.xlu1 %v6501_v16, %s8213_s12  ;;  %3091 = vrot.lane.b32.xlu0 %v6504_v58, %s8110_s10  ;;  %s8218_s10 = smov 29  }
 0x141   : > { %v508_v19 = vsel %vm277_vm0, %v501_v31, %v8116_v43 }
 0x142   : > { %v509_v25 = vsel %vm506_vm3, %v6446_v62, %v508_v19  ;;  %v4174_v51 = vpop.permute.xlu1 %4173  ;;  %v6563_v39 = vpop.permute.xlu0 %4100  ;;  %v4218_v9 = vld [vmem:[#allocation2 + $0x68] sm:$0xff] }
 0x143   : > { %519 = vst [vmem:[#allocation2 + $0x28] sm:$0xcc] %v509_v25  ;;  %v4109_v57 = vrot.slane %v6563_v39, 4  ;;  %v5348_v24 = vcombine.high %v4214_v1, %v4218_v9  ;;  %v5347_v6 = vcombine.low %v4214_v1, %v4218_v9  ;;  %v6578_v25 = vld [vmem:[%s8062_s2] sm:$0xff]  ;;  %v4183_v1 = vrot.slane %v4174_v51, 4 }
 0x144   : > { %2423 = vrot.lane.b32.xlu1 %v6553_v18, %s8133_s24  ;;  %2348 = vrot.lane.b32.xlu0 %v2334_v30, %s5578_s25  ;;  %v6583_v59 = vcombine.high %v6578_v25, %v6578_v25 }
 0x145   : > { %v4113_v62 = vsel %vm277_vm0, %v4108_v20, %v4109_v57  ;;  %4941 = vmatprep.subr.bf16.mxu1 %v5348_v24 }
 0x146   : > { %v4114_v31 = vsel %vm2133_vm6, %v4099_v10, %v4113_v62  ;;  %v3801_v11 = vpop.permute.xlu1 %3800  ;;  %4942 = vmatpush1.bf16.msra.mxu1 %v5347_v6  ;;  %v6573_v19 = vpop.permute.xlu0 %4175  ;;  %5450 = vmatprep.mubr.msk.bf16.mxu0 %vm8121_vm8, %v6583_v59  ;;  %v4206_v62 = vld [vmem:[#allocation2 + $0x8] sm:$0xff] }
 0x147   : > { %4125 = vst [vmem:[#allocation2 + $0x340] sm:$0x33] %v4114_v31  ;;  %v4184_v9 = vrot.slane %v6573_v19, 4  ;;  %5452 = vmatprep.mubr.msk.bf16.mxu1 %vm8121_vm8, %v6583_v59  ;;  %v3810_v43 = vrot.slane %v3801_v11, 4  ;;  %vm8214_vm8 = vcmask 228352  }
 0x148   : > { %2572 = vrot.lane.b32.xlu1 %v6553_v18, %s5579_s26  ;;  %2497 = vrot.lane.b32.xlu0 %v2334_v30, %s5580_s27 }
 0x149   : > { %v4188_v10 = vsel %vm277_vm0, %v4183_v1, %v4184_v9  ;;  %v5564_v1 = vld [vmem:[%s5655_s23 + $0xa] sm:$0xff] }
 0x14a   : > { %v4189_v20 = vsel %vm2208_vm7, %v4174_v51, %v4188_v10  ;;  %v3876_v24 = vpop.permute.xlu1 %3875  ;;  %v6596_v6 = vpop.permute.xlu0 %3802  ;;  %v4210_v31 = vld [vmem:[#allocation2 + $0x28] sm:$0xff]  ;;  %v2019_v4 = vcombine.high %v5564_v1, %v5564_v1 }
 0x14b   : > { %4200 = vst [vmem:[#allocation2 + $0x340] sm:$0xcc] %v4189_v20  ;;  %v3811_v30 = vrot.slane %v6596_v6, 4  ;;  %v5340_v38 = vcombine.high %v4206_v62, %v4210_v31  ;;  %v5339_v13 = vcombine.low %v4206_v62, %v4210_v31  ;;  %v3885_v62 = vrot.slane %v3876_v24, 4 }
 0x14c   : > { %2719 = vrot.lane.b32.xlu1 %v6501_v16, %s5601_s18  ;;  %2644 = vrot.lane.b32.xlu0 %v6504_v58, %s5600_s14 }
 0x14d   : > { %v3815_v51 = vsel %vm277_vm0, %v3810_v43, %v3811_v30  ;;  %4943 = vmatprep.subr.bf16.mxu1 %v5340_v38  ;;  %v6616_v43 = vrot.slane %v5564_v1, %v5643_v5  ;;  %v6619_v38 = vrot.slane %v2019_v4, %v5643_v5  ;;  %v5526_v4 = vld [vmem:[%s5648_s20 + $0x10] ss:$0 sps:$4 sm:$0x33]  }
 0x14e   : > { %v3816_v10 = vsel %vm8138_vm10, %v3801_v11, %v3815_v51  ;;  %v3950_v20 = vpop.permute.xlu1 %3949  ;;  %4944 = vmatpush1.bf16.msra.mxu1 %v5339_v13  ;;  %v6608_v63 = vpop.permute.xlu0 %3877 }
 0x14f   : > { %3827 = vst [vmem:[#allocation2 + $0x300] sm:$0x33] %v3816_v10  ;;  %v8136_v31 = vrot.slane %v6608_v63, 4  ;;  %v3959_v42 = vrot.slane %v3950_v20, 4 }
 0x150   : > { %2868 = vrot.lane.b32.xlu1 %v6501_v16, %s8188_s19  ;;  %2793 = vrot.lane.b32.xlu0 %v6504_v58, %s5602_s17 }
 0x151   : > { %v3890_v13 = vsel %vm277_vm0, %v3885_v62, %v8136_v31 }
 0x152   : > { %v3891_v11 = vsel %vm8214_vm8, %v3876_v24, %v3890_v13  ;;  %v4025_v51 = vpop.permute.xlu1 %4024  ;;  %v6625_v10 = vpop.permute.xlu0 %3951  ;;  %v4309_v16 = vld [vmem:[#allocation2 + $0x340] sm:$0xff]  ;;  %vm8215_vm8 = vcmask 220160  }
 0x153   : > { %3902 = vst [vmem:[#allocation2 + $0x300] sm:$0xcc] %v3891_v11  ;;  %v8137_v58 = vrot.slane %v6625_v10, 4  ;;  %v5442_v27 = vcombine.high %v4309_v16, %v4309_v16  ;;  %v5441_v1 = vcombine.low %v4309_v16, %v4309_v16  ;;  %v4034_v36 = vrot.slane %v4025_v51, 4 }
 0x154   : > { %2123 = vrot.lane.b32.xlu1 %v6616_v43, %s5582_s29  ;;  %2047 = vrot.lane.b32.xlu0 %v6619_v38, %s8143_s28 }
 0x155   : > { %v3964_v24 = vsel %vm277_vm0, %v3959_v42, %v8137_v58  ;;  %5449 = vmatprep.subr.msk.bf16.mxu0 %vm277_vm0, %v5442_v27  ;;  %v4865_v62 = vsel %vm277_vm0, %v5441_v1, 0  ;;  %v2416_v27 = vrot.slane %v5526_v4, %v5643_v5  ;;  %v5527_v42 = vld [vmem:[%s5648_s20 + $0x10] ss:$0 sps:$4 sm:$0x33]  }
 0x156   : > { %v3965_v13 = vsel %vm8215_vm8, %v3950_v20, %v3964_v24  ;;  %v6639_v11 = vpop.permute.xlu1 %4102  ;;  %4909 = vmatpush2.bf16.msra.mxu0 %v4865_v62  ;;  %v6641_v16 = vpop.permute.xlu0 %4026  ;;  %v5319_v24 = vld.sshfl [vmem:[%s5648_s20 + $0x10] sm:$0x3 pattern:$0x76325410]  ;;  %vm8216_vm8 = vcmask 154624  }
 0x157   : > { %3976 = vst [vmem:[#allocation2 + $0x320] sm:$0x33] %v3965_v13  ;;  %v8128_v45 = vrot.slane %v6639_v11, 4  ;;  %v8132_v47 = vrot.slane %v6641_v16, 4 }
 0x158   : > { %2274 = vrot.lane.b32.xlu1 %v6553_v18, %s5584_s5  ;;  %2198 = vrot.lane.b32.xlu0 %v6619_v38, %s5583_s30 }
 0x159   : > { %v4115_v20 = vsel %vm277_vm0, %v4109_v57, %v8128_v45  ;;  %v4039_v1 = vsel %vm277_vm0, %v4034_v36, %v8132_v47  ;;  %v2565_v57 = vrot.slane %v5527_v42, %v5643_v5 }
 0x15a   : > { %v4116_v18 = vsel %vm2133_vm6, %v6563_v39, %v4115_v20  ;;  %v4040_v62 = vsel %vm8216_vm8, %v4025_v51, %v4039_v1  ;;  %v3503_v13 = vpop.permute.xlu1 %3502  ;;  %v6663_v32 = vpop.permute.xlu0 %4177  ;;  %vm8217_vm8 = vcmask 957440  }
 0x15b   : > { %4126 = vst [vmem:[#allocation2 + $0x348] sm:$0x33] %v4116_v18  ;;  %4051 = vst [vmem:[#allocation2 + $0x320] sm:$0xcc] %v4040_v62  ;;  %v8129_v4 = vrot.slane %v6663_v32, 4  ;;  %v3512_v1 = vrot.slane %v3503_v13, 4 }
 0x15c   : > { %2425 = vrot.lane.b32.xlu1 %v2416_v27, %s8133_s24  ;;  %2350 = vrot.lane.b32.xlu0 %v5319_v24, %s5578_s25  ;;  %v4301_v62 = vld [vmem:[#allocation2 + $0x300] sm:$0xff]  ;;  %s8221_s24 = smov 28  }
 0x15d   : > { %v4190_v36 = vsel %vm277_vm0, %v4184_v9, %v8129_v4 }
 0x15e   : > { %v4191_v39 = vsel %vm2208_vm7, %v6573_v19, %v4190_v36  ;;  %v3578_v51 = vpop.permute.xlu1 %3577  ;;  %v6676_v20 = vpop.permute.xlu0 %3504 }
 0x15f   : > { %4201 = vst [vmem:[#allocation2 + $0x348] sm:$0xcc] %v4191_v39  ;;  %v8131_v27 = vrot.slane %v6676_v20, 4  ;;  %v3587_v45 = vrot.slane %v3578_v51, 4 }
 0x160   : > { %2574 = vrot.lane.b32.xlu1 %v2565_v57, %s5579_s26  ;;  %2499 = vrot.lane.b32.xlu0 %v5319_v24, %s5580_s27  ;;  %v5530_v24 = vld [vmem:[%s5655_s23 + $0x12] ss:$0 sps:$4 sm:$0x33]  }
 0x161   : > { %v3517_v42 = vsel %vm277_vm0, %v3512_v1, %v8131_v27 }
 0x162   : > { %v3518_v9 = vsel %vm8217_vm8, %v3503_v13, %v3517_v42  ;;  %v3652_v18 = vpop.permute.xlu1 %3651  ;;  %v6685_v19 = vpop.permute.xlu0 %3579  ;;  %v4305_v36 = vld [vmem:[#allocation2 + $0x320] sm:$0xff]  ;;  %vm8219_vm8 = vcmask 318464  }
 0x163   : > { %3529 = vst [vmem:[#allocation2 + $0x2c0] sm:$0x33] %v3518_v9  ;;  %v8135_v39 = vrot.slane %v6685_v19, 4  ;;  %v5434_v4 = vcombine.high %v4301_v62, %v4305_v36  ;;  %v5433_v35 = vcombine.low %v4301_v62, %v4305_v36  ;;  %v3661_v62 = vrot.slane %v3652_v18, 4 }
 0x164   : > { %1821 = vrot.lane.b32.xlu1 %v6616_v43, %s8218_s10  ;;  %1745 = vrot.lane.b32.xlu0 %v6619_v38, %s8168_s6 }
 0x165   : > { %v3592_v13 = vsel %vm277_vm0, %v3587_v45, %v8135_v39  ;;  %4910 = vmatprep.subr.bf16.mxu0 %v5434_v4  ;;  %v2116_v45 = vrot.slane %v5530_v24, %v5643_v5  ;;  %v5531_v4 = vld [vmem:[%s5648_s20 + $0x10] ss:$0 sps:$4 sm:$0x33]  }
 0x166   : > { %v3593_v57 = vsel %vm8219_vm8, %v3578_v51, %v3592_v13  ;;  %v3727_v1 = vpop.permute.xlu1 %3726  ;;  %4911 = vmatpush2.bf16.msra.mxu0 %v5433_v35  ;;  %v6697_v42 = vpop.permute.xlu0 %3653  ;;  %v4310_v9 = vld [vmem:[#allocation2 + $0x348] sm:$0xff]  ;;  %v6712_v13 = vld.sshfl [vmem:[%s5655_s23 + $0x12] sm:$0x3 pattern:$0x76325410]  ;;  %vm8222_vm8 = vcmask 310272  }
 0x167   : > { %3604 = vst [vmem:[#allocation2 + $0x2c0] sm:$0xcc] %v3593_v57  ;;  %v8146_v36 = vrot.slane %v6697_v42, 4  ;;  %v5444_v27 = vcombine.high %v4310_v9, %v4310_v9  ;;  %v5443_v47 = vcombine.low %v4310_v9, %v4310_v9  ;;  %v3736_v31 = vrot.slane %v3727_v1, 4 }
 0x168   : > { %1972 = vrot.lane.b32.xlu1 %v6616_v43, %s8220_s21  ;;  %1896 = vrot.lane.b32.xlu0 %v6619_v38, %s8221_s24 }
 0x169   : > { %v3666_v35 = vsel %vm277_vm0, %v3661_v62, %v8146_v36  ;;  %5451 = vmatprep.subr.msk.bf16.mxu1 %vm277_vm0, %v5444_v27  ;;  %v4871_v51 = vsel %vm277_vm0, %v5443_v47, 0  ;;  %v2267_v47 = vrot.slane %v5531_v4, %v5643_v5 }
 0x16a   : > { %v3667_v57 = vsel %vm8222_vm8, %v3652_v18, %v3666_v35  ;;  %v6715_v9 = vpop.permute.xlu1 %3804  ;;  %4950 = vmatpush2.bf16.msra.mxu1 %v4871_v51  ;;  %v6717_v39 = vpop.permute.xlu0 %3728  ;;  %vm8224_vm8 = vcmask 302080  }
 0x16b   : > { %8223 = vst [vmem:[#allocation4_spill] sm:$0xff] %v6715_v9  ;;  %3678 = vst [vmem:[#allocation2 + $0x2e0] sm:$0x33] %v3667_v57  ;;  %v8140_v24 = vrot.slane %v6715_v9, 4  ;;  %v8142_v58 = vrot.slane %v6717_v39, 4 }
 0x16c   : > { %2125 = vrot.lane.b32.xlu1 %v2116_v45, %s5582_s29  ;;  %2049 = vrot.lane.b32.xlu0 %v6712_v13, %s8143_s28  ;;  %s8233_s28 = smov 39  }
 0x16d   : > { %v3817_v27 = vsel %vm277_vm0, %v3811_v30, %v8140_v24  ;;  %v3741_v18 = vsel %vm277_vm0, %v3736_v31, %v8142_v58 }
 0x16e   : > { %v3818_v62 = vsel %vm8138_vm10, %v6596_v6, %v3817_v27  ;;  %v3742_v45 = vsel %vm8224_vm8, %v3727_v1, %v3741_v18  ;;  %v6736_v35 = vpop.permute.xlu1 %3953  ;;  %v6738_v51 = vpop.permute.xlu0 %3879  ;;  %v8226_v6 = vrot.slane %v6625_v10, 4  ;;  %v8227_v1 = vrot.slane %v6608_v63, 4 }
 0x16f   : > { %8225 = vst [vmem:[#allocation5_spill] sm:$0xff] %v6736_v35  ;;  %3828 = vst [vmem:[#allocation2 + $0x308] sm:$0x33] %v3818_v62  ;;  %v8139_v4 = vrot.slane %v6736_v35, 4  ;;  %v8141_v30 = vrot.slane %v6738_v51, 4  ;;  %vm8228_vm8 = vcmask 220160  }
 0x170   : > { %3753 = vst [vmem:[#allocation2 + $0x2e0] sm:$0xcc] %v3742_v45  ;;  %2276 = vrot.lane.b32.xlu1 %v2267_v47, %s5584_s5  ;;  %2200 = vrot.lane.b32.xlu0 %v6712_v13, %s5583_s30  ;;  %vm8229_vm10 = vcmask 228352  }
 0x171   : > { %v3966_v31 = vsel %vm277_vm0, %v8226_v6, %v8139_v4  ;;  %v3892_v57 = vsel %vm277_vm0, %v8227_v1, %v8141_v30  ;;  %v5532_v6 = vld [vmem:[%s5655_s23 + $0x12] ss:$0 sps:$4 sm:$0x33]  }
 0x172   : > { %v3967_v27 = vsel %vm8228_vm8, %v6625_v10, %v3966_v31  ;;  %v3893_v47 = vsel %vm8229_vm10, %v6608_v63, %v3892_v57  ;;  %v3280_v18 = vpop.permute.xlu1 %3279  ;;  %v6759_v62 = vpop.permute.xlu0 %4028  ;;  %v8231_v10 = vrot.slane %v6641_v16, 4  ;;  %vm8232_vm10 = vcmask 154624  }
 0x173   : > { %8230 = vst [vmem:[#allocation6_spill] sm:$0xff] %v6759_v62  ;;  %3977 = vst [vmem:[#allocation2 + $0x328] sm:$0x33] %v3967_v27  ;;  %v8145_v45 = vrot.slane %v6759_v62, 4  ;;  %v4293_v27 = vld [vmem:[#allocation2 + $0x2c0] sm:$0xff]  ;;  %v3289_v4 = vrot.slane %v3280_v18, 4 }
 0x174   : > { %3903 = vst [vmem:[#allocation2 + $0x308] sm:$0xcc] %v3893_v47  ;;  %1519 = vrot.lane.b32.xlu1 %v6616_v43, %s5590_s11  ;;  %1443 = vrot.lane.b32.xlu0 %v6619_v38, %s8212_s7  ;;  %vm8234_vm8 = vcmask 1039360  }
 0x175   : > { %v4041_v63 = vsel %vm277_vm0, %v8231_v10, %v8145_v45  ;;  %v5533_v10 = vld [vmem:[%s5655_s23 + $0x12] ss:$0 sps:$4 sm:$0x33]  }
 0x176   : > { %v4042_v31 = vsel %vm8232_vm10, %v6641_v16, %v4041_v63  ;;  %v3354_v1 = vpop.permute.xlu1 %3353  ;;  %v6774_v57 = vpop.permute.xlu0 %3281  ;;  %v1814_v16 = vrot.slane %v5532_v6, %v5643_v5  ;;  %v1202_v63 = vld [vmem:[%s5655_s23 + $0xa] sm:$0xff]  ;;  %vm8235_vm10 = vcmask 973824  }
 0x177   : > { %v4297_v47 = vld [vmem:[#allocation2 + $0x2e0] sm:$0xff]  ;;  %4052 = vst [vmem:[#allocation2 + $0x328] sm:$0xcc] %v4042_v31  ;;  %v8153_v24 = vrot.slane %v6774_v57, 4  ;;  %v1220_v31 = vcombine.low %v1202_v63, %v1202_v63  ;;  %v3363_v3 = vrot.slane %v3354_v1, 4  ;;  %v6792_v6 = vld [vmem:[%s5655_s23 + $0x8] sm:$0xff] }
 0x178   : > { %v5426_v30 = vcombine.high %v4293_v27, %v4297_v47  ;;  %v5425_v58 = vcombine.low %v4293_v27, %v4297_v47  ;;  %1670 = vrot.lane.b32.xlu1 %v6616_v43, %s8163_s13  ;;  %1594 = vrot.lane.b32.xlu0 %v6619_v38, %s8233_s28  ;;  %5311 = vst.sshfl [vmem:[#allocation2 + $0xd8] sm:$0xf0 pattern:$0x76325410] %v1202_v63 }
 0x179   : > { %v3294_v45 = vsel %vm277_vm0, %v3289_v4, %v8153_v24  ;;  %5310 = vst.sshfl [vmem:[#allocation2 + $0xd0] sm:$0xf0 pattern:$0x76325410] %v1220_v31  ;;  %v1147_v62 = vcombine.high %v6792_v6, %v6792_v6  ;;  %v1965_v4 = vrot.slane %v5533_v10, %v5643_v5 }
 0x17a   : > { %4912 = vmatprep.subr.bf16.mxu0 %v5426_v30  ;;  %v3295_v27 = vsel %vm8234_vm8, %v3280_v18, %v3294_v45  ;;  %v3429_v47 = vpop.permute.xlu1 %3428  ;;  %v6788_v36 = vpop.permute.xlu0 %3355  ;;  %vm8238_vm8 = vcmask 957440  }
 0x17b   : > { %4913 = vmatpush2.bf16.msra.mxu0 %v5425_v58  ;;  %3306 = vst [vmem:[#allocation2 + $0x280] sm:$0xcc] %v3295_v27  ;;  %v8156_v35 = vrot.slane %v6788_v36, 4  ;;  %v3438_v30 = vrot.slane %v3429_v47, 4  ;;  %v4302_v31 = vld [vmem:[#allocation2 + $0x308] sm:$0xff] }
 0x17c   : > { %1823 = vrot.lane.b32.xlu1 %v1814_v16, %s8218_s10  ;;  %1747 = vrot.lane.b32.xlu0 %v6712_v13, %s8168_s6  ;;  %s8250_s6 = smov 9  }
 0x17d   : > { %v3368_v58 = vsel %vm277_vm0, %v3363_v3, %v8156_v35  ;;  %v6814_v3 = vrot.slane %v1147_v62, %v5643_v5 }
 0x17e   : > { %v3369_v18 = vsel %vm8235_vm10, %v3354_v1, %v3368_v58  ;;  %v6804_v45 = vpop.permute.xlu1 %3506  ;;  %v6806_v63 = vpop.permute.xlu0 %3430  ;;  %v4306_v27 = vld [vmem:[#allocation2 + $0x328] sm:$0xff]  ;;  %v8237_v1 = vrot.slane %v6676_v20, 4  ;;  %vm8239_vm10 = vcmask 965632  }
 0x17f   : > { %8236 = vst [vmem:[#allocation7_spill] sm:$0xff] %v6804_v45  ;;  %3380 = vst [vmem:[#allocation2 + $0x2a0] sm:$0x33] %v3369_v18  ;;  %v8158_v16 = vrot.slane %v6804_v45, 4  ;;  %v8161_v24 = vrot.slane %v6806_v63, 4  ;;  %v5436_v9 = vcombine.high %v4302_v31, %v4306_v27  ;;  %v5435_v10 = vcombine.low %v4302_v31, %v4306_v27 }
 0x180   : > { %1974 = vrot.lane.b32.xlu1 %v1965_v4, %s8220_s21  ;;  %1898 = vrot.lane.b32.xlu0 %v6712_v13, %s8221_s24 }
 0x181   : > { %v3519_v58 = vsel %vm277_vm0, %v8237_v1, %v8158_v16  ;;  %v3443_v18 = vsel %vm277_vm0, %v3438_v30, %v8161_v24  ;;  %4951 = vmatprep.subr.bf16.mxu1 %v5436_v9  ;;  %v8241_v9 = vrot.slane %v6697_v42, 4  ;;  %v8242_v30 = vrot.slane %v6685_v19, 4 }
 0x182   : > { %v3520_v4 = vsel %vm8238_vm8, %v6676_v20, %v3519_v58  ;;  %v3444_v31 = vsel %vm8239_vm10, %v3429_v47, %v3443_v18  ;;  %v6827_v27 = vpop.permute.xlu1 %3655  ;;  %4952 = vmatpush2.bf16.msra.mxu1 %v5435_v10  ;;  %v6829_v62 = vpop.permute.xlu0 %3581  ;;  %v5534_v20 = vld [vmem:[%s5655_s23 + $0x12] ss:$0 sps:$4 sm:$0x33]   ;;  %vm8243_vm8 = vcmask 310272   ;;  %vm8244_vm10 = vcmask 318464  }
 0x183   : > { %8240 = vst [vmem:[#allocation8_spill] sm:$0xff] %v6827_v27  ;;  %3530 = vst [vmem:[#allocation2 + $0x2c8] sm:$0x33] %v3520_v4  ;;  %v8157_v35 = vrot.slane %v6827_v27, 4  ;;  %v8159_v1 = vrot.slane %v6829_v62, 4 }
 0x184   : > { %3455 = vst [vmem:[#allocation2 + $0x2a0] sm:$0xcc] %v3444_v31  ;;  %1292 = vrot.lane.b32.xlu1 %v6619_v38, %s8210_s9  ;;  %1175 = vrot.lane.b32.xlu0 %v6814_v3, %s8213_s12 }
 0x185   : > { %v3668_v47 = vsel %vm277_vm0, %v8241_v9, %v8157_v35  ;;  %v3594_v10 = vsel %vm277_vm0, %v8242_v30, %v8159_v1  ;;  %v1512_v9 = vrot.slane %v5534_v20, %v5643_v5  ;;  %v5535_v30 = vld [vmem:[%s5655_s23 + $0x12] ss:$0 sps:$4 sm:$0x33]  }
 0x186   : > { %v3669_v58 = vsel %vm8243_vm8, %v6697_v42, %v3668_v47  ;;  %v3595_v38 = vsel %vm8244_vm10, %v6685_v19, %v3594_v10  ;;  %v2939_v18 = vpop.permute.xlu1 %2938  ;;  %v6852_v4 = vpop.permute.xlu0 %3730  ;;  %v8246_v19 = vrot.slane %v6717_v39, 4  ;;  %vm8247_vm8 = vcmask 302080  }
 0x187   : > { %8245 = vst [vmem:[#allocation9_spill] sm:$0xff] %v6852_v4  ;;  %3679 = vst [vmem:[#allocation2 + $0x2e8] sm:$0x33] %v3669_v58  ;;  %v8160_v31 = vrot.slane %v6852_v4, 4  ;;  %v2948_v16 = vrot.slane %v2939_v18, 4  ;;  %vm8252_vm10 = vcmask 1039360  }
 0x188   : > { %3605 = vst [vmem:[#allocation2 + $0x2c8] sm:$0xcc] %v3595_v38  ;;  %1445 = vrot.lane.b32.xlu1 %v6712_v13, %s8212_s7  ;;  %1368 = vrot.lane.b32.xlu0 %v6616_v43, %s8211_s8  ;;  %v4285_v38 = vld [vmem:[#allocation2 + $0x280] sm:$0xff] }
 0x189   : > { %v3743_v42 = vsel %vm277_vm0, %v8246_v19, %v8160_v31  ;;  %v1663_v19 = vrot.slane %v5535_v30, %v5643_v5 }
 0x18a   : > { %v3744_v47 = vsel %vm8247_vm8, %v6717_v39, %v3743_v42  ;;  %v3014_v10 = vpop.permute.xlu1 %3013  ;;  %v6868_v58 = vpop.permute.xlu0 %2940  ;;  %vm8253_vm8 = vcmask 7168  }
 0x18b   : > { %v4289_v35 = vld [vmem:[#allocation2 + $0x2a0] sm:$0xff]  ;;  %3754 = vst [vmem:[#allocation2 + $0x2e8] sm:$0xcc] %v3744_v47  ;;  %v8162_v43 = vrot.slane %v6868_v58, 4  ;;  %v3023_v24 = vrot.slane %v3014_v10, 4 }
 0x18c   : > { %v5418_v20 = vcombine.high %v4285_v38, %v4289_v35  ;;  %v5417_v1 = vcombine.low %v4285_v38, %v4289_v35  ;;  %1596 = vrot.lane.b32.xlu1 %v6712_v13, %s8233_s28  ;;  %1521 = vrot.lane.b32.xlu0 %v1512_v9, %s5590_s11 }
 0x18d   : > { %v2953_v39 = vsel %vm277_vm0, %v2948_v16, %v8162_v43  ;;  %v6887_v16 = vrot.slane %v6792_v6, %v5643_v5 }
 0x18e   : > { %4914 = vmatprep.subr.bf16.mxu0 %v5418_v20  ;;  %v2954_v42 = vsel %vm959_vm5, %v2939_v18, %v2953_v39  ;;  %v3088_v31 = vpop.permute.xlu1 %3087  ;;  %v6879_v47 = vpop.permute.xlu0 %3015 }
 0x18f   : > { %4915 = vmatpush2.bf16.msra.mxu0 %v5417_v1  ;;  %2965 = vst [vmem:[#allocation2 + $0x240] sm:$0x33] %v2954_v42  ;;  %v8165_v35 = vrot.slane %v6879_v47, 4  ;;  %v4294_v38 = vld [vmem:[#allocation2 + $0x2c8] sm:$0xff]  ;;  %v3097_v39 = vrot.slane %v3088_v31, 4 }
 0x190   : > { %873 = vrot.lane.b32.xlu1 %v6814_v3, %s8188_s19  ;;  %1672 = vrot.lane.b32.xlu0 %v1663_v19, %s8163_s13  ;;  %s8248_s13 = smov 11  }
 0x191   : > { %v3028_v1 = vsel %vm277_vm0, %v3023_v24, %v8165_v35  ;;  %v5536_v24 = vld [vmem:[%s5655_s23 + $0x12] ss:$0 sps:$4 sm:$0x33]  }
 0x192   : > { %v3029_v18 = vsel %vm1034_vm15, %v3014_v10, %v3028_v1  ;;  %v3163_v9 = vpop.permute.xlu1 %3162  ;;  %v6893_v30 = vpop.permute.xlu0 %3089  ;;  %v4298_v20 = vld [vmem:[#allocation2 + $0x2e8] sm:$0xff]  ;;  %v6905_v10 = vld.sshfl [vmem:[%s5655_s23 + $0x10] sm:$0x3 pattern:$0x76325410] }
 0x193   : > { %3040 = vst [vmem:[#allocation2 + $0x240] sm:$0xcc] %v3029_v18  ;;  %v8170_v19 = vrot.slane %v6893_v30, 4  ;;  %v5428_v42 = vcombine.high %v4294_v38, %v4298_v20  ;;  %v5427_v43 = vcombine.low %v4294_v38, %v4298_v20  ;;  %v3172_v20 = vrot.slane %v3163_v9, 4 }
 0x194   : > { %1024 = vrot.lane.b32.xlu1 %v6814_v3, %s5598_s22  ;;  %949 = vrot.lane.b32.xlu0 %v6887_v16, %s8248_s13 }
 0x195   : > { %v3102_v6 = vsel %vm277_vm0, %v3097_v39, %v8170_v19  ;;  %4953 = vmatprep.subr.bf16.mxu1 %v5428_v42  ;;  %v1361_v39 = vrot.slane %v5536_v24, %v5643_v5 }
 0x196   : > { %v3103_v1 = vsel %vm1110_vm14, %v3088_v31, %v3102_v6  ;;  %v6908_v18 = vpop.permute.xlu1 %3283  ;;  %4954 = vmatpush2.bf16.msra.mxu1 %v5427_v43  ;;  %v6910_v38 = vpop.permute.xlu0 %3164  ;;  %v8251_v31 = vrot.slane %v6774_v57, 4 }
 0x197   : > { %8249 = vst [vmem:[#allocation10_spill] sm:$0xff] %v6908_v18  ;;  %3114 = vst [vmem:[#allocation2 + $0x260] sm:$0x33] %v3103_v1  ;;  %v8174_v35 = vrot.slane %v6908_v18, 4  ;;  %v8176_v27 = vrot.slane %v6910_v38, 4 }
 0x198   : > { %1177 = vrot.lane.b32.xlu1 %v6905_v10, %s8213_s12  ;;  %1100 = vrot.lane.b32.xlu0 %v6887_v16, %s8250_s6 }
 0x199   : > { %v3296_v43 = vsel %vm277_vm0, %v8251_v31, %v8174_v35  ;;  %v3177_v42 = vsel %vm277_vm0, %v3172_v20, %v8176_v27  ;;  %v8257_v20 = vrot.slane %v6788_v36, 4 }
 0x19a   : > { %v3297_v6 = vsel %vm8252_vm10, %v6774_v57, %v3296_v43  ;;  %v3178_v1 = vsel %vm8253_vm8, %v3163_v9, %v3177_v42  ;;  %v6930_v19 = vpop.permute.xlu1 %3432  ;;  %v6932_v4 = vpop.permute.xlu0 %3357  ;;  %v8256_v57 = vrot.slane %v6806_v63, 4  ;;  %vm8258_vm10 = vcmask 965632  }
 0x19b   : > { %8254 = vst [vmem:[#allocation11_spill] sm:$0xff] %v6930_v19  ;;  %8255 = vst [vmem:[#allocation12_spill] sm:$0xff] %v6932_v4  ;;  %v8173_v24 = vrot.slane %v6930_v19, 4  ;;  %v8175_v31 = vrot.slane %v6932_v4, 4  ;;  %vm8259_vm8 = vcmask 973824  }
 0x19c   : > { %3307 = vst [vmem:[#allocation2 + $0x288] sm:$0xcc] %v3297_v6  ;;  %3189 = vst [vmem:[#allocation2 + $0x260] sm:$0xcc] %v3178_v1  ;;  %1370 = vrot.lane.b32.xlu1 %v1361_v39, %s8211_s8  ;;  %1294 = vrot.lane.b32.xlu0 %v6712_v13, %s8210_s9 }
 0x19d   : > { %v3445_v9 = vsel %vm277_vm0, %v8256_v57, %v8173_v24  ;;  %v3370_v43 = vsel %vm277_vm0, %v8257_v20, %v8175_v31  ;;  %v5537_v20 = vld [vmem:[%s5655_s23 + $0x10] ss:$0 sps:$4 sm:$0x33]  }
 0x19e   : > { %v3446_v42 = vsel %vm8258_vm10, %v6806_v63, %v3445_v9  ;;  %v3371_v39 = vsel %vm8259_vm8, %v6788_v36, %v3370_v43  ;;  %v6953_v6 = vpop.permute.xlu1 %2642  ;;  %v2641_v13 = vpop.permute.xlu0 %2640  ;;  %vm8265_vm10 = vcmask 7168   ;;  %vm8270_vm8 = vcmask 719872  }
 0x19f   : > { %3456 = vst [vmem:[#allocation2 + $0x2a8] sm:$0xcc] %v3446_v42  ;;  %3381 = vst [vmem:[#allocation2 + $0x2a8] sm:$0x33] %v3371_v39  ;;  %v8177_v1 = vrot.slane %v6953_v6, 4  ;;  %v2650_v57 = vrot.slane %v2641_v13, 4 }
 0x1a0   : > { %647 = vrot.lane.b32.xlu1 %v6887_v16, %s5600_s14  ;;  %571 = vrot.lane.b32.xlu0 %v6814_v3, %s5579_s26  ;;  %v4277_v42 = vld [vmem:[#allocation2 + $0x240] sm:$0xff] }
 0x1a1   : > { %v2655_v36 = vsel %vm277_vm0, %v2650_v57, %v8177_v1  ;;  %v942_v57 = vrot.slane %v5537_v20, %v5643_v5 }
 0x1a2   : > { %v2656_v63 = vsel %vm657_vm9, %v2641_v13, %v2655_v36  ;;  %v6965_v9 = vpop.permute.xlu1 %2717  ;;  %v2716_v43 = vpop.permute.xlu0 %2715  ;;  %v5538_v13 = vld [vmem:[%s5655_s23 + $0x10] ss:$0 sps:$4 sm:$0x33]  }
 0x1a3   : > { %v4281_v39 = vld [vmem:[#allocation2 + $0x260] sm:$0xff]  ;;  %2667 = vst [vmem:[#allocation2 + $0x200] sm:$0x33] %v2656_v63  ;;  %v2726_v24 = vrot.slane %v6965_v9, 4  ;;  %v2725_v35 = vrot.slane %v2716_v43, 4 }
 0x1a4   : > { %v5410_v31 = vcombine.high %v4277_v42, %v4281_v39  ;;  %v5409_v27 = vcombine.low %v4277_v42, %v4281_v39  ;;  %798 = vrot.lane.b32.xlu1 %v6887_v16, %s5602_s17  ;;  %722 = vrot.lane.b32.xlu0 %v6814_v3, %s5601_s18  ;;  %v4286_v39 = vld [vmem:[#allocation2 + $0x288] sm:$0xff] }
 0x1a5   : > { %v2730_v36 = vsel %vm277_vm0, %v2725_v35, %v2726_v24  ;;  %v1093_v35 = vrot.slane %v5538_v13, %v5643_v5 }
 0x1a6   : > { %4916 = vmatprep.subr.bf16.mxu0 %v5410_v31  ;;  %v2731_v63 = vsel %vm732_vm11, %v2716_v43, %v2730_v36  ;;  %v6978_v1 = vpop.permute.xlu1 %2791  ;;  %v2790_v42 = vpop.permute.xlu0 %2789  ;;  %v4290_v19 = vld [vmem:[#allocation2 + $0x2a8] sm:$0xff] }
 0x1a7   : > { %4917 = vmatpush2.bf16.msra.mxu0 %v5409_v27  ;;  %2742 = vst [vmem:[#allocation2 + $0x200] sm:$0xcc] %v2731_v63  ;;  %v8186_v18 = vrot.slane %v6978_v1, 4  ;;  %v2799_v4 = vrot.slane %v2790_v42, 4  ;;  %v5420_v45 = vcombine.high %v4286_v39, %v4290_v19  ;;  %v5419_v20 = vcombine.low %v4286_v39, %v4290_v19 }
 0x1a8   : > { %951 = vrot.lane.b32.xlu1 %v942_v57, %s8248_s13  ;;  %875 = vrot.lane.b32.xlu0 %v6905_v10, %s8188_s19  ;;  %s8262_s19 = smov 109  }
 0x1a9   : > { %v2804_v27 = vsel %vm277_vm0, %v2799_v4, %v8186_v18  ;;  %4955 = vmatprep.subr.bf16.mxu1 %v5420_v45 }
 0x1aa   : > { %v2805_v31 = vsel %vm808_vm12, %v2790_v42, %v2804_v27  ;;  %v6989_v43 = vpop.permute.xlu1 %2866  ;;  %4956 = vmatpush2.bf16.msra.mxu1 %v5419_v20  ;;  %v2865_v36 = vpop.permute.xlu0 %2864  ;;  %v5539_v20 = vld [vmem:[%s5655_s23 + $0x10] ss:$0 sps:$4 sm:$0x33]  }
 0x1ab   : > { %2816 = vst [vmem:[#allocation2 + $0x220] sm:$0x33] %v2805_v31  ;;  %v8191_v19 = vrot.slane %v6989_v43, 4  ;;  %v2874_v57 = vrot.slane %v2865_v36, 4  ;;  %v8261_v31 = vrot.slane %v6868_v58, 4 }
 0x1ac   : > { %1102 = vrot.lane.b32.xlu1 %v1093_v35, %s8250_s6  ;;  %1026 = vrot.lane.b32.xlu0 %v6905_v10, %s5598_s22  ;;  %v8260_v35 = vrot.slane %v6879_v47, 4 }
 0x1ad   : > { %v2879_v45 = vsel %vm277_vm0, %v2874_v57, %v8191_v19 }
 0x1ae   : > { %v2880_v4 = vsel %vm883_vm13, %v2865_v36, %v2879_v45  ;;  %v6999_v13 = vpop.permute.xlu1 %3017  ;;  %v7001_v63 = vpop.permute.xlu0 %2942 }
 0x1af   : > { %2891 = vst [vmem:[#allocation2 + $0x220] sm:$0xcc] %v2880_v4  ;;  %v8187_v42 = vrot.slane %v6999_v13, 4  ;;  %v8190_v39 = vrot.slane %v7001_v63, 4 }
 0x1b0   : > { %345 = vrot.lane.b32.xlu1 %v6887_v16, %s5578_s25  ;;  %268 = vrot.lane.b32.xlu0 %v6814_v3, %s5584_s5 }
 0x1b1   : > { %v3030_v27 = vsel %vm277_vm0, %v8260_v35, %v8187_v42  ;;  %v2955_v36 = vsel %vm277_vm0, %v8261_v31, %v8190_v39  ;;  %v4269_v39 = vld [vmem:[#allocation2 + $0x200] sm:$0xff] }
 0x1b2   : > { %v3031_v57 = vsel %vm1034_vm15, %v6879_v47, %v3030_v27  ;;  %v2956_v45 = vsel %vm959_vm5, %v6868_v58, %v2955_v36  ;;  %v7024_v4 = vpop.permute.xlu1 %3166  ;;  %v7026_v18 = vpop.permute.xlu0 %3091  ;;  %v640_v47 = vrot.slane %v5539_v20, %v5643_v5  ;;  %v5540_v27 = vld [vmem:[%s5655_s23 + $0x10] ss:$0 sps:$4 sm:$0x33]   ;;  %v8263_v58 = vrot.slane %v6910_v38, 4 }
 0x1b3   : > { %3041 = vst [vmem:[#allocation2 + $0x248] sm:$0xcc] %v3031_v57  ;;  %2966 = vst [vmem:[#allocation2 + $0x248] sm:$0x33] %v2956_v45  ;;  %v8192_v35 = vrot.slane %v7024_v4, 4  ;;  %v8193_v42 = vrot.slane %v7026_v18, 4 }
 0x1b4   : > { %496 = vrot.lane.b32.xlu1 %v6887_v16, %s5580_s27  ;;  %420 = vrot.lane.b32.xlu0 %v6814_v3, %s8262_s19  ;;  %v8264_v36 = vrot.slane %v6893_v30, 4 }
 0x1b5   : > { %v3179_v31 = vsel %vm277_vm0, %v8263_v58, %v8192_v35 }
 0x1b6   : > { %v3104_v57 = vsel %vm277_vm0, %v8264_v36, %v8193_v42  ;;  %v3180_v16 = vsel %vm8265_vm10, %v6910_v38, %v3179_v31  ;;  %v7050_v20 = vpop.permute.xlu1 %2423  ;;  %v7052_v45 = vpop.permute.xlu0 %2348  ;;  %v4273_v19 = vld [vmem:[#allocation2 + $0x220] sm:$0xff]  ;;  %v5541_v38 = vld [vmem:[%s5655_s23 + $0x10] ss:$0 sps:$4 sm:$0x33]   ;;  %v8266_v31 = vrot.slane %v5893_v29, 4  ;;  %vm8277_vm10 = vcmask 154624  }
 0x1b7   : > { %v3105_v3 = vsel %vm1110_vm14, %v6893_v30, %v3104_v57  ;;  %3190 = vst [vmem:[#allocation2 + $0x268] sm:$0xcc] %v3180_v16  ;;  %v8197_v58 = vrot.slane %v7050_v20, 4  ;;  %v8196_v35 = vrot.slane %v7052_v45, 4  ;;  %v5402_v36 = vcombine.high %v4269_v39, %v4273_v19 }
 0x1b8   : > { %3115 = vst [vmem:[#allocation2 + $0x268] sm:$0x33] %v3105_v3  ;;  %v5401_v42 = vcombine.low %v4269_v39, %v4273_v19  ;;  %649 = vrot.lane.b32.xlu1 %v640_v47, %s5600_s14  ;;  %573 = vrot.lane.b32.xlu0 %v6905_v10, %s5579_s26  ;;  %v791_v30 = vrot.slane %v5540_v27, %v5643_v5  ;;  %v8267_v16 = vrot.slane %v5891_v28, 4  ;;  %s8292_s26 = smov 38  }
 0x1b9   : > { %v2436_v57 = vsel %vm277_vm0, %v8266_v31, %v8197_v58  ;;  %4918 = vmatprep.subr.bf16.mxu0 %v5402_v36  ;;  %v7073_v39 = vcombine.low %v6578_v25, %v6578_v25  ;;  %v5542_v25 = vld [vmem:[%s5655_s23 + $0x10] ss:$0 sps:$4 sm:$0x33]   ;;  %s8281_s23 = smov 19  }
 0x1ba   : > { %v2361_v19 = vsel %vm277_vm0, %v8267_v16, %v8196_v35  ;;  %v2437_v47 = vsel %vm430_vm1, %v5893_v29, %v2436_v57  ;;  %v7079_v3 = vpop.permute.xlu1 %2572  ;;  %4919 = vmatpush2.bf16.msra.mxu0 %v5401_v42  ;;  %v7081_v31 = vpop.permute.xlu0 %2497  ;;  %v338_v29 = vrot.slane %v5541_v38, %v5643_v5  ;;  %v8269_v57 = vrot.slane %v5915_v44, 4 }
 0x1bb   : > { %v2362_v27 = vsel %vm355_vm2, %v5891_v28, %v2361_v19  ;;  %2446 = vst [vmem:[#allocation2 + $0x1d0] sm:$0xcc] %v2437_v47  ;;  %v8194_v16 = vrot.slane %v7079_v3, 4  ;;  %v8195_v36 = vrot.slane %v7081_v31, 4  ;;  %v8268_v28 = vrot.slane %v5917_v46, 4 }
 0x1bc   : > { %2371 = vst [vmem:[#allocation2 + $0x1d0] sm:$0x33] %v2362_v27  ;;  %800 = vrot.lane.b32.xlu1 %v791_v30, %s5602_s17  ;;  %724 = vrot.lane.b32.xlu0 %v6905_v10, %s5601_s18 }
 0x1bd   : > { %v2585_v42 = vsel %vm277_vm0, %v8268_v28, %v8194_v16  ;;  %v2510_v19 = vsel %vm277_vm0, %v8269_v57, %v8195_v36  ;;  %4921 = vmatmul.mubr.bf16.vlgmr.msra.gmra.mxu0 %v7073_v39  ;;  %v4278_v28 = vld [vmem:[#allocation2 + $0x248] sm:$0xff] }
 0x1be   : > { %v2586_v30 = vsel %vm581_vm4, %v5917_v46, %v2585_v42  ;;  %v2511_v38 = vsel %vm506_vm3, %v5915_v44, %v2510_v19  ;;  %v7105_v47 = vpop.permute.xlu1 %2719  ;;  %v7107_v27 = vpop.permute.xlu0 %2644  ;;  %5454 = vmatprep.mubr.msk.bf16.mxu0 %vm8270_vm8, %v6583_v59  ;;  %v489_v44 = vrot.slane %v5542_v25, %v5643_v5  ;;  %v5566_v19 = vld [vmem:[%s5648_s20 + $0xa] sm:$0xff]  ;;  %vm8280_vm8 = vcmask 908288  }
 0x1bf   : > { %v4282_v16 = vld [vmem:[#allocation2 + $0x268] sm:$0xff]  ;;  %2595 = vst [vmem:[#allocation2 + $0x1f0] sm:$0xcc] %v2586_v30  ;;  %2520 = vst [vmem:[#allocation2 + $0x1f0] sm:$0x33] %v2511_v38  ;;  %v8198_v57 = vrot.slane %v7105_v47, 4  ;;  %v4076_v35 = vcombine.high %v5566_v19, %v5566_v19 }
 0x1c0   : > { %v8201_v36 = vrot.slane %v7107_v27, 4  ;;  %v5412_v46 = vcombine.high %v4278_v28, %v4282_v16  ;;  %v5411_v42 = vcombine.low %v4278_v28, %v4282_v16  ;;  %347 = vrot.lane.b32.xlu1 %v338_v29, %s5578_s25  ;;  %270 = vrot.lane.b32.xlu0 %v6905_v10, %s5584_s5  ;;  %v8271_v38 = vrot.slane %v6953_v6, 4  ;;  %s8291_s25 = smov 37  }
 0x1c1   : > { %v2732_v30 = vsel %vm277_vm0, %v2726_v24, %v8198_v57 }
 0x1c2   : > { %v2657_v16 = vsel %vm277_vm0, %v8271_v38, %v8201_v36  ;;  %4957 = vmatprep.subr.bf16.mxu1 %v5412_v46  ;;  %v2733_v29 = vsel %vm732_vm11, %v6965_v9, %v2732_v30  ;;  %v7132_v28 = vpop.permute.xlu1 %2868  ;;  %v7134_v58 = vpop.permute.xlu0 %2793  ;;  %v7142_v9 = vrot.slane %v5566_v19, %v5643_v5  ;;  %v8273_v46 = vrot.slane %v6989_v43, 4 }
 0x1c3   : > { %v2658_v25 = vsel %vm657_vm9, %v6953_v6, %v2657_v16  ;;  %4958 = vmatpush2.bf16.msra.mxu1 %v5411_v42  ;;  %8272 = vst [vmem:[#allocation13_spill] sm:$0xff] %v7134_v58  ;;  %2743 = vst [vmem:[#allocation2 + $0x208] sm:$0xcc] %v2733_v29  ;;  %v8199_v24 = vrot.slane %v7132_v28, 4  ;;  %v8200_v57 = vrot.slane %v7134_v58, 4  ;;  %v7145_v6 = vrot.slane %v4076_v35, %v5643_v5  ;;  %v4263_v16 = vld [vmem:[#allocation2 + $0x1d0] sm:$0xff] }
 0x1c4   : > { %2668 = vst [vmem:[#allocation2 + $0x208] sm:$0x33] %v2658_v25  ;;  %498 = vrot.lane.b32.xlu1 %v489_v44, %s5580_s27  ;;  %422 = vrot.lane.b32.xlu0 %v6905_v10, %s8262_s19  ;;  %v8274_v30 = vrot.slane %v6978_v1, 4 }
 0x1c5   : > { %v2881_v42 = vsel %vm277_vm0, %v8273_v46, %v8199_v24 }
 0x1c6   : > { %v2806_v44 = vsel %vm277_vm0, %v8274_v30, %v8200_v57  ;;  %v2882_v10 = vsel %vm883_vm13, %v6989_v43, %v2881_v42  ;;  %v7161_v35 = vpop.permute.xlu1 %2123  ;;  %v7163_v38 = vpop.permute.xlu0 %2047  ;;  %v4267_v29 = vld [vmem:[#allocation2 + $0x1f0] sm:$0xff]  ;;  %v8276_v42 = vrot.slane %v5983_v23, 4 }
 0x1c7   : > { %v2807_v19 = vsel %vm808_vm12, %v6978_v1, %v2806_v44  ;;  %2892 = vst [vmem:[#allocation2 + $0x228] sm:$0xcc] %v2882_v10  ;;  %v8204_v25 = vrot.slane %v7161_v35, 4  ;;  %v8202_v46 = vrot.slane %v7163_v38, 4  ;;  %v5397_v24 = vcombine.low %v4263_v16, %v4267_v29 }
 0x1c8   : > { %2817 = vst [vmem:[#allocation2 + $0x228] sm:$0x33] %v2807_v19  ;;  %v5398_v30 = vcombine.high %v4263_v16, %v4267_v29  ;;  %4179 = vrot.lane.b32.xlu1 %v7142_v9, %s5583_s30  ;;  %4104 = vrot.lane.b32.xlu0 %v7145_v6, %s5582_s29  ;;  %v8275_v1 = vrot.slane %v5985_v26, 4 }
 0x1c9   : > { %v2061_v44 = vsel %vm277_vm0, %v8276_v42, %v8202_v46 }
 0x1ca   : > { %v2137_v43 = vsel %vm277_vm0, %v8275_v1, %v8204_v25  ;;  %4970 = vmatprep.subr.bf16.mxu0 %v5398_v30  ;;  %v2062_v19 = vsel %vm8277_vm10, %v5983_v23, %v2061_v44  ;;  %v7185_v16 = vpop.permute.xlu1 %2274  ;;  %v7187_v29 = vpop.permute.xlu0 %2198  ;;  %v8278_v23 = vrot.slane %v6009_v41, 4  ;;  %v8279_v30 = vrot.slane %v6007_v34, 4 }
 0x1cb   : > { %v2138_v10 = vsel %vm2133_vm6, %v5985_v26, %v2137_v43  ;;  %4971 = vmatpush1.bf16.msra.mxu0 %v5397_v24  ;;  %2071 = vst [vmem:[#allocation2 + $0x190] sm:$0x33] %v2062_v19  ;;  %v8203_v1 = vrot.slane %v7185_v16, 4  ;;  %v2205_v57 = vrot.slane %v7187_v29, 4  ;;  %v4270_v36 = vld [vmem:[#allocation2 + $0x208] sm:$0xff]  ;;  %vm8286_vm10 = vcmask 719872  }
 0x1cc   : > { %2147 = vst [vmem:[#allocation2 + $0x190] sm:$0xcc] %v2138_v10  ;;  %3881 = vrot.lane.b32.xlu1 %v7142_v9, %s8221_s24  ;;  %3806 = vrot.lane.b32.xlu0 %v7145_v6, %s8218_s10  ;;  %v5545_v26 = vld [vmem:[%s5648_s20 + $0x12] ss:$0 sps:$4 sm:$0x33]  }
 0x1cd   : > { %v2287_v24 = vsel %vm277_vm0, %v8278_v23, %v8203_v1  ;;  %v2212_v43 = vsel %vm277_vm0, %v8279_v30, %v2205_v57  ;;  %v8283_v30 = vrot.slane %v7052_v45, 4 }
 0x1ce   : > { %v2288_v42 = vsel %vm8280_vm8, %v6009_v41, %v2287_v24  ;;  %v2213_v44 = vsel %vm2208_vm7, %v6007_v34, %v2212_v43  ;;  %v2426_v10 = vpop.permute.xlu1 %2425  ;;  %v2351_v19 = vpop.permute.xlu0 %2350  ;;  %v4172_v41 = vrot.slane %v5545_v26, %v5643_v5  ;;  %v8282_v34 = vrot.slane %v7050_v20, 4 }
 0x1cf   : > { %v4274_v46 = vld [vmem:[#allocation2 + $0x228] sm:$0xff]  ;;  %2297 = vst [vmem:[#allocation2 + $0x1b0] sm:$0xcc] %v2288_v42  ;;  %2222 = vst [vmem:[#allocation2 + $0x1b0] sm:$0x33] %v2213_v44  ;;  %v2431_v23 = vrot.slane %v2426_v10, 4 }
 0x1d0   : > { %v2356_v1 = vrot.slane %v2351_v19, 4  ;;  %v5404_v25 = vcombine.high %v4270_v36, %v4274_v46  ;;  %v5403_v58 = vcombine.low %v4270_v36, %v4274_v46  ;;  %4030 = vrot.lane.b32.xlu1 %v7142_v9, %s8281_s23  ;;  %3955 = vrot.lane.b32.xlu0 %v7145_v6, %s8220_s21  ;;  %v7222_v42 = vld.sshfl [vmem:[%s5648_s20 + $0x12] sm:$0x3 pattern:$0x76325410]  ;;  %vm8289_vm8 = vcmask 236544  }
 0x1d1   : > { %v2438_v24 = vsel %vm277_vm0, %v8282_v34, %v2431_v23 }
 0x1d2   : > { %v2363_v43 = vsel %vm277_vm0, %v8283_v30, %v2356_v1  ;;  %4959 = vmatprep.subr.bf16.mxu1 %v5404_v25  ;;  %v2439_v36 = vsel %vm430_vm1, %v7050_v20, %v2438_v24  ;;  %v2575_v44 = vpop.permute.xlu1 %2574  ;;  %v2500_v26 = vpop.permute.xlu0 %2499  ;;  %v8284_v25 = vrot.slane %v7079_v3, 4  ;;  %v8285_v20 = vrot.slane %v7081_v31, 4 }
 0x1d3   : > { %v2364_v46 = vsel %vm355_vm2, %v7052_v45, %v2363_v43  ;;  %4960 = vmatpush2.bf16.msra.mxu1 %v5403_v58  ;;  %2447 = vst [vmem:[#allocation2 + $0x1d8] sm:$0xcc] %v2439_v36  ;;  %v2580_v10 = vrot.slane %v2575_v44, 4  ;;  %v2505_v19 = vrot.slane %v2500_v26, 4  ;;  %v4255_v24 = vld [vmem:[#allocation2 + $0x190] sm:$0xff]  ;;  %v8287_v44 = vrot.slane %v6087_v53, 4 }
 0x1d4   : > { %2372 = vst [vmem:[#allocation2 + $0x1d8] sm:$0x33] %v2364_v46  ;;  %4181 = vrot.lane.b32.xlu1 %v4172_v41, %s5583_s30  ;;  %4106 = vrot.lane.b32.xlu0 %v7222_v42, %s5582_s29  ;;  %v8288_v26 = vrot.slane %v6085_v49, 4 }
 0x1d5   : > { %v2587_v1 = vsel %vm277_vm0, %v8284_v25, %v2580_v10  ;;  %v2512_v45 = vsel %vm277_vm0, %v8285_v20, %v2505_v19 }
 0x1d6   : > { %4962 = vmatmul.mubr.bf16.vlgmr.msra.gmra.mxu1 %v7073_v39  ;;  %v2588_v58 = vsel %vm581_vm4, %v7079_v3, %v2587_v1  ;;  %v2513_v23 = vsel %vm506_vm3, %v7081_v31, %v2512_v45  ;;  %v7242_v41 = vpop.permute.xlu1 %1821  ;;  %v7244_v34 = vpop.permute.xlu0 %1745  ;;  %v4259_v30 = vld [vmem:[#allocation2 + $0x1b0] sm:$0xff] }
 0x1d7   : > { %5456 = vmatprep.mubr.msk.bf16.mxu1 %vm8286_vm10, %v6583_v59  ;;  %2596 = vst [vmem:[#allocation2 + $0x1f8] sm:$0xcc] %v2588_v58  ;;  %2521 = vst [vmem:[#allocation2 + $0x1f8] sm:$0x33] %v2513_v23  ;;  %v1828_v43 = vrot.slane %v7242_v41, 4  ;;  %v8208_v36 = vrot.slane %v7244_v34, 4  ;;  %v5389_v46 = vcombine.low %v4255_v24, %v4259_v30  ;;  %v5390_v3 = vcombine.high %v4255_v24, %v4259_v30 }
 0x1d8   : > { %3583 = vrot.lane.b32.xlu1 %v7142_v9, %s8233_s28  ;;  %3508 = vrot.lane.b32.xlu0 %v7145_v6, %s5590_s11  ;;  %v5546_v31 = vld [vmem:[%s5648_s20 + $0x12] ss:$0 sps:$4 sm:$0x33]   ;;  %vm8290_vm10 = vcmask 302080   ;;  %v8293_v23 = vrot.slane %v6111_v52, 4  ;;  %v8294_v30 = vrot.slane %v6109_v50, 4 }
 0x1d9   : > { %v1835_v59 = vsel %vm277_vm0, %v8287_v44, %v1828_v43  ;;  %v1759_v10 = vsel %vm277_vm0, %v8288_v26, %v8208_v36  ;;  %4972 = vmatprep.subr.bf16.mxu0 %v5390_v3 }
 0x1da   : > { %v1836_v19 = vsel %vm8289_vm8, %v6087_v53, %v1835_v59  ;;  %v1760_v25 = vsel %vm8290_vm10, %v6085_v49, %v1759_v10  ;;  %v7269_v1 = vpop.permute.xlu1 %1972  ;;  %4973 = vmatpush1.bf16.msra.mxu0 %v5389_v46  ;;  %v7271_v20 = vpop.permute.xlu0 %1896  ;;  %v3874_v49 = vrot.slane %v5546_v31, %v5643_v5  ;;  %v5547_v53 = vld [vmem:[%s5648_s20 + $0x12] ss:$0 sps:$4 sm:$0x33]   ;;  %vm8295_vm8 = vcmask 220160  }
 0x1db   : > { %1845 = vst [vmem:[#allocation2 + $0x150] sm:$0xcc] %v1836_v19  ;;  %1769 = vst [vmem:[#allocation2 + $0x150] sm:$0x33] %v1760_v25  ;;  %v8207_v45 = vrot.slane %v7269_v1, 4  ;;  %v1903_v58 = vrot.slane %v7271_v20, 4 }
 0x1dc   : > { %3732 = vrot.lane.b32.xlu1 %v7142_v9, %s8291_s25  ;;  %3657 = vrot.lane.b32.xlu0 %v7145_v6, %s8292_s26  ;;  %vm8296_vm10 = vcmask 228352   ;;  %v4264_v26 = vld [vmem:[#allocation2 + $0x1d8] sm:$0xff]  ;;  %v7296_v19 = vld [vmem:[%s5648_s20 + $0xa] sm:$0xff] }
 0x1dd   : > { %v1986_v24 = vsel %vm277_vm0, %v8293_v23, %v8207_v45  ;;  %v1910_v46 = vsel %vm277_vm0, %v8294_v30, %v1903_v58  ;;  %5327 = vst.sshfl [vmem:[#allocation2 + $0x290] sm:$0xf pattern:$0x76325410] %v7296_v19  ;;  %v8298_v30 = vrot.slane %v7163_v38, 4 }
 0x1de   : > { %v1987_v3 = vsel %vm8295_vm8, %v6111_v52, %v1986_v24  ;;  %v1911_v44 = vsel %vm8296_vm10, %v6109_v50, %v1910_v46  ;;  %v2126_v31 = vpop.permute.xlu1 %2125  ;;  %v2050_v59 = vpop.permute.xlu0 %2049  ;;  %v4268_v10 = vld [vmem:[#allocation2 + $0x1f8] sm:$0xff]  ;;  %v4023_v50 = vrot.slane %v5547_v53, %v5643_v5  ;;  %v8297_v52 = vrot.slane %v7161_v35, 4 }
 0x1df   : > { %1996 = vst [vmem:[#allocation2 + $0x170] sm:$0xcc] %v1987_v3  ;;  %1920 = vst [vmem:[#allocation2 + $0x170] sm:$0x33] %v1911_v44  ;;  %v2131_v25 = vrot.slane %v2126_v31, 4  ;;  %v2055_v23 = vrot.slane %v2050_v59, 4  ;;  %v5399_v45 = vcombine.low %v4264_v26, %v4268_v10  ;;  %v5400_v36 = vcombine.high %v4264_v26, %v4268_v10 }
 0x1e0   : > { %3883 = vrot.lane.b32.xlu1 %v3874_v49, %s8221_s24  ;;  %3808 = vrot.lane.b32.xlu0 %v7222_v42, %s8218_s10  ;;  %vm8299_vm8 = vcmask 154624   ;;  %vm8301_vm10 = vcmask 908288   ;;  %s8327_s24 = smov 89  }
 0x1e1   : > { %v2139_v24 = vsel %vm277_vm0, %v8297_v52, %v2131_v25  ;;  %v2063_v46 = vsel %vm277_vm0, %v8298_v30, %v2055_v23  ;;  %5011 = vmatprep.subr.bf16.mxu1 %v5400_v36  ;;  %v8300_v36 = vrot.slane %v7185_v16, 4 }
 0x1e2   : > { %v2140_v3 = vsel %vm2133_vm6, %v7161_v35, %v2139_v24  ;;  %v2064_v49 = vsel %vm8299_vm8, %v7163_v38, %v2063_v46  ;;  %v2277_v44 = vpop.permute.xlu1 %2276  ;;  %5012 = vmatpush1.bf16.msra.mxu1 %v5399_v45  ;;  %v2201_v31 = vpop.permute.xlu0 %2200  ;;  %v4247_v23 = vld [vmem:[#allocation2 + $0x150] sm:$0xff]  ;;  %vm8304_vm8 = vcmask 957440  }
 0x1e3   : > { %2148 = vst [vmem:[#allocation2 + $0x198] sm:$0xcc] %v2140_v3  ;;  %2072 = vst [vmem:[#allocation2 + $0x198] sm:$0x33] %v2064_v49  ;;  %v2282_v53 = vrot.slane %v2277_v44, 4  ;;  %v2206_v59 = vrot.slane %v2201_v31, 4 }
 0x1e4   : > { %4032 = vrot.lane.b32.xlu1 %v4023_v50, %s8281_s23  ;;  %3957 = vrot.lane.b32.xlu0 %v7222_v42, %s8220_s21  ;;  %v8303_v3 = vrot.slane %v6173_v17, 4 }
 0x1e5   : > { %v2289_v26 = vsel %vm277_vm0, %v8300_v36, %v2282_v53  ;;  %v2214_v35 = vsel %vm277_vm0, %v2205_v57, %v2206_v59 }
 0x1e6   : > { %v2290_v38 = vsel %vm8301_vm10, %v7185_v16, %v2289_v26  ;;  %v2215_v45 = vsel %vm2208_vm7, %v7187_v29, %v2214_v35  ;;  %v7326_v10 = vpop.permute.xlu1 %1519  ;;  %v7328_v25 = vpop.permute.xlu0 %1443  ;;  %v4251_v50 = vld [vmem:[#allocation2 + $0x170] sm:$0xff]  ;;  %v8302_v29 = vrot.slane %v6175_v12, 4  ;;  %vm8305_vm10 = vcmask 965632  }
 0x1e7   : > { %2298 = vst [vmem:[#allocation2 + $0x1b8] sm:$0xcc] %v2290_v38  ;;  %2223 = vst [vmem:[#allocation2 + $0x1b8] sm:$0x33] %v2215_v45  ;;  %v1526_v52 = vrot.slane %v7326_v10, 4  ;;  %v1450_v24 = vrot.slane %v7328_v25, 4  ;;  %v5381_v30 = vcombine.low %v4247_v23, %v4251_v50  ;;  %v5382_v57 = vcombine.high %v4247_v23, %v4251_v50 }
 0x1e8   : > { %3359 = vrot.lane.b32.xlu1 %v7145_v6, %s8211_s8  ;;  %3285 = vrot.lane.b32.xlu0 %v7142_v9, %s8210_s9  ;;  %v5548_v16 = vld [vmem:[%s5648_s20 + $0x12] ss:$0 sps:$4 sm:$0x33]   ;;  %v8306_v38 = vrot.slane %v6199_v48, 4  ;;  %v8307_v23 = vrot.slane %v6197_v40, 4 }
 0x1e9   : > { %v1533_v46 = vsel %vm277_vm0, %v8302_v29, %v1526_v52  ;;  %v1457_v49 = vsel %vm277_vm0, %v8303_v3, %v1450_v24  ;;  %4974 = vmatprep.subr.bf16.mxu0 %v5382_v57  ;;  %v5549_v35 = vld [vmem:[%s5648_s20 + $0x12] ss:$0 sps:$4 sm:$0x33]  }
 0x1ea   : > { %v1534_v6 = vsel %vm8304_vm8, %v6175_v12, %v1533_v46  ;;  %v1458_v44 = vsel %vm8305_vm10, %v6173_v17, %v1457_v49  ;;  %v7351_v31 = vpop.permute.xlu1 %1670  ;;  %4975 = vmatpush1.bf16.msra.mxu0 %v5381_v30  ;;  %v7353_v53 = vpop.permute.xlu0 %1594  ;;  %v3576_v12 = vrot.slane %v5548_v16, %v5643_v5  ;;  %v5567_v17 = vld [vmem:[%s5648_s20 + $0x8] sm:$0xff]  ;;  %vm8308_vm8 = vcmask 310272   ;;  %v4256_v29 = vld [vmem:[#allocation2 + $0x198] sm:$0xff] }
 0x1eb   : > { %1543 = vst [vmem:[#allocation2 + $0x110] sm:$0xcc] %v1534_v6  ;;  %1467 = vst [vmem:[#allocation2 + $0x110] sm:$0x33] %v1458_v44  ;;  %v1677_v59 = vrot.slane %v7351_v31, 4  ;;  %v1601_v36 = vrot.slane %v7353_v53, 4  ;;  %v2916_v26 = vcombine.high %v5567_v17, %v5567_v17 }
 0x1ec   : > { %3510 = vrot.lane.b32.xlu1 %v7222_v42, %s5590_s11  ;;  %3434 = vrot.lane.b32.xlu0 %v7142_v9, %s8212_s7  ;;  %vm8309_vm10 = vcmask 318464  }
 0x1ed   : > { %v1684_v45 = vsel %vm277_vm0, %v8306_v38, %v1677_v59  ;;  %v1608_v50 = vsel %vm277_vm0, %v8307_v23, %v1601_v36 }
 0x1ee   : > { %v1685_v9 = vsel %vm8308_vm8, %v6199_v48, %v1684_v45  ;;  %v1609_v30 = vsel %vm8309_vm10, %v6197_v40, %v1608_v50  ;;  %v1824_v57 = vpop.permute.xlu1 %1823  ;;  %v1748_v16 = vpop.permute.xlu0 %1747  ;;  %v4260_v46 = vld [vmem:[#allocation2 + $0x1b8] sm:$0xff]  ;;  %v7382_v48 = vrot.slane %v2916_v26, %v5643_v5  ;;  %v3725_v40 = vrot.slane %v5549_v35, %v5643_v5 }
 0x1ef   : > { %1694 = vst [vmem:[#allocation2 + $0x130] sm:$0xcc] %v1685_v9  ;;  %1618 = vst [vmem:[#allocation2 + $0x130] sm:$0x33] %v1609_v30  ;;  %v1829_v3 = vrot.slane %v1824_v57, 4  ;;  %v1753_v49 = vrot.slane %v1748_v16, 4  ;;  %v5391_v6 = vcombine.low %v4256_v29, %v4260_v46  ;;  %v5392_v44 = vcombine.high %v4256_v29, %v4260_v46 }
 0x1f0   : > { %3659 = vrot.lane.b32.xlu1 %v7222_v42, %s8292_s26  ;;  %3585 = vrot.lane.b32.xlu0 %v3576_v12, %s8233_s28  ;;  %v8310_v45 = vrot.slane %v7244_v34, 4  ;;  %v3212_v50 = vcombine.high %v7296_v19, %v7296_v19  ;;  %vm8311_vm8 = vcmask 236544   ;;  %vm8312_vm10 = vcmask 302080   ;;  %s5468_s28 = smul.u32 40, %s8397_s16 }
 0x1f1   : > { %v1837_v38 = vsel %vm277_vm0, %v1828_v43, %v1829_v3  ;;  %5013 = vmatprep.subr.bf16.mxu1 %v5392_v44  ;;  %v7401_v19 = vrot.slane %v5567_v17, %v5643_v5  ;;  %v8313_v57 = vrot.slane %v7269_v1, 4 }
 0x1f2   : > { %v1761_v23 = vsel %vm277_vm0, %v8310_v45, %v1753_v49  ;;  %v1838_v12 = vsel %vm8311_vm8, %v7242_v41, %v1837_v38  ;;  %v1975_v35 = vpop.permute.xlu1 %1974  ;;  %5014 = vmatpush1.bf16.msra.mxu1 %v5391_v6  ;;  %v1899_v9 = vpop.permute.xlu0 %1898  ;;  %5328 = vst.sshfl [vmem:[#allocation2 + $0x298] sm:$0xf pattern:$0x76325410] %v3212_v50  ;;  %vm8314_vm8 = vcmask 220160   ;;  %v4239_v49 = vld [vmem:[#allocation2 + $0x110] sm:$0xff]  ;;  %s8023_s5 = scalar_lea.vmem %s8064_s4, %s5468_s28 }
 0x1f3   : > { %v1762_v26 = vsel %vm8312_vm10, %v7244_v34, %v1761_v23  ;;  %1846 = vst [vmem:[#allocation2 + $0x158] sm:$0xcc] %v1838_v12  ;;  %v1980_v43 = vrot.slane %v1975_v35, 4  ;;  %v1904_v30 = vrot.slane %v1899_v9, 4  ;;  %vm8315_vm10 = vcmask 228352  }
 0x1f4   : > { %1770 = vst [vmem:[#allocation2 + $0x158] sm:$0x33] %v1762_v26  ;;  %2944 = vrot.lane.b32.xlu1 %v7382_v48, %s8248_s13  ;;  %3734 = vrot.lane.b32.xlu0 %v3725_v40, %s8291_s25  ;;  %v5550_v41 = vld [vmem:[%s5648_s20 + $0x12] ss:$0 sps:$4 sm:$0x33]   ;;  %v8316_v45 = vrot.slane %v6271_v0, 4 }
 0x1f5   : > { %v1988_v34 = vsel %vm277_vm0, %v8313_v57, %v1980_v43  ;;  %v1912_v16 = vsel %vm277_vm0, %v1903_v58, %v1904_v30  ;;  %v8317_v50 = vrot.slane %v6269_v22, 4 }
 0x1f6   : > { %v1989_v29 = vsel %vm8314_vm8, %v7269_v1, %v1988_v34  ;;  %v1913_v46 = vsel %vm8315_vm10, %v7271_v20, %v1912_v16  ;;  %v7414_v3 = vpop.permute.xlu1 %1292  ;;  %v7416_v17 = vpop.permute.xlu0 %1175  ;;  %v4243_v6 = vld [vmem:[#allocation2 + $0x130] sm:$0xff]  ;;  %v3278_v1 = vrot.slane %v5550_v41, %v5643_v5  ;;  %vm8318_vm8 = vcmask 1039360  }
 0x1f7   : > { %1997 = vst [vmem:[#allocation2 + $0x178] sm:$0xcc] %v1989_v29  ;;  %1921 = vst [vmem:[#allocation2 + $0x178] sm:$0x33] %v1913_v46  ;;  %v1299_v44 = vrot.slane %v7414_v3, 4  ;;  %v1182_v40 = vrot.slane %v7416_v17, 4  ;;  %v5373_v58 = vcombine.low %v4239_v49, %v4243_v6  ;;  %v5374_v38 = vcombine.high %v4239_v49, %v4243_v6 }
 0x1f8   : > { %3093 = vrot.lane.b32.xlu1 %v7382_v48, %s8250_s6  ;;  %3019 = vrot.lane.b32.xlu0 %v7401_v19, %s5598_s22  ;;  %v5551_v20 = vld [vmem:[%s5648_s20 + $0x12] ss:$0 sps:$4 sm:$0x33]   ;;  %vm8319_vm10 = vcmask 7168  }
 0x1f9   : > { %v1306_v23 = vsel %vm277_vm0, %v8316_v45, %v1299_v44  ;;  %v1189_v12 = vsel %vm277_vm0, %v8317_v50, %v1182_v40  ;;  %4976 = vmatprep.subr.bf16.mxu0 %v5374_v38  ;;  %v3427_v57 = vrot.slane %v5551_v20, %v5643_v5 }
 0x1fa   : > { %v1307_v26 = vsel %vm8318_vm8, %v6271_v0, %v1306_v23  ;;  %v1190_v35 = vsel %vm8319_vm10, %v6269_v22, %v1189_v12  ;;  %v1446_v9 = vpop.permute.xlu1 %1445  ;;  %4977 = vmatpush1.bf16.msra.mxu0 %v5373_v58  ;;  %v7440_v43 = vpop.permute.xlu0 %1368  ;;  %v8320_v0 = vrot.slane %v6293_v37, 4  ;;  %vm8321_vm8 = vcmask 965632  }
 0x1fb   : > { %1316 = vst [vmem:[#allocation2 + $0xf0] sm:$0x33] %v1307_v26  ;;  %1199 = vst [vmem:[#allocation2 + $0xd0] sm:$0x33] %v1190_v35  ;;  %v1451_v30 = vrot.slane %v1446_v9, 4  ;;  %v1375_v41 = vrot.slane %v7440_v43, 4 }
 0x1fc   : > { %3287 = vrot.lane.b32.xlu1 %v3278_v1, %s8210_s9  ;;  %3168 = vrot.lane.b32.xlu0 %v7401_v19, %s8213_s12  ;;  %vm8322_vm10 = vcmask 973824   ;;  %v4248_v6 = vld [vmem:[#allocation2 + $0x158] sm:$0xff] }
 0x1fd   : > { %v1459_v22 = vsel %vm277_vm0, %v1450_v24, %v1451_v30  ;;  %v1382_v34 = vsel %vm277_vm0, %v8320_v0, %v1375_v41 }
 0x1fe   : > { %v1460_v16 = vsel %vm8321_vm8, %v7328_v25, %v1459_v22  ;;  %v1383_v29 = vsel %vm8322_vm10, %v6293_v37, %v1382_v34  ;;  %v1597_v46 = vpop.permute.xlu1 %1596  ;;  %v1522_v49 = vpop.permute.xlu0 %1521  ;;  %v4252_v58 = vld [vmem:[#allocation2 + $0x178] sm:$0xff]  ;;  %vm8323_vm8 = vcmask 318464   ;;  %vm8324_vm10 = vcmask 957440  }
 0x1ff   : > { %1468 = vst [vmem:[#allocation2 + $0x118] sm:$0x33] %v1460_v16  ;;  %1392 = vst [vmem:[#allocation2 + $0xf0] sm:$0xcc] %v1383_v29  ;;  %v1602_v38 = vrot.slane %v1597_v46, 4  ;;  %v1527_v24 = vrot.slane %v1522_v49, 4  ;;  %v5383_v1 = vcombine.low %v4248_v6, %v4252_v58  ;;  %v5384_v20 = vcombine.high %v4248_v6, %v4252_v58 }
 0x200   : > { %3436 = vrot.lane.b32.xlu1 %v3427_v57, %s8212_s7  ;;  %3361 = vrot.lane.b32.xlu0 %v7222_v42, %s8211_s8  ;;  %v8328_v46 = vrot.slane %v6373_v8, 4  ;;  %v8329_v6 = vrot.slane %v6375_v60, 4 }
 0x201   : > { %v1610_v37 = vsel %vm277_vm0, %v1601_v36, %v1602_v38  ;;  %v1535_v25 = vsel %vm277_vm0, %v1526_v52, %v1527_v24  ;;  %5015 = vmatprep.subr.bf16.mxu1 %v5384_v20  ;;  %v5553_v52 = vld [vmem:[%s5648_s20 + $0x10] ss:$0 sps:$4 sm:$0x33]  }
 0x202   : > { %v1611_v45 = vsel %vm8323_vm8, %v7353_v53, %v1610_v37  ;;  %v1536_v23 = vsel %vm8324_vm10, %v7326_v10, %v1535_v25  ;;  %v7472_v50 = vpop.permute.xlu1 %873  ;;  %5016 = vmatpush1.bf16.msra.mxu1 %v5383_v1  ;;  %v1673_v12 = vpop.permute.xlu0 %1672  ;;  %v8325_v10 = vrot.slane %v6350_v14, 4  ;;  %vm8326_vm8 = vcmask 310272   ;;  %v4231_v22 = vld [vmem:[#allocation2 + $0xd0] sm:$0xff] }
 0x203   : > { %1619 = vst [vmem:[#allocation2 + $0x138] sm:$0x33] %v1611_v45  ;;  %1544 = vst [vmem:[#allocation2 + $0x118] sm:$0xcc] %v1536_v23  ;;  %v880_v42 = vrot.slane %v7472_v50, 4  ;;  %v1678_v36 = vrot.slane %v1673_v12, 4 }
 0x204   : > { %2721 = vrot.lane.b32.xlu1 %v7401_v19, %s5601_s18  ;;  %2646 = vrot.lane.b32.xlu0 %v7382_v48, %s5600_s14  ;;  %v5555_v45 = vld [vmem:[%s5648_s20 + $0x10] ss:$0 sps:$4 sm:$0x33]   ;;  %vm8331_vm10 = vcmask 7168  }
 0x205   : > { %v887_v53 = vsel %vm277_vm0, %v8325_v10, %v880_v42  ;;  %v1686_v26 = vsel %vm277_vm0, %v1677_v59, %v1678_v36 }
 0x206   : > { %v888_v35 = vsel %vm883_vm13, %v6350_v14, %v887_v53  ;;  %v1687_v9 = vsel %vm8326_vm8, %v7351_v31, %v1686_v26  ;;  %v7492_v30 = vpop.permute.xlu1 %1024  ;;  %v7494_v57 = vpop.permute.xlu0 %949  ;;  %v4235_v0 = vld [vmem:[#allocation2 + $0xf0] sm:$0xff]  ;;  %v3012_v14 = vrot.slane %v5553_v52, %v5643_v5  ;;  %vm8332_vm8 = vcmask 973824  }
 0x207   : > { %897 = vst [vmem:[#allocation2 + $0x90] sm:$0x33] %v888_v35  ;;  %1695 = vst [vmem:[#allocation2 + $0x138] sm:$0xcc] %v1687_v9  ;;  %v1031_v34 = vrot.slane %v7492_v30, 4  ;;  %v956_v59 = vrot.slane %v7494_v57, 4  ;;  %v5365_v16 = vcombine.low %v4231_v22, %v4235_v0  ;;  %v5366_v29 = vcombine.high %v4231_v22, %v4235_v0 }
 0x208   : > { %2870 = vrot.lane.b32.xlu1 %v7401_v19, %s8327_s24  ;;  %2795 = vrot.lane.b32.xlu0 %v7382_v48, %s5602_s17  ;;  %v5554_v31 = vld [vmem:[%s5648_s20 + $0x10] ss:$0 sps:$4 sm:$0x33]   ;;  %v2714_v0 = vrot.slane %v5555_v45, %v5643_v5 }
 0x209   : > { %v1038_v49 = vsel %vm277_vm0, %v8328_v46, %v1031_v34  ;;  %v963_v58 = vsel %vm277_vm0, %v8329_v6, %v956_v59  ;;  %4978 = vmatprep.subr.bf16.mxu0 %v5366_v29  ;;  %v5323_v19 = vld.sshfl [vmem:[%s5648_s20 + $0x10] sm:$0x3 pattern:$0x76325410]  ;;  %v3161_v25 = vrot.slane %v5554_v31, %v5643_v5  ;;  %v8335_v6 = vrot.slane %v6444_v2, 4 }
 0x20a   : > { %v1039_v48 = vsel %vm1034_vm15, %v6373_v8, %v1038_v49  ;;  %v964_v38 = vsel %vm959_vm5, %v6375_v60, %v963_v58  ;;  %v1178_v24 = vpop.permute.xlu1 %1177  ;;  %4979 = vmatpush1.bf16.msra.mxu0 %v5365_v16  ;;  %v7519_v1 = vpop.permute.xlu0 %1100  ;;  %v8330_v8 = vrot.slane %v6397_v56, 4  ;;  %v4240_v53 = vld [vmem:[#allocation2 + $0x118] sm:$0xff] }
 0x20b   : > { %1048 = vst [vmem:[#allocation2 + $0xb0] sm:$0x33] %v1039_v48  ;;  %973 = vst [vmem:[#allocation2 + $0x90] sm:$0xcc] %v964_v38  ;;  %v1183_v20 = vrot.slane %v1178_v24, 4  ;;  %v1107_v37 = vrot.slane %v7519_v1, 4 }
 0x20c   : > { %3021 = vrot.lane.b32.xlu1 %v3012_v14, %s5598_s22  ;;  %2946 = vrot.lane.b32.xlu0 %v5323_v19, %s8248_s13 }
 0x20d   : > { %v1191_v60 = vsel %vm277_vm0, %v1182_v40, %v1183_v20  ;;  %v1114_v23 = vsel %vm277_vm0, %v8330_v8, %v1107_v37 }
 0x20e   : > { %v1192_v12 = vsel %vm8331_vm10, %v7416_v17, %v1191_v60  ;;  %v1115_v36 = vsel %vm1110_vm14, %v6397_v56, %v1114_v23  ;;  %v1371_v52 = vpop.permute.xlu1 %1370  ;;  %v1295_v10 = vpop.permute.xlu0 %1294  ;;  %v4244_v26 = vld [vmem:[#allocation2 + $0x138] sm:$0xff]  ;;  %v5556_v17 = vld [vmem:[%s5648_s20 + $0x10] ss:$0 sps:$4 sm:$0x33]   ;;  %vm8333_vm10 = vcmask 1039360  }
 0x20f   : > { %1200 = vst [vmem:[#allocation2 + $0xd8] sm:$0x33] %v1192_v12  ;;  %1124 = vst [vmem:[#allocation2 + $0xb0] sm:$0xcc] %v1115_v36  ;;  %v1376_v40 = vrot.slane %v1371_v52, 4  ;;  %v1300_v35 = vrot.slane %v1295_v10, 4  ;;  %v5375_v9 = vcombine.low %v4240_v53, %v4244_v26  ;;  %v5376_v22 = vcombine.high %v4240_v53, %v4244_v26 }
 0x210   : > { %3170 = vrot.lane.b32.xlu1 %v3161_v25, %s8213_s12  ;;  %3095 = vrot.lane.b32.xlu0 %v5323_v19, %s8250_s6  ;;  %v8337_v12 = vrot.slane %v6466_v15, 4 }
 0x211   : > { %v1384_v56 = vsel %vm277_vm0, %v1375_v41, %v1376_v40  ;;  %v1308_v16 = vsel %vm277_vm0, %v1299_v44, %v1300_v35  ;;  %5017 = vmatprep.subr.bf16.mxu1 %v5376_v22  ;;  %v2863_v44 = vrot.slane %v5556_v17, %v5643_v5 }
 0x212   : > { %v1385_v29 = vsel %vm8332_vm8, %v7440_v43, %v1384_v56  ;;  %v1309_v14 = vsel %vm8333_vm10, %v7414_v3, %v1308_v16  ;;  %v7552_v31 = vpop.permute.xlu1 %647  ;;  %5018 = vmatpush1.bf16.msra.mxu1 %v5375_v9  ;;  %v7554_v46 = vpop.permute.xlu0 %571  ;;  %v8334_v3 = vrot.slane %v6468_v54, 4  ;;  %v4223_v20 = vld [vmem:[#allocation2 + $0x90] sm:$0xff]  ;;  %vm8340_vm8 = vcmask 908288  }
 0x213   : > { %1393 = vst [vmem:[#allocation2 + $0xf8] sm:$0xcc] %v1385_v29  ;;  %1317 = vst [vmem:[#allocation2 + $0xf8] sm:$0x33] %v1309_v14  ;;  %v654_v41 = vrot.slane %v7552_v31, 4  ;;  %v578_v49 = vrot.slane %v7554_v46, 4 }
 0x214   : > { %2723 = vrot.lane.b32.xlu1 %v2714_v0, %s5601_s18  ;;  %2648 = vrot.lane.b32.xlu0 %v5323_v19, %s5600_s14  ;;  %vm8356_vm10 = vcmask 220160  }
 0x215   : > { %v661_v43 = vsel %vm277_vm0, %v8334_v3, %v654_v41  ;;  %v585_v58 = vsel %vm277_vm0, %v8335_v6, %v578_v49 }
 0x216   : > { %v662_v48 = vsel %vm657_vm9, %v6468_v54, %v661_v43  ;;  %v586_v38 = vsel %vm581_vm4, %v6444_v2, %v585_v58  ;;  %v7575_v24 = vpop.permute.xlu1 %798  ;;  %v7577_v5 = vpop.permute.xlu0 %722  ;;  %v4227_v25 = vld [vmem:[#allocation2 + $0xb0] sm:$0xff]  ;;  %v8336_v54 = vrot.slane %v6492_v7, 4  ;;  %v4232_v26 = vld [vmem:[#allocation2 + $0xd8] sm:$0xff] }
 0x217   : > { %671 = vst [vmem:[#allocation2 + $0x50] sm:$0xcc] %v662_v48  ;;  %595 = vst [vmem:[#allocation2 + $0x50] sm:$0x33] %v586_v38  ;;  %v805_v45 = vrot.slane %v7575_v24, 4  ;;  %v729_v60 = vrot.slane %v7577_v5, 4  ;;  %v5357_v8 = vcombine.low %v4223_v20, %v4227_v25  ;;  %v5358_v23 = vcombine.high %v4223_v20, %v4227_v25 }
 0x218   : > { %2872 = vrot.lane.b32.xlu1 %v2863_v44, %s8327_s24  ;;  %2797 = vrot.lane.b32.xlu0 %v5323_v19, %s5602_s17  ;;  %v8338_v20 = vrot.slane %v6522_v61, 4 }
 0x219   : > { %v812_v2 = vsel %vm277_vm0, %v8336_v54, %v805_v45  ;;  %v736_v36 = vsel %vm277_vm0, %v8337_v12, %v729_v60  ;;  %4980 = vmatprep.subr.bf16.mxu0 %v5358_v23 }
 0x21a   : > { %v813_v52 = vsel %vm808_vm12, %v6492_v7, %v812_v2  ;;  %v737_v10 = vsel %vm732_vm11, %v6466_v15, %v736_v36  ;;  %v952_v19 = vpop.permute.xlu1 %951  ;;  %4981 = vmatpush1.bf16.msra.mxu0 %v5357_v8  ;;  %v876_v53 = vpop.permute.xlu0 %875  ;;  %v4236_v40 = vld [vmem:[#allocation2 + $0xf8] sm:$0xff] }
 0x21b   : > { %822 = vst [vmem:[#allocation2 + $0x70] sm:$0xcc] %v813_v52  ;;  %746 = vst [vmem:[#allocation2 + $0x70] sm:$0x33] %v737_v10  ;;  %v957_v35 = vrot.slane %v952_v19, 4  ;;  %v881_v9 = vrot.slane %v876_v53, 4  ;;  %v5367_v22 = vcombine.low %v4232_v26, %v4236_v40  ;;  %v5368_v0 = vcombine.high %v4232_v26, %v4236_v40 }
 0x21c   : > { %v8341_v52 = vrot.slane %v6545_v21, 4  ;;  %v8342_v19 = vrot.slane %v6520_v55, 4 }
 0x21d   : > { %v965_v17 = vsel %vm277_vm0, %v956_v59, %v957_v35  ;;  %v889_v7 = vsel %vm277_vm0, %v880_v42, %v881_v9  ;;  %5019 = vmatprep.subr.bf16.mxu1 %v5368_v0 }
 0x21e   : > { %v966_v15 = vsel %vm959_vm5, %v7494_v57, %v965_v17  ;;  %v890_v56 = vsel %vm883_vm13, %v7472_v50, %v889_v7  ;;  %v1103_v16 = vpop.permute.xlu1 %1102  ;;  %5020 = vmatpush1.bf16.msra.mxu1 %v5367_v22  ;;  %v1027_v29 = vpop.permute.xlu0 %1026  ;;  %v4215_v6 = vld [vmem:[#allocation2 + $0x50] sm:$0xff] }
 0x21f   : > { %974 = vst [vmem:[#allocation2 + $0x98] sm:$0xcc] %v966_v15  ;;  %898 = vst [vmem:[#allocation2 + $0x98] sm:$0x33] %v890_v56  ;;  %v1108_v14 = vrot.slane %v1103_v16, 4  ;;  %v1032_v44 = vrot.slane %v1027_v29, 4 }
 0x221   : > { %v1116_v59 = vsel %vm277_vm0, %v1107_v37, %v1108_v14  ;;  %v1040_v42 = vsel %vm277_vm0, %v1031_v34, %v1032_v44 }
 0x222   : > { %v1117_v57 = vsel %vm1110_vm14, %v7519_v1, %v1116_v59  ;;  %v1041_v50 = vsel %vm1034_vm15, %v7492_v30, %v1040_v42  ;;  %v7617_v3 = vpop.permute.xlu1 %345  ;;  %v7619_v43 = vpop.permute.xlu0 %268  ;;  %v4219_v58 = vld [vmem:[#allocation2 + $0x70] sm:$0xff]  ;;  %v8339_v30 = vrot.slane %v6490_v33, 4 }
 0x223   : > { %1125 = vst [vmem:[#allocation2 + $0xb8] sm:$0xcc] %v1117_v57  ;;  %1049 = vst [vmem:[#allocation2 + $0xb8] sm:$0x33] %v1041_v50  ;;  %v352_v37 = vrot.slane %v7617_v3, 4  ;;  %v275_v48 = vrot.slane %v7619_v43, 4  ;;  %v5349_v38 = vcombine.low %v4215_v6, %v4219_v58  ;;  %v5350_v34 = vcombine.high %v4215_v6, %v4219_v58 }
 0x225   : > { %v359_v1 = vsel %vm277_vm0, %v8338_v20, %v352_v37  ;;  %v283_v25 = vsel %vm277_vm0, %v8339_v30, %v275_v48  ;;  %4982 = vmatprep.subr.bf16.mxu0 %v5350_v34 }
 0x226   : > { %v360_v8 = vsel %vm355_vm2, %v6522_v61, %v359_v1  ;;  %v284_v23 = vsel %vm8340_vm8, %v6490_v33, %v283_v25  ;;  %v497_v54 = vpop.permute.xlu1 %496  ;;  %4983 = vmatpush1.bf16.msra.mxu0 %v5349_v38  ;;  %v421_v2 = vpop.permute.xlu0 %420  ;;  %v4224_v35 = vld [vmem:[#allocation2 + $0x98] sm:$0xff] }
 0x227   : > { %369 = vst [vmem:[#allocation2 + $0x10] sm:$0xcc] %v360_v8  ;;  %293 = vst [vmem:[#allocation2 + $0x10] sm:$0x33] %v284_v23  ;;  %v503_v12 = vrot.slane %v497_v54, 4  ;;  %v427_v36 = vrot.slane %v421_v2, 4 }
 0x229   : > { %v510_v10 = vsel %vm277_vm0, %v8341_v52, %v503_v12  ;;  %v434_v53 = vsel %vm277_vm0, %v8342_v19, %v427_v36 }
 0x22a   : > { %v511_v61 = vsel %vm506_vm3, %v6545_v21, %v510_v10  ;;  %v435_v33 = vsel %vm430_vm1, %v6520_v55, %v434_v53  ;;  %v650_v26 = vpop.permute.xlu1 %649  ;;  %v574_v40 = vpop.permute.xlu0 %573  ;;  %v4228_v9 = vld [vmem:[#allocation2 + $0xb8] sm:$0xff] }
 0x22b   : > { %520 = vst [vmem:[#allocation2 + $0x30] sm:$0xcc] %v511_v61  ;;  %444 = vst [vmem:[#allocation2 + $0x30] sm:$0x33] %v435_v33  ;;  %v655_v22 = vrot.slane %v650_v26, 4  ;;  %v579_v0 = vrot.slane %v574_v40, 4  ;;  %v5359_v17 = vcombine.low %v4224_v35, %v4228_v9  ;;  %v5360_v7 = vcombine.high %v4224_v35, %v4228_v9 }
 0x22c   : > { %v8344_v26 = vrot.slane %v6663_v32, 4 }
 0x22d   : > { %v663_v15 = vsel %vm277_vm0, %v654_v41, %v655_v22  ;;  %v587_v21 = vsel %vm277_vm0, %v578_v49, %v579_v0  ;;  %5021 = vmatprep.subr.bf16.mxu1 %v5360_v7 }
 0x22e   : > { %v664_v55 = vsel %vm657_vm9, %v7552_v31, %v663_v15  ;;  %v588_v56 = vsel %vm581_vm4, %v7554_v46, %v587_v21  ;;  %v801_v16 = vpop.permute.xlu1 %800  ;;  %5022 = vmatpush1.bf16.msra.mxu1 %v5359_v17  ;;  %v725_v29 = vpop.permute.xlu0 %724  ;;  %v4207_v57 = vld [vmem:[#allocation2 + $0x10] sm:$0xff]  ;;  %vm8343_vm4 = vmmov %vm8340_vm8  ;;  %v8346_v17 = vrot.slane %v6738_v51, 4  ;;  %vm8366_vm8 = vcmask 302080  }
 0x22f   : > { %672 = vst [vmem:[#allocation2 + $0x58] sm:$0xcc] %v664_v55  ;;  %596 = vst [vmem:[#allocation2 + $0x58] sm:$0x33] %v588_v56  ;;  %v806_v14 = vrot.slane %v801_v16, 4  ;;  %v730_v44 = vrot.slane %v725_v29, 4 }
 0x231   : > { %v814_v41 = vsel %vm277_vm0, %v805_v45, %v806_v14  ;;  %v738_v49 = vsel %vm277_vm0, %v729_v60, %v730_v44 }
 0x232   : > { %v815_v31 = vsel %vm808_vm12, %v7575_v24, %v814_v41  ;;  %v739_v46 = vsel %vm732_vm11, %v7577_v5, %v738_v49  ;;  %v348_v59 = vpop.permute.xlu1 %347  ;;  %v271_v42 = vpop.permute.xlu0 %270  ;;  %v4211_v50 = vld [vmem:[#allocation2 + $0x30] sm:$0xff] }
 0x233   : > { %823 = vst [vmem:[#allocation2 + $0x78] sm:$0xcc] %v815_v31  ;;  %747 = vst [vmem:[#allocation2 + $0x78] sm:$0x33] %v739_v46  ;;  %v353_v6 = vrot.slane %v348_v59, 4  ;;  %v276_v58 = vrot.slane %v271_v42, 4  ;;  %v5341_v38 = vcombine.low %v4207_v57, %v4211_v50  ;;  %v5342_v45 = vcombine.high %v4207_v57, %v4211_v50 }
 0x234   : > { %v8353_v42 = vld [vmem:[#allocation5_spill] sm:$0xff] }
 0x235   : > { %v361_v34 = vsel %vm277_vm0, %v352_v37, %v353_v6  ;;  %v285_v60 = vsel %vm277_vm0, %v275_v48, %v276_v58  ;;  %4984 = vmatprep.subr.bf16.mxu0 %v5342_v45  ;;  %v8354_v57 = vrot.slane %v8353_v42, 4 }
 0x236   : > { %v362_v24 = vsel %vm355_vm2, %v7617_v3, %v361_v34  ;;  %v286_v5 = vsel %vm8343_vm4, %v7619_v43, %v285_v60  ;;  %v499_v20 = vpop.permute.xlu1 %498  ;;  %4985 = vmatpush1.bf16.msra.mxu0 %v5341_v38  ;;  %v423_v1 = vpop.permute.xlu0 %422  ;;  %v4216_v10 = vld [vmem:[#allocation2 + $0x58] sm:$0xff]  ;;  %vm8350_vm2 = vcmask 236544   ;;  %vm8367_vm4 = vcmask 310272  }
 0x237   : > { %370 = vst [vmem:[#allocation2 + $0x18] sm:$0xcc] %v362_v24  ;;  %294 = vst [vmem:[#allocation2 + $0x18] sm:$0x33] %v286_v5  ;;  %v504_v30 = vrot.slane %v499_v20, 4  ;;  %v428_v25 = vrot.slane %v423_v1, 4 }
 0x239   : > { %v512_v8 = vsel %vm277_vm0, %v503_v12, %v504_v30  ;;  %v436_v37 = vsel %vm277_vm0, %v427_v36, %v428_v25  ;;  %v8345_v36 = vrot.slane %v6639_v11, 4 }
 0x23a   : > { %v513_v48 = vsel %vm506_vm3, %v497_v54, %v512_v8  ;;  %v437_v23 = vsel %vm430_vm1, %v421_v2, %v436_v37  ;;  %v4180_v52 = vpop.permute.xlu1 %4179  ;;  %v4105_v3 = vpop.permute.xlu0 %4104  ;;  %v4220_v19 = vld [vmem:[#allocation2 + $0x78] sm:$0xff]  ;;  %vm8349_vm1 = vcmask 228352   ;;  %vm8355_vm3 = vcmask 154624  }
 0x23b   : > { %521 = vst [vmem:[#allocation2 + $0x38] sm:$0xcc] %v513_v48  ;;  %445 = vst [vmem:[#allocation2 + $0x38] sm:$0x33] %v437_v23  ;;  %v4186_v43 = vrot.slane %v4180_v52, 4  ;;  %v4111_v53 = vrot.slane %v4105_v3, 4  ;;  %v5351_v61 = vcombine.low %v4216_v10, %v4220_v19  ;;  %v5352_v33 = vcombine.high %v4216_v10, %v4220_v19 }
 0x23d   : > { %v4192_v12 = vsel %vm277_vm0, %v8344_v26, %v4186_v43  ;;  %v4117_v54 = vsel %vm277_vm0, %v8345_v36, %v4111_v53  ;;  %5023 = vmatprep.subr.bf16.mxu1 %v5352_v33 }
 0x23e   : > { %v4193_v2 = vsel %vm2208_vm7, %v6663_v32, %v4192_v12  ;;  %v4118_v40 = vsel %vm2133_vm6, %v6639_v11, %v4117_v54  ;;  %v7683_v35 = vpop.permute.xlu1 %3881  ;;  %5024 = vmatpush1.bf16.msra.mxu1 %v5351_v61  ;;  %v7685_v9 = vpop.permute.xlu0 %3806  ;;  %v8347_v11 = vld [vmem:[#allocation4_spill] sm:$0xff]  ;;  %v4208_v29 = vld [vmem:[#allocation2 + $0x18] sm:$0xff] }
 0x23f   : > { %4202 = vst [vmem:[#allocation2 + $0x350] sm:$0xcc] %v4193_v2  ;;  %4127 = vst [vmem:[#allocation2 + $0x350] sm:$0x33] %v4118_v40  ;;  %v3888_v22 = vrot.slane %v7683_v35, 4  ;;  %v3813_v0 = vrot.slane %v7685_v9, 4 }
 0x240   : > { %v8348_v7 = vrot.slane %v8347_v11, 4 }
 0x241   : > { %v3894_v32 = vsel %vm277_vm0, %v8346_v17, %v3888_v22 }
 0x242   : > { %v3819_v15 = vsel %vm277_vm0, %v8348_v7, %v3813_v0  ;;  %v3895_v21 = vsel %vm8349_vm1, %v6738_v51, %v3894_v32  ;;  %v7703_v56 = vpop.permute.xlu1 %4030  ;;  %v7705_v16 = vpop.permute.xlu0 %3955  ;;  %v4212_v14 = vld [vmem:[#allocation2 + $0x38] sm:$0xff] }
 0x243   : > { %v3820_v55 = vsel %vm8350_vm2, %v8347_v11, %v3819_v15  ;;  %3904 = vst [vmem:[#allocation2 + $0x310] sm:$0xcc] %v3895_v21  ;;  %v4037_v44 = vrot.slane %v7703_v56, 4  ;;  %v3962_v41 = vrot.slane %v7705_v16, 4  ;;  %v5343_v49 = vcombine.low %v4208_v29, %v4212_v14  ;;  %v8351_v51 = vld [vmem:[#allocation6_spill] sm:$0xff]  ;;  %v8364_v21 = vld [vmem:[#allocation8_spill] sm:$0xff] }
 0x244   : > { %3829 = vst [vmem:[#allocation2 + $0x310] sm:$0x33] %v3820_v55  ;;  %v5344_v31 = vcombine.high %v4208_v29, %v4212_v14  ;;  %v8352_v46 = vrot.slane %v8351_v51, 4  ;;  %v8365_v55 = vrot.slane %v8364_v21, 4 }
 0x245   : > { %v3968_v50 = vsel %vm277_vm0, %v8354_v57, %v3962_v41 }
 0x246   : > { %v4043_v59 = vsel %vm277_vm0, %v8352_v46, %v4037_v44  ;;  %5025 = vmatprep.subr.bf16.mxu1 %v5344_v31  ;;  %v3969_v58 = vsel %vm8356_vm10, %v8353_v42, %v3968_v50  ;;  %v4182_v38 = vpop.permute.xlu1 %4181  ;;  %v4107_v45 = vpop.permute.xlu0 %4106  ;;  %v4311_v34 = vld [vmem:[#allocation2 + $0x350] sm:$0xff] }
 0x247   : > { %v4044_v6 = vsel %vm8355_vm3, %v8351_v51, %v4043_v59  ;;  %5026 = vmatpush1.bf16.msra.mxu1 %v5343_v49  ;;  %3978 = vst [vmem:[#allocation2 + $0x330] sm:$0x33] %v3969_v58  ;;  %v4187_v60 = vrot.slane %v4182_v38, 4  ;;  %v4112_v24 = vrot.slane %v4107_v45, 4  ;;  %v5446_v5 = vcombine.high %v4311_v34, %v4311_v34 }
 0x248   : > { %4053 = vst [vmem:[#allocation2 + $0x330] sm:$0xcc] %v4044_v6  ;;  %v5445_v20 = vcombine.low %v4311_v34, %v4311_v34 }
 0x249   : > { %v4194_v1 = vsel %vm277_vm0, %v4186_v43, %v4187_v60  ;;  %v4119_v30 = vsel %vm277_vm0, %v4111_v53, %v4112_v24  ;;  %5453 = vmatprep.subr.msk.bf16.mxu0 %vm277_vm0, %v5446_v5  ;;  %v8357_v43 = vrot.slane %v6829_v62, 4 }
 0x24a   : > { %v4877_v25 = vsel %vm277_vm0, %v5445_v20, 0  ;;  %v4195_v8 = vsel %vm2208_vm7, %v4180_v52, %v4194_v1  ;;  %v4120_v37 = vsel %vm2133_vm6, %v4105_v3, %v4119_v30  ;;  %v7729_v48 = vpop.permute.xlu1 %3583  ;;  %v7731_v23 = vpop.permute.xlu0 %3508  ;;  %v8358_v52 = vld [vmem:[#allocation7_spill] sm:$0xff]  ;;  %vm8360_vm6 = vcmask 318464  }
 0x24b   : > { %4991 = vmatpush2.bf16.msra.mxu0 %v4877_v25  ;;  %4203 = vst [vmem:[#allocation2 + $0x358] sm:$0xcc] %v4195_v8  ;;  %4128 = vst [vmem:[#allocation2 + $0x358] sm:$0x33] %v4120_v37  ;;  %v3590_v10 = vrot.slane %v7729_v48, 4  ;;  %v3515_v19 = vrot.slane %v7731_v23, 4 }
 0x24c   : > { %v8359_v3 = vrot.slane %v8358_v52, 4  ;;  %vm8361_vm7 = vcmask 957440   ;;  %v4303_v54 = vld [vmem:[#allocation2 + $0x310] sm:$0xff] }
 0x24d   : > { %v3596_v53 = vsel %vm277_vm0, %v8357_v43, %v3590_v10 }
 0x24e   : > { %v3521_v61 = vsel %vm277_vm0, %v8359_v3, %v3515_v19  ;;  %v3597_v33 = vsel %vm8360_vm6, %v6829_v62, %v3596_v53  ;;  %v7749_v12 = vpop.permute.xlu1 %3732  ;;  %v7751_v36 = vpop.permute.xlu0 %3657  ;;  %v8362_v62 = vld [vmem:[#allocation9_spill] sm:$0xff]  ;;  %vm8372_vm6 = vcmask 973824  }
 0x24f   : > { %v3522_v26 = vsel %vm8361_vm7, %v8358_v52, %v3521_v61  ;;  %v4307_v2 = vld [vmem:[#allocation2 + $0x330] sm:$0xff]  ;;  %3606 = vst [vmem:[#allocation2 + $0x2d0] sm:$0xcc] %v3597_v33  ;;  %v3739_v40 = vrot.slane %v7749_v12, 4  ;;  %v3664_v17 = vrot.slane %v7751_v36, 4  ;;  %v8363_v7 = vrot.slane %v8362_v62, 4 }
 0x250   : > { %3531 = vst [vmem:[#allocation2 + $0x2d0] sm:$0x33] %v3522_v26  ;;  %v5437_v32 = vcombine.low %v4303_v54, %v4307_v2  ;;  %v5438_v11 = vcombine.high %v4303_v54, %v4307_v2  ;;  %v8370_v52 = vld [vmem:[#allocation10_spill] sm:$0xff]  ;;  %vm8373_vm7 = vcmask 1039360  }
 0x251   : > { %v3745_v15 = vsel %vm277_vm0, %v8363_v7, %v3739_v40  ;;  %v3670_v29 = vsel %vm277_vm0, %v8365_v55, %v3664_v17  ;;  %v8371_v3 = vrot.slane %v8370_v52, 4  ;;  %v8374_v7 = vld [vmem:[#allocation11_spill] sm:$0xff] }
 0x252   : > { %4992 = vmatprep.subr.bf16.mxu0 %v5438_v11  ;;  %v3746_v14 = vsel %vm8366_vm8, %v8362_v62, %v3745_v15  ;;  %v3671_v49 = vsel %vm8367_vm4, %v8364_v21, %v3670_v29  ;;  %v3884_v31 = vpop.permute.xlu1 %3883  ;;  %v3809_v51 = vpop.permute.xlu0 %3808  ;;  %v4312_v46 = vld [vmem:[#allocation2 + $0x358] sm:$0xff]  ;;  %v8375_v15 = vrot.slane %v8374_v7, 4  ;;  %vm8376_vm8 = vcmask 957440  }
 0x253   : > { %4993 = vmatpush2.bf16.msra.mxu0 %v5437_v32  ;;  %3755 = vst [vmem:[#allocation2 + $0x2f0] sm:$0xcc] %v3746_v14  ;;  %3680 = vst [vmem:[#allocation2 + $0x2f0] sm:$0x33] %v3671_v49  ;;  %v3889_v59 = vrot.slane %v3884_v31, 4  ;;  %v3814_v42 = vrot.slane %v3809_v51, 4  ;;  %v5448_v57 = vcombine.high %v4312_v46, %v4312_v46  ;;  %v5447_v50 = vcombine.low %v4312_v46, %v4312_v46 }
 0x254   : > { %vm8377_vm4 = vcmask 965632  }
 0x255   : > { %v3896_v6 = vsel %vm277_vm0, %v3888_v22, %v3889_v59  ;;  %v3821_v58 = vsel %vm277_vm0, %v3813_v0, %v3814_v42  ;;  %5455 = vmatprep.subr.msk.bf16.mxu1 %vm277_vm0, %v5448_v57  ;;  %v4883_v38 = vsel %vm277_vm0, %v5447_v50, 0 }
 0x256   : > { %v3897_v45 = vsel %vm8349_vm1, %v7683_v35, %v3896_v6  ;;  %v3822_v34 = vsel %vm8350_vm2, %v7685_v9, %v3821_v58  ;;  %v4033_v60 = vpop.permute.xlu1 %4032  ;;  %5032 = vmatpush2.bf16.msra.mxu1 %v4883_v38  ;;  %v3958_v24 = vpop.permute.xlu0 %3957  ;;  %vm8378_vm1 = vcmask 310272   ;;  %vm8379_vm2 = vcmask 318464  }
 0x257   : > { %3905 = vst [vmem:[#allocation2 + $0x318] sm:$0xcc] %v3897_v45  ;;  %3830 = vst [vmem:[#allocation2 + $0x318] sm:$0x33] %v3822_v34  ;;  %v4038_v22 = vrot.slane %v4033_v60, 4  ;;  %v3963_v5 = vrot.slane %v3958_v24, 4 }
 0x258   : > { %v4295_v25 = vld [vmem:[#allocation2 + $0x2d0] sm:$0xff] }
 0x259   : > { %v4045_v0 = vsel %vm277_vm0, %v4037_v44, %v4038_v22  ;;  %v3970_v20 = vsel %vm277_vm0, %v3962_v41, %v3963_v5 }
 0x25a   : > { %v4046_v35 = vsel %vm8355_vm3, %v7703_v56, %v4045_v0  ;;  %v3971_v9 = vsel %vm8356_vm10, %v7705_v16, %v3970_v20  ;;  %v7791_v1 = vpop.permute.xlu1 %3359  ;;  %v7793_v30 = vpop.permute.xlu0 %3285  ;;  %v4299_v8 = vld [vmem:[#allocation2 + $0x2f0] sm:$0xff]  ;;  %v8368_v56 = vld [vmem:[#allocation12_spill] sm:$0xff]  ;;  %vm8381_vm3 = vcmask 302080   ;;  %vm8385_vm10 = vmmov %vm8373_vm7 }
 0x25b   : > { %4054 = vst [vmem:[#allocation2 + $0x338] sm:$0xcc] %v4046_v35  ;;  %3979 = vst [vmem:[#allocation2 + $0x338] sm:$0x33] %v3971_v9  ;;  %v3366_v44 = vrot.slane %v7791_v1, 4  ;;  %v3292_v37 = vrot.slane %v7793_v30, 4  ;;  %v5429_v43 = vcombine.low %v4295_v25, %v4299_v8  ;;  %v5430_v41 = vcombine.high %v4295_v25, %v4299_v8 }
 0x25c   : > { %v8369_v53 = vrot.slane %v8368_v56, 4  ;;  %v8383_v25 = vrot.slane %v6999_v13, 4 }
 0x25d   : > { %v3298_v61 = vsel %vm277_vm0, %v8371_v3, %v3292_v37  ;;  %4994 = vmatprep.subr.bf16.mxu0 %v5430_v41 }
 0x25e   : > { %v3372_v16 = vsel %vm277_vm0, %v8369_v53, %v3366_v44  ;;  %v3299_v26 = vsel %vm8373_vm7, %v8370_v52, %v3298_v61  ;;  %v3511_v54 = vpop.permute.xlu1 %3510  ;;  %4995 = vmatpush2.bf16.msra.mxu0 %v5429_v43  ;;  %v7811_v2 = vpop.permute.xlu0 %3434  ;;  %v4304_v31 = vld [vmem:[#allocation2 + $0x318] sm:$0xff]  ;;  %vm8387_vm7 = vmmov %vm8377_vm4 }
 0x25f   : > { %v3373_v33 = vsel %vm8372_vm6, %v8368_v56, %v3372_v16  ;;  %3308 = vst [vmem:[#allocation2 + $0x290] sm:$0xcc] %v3299_v26  ;;  %v3516_v32 = vrot.slane %v3511_v54, 4  ;;  %v3441_v11 = vrot.slane %v7811_v2, 4  ;;  %vm8386_vm6 = vcmask 7168  }
 0x260   : > { %3382 = vst [vmem:[#allocation2 + $0x2b0] sm:$0x33] %v3373_v33 }
 0x261   : > { %v3523_v62 = vsel %vm277_vm0, %v3515_v19, %v3516_v32  ;;  %v3447_v21 = vsel %vm277_vm0, %v8375_v15, %v3441_v11 }
 0x262   : > { %v3524_v55 = vsel %vm8376_vm8, %v7731_v23, %v3523_v62  ;;  %v3448_v29 = vsel %vm8377_vm4, %v8374_v7, %v3447_v21  ;;  %v3660_v14 = vpop.permute.xlu1 %3659  ;;  %v3586_v49 = vpop.permute.xlu0 %3585  ;;  %v4308_v51 = vld [vmem:[#allocation2 + $0x338] sm:$0xff]  ;;  %vm8388_vm8 = vcmask 973824  }
 0x263   : > { %3532 = vst [vmem:[#allocation2 + $0x2d8] sm:$0x33] %v3524_v55  ;;  %3457 = vst [vmem:[#allocation2 + $0x2b0] sm:$0xcc] %v3448_v29  ;;  %v3665_v46 = vrot.slane %v3660_v14, 4  ;;  %v3591_v19 = vrot.slane %v3586_v49, 4  ;;  %v5439_v59 = vcombine.low %v4304_v31, %v4308_v51  ;;  %v5440_v42 = vcombine.high %v4304_v31, %v4308_v51 }
 0x265   : > { %v3672_v57 = vsel %vm277_vm0, %v3664_v17, %v3665_v46  ;;  %v3598_v23 = vsel %vm277_vm0, %v3590_v10, %v3591_v19  ;;  %5033 = vmatprep.subr.bf16.mxu1 %v5440_v42  ;;  %v8380_v10 = vrot.slane %v7001_v63, 4 }
 0x266   : > { %v3673_v50 = vsel %vm8378_vm1, %v7751_v36, %v3672_v57  ;;  %v3599_v6 = vsel %vm8379_vm2, %v7729_v48, %v3598_v23  ;;  %v7836_v58 = vpop.permute.xlu1 %2944  ;;  %5034 = vmatpush2.bf16.msra.mxu1 %v5439_v59  ;;  %v3735_v38 = vpop.permute.xlu0 %3734  ;;  %v4287_v5 = vld [vmem:[#allocation2 + $0x290] sm:$0xff] }
 0x267   : > { %3681 = vst [vmem:[#allocation2 + $0x2f8] sm:$0x33] %v3673_v50  ;;  %3607 = vst [vmem:[#allocation2 + $0x2d8] sm:$0xcc] %v3599_v6  ;;  %v2951_v45 = vrot.slane %v7836_v58, 4  ;;  %v3740_v17 = vrot.slane %v3735_v38, 4 }
 0x269   : > { %v2957_v34 = vsel %vm277_vm0, %v8380_v10, %v2951_v45  ;;  %v3747_v36 = vsel %vm277_vm0, %v3739_v40, %v3740_v17  ;;  %v8392_v10 = vld [vmem:[#allocation13_spill] sm:$0xff] }
 0x26a   : > { %v2958_v48 = vsel %vm959_vm5, %v7001_v63, %v2957_v34  ;;  %v3748_v60 = vsel %vm8381_vm3, %v7749_v12, %v3747_v36  ;;  %v7851_v24 = vpop.permute.xlu1 %3093  ;;  %v7853_v22 = vpop.permute.xlu0 %3019  ;;  %v4291_v0 = vld [vmem:[#allocation2 + $0x2b0] sm:$0xff]  ;;  %v8382_v63 = vrot.slane %v7026_v18, 4  ;;  %v8393_v34 = vrot.slane %v8392_v10, 4 }
 0x26b   : > { %2967 = vst [vmem:[#allocation2 + $0x250] sm:$0x33] %v2958_v48  ;;  %3756 = vst [vmem:[#allocation2 + $0x2f8] sm:$0xcc] %v3748_v60  ;;  %v3100_v20 = vrot.slane %v7851_v24, 4  ;;  %v3026_v35 = vrot.slane %v7853_v22, 4  ;;  %v5421_v9 = vcombine.low %v4287_v5, %v4291_v0  ;;  %v5422_v40 = vcombine.high %v4287_v5, %v4291_v0 }
 0x26d   : > { %v3106_v12 = vsel %vm277_vm0, %v8382_v63, %v3100_v20  ;;  %v3032_v8 = vsel %vm277_vm0, %v8383_v25, %v3026_v35  ;;  %4996 = vmatprep.subr.bf16.mxu0 %v5422_v40 }
 0x26e   : > { %v3107_v43 = vsel %vm1110_vm14, %v7026_v18, %v3106_v12  ;;  %v3033_v41 = vsel %vm1034_vm15, %v6999_v13, %v3032_v8  ;;  %v3288_v56 = vpop.permute.xlu1 %3287  ;;  %4997 = vmatpush2.bf16.msra.mxu0 %v5421_v9  ;;  %v7871_v53 = vpop.permute.xlu0 %3168  ;;  %v8384_v18 = vrot.slane %v7024_v4, 4  ;;  %v4296_v32 = vld [vmem:[#allocation2 + $0x2d8] sm:$0xff] }
 0x26f   : > { %3116 = vst [vmem:[#allocation2 + $0x270] sm:$0x33] %v3107_v43  ;;  %3042 = vst [vmem:[#allocation2 + $0x250] sm:$0xcc] %v3033_v41  ;;  %v3293_v16 = vrot.slane %v3288_v56, 4  ;;  %v3175_v52 = vrot.slane %v7871_v53, 4 }
 0x271   : > { %v3300_v3 = vsel %vm277_vm0, %v3292_v37, %v3293_v16  ;;  %v3181_v61 = vsel %vm277_vm0, %v8384_v18, %v3175_v52 }
 0x272   : > { %v3301_v13 = vsel %vm8385_vm10, %v7793_v30, %v3300_v3  ;;  %v3182_v33 = vsel %vm8386_vm6, %v7024_v4, %v3181_v61  ;;  %v3437_v26 = vpop.permute.xlu1 %3436  ;;  %v3362_v54 = vpop.permute.xlu0 %3361  ;;  %v4300_v62 = vld [vmem:[#allocation2 + $0x2f8] sm:$0xff] }
 0x273   : > { %3309 = vst [vmem:[#allocation2 + $0x298] sm:$0xcc] %v3301_v13  ;;  %3191 = vst [vmem:[#allocation2 + $0x270] sm:$0xcc] %v3182_v33  ;;  %v3442_v7 = vrot.slane %v3437_v26, 4  ;;  %v3367_v37 = vrot.slane %v3362_v54, 4  ;;  %v5431_v15 = vcombine.low %v4296_v32, %v4300_v62  ;;  %v5432_v21 = vcombine.high %v4296_v32, %v4300_v62 }
 0x275   : > { %v3449_v55 = vsel %vm277_vm0, %v3441_v11, %v3442_v7  ;;  %v3374_v30 = vsel %vm277_vm0, %v3366_v44, %v3367_v37  ;;  %5035 = vmatprep.subr.bf16.mxu1 %v5432_v21  ;;  %v8389_v44 = vrot.slane %v7105_v47, 4 }
 0x276   : > { %v3450_v4 = vsel %vm8387_vm7, %v7811_v2, %v3449_v55  ;;  %v3375_v29 = vsel %vm8388_vm8, %v7791_v1, %v3374_v30  ;;  %v7896_v14 = vpop.permute.xlu1 %2721  ;;  %5036 = vmatpush2.bf16.msra.mxu1 %v5431_v15  ;;  %v7898_v49 = vpop.permute.xlu0 %2646  ;;  %v8390_v1 = vrot.slane %v7107_v27, 4  ;;  %v4279_v57 = vld [vmem:[#allocation2 + $0x250] sm:$0xff] }
 0x277   : > { %3458 = vst [vmem:[#allocation2 + $0x2b8] sm:$0xcc] %v3450_v4  ;;  %3383 = vst [vmem:[#allocation2 + $0x2b8] sm:$0x33] %v3375_v29  ;;  %v2728_v11 = vrot.slane %v7896_v14, 4  ;;  %v2653_v31 = vrot.slane %v7898_v49, 4 }
 0x279   : > { %v2734_v2 = vsel %vm277_vm0, %v8389_v44, %v2728_v11  ;;  %v2659_v51 = vsel %vm277_vm0, %v8390_v1, %v2653_v31 }
 0x27a   : > { %v2735_v46 = vsel %vm732_vm11, %v7105_v47, %v2734_v2  ;;  %v2660_v19 = vsel %vm657_vm9, %v7107_v27, %v2659_v51  ;;  %v7916_v59 = vpop.permute.xlu1 %2870  ;;  %v7918_v42 = vpop.permute.xlu0 %2795  ;;  %v4283_v23 = vld [vmem:[#allocation2 + $0x270] sm:$0xff]  ;;  %v8391_v47 = vrot.slane %v7132_v28, 4  ;;  %v4288_v40 = vld [vmem:[#allocation2 + $0x298] sm:$0xff] }
 0x27b   : > { %2744 = vst [vmem:[#allocation2 + $0x210] sm:$0xcc] %v2735_v46  ;;  %2669 = vst [vmem:[#allocation2 + $0x210] sm:$0x33] %v2660_v19  ;;  %v2877_v50 = vrot.slane %v7916_v59, 4  ;;  %v2802_v6 = vrot.slane %v7918_v42, 4  ;;  %v5413_v38 = vcombine.low %v4279_v57, %v4283_v23  ;;  %v5414_v17 = vcombine.high %v4279_v57, %v4283_v23 }
 0x27d   : > { %v2883_v27 = vsel %vm277_vm0, %v8391_v47, %v2877_v50  ;;  %v2808_v36 = vsel %vm277_vm0, %v8393_v34, %v2802_v6  ;;  %4998 = vmatprep.subr.bf16.mxu0 %v5414_v17  ;;  %v7932_v48 = vpop.f32.mrf.mxu0  ;;  %v5052_v34 = vld [vmem:[%s8063_s3] sm:$0xff] }
 0x27e   : > { %v2884_v60 = vsel %vm883_vm13, %v7132_v28, %v2883_v27  ;;  %v2809_v5 = vsel %vm808_vm12, %v8392_v10, %v2808_v36  ;;  %v3022_v0 = vpop.permute.xlu1 %3021  ;;  %4999 = vmatpush2.bf16.msra.mxu0 %v5413_v38  ;;  %v2947_v9 = vpop.permute.xlu0 %2946  ;;  %v4292_v63 = vld [vmem:[#allocation2 + $0x2b8] sm:$0xff] }
 0x27f   : > { %2893 = vst [vmem:[#allocation2 + $0x230] sm:$0xcc] %v2884_v60  ;;  %2818 = vst [vmem:[#allocation2 + $0x230] sm:$0x33] %v2809_v5  ;;  %v3027_v12 = vrot.slane %v3022_v0, 4  ;;  %v2952_v25 = vrot.slane %v2947_v9, 4  ;;  %v5423_v8 = vcombine.low %v4288_v40, %v4292_v63  ;;  %v5424_v43 = vcombine.high %v4288_v40, %v4292_v63  ;;  %v7938_v41 = vpop.f32.mrf.mxu0 }
 0x281   : > { %v3034_v28 = vsel %vm277_vm0, %v3026_v35, %v3027_v12  ;;  %v2959_v56 = vsel %vm277_vm0, %v2951_v45, %v2952_v25  ;;  %5037 = vmatprep.subr.bf16.mxu1 %v5424_v43  ;;  %v4926_v16 = vpop.f32.mrf.mxu0 }
 0x282   : > { %v3035_v3 = vsel %vm1034_vm15, %v7853_v22, %v3034_v28  ;;  %v2960_v18 = vsel %vm959_vm5, %v7836_v58, %v2959_v56  ;;  %v3171_v61 = vpop.permute.xlu1 %3170  ;;  %5038 = vmatpush2.bf16.msra.mxu1 %v5423_v8  ;;  %v3096_v13 = vpop.permute.xlu0 %3095  ;;  %vm8394_vm15 = vmmov %vm8386_vm6  ;;  %v4271_v7 = vld [vmem:[#allocation2 + $0x210] sm:$0xff] }
 0x283   : > { %3043 = vst [vmem:[#allocation2 + $0x258] sm:$0xcc] %v3035_v3  ;;  %2968 = vst [vmem:[#allocation2 + $0x258] sm:$0x33] %v2960_v18  ;;  %v3176_v33 = vrot.slane %v3171_v61, 4  ;;  %v3101_v26 = vrot.slane %v3096_v13, 4  ;;  %v4927_v35 = vpop.f32.mrf.mxu0 }
 0x285   : > { %v3183_v45 = vsel %vm277_vm0, %v3175_v52, %v3176_v33  ;;  %v3108_v54 = vsel %vm277_vm0, %v3100_v20, %v3101_v26 }
 0x286   : > { %v3184_v22 = vsel %vm8394_vm15, %v7871_v53, %v3183_v45  ;;  %v3109_v58 = vsel %vm1110_vm14, %v7851_v24, %v3108_v54  ;;  %v2724_v32 = vpop.permute.xlu1 %2723  ;;  %v2649_v62 = vpop.permute.xlu0 %2648  ;;  %v4275_v37 = vld [vmem:[#allocation2 + $0x230] sm:$0xff] }
 0x287   : > { %3192 = vst [vmem:[#allocation2 + $0x278] sm:$0xcc] %v3184_v22  ;;  %3117 = vst [vmem:[#allocation2 + $0x278] sm:$0x33] %v3109_v58  ;;  %v2729_v15 = vrot.slane %v2724_v32, 4  ;;  %v2654_v21 = vrot.slane %v2649_v62, 4  ;;  %v5405_v55 = vcombine.low %v4271_v7, %v4275_v37  ;;  %v5406_v52 = vcombine.high %v4271_v7, %v4275_v37 }
 0x289   : > { %v2736_v20 = vsel %vm277_vm0, %v2728_v11, %v2729_v15  ;;  %v2661_v53 = vsel %vm277_vm0, %v2653_v31, %v2654_v21  ;;  %5000 = vmatprep.subr.bf16.mxu0 %v5406_v52 }
 0x28a   : > { %v2737_v24 = vsel %vm732_vm11, %v7896_v14, %v2736_v20  ;;  %v2662_v30 = vsel %vm657_vm9, %v7898_v49, %v2661_v53  ;;  %v2873_v4 = vpop.permute.xlu1 %2872  ;;  %5001 = vmatpush2.bf16.msra.mxu0 %v5405_v55  ;;  %v2798_v29 = vpop.permute.xlu0 %2797  ;;  %v4280_v1 = vld [vmem:[#allocation2 + $0x258] sm:$0xff] }
 0x28b   : > { %2745 = vst [vmem:[#allocation2 + $0x218] sm:$0xcc] %v2737_v24  ;;  %2670 = vst [vmem:[#allocation2 + $0x218] sm:$0x33] %v2662_v30  ;;  %v2878_v44 = vrot.slane %v2873_v4, 4  ;;  %v2803_v2 = vrot.slane %v2798_v29, 4 }
 0x28c   : > { %v5603_v30 = vmov 0  }
 0x28d   : > { %v2885_v11 = vsel %vm277_vm0, %v2877_v50, %v2878_v44  ;;  %v2810_v31 = vsel %vm277_vm0, %v2802_v6, %v2803_v2  ;;  %5003 = vmatmul.mubr.bf16.vlgmr.msra.gmra.mxu0 %v7073_v39  ;;  %5188 = vst [vmem:[%s8023_s5] sm:$0xf] %v5603_v30  ;;  %5225 = vst [vmem:[%s8023_s5 + $0x24] sm:$0xf] %v5603_v30 }
 0x28e   : > { %v2886_v14 = vsel %vm883_vm13, %v7916_v59, %v2885_v11  ;;  %v2811_v49 = vsel %vm808_vm12, %v7918_v42, %v2810_v31  ;;  %v4284_v51 = vld [vmem:[#allocation2 + $0x278] sm:$0xff]  ;;  %v8395_v42 = vld [vmem:[#allocation3_spill] sm:$0xff] }
 0x28f   : > { %2894 = vst [vmem:[#allocation2 + $0x238] sm:$0xcc] %v2886_v14  ;;  %2819 = vst [vmem:[#allocation2 + $0x238] sm:$0x33] %v2811_v49  ;;  %v5415_v46 = vcombine.low %v4280_v1, %v4284_v51  ;;  %v5416_v19 = vcombine.high %v4280_v1, %v4284_v51  ;;  %v5056_v27 = vsub.s32 0, %v8395_v42  ;;  %v5060_v10 = vsub.s32 1, %v8395_v42 }
 0x290   : > { %v5064_v5 = vsub.s32 2, %v8395_v42  ;;  %v5068_v40 = vsub.s32 3, %v8395_v42  ;;  %v5072_v12 = vsub.s32 4, %v8395_v42  ;;  %v5076_v3 = vsub.s32 5, %v8395_v42 }
 0x291   : > { %5039 = vmatprep.subr.bf16.mxu1 %v5416_v19  ;;  %v7987_v36 = vrot.slane %v5052_v34, %v5056_v27  ;;  %v7989_v60 = vrot.slane %v5052_v34, %v5060_v10  ;;  %v5080_v35 = vsub.s32 6, %v8395_v42  ;;  %v5084_v54 = vsub.s32 7, %v8395_v42 }
 0x292   : > { %5040 = vmatpush2.bf16.msra.mxu1 %v5415_v46  ;;  %v4272_v23 = vld [vmem:[#allocation2 + $0x218] sm:$0xff]  ;;  %v7996_v9 = vrot.slane %v5052_v34, %v5064_v5  ;;  %v8001_v28 = vrot.slane %v5052_v34, %v5068_v40  ;;  %v8003_v16 = vrot.slane %v5052_v34, %v5072_v12  ;;  %v8008_v26 = vrot.slane %v5052_v34, %v5076_v3 }
 0x293   : > { %v5094_v0 = vmul.f32 %v7987_v36, %v7932_v48  ;;  %v8013_v32 = vrot.slane %v5052_v34, %v5080_v35  ;;  %v8015_v62 = vrot.slane %v5052_v34, %v5084_v54 }
 0x296   : > { %v4963_v57 = vpop.f32.mrf.mxu1  ;;  %v4276_v50 = vld [vmem:[#allocation2 + $0x238] sm:$0xff] }
 0x297   : > { %v5407_v6 = vcombine.low %v4272_v23, %v4276_v50  ;;  %v5408_v38 = vcombine.high %v4272_v23, %v4276_v50  ;;  %v5096_v43 = vmul.f32 %v7996_v9, %v4963_v57 }
 0x298   : > { %v4965_v17 = vpop.f32.mrf.mxu1 }
 0x299   : > { %5041 = vmatprep.subr.bf16.mxu1 %v5408_v38  ;;  %v5097_v13 = vmul.f32 %v8001_v28, %v4965_v17 }
 0x29a   : > { %v4967_v47 = vpop.f32.mrf.mxu1  ;;  %5042 = vmatpush2.bf16.msra.mxu1 %v5407_v6 }
 0x29c   : > { %v4968_v59 = vpop.f32.mrf.mxu1 }
 0x29d   : > { %5044 = vmatmul.mubr.bf16.vlgmr.msra.gmra.mxu1 %v7073_v39  ;;  %v5095_v39 = vmul.f32 %v7989_v60, %v7938_v41 }
 0x29f   : > { %v5102_v8 = vadd.f32 %v5095_v39, %v5094_v0 }
 0x2a1   : > { %v5103_v61 = vadd.f32 %v5102_v8, %v5096_v43 }
 0x2a3   : > { %v5104_v45 = vadd.f32 %v5103_v61, %v5097_v13 }
 0x34d   : > { %v5004_v63 = vpop.f32.mrf.mxu0 }
 0x34e   : > { %v5098_v33 = vmul.f32 %v8003_v16, %v5004_v63 }
 0x34f   : > { %v5006_v25 = vpop.f32.mrf.mxu0 }
 0x350   : > { %v5105_v22 = vadd.f32 %v5104_v45, %v5098_v33  ;;  %v5099_v58 = vmul.f32 %v8008_v26, %v5006_v25 }
 0x351   : > { %v5008_v56 = vpop.f32.mrf.mxu0 }
 0x352   : > { %v5106_v37 = vadd.f32 %v5105_v22, %v5099_v58 }
 0x353   : > { %v5009_v18 = vpop.f32.mrf.mxu0 }
 0x35d   : > { %v5045_v7 = vpop.f32.mrf.mxu1 }
 0x35e   : > { %v5100_v15 = vmul.f32 %v8013_v32, %v5045_v7 }
 0x35f   : > { %v5047_v21 = vpop.f32.mrf.mxu1 }
 0x360   : > { %v5107_v55 = vadd.f32 %v5106_v37, %v5100_v15  ;;  %v5101_v52 = vmul.f32 %v8015_v62, %v5047_v21 }
 0x361   : > { %v5049_v20 = vpop.f32.mrf.mxu1 }
 0x362   : > { %v5108_v53 = vadd.f32 %v5107_v55, %v5101_v52 }
 0x363   : > { %v5050_v24 = vpop.f32.mrf.mxu1 }
 0x364   : > { %5109 = vadd.xlane.f32.xlu0 %v5108_v53 }
 0x3ed   : > { %v5110_v4 = vpop.xlane.xlu0 %5109 }
 0x3ee   : > { %v5111_v29 = vmul.f32 0.001953125, %v5110_v4 }
 0x3f0   : > { %v5112_v44 = vsub.f32 %v7932_v48, %v5111_v29  ;;  %v5113_v2 = vsub.f32 %v7938_v41, %v5111_v29  ;;  %v5114_v11 = vsub.f32 %v4963_v57, %v5111_v29  ;;  %v5115_v31 = vsub.f32 %v4965_v17, %v5111_v29 }
 0x3f1   : > { %v5116_v14 = vsub.f32 %v5004_v63, %v5111_v29  ;;  %v5117_v46 = vsub.f32 %v5006_v25, %v5111_v29  ;;  %v5118_v6 = vsub.f32 %v5045_v7, %v5111_v29  ;;  %v5119_v41 = vsub.f32 %v5047_v21, %v5111_v29 }
 0x3f2   : > { %v5120_v49 = vmul.f32 %v5112_v44, %v7987_v36  ;;  %v5121_v1 = vmul.f32 %v5113_v2, %v7989_v60  ;;  %v5122_v51 = vmul.f32 %v5114_v11, %v7996_v9  ;;  %v5123_v19 = vmul.f32 %v5115_v31, %v8001_v28 }
 0x3f3   : > { %v5124_v38 = vmul.f32 %v5116_v14, %v8003_v16  ;;  %v5125_v57 = vmul.f32 %v5117_v46, %v8008_v26  ;;  %v5126_v42 = vmul.f32 %v5118_v6, %v8013_v32  ;;  %v5127_v34 = vmul.f32 %v5119_v41, %v8015_v62 }
 0x3f4   : > { %v5128_v23 = vmul.f32 %v5120_v49, %v5120_v49  ;;  %v5129_v50 = vmul.f32 %v5121_v1, %v5121_v1  ;;  %v5130_v48 = vmul.f32 %v5122_v51, %v5122_v51  ;;  %v5131_v17 = vmul.f32 %v5123_v19, %v5123_v19 }
 0x3f5   : > { %v5132_v27 = vmul.f32 %v5124_v38, %v5124_v38  ;;  %v5133_v5 = vmul.f32 %v5125_v57, %v5125_v57  ;;  %v5134_v39 = vmul.f32 %v5126_v42, %v5126_v42  ;;  %v5135_v63 = vmul.f32 %v5127_v34, %v5127_v34 }
 0x3f6   : > { %v5136_v47 = vadd.f32 %v5129_v50, %v5128_v23 }
 0x3f8   : > { %v5137_v59 = vadd.f32 %v5136_v47, %v5130_v48 }
 0x3fa   : > { %v5138_v10 = vadd.f32 %v5137_v59, %v5131_v17 }
 0x3fc   : > { %v5139_v0 = vadd.f32 %v5138_v10, %v5132_v27 }
 0x3fe   : > { %v5140_v40 = vadd.f32 %v5139_v0, %v5133_v5 }
 0x400   : > { %v5141_v12 = vadd.f32 %v5140_v40, %v5134_v39 }
 0x402   : > { %v5142_v25 = vadd.f32 %v5141_v12, %v5135_v63 }
 0x404   : > { %5143 = vadd.xlane.f32.xlu1 %v5142_v25 }
 0x48d   : > { %v5144_v8 = vpop.xlane.xlu1 %5143 }
 0x48e   : > { %v5145_v43 = vmul.f32 0.001953125, %v5144_v8 }
 0x490   : > { %v5146_v56 = vadd.f32 1e-05, %v5145_v43 }
 0x492   : > { %5561 = vrsqrt.f32 %v5146_v56 }
 0x49f   : > { %v5562_v3 = vpop.eup %5561 }
 0x4a0   : > { %v5148_v18 = vmul.f32 %v5562_v3, %v5112_v44  ;;  %v5149_v61 = vmul.f32 %v5562_v3, %v5113_v2  ;;  %v5150_v13 = vmul.f32 %v5562_v3, %v5114_v11  ;;  %v5151_v33 = vmul.f32 %v5562_v3, %v5115_v31 }
 0x4a1   : > { %v5152_v35 = vmul.f32 %v5562_v3, %v5116_v14  ;;  %v5153_v45 = vmul.f32 %v5562_v3, %v5117_v46  ;;  %v5154_v54 = vmul.f32 %v5562_v3, %v5118_v6  ;;  %v5155_v22 = vmul.f32 %v5562_v3, %v5119_v41 }
 0x4a2   : > { %vm5156_vm0 = vcmp.ge.f32.partialorder %v5148_v18, 0.0  ;;  %vm5157_vm5 = vcmp.ge.f32.partialorder %v5149_v61, 0.0  ;;  %vm5158_vm9 = vcmp.ge.f32.partialorder %v5150_v13, 0.0  ;;  %vm5159_vm11 = vcmp.ge.f32.partialorder %v5151_v33, 0.0 }
 0x4a3   : > { %vm5160_vm12 = vcmp.ge.f32.partialorder %v5152_v35, 0.0  ;;  %vm5161_vm13 = vcmp.ge.f32.partialorder %v5153_v45, 0.0  ;;  %vm5162_vm14 = vcmp.ge.f32.partialorder %v5154_v54, 0.0  ;;  %vm5163_vm4 = vcmp.ge.f32.partialorder %v5155_v22, 0.0 }
 0x4a4   : > { %v5164_v58 = vmul.f32 0.01, %v5148_v18  ;;  %v5165_v7 = vmul.f32 0.01, %v5149_v61  ;;  %v5166_v37 = vmul.f32 0.01, %v5150_v13 }
 0x4a5   : > { %v5167_v15 = vmul.f32 0.01, %v5151_v33  ;;  %v5168_v21 = vmul.f32 0.01, %v5152_v35  ;;  %v5169_v55 = vmul.f32 0.01, %v5153_v45 }
 0x4a6   : > { %v5170_v52 = vmul.f32 0.01, %v5154_v54  ;;  %v5171_v20 = vmul.f32 0.01, %v5155_v22  ;;  %v5172_v53 = vsel %vm5156_vm0, %v5148_v18, %v5164_v58  ;;  %v5173_v24 = vsel %vm5157_vm5, %v5149_v61, %v5165_v7 }
 0x4a7   : > { %v5174_v30 = vsel %vm5158_vm9, %v5150_v13, %v5166_v37  ;;  %v5175_v4 = vsel %vm5159_vm11, %v5151_v33, %v5167_v15  ;;  %v5176_v29 = vsel %vm5160_vm12, %v5152_v35, %v5168_v21  ;;  %v5177_v44 = vsel %vm5161_vm13, %v5153_v45, %v5169_v55 }
 0x4a8   : > { %v5178_v2 = vsel %vm5162_vm14, %v5154_v54, %v5170_v52  ;;  %v5179_v11 = vsel %vm5163_vm4, %v5155_v22, %v5171_v20  ;;  %v5180_v31 = vmul.f32 %v5172_v53, %v7987_v36  ;;  %v5181_v14 = vmul.f32 %v5173_v24, %v7989_v60 }
 0x4a9   : > { %v5182_v49 = vmul.f32 %v5174_v30, %v7996_v9  ;;  %v5183_v1 = vmul.f32 %v5175_v4, %v8001_v28  ;;  %v5184_v51 = vmul.f32 %v5176_v29, %v8003_v16  ;;  %v5185_v46 = vmul.f32 %v5177_v44, %v8008_v26 }
 0x4aa   : > { %v5186_v19 = vmul.f32 %v5178_v2, %v8013_v32  ;;  %v5187_v23 = vmul.f32 %v5179_v11, %v8015_v62  ;;  %v5463_v50 = vpack.c.bf16 %v5181_v14, %v5180_v31 }
 0x4ab   : > { %v5464_v6 = vpack.c.bf16 %v5183_v1, %v5182_v49  ;;  %v5465_v38 = vpack.c.bf16 %v5185_v46, %v5184_v51 }
 0x4ac   : > { %v5466_v48 = vpack.c.bf16 %v5187_v23, %v5186_v19  ;;  %5221 = vst [vmem:[%s8023_s5 + $0x4] sm:$0xff] %v5463_v50 }
 0x4ad   : > { %5222 = vst [vmem:[%s8023_s5 + $0xc] sm:$0xff] %v5464_v6  ;;  %5223 = vst [vmem:[%s8023_s5 + $0x14] sm:$0xff] %v5465_v38 }
 0x4ae   : > { %5224 = vst [vmem:[%s8023_s5 + $0x1c] sm:$0xff] %v5466_v48 }
 0x4af PF: > { %s14_s15 = sadd.s32 1, %s5574_s15  }
 0x4b0   : > { %p11_p4 = scmp.ge.s32.totalorder %s14_s15, 4  }
 0x4b2   :  { %13 = sbr.rel (!%p11_p4) target bundleno = 1 (0x1), region = 69 }

</bundles_post_ra>
